<compile_context>
chip_gen: v7x
topology: tpu7x:2x2x1
jax: 0.10.0
libtpu: 0.0.40
codegen_flags: <defaults>
</compile_context>

<pallas_src>
import functools

import jax
import jax.numpy as jnp
from jax.experimental import pallas as pl
from jax.experimental.pallas import tpu as pltpu

# -----------------------------------------------------------------------------
# Hardware-aware knobs (host-side, cheap, failure-safe).
# -----------------------------------------------------------------------------


@functools.lru_cache(maxsize=None)
def _tensorcores_per_chip():
    try:
        kind = jax.devices()[0].device_kind.lower()
    except Exception:
        return 1
    return 2 if any(t in kind for t in ("v7", "v4", "v5p")) else 1


@functools.lru_cache(maxsize=None)
def _vmem_limit_bytes():
    cap = None
    try:
        cap = pltpu.get_tpu_info().vmem_capacity_bytes
    except Exception:
        cap = None
    if not cap:
        return 48 * 1024 * 1024
    # leave 16 MiB headroom; never ask for more than 64 MiB (fits every gen).
    return int(max(32 * 1024 * 1024, min(cap - 16 * 1024 * 1024, 64 * 1024 * 1024)))


def _pick_tm(m):
    cores = _tensorcores_per_chip()
    if cores > 1:
        # >=2 tiles along the parallel axis so both TensorCores get work (v7x).
        if m % 256 == 0 and m >= 512:
            return 256
        if m % 128 == 0 and m >= 256:
            return 128
        return m
    # single-TC chips (v5e/v6e): one big tile, no extra ~0.35us pipeline steps.
    if m <= 1024:
        return m
    for t in (1024, 512, 256, 128):
        if m % t == 0:
            return t
    return m


_KTILE_CANDIDATES = (2048, 1024, 512, 256)
_WEIGHT_VMEM_BUDGET = 8 * 1024 * 1024   # bf16 weight bytes before K-tiling


def _pick_tk(k):
    for tk in _KTILE_CANDIDATES:
        if k % tk == 0:
            return tk
    return None


# -----------------------------------------------------------------------------
# Pallas fused matmul + bias + (optional) ReLU kernels.
# -----------------------------------------------------------------------------


def _matmul_bias_act_kernel(x_ref, w_ref, b_ref, o_ref, *, relu):
    x = x_ref[...].astype(jnp.bfloat16)          # no-op when already bf16
    y = jnp.dot(x, w_ref[...], preferred_element_type=jnp.float32)
    y = y + b_ref[...]                           # f32 epilogue (v5e-safe)
    if relu:
        y = jnp.maximum(y, 0.0)
    o_ref[...] = y.astype(o_ref.dtype)           # bf16 or f32 per out_shape


def _matmul_bias_act_ktiled_kernel(x_ref, w_ref, b_ref, o_ref, acc_ref, *, relu):
    @pl.when(pl.program_id(1) == 0)
    def _():
        acc_ref[...] = jnp.zeros_like(acc_ref)

    x = x_ref[...].astype(jnp.bfloat16)
    acc_ref[...] += jnp.dot(x, w_ref[...], preferred_element_type=jnp.float32)

    @pl.when(pl.program_id(1) == pl.num_programs(1) - 1)
    def _():
        y = acc_ref[...] + b_ref[...]
        if relu:
            y = jnp.maximum(y, 0.0)
        o_ref[...] = y.astype(o_ref.dtype)


def pallas_linear(x, w, b, relu=False, out_dtype=jnp.float32):
    """y = relu?(x @ w + b).  x: (M, K) bf16, w: (K, N) bf16, b: (1, N) f32.

    N is a multiple of 128 in this model (lane-dense stores).  Small weights
    stay fully resident in VMEM (single MXU pass per M tile); large weights
    fall back to a K-tiled accumulator path so the design scales to real
    torchvision sizes on v7x's 64 MiB VMEM.
    """
    M, K = x.shape
    N = w.shape[1]
    b = b.astype(jnp.float32)
    tm = _pick_tm(M)
    vmem = _vmem_limit_bytes()
    tk = _pick_tk(K)
    w_bytes = K * N * 2   # bf16

    if w_bytes <= _WEIGHT_VMEM_BUDGET or tk is None:
        return pl.pallas_call(
            functools.partial(_matmul_bias_act_kernel, relu=relu),
            out_shape=jax.ShapeDtypeStruct((M, N), out_dtype),
            grid_spec=pltpu.PrefetchScalarGridSpec(
                num_scalar_prefetch=0,
                grid=(M // tm,),
                in_specs=[
                    pl.BlockSpec((tm, K), lambda i: (i, 0)),   # activation tile
                    # constant block index -> weight/bias are DMA'd once and
                    # reused across M tiles (no per-step re-fetch).
                    pl.BlockSpec((K, N), lambda i: (0, 0)),
                    pl.BlockSpec((1, N), lambda i: (0, 0)),
                ],
                out_specs=pl.BlockSpec((tm, N), lambda i: (i, 0)),
            ),
            compiler_params=pltpu.CompilerParams(
                dimension_semantics=("parallel",),
                vmem_limit_bytes=vmem,
            ),
        )(x, w, b)

    # K-tiled path (not exercised at toy scale; keeps real-scale fc1 feasible).
    return pl.pallas_call(
        functools.partial(_matmul_bias_act_ktiled_kernel, relu=relu),
        out_shape=jax.ShapeDtypeStruct((M, N), out_dtype),
        grid_spec=pltpu.PrefetchScalarGridSpec(
            num_scalar_prefetch=0,
            grid=(M // tm, K // tk),
            in_specs=[
                pl.BlockSpec((tm, tk), lambda i, k: (i, k)),
                pl.BlockSpec((tk, N), lambda i, k: (k, 0)),
                pl.BlockSpec((1, N), lambda i, k: (0, 0)),
            ],
            out_specs=pl.BlockSpec((tm, N), lambda i, k: (i, 0)),
            scratch_shapes=[pltpu.VMEM((tm, N), jnp.float32)],
        ),
        compiler_params=pltpu.CompilerParams(
            dimension_semantics=("parallel", "arbitrary"),
            vmem_limit_bytes=vmem,
        ),
    )(x, w, b)


# -----------------------------------------------------------------------------
# Fused box head: fc1 -> ReLU -> fc2 -> ReLU -> [cls_score | bbox_pred] in one
# Pallas kernel.  All weights (<2 MiB bf16) + h1/h2 stay in VMEM; one launch.
# -----------------------------------------------------------------------------


def _box_head_kernel(x_ref, w1_ref, b1_ref, w2_ref, b2_ref, w3_ref, b3_ref, o_ref):
    h = jnp.dot(x_ref[...].astype(jnp.bfloat16), w1_ref[...],
                preferred_element_type=jnp.float32)
    h = jnp.maximum(h + b1_ref[...], 0.0).astype(jnp.bfloat16)
    h = jnp.dot(h, w2_ref[...], preferred_element_type=jnp.float32)
    h = jnp.maximum(h + b2_ref[...], 0.0).astype(jnp.bfloat16)
    y = jnp.dot(h, w3_ref[...], preferred_element_type=jnp.float32) + b3_ref[...]
    o_ref[...] = y.astype(o_ref.dtype)


def pallas_box_head(pooled, w1, b1, w2, b2, w3, b3):
    # TODO(synk): grid=(1,) leaves one TC idle on v7x; at real scale split the
    #             N dim across 2 tiles or batch more ROIs per call.
    R, K = pooled.shape
    N1, N2, N3 = w1.shape[1], w2.shape[1], w3.shape[1]
    return pl.pallas_call(
        _box_head_kernel,
        out_shape=jax.ShapeDtypeStruct((R, N3), jnp.float32),
        grid_spec=pltpu.PrefetchScalarGridSpec(
            num_scalar_prefetch=0,
            grid=(1,),
            in_specs=[
                pl.BlockSpec((R, K), lambda i: (0, 0)),
                pl.BlockSpec((K, N1), lambda i: (0, 0)),
                pl.BlockSpec((1, N1), lambda i: (0, 0)),
                pl.BlockSpec((N1, N2), lambda i: (0, 0)),
                pl.BlockSpec((1, N2), lambda i: (0, 0)),
                pl.BlockSpec((N2, N3), lambda i: (0, 0)),
                pl.BlockSpec((1, N3), lambda i: (0, 0)),
            ],
            out_specs=pl.BlockSpec((R, N3), lambda i: (0, 0)),
        ),
        compiler_params=pltpu.CompilerParams(
            dimension_semantics=("arbitrary",),
            vmem_limit_bytes=_vmem_limit_bytes(),
        ),
    )(pooled, w1, b1, w2, b2, w3, b3)


# -----------------------------------------------------------------------------
# Convolution = im2col (cheap bf16 JAX slicing/concat) + Pallas matmul.
# -----------------------------------------------------------------------------


def _im2col(x, kh, kw, stride, pad):
    # x: (N, H, W, C) NHWC
    N, H, W, C = x.shape
    Ho = (H + 2 * pad - kh) // stride + 1
    Wo = (W + 2 * pad - kw) // stride + 1
    xp = jnp.pad(x, ((0, 0), (pad, pad), (pad, pad), (0, 0)))
    cols = []
    for dy in range(kh):
        for dx in range(kw):
            cols.append(xp[:, dy:dy + stride * Ho:stride,
                           dx:dx + stride * Wo:stride, :])
    patches = jnp.concatenate(cols, axis=-1)           # (N, Ho, Wo, kh*kw*C)
    return patches.reshape(N * Ho * Wo, kh * kw * C), (N, Ho, Wo)


def pallas_conv2d(x, w_mat, b, kh, kw, stride=1, pad=1, relu=True,
                  out_dtype=jnp.bfloat16):
    # TODO(synk): fold im2col into the kernel (halo-tile index_maps / sum of
    #             kh*kw shifted MXU passes) so the patch slab never round-trips
    #             HBM at real backbone scale; at toy scale it is <1.2 MiB bf16.
    cols, (N, Ho, Wo) = _im2col(x, kh, kw, stride, pad)
    y = pallas_linear(cols, w_mat, b, relu=relu, out_dtype=out_dtype)
    return y.reshape(N, Ho, Wo, w_mat.shape[1])


# -----------------------------------------------------------------------------
# Anchor generation / box decoding / RoIAlign (plain-JAX glue feeding the MXU).
# -----------------------------------------------------------------------------

ANCHOR_SIZES = (32.0, 64.0, 128.0, 256.0, 512.0)
ANCHOR_RATIOS = (0.5, 1.0, 2.0)
NUM_ANCHORS = len(ANCHOR_SIZES) * len(ANCHOR_RATIOS)   # 15


def make_anchors(feat_h, feat_w, stride):
    scales = jnp.array(ANCHOR_SIZES, jnp.float32)
    ratios = jnp.array(ANCHOR_RATIOS, jnp.float32)
    h_r = jnp.sqrt(ratios)
    w_r = 1.0 / h_r
    ws = (w_r[:, None] * scales[None, :]).reshape(-1)
    hs = (h_r[:, None] * scales[None, :]).reshape(-1)
    base = jnp.stack([-ws, -hs, ws, hs], axis=1) / 2.0          # (A, 4)
    ys = jnp.arange(feat_h, dtype=jnp.float32) * stride
    xs = jnp.arange(feat_w, dtype=jnp.float32) * stride
    yy, xx = jnp.meshgrid(ys, xs, indexing="ij")
    shifts = jnp.stack([xx, yy, xx, yy], axis=-1).reshape(-1, 1, 4)
    return (shifts + base[None]).reshape(-1, 4)                 # (H*W*A, 4)


def decode_boxes(anchors, deltas, img_hw):
    img_h, img_w = img_hw
    wa = anchors[:, 2] - anchors[:, 0]
    ha = anchors[:, 3] - anchors[:, 1]
    cxa = anchors[:, 0] + 0.5 * wa
    cya = anchors[:, 1] + 0.5 * ha
    dx, dy, dw, dh = deltas[:, 0], deltas[:, 1], deltas[:, 2], deltas[:, 3]
    clamp = jnp.log(1000.0 / 16.0)
    dw = jnp.minimum(dw, clamp)
    dh = jnp.minimum(dh, clamp)
    cx = dx * wa + cxa
    cy = dy * ha + cya
    w = jnp.exp(dw) * wa
    h = jnp.exp(dh) * ha
    x1 = jnp.clip(cx - 0.5 * w, 0.0, float(img_w))
    y1 = jnp.clip(cy - 0.5 * h, 0.0, float(img_h))
    x2 = jnp.clip(cx + 0.5 * w, 0.0, float(img_w))
    y2 = jnp.clip(cy + 0.5 * h, 0.0, float(img_h))
    return jnp.stack([x1, y1, x2, y2], axis=1)


def roi_align_matmul(feat, rois, out_size=7, spatial_scale=1.0, sampling=2):
    """Matmul-form bilinear RoIAlign: bf16 interpolation matmuls, f32 accum.

    feat: (H, W, C) bf16, rois: (R, 4) xyxy in image coords.
    TODO(synk): fuse RoIAlign + flatten + fc1 into one Pallas kernel with feat
                resident in VMEM to drop the pooled HBM round-trip.
    """
    H, W, C = feat.shape
    P = out_size * sampling
    s = spatial_scale
    x1, y1, x2, y2 = (rois[:, 0] * s, rois[:, 1] * s,
                      rois[:, 2] * s, rois[:, 3] * s)
    bw = jnp.maximum(x2 - x1, 1.0)
    bh = jnp.maximum(y2 - y1, 1.0)
    offs = (jnp.arange(P, dtype=jnp.float32) + 0.5) / P
    xs = jnp.clip(x1[:, None] + offs[None, :] * bw[:, None], 0.0, W - 1.0)
    ys = jnp.clip(y1[:, None] + offs[None, :] * bh[:, None], 0.0, H - 1.0)
    # bilinear weight of grid index i at coordinate t is max(0, 1 - |t - i|)
    wx = jnp.maximum(0.0, 1.0 - jnp.abs(
        xs[:, :, None] - jnp.arange(W, dtype=jnp.float32))).astype(jnp.bfloat16)
    wy = jnp.maximum(0.0, 1.0 - jnp.abs(
        ys[:, :, None] - jnp.arange(H, dtype=jnp.float32))).astype(jnp.bfloat16)
    feat = feat.astype(jnp.bfloat16)
    rows = jnp.einsum("rph,hwc->rpwc", wy, feat,
                      preferred_element_type=jnp.float32)
    smp = jnp.einsum("rqw,rpwc->rpqc", wx, rows.astype(jnp.bfloat16),
                     preferred_element_type=jnp.float32)
    smp = smp.reshape(-1, out_size, sampling, out_size, sampling, C)
    return smp.mean(axis=(2, 4))                                 # (R, 7, 7, C) f32


# -----------------------------------------------------------------------------
# Parameters.  All output-channel dims are zero-padded to 128 (lane-dense
# stores); the padded channels are exactly zero everywhere, so numerics match
# the unpadded model.  Weights are stored in matmul layout + bf16, biases (1,N)
# f32, sibling heads pre-fused (rpn cls+box, cls_score+bbox_pred).
# -----------------------------------------------------------------------------

C_PAD = 128
BB1_REAL = 16            # stand-in channel counts (real torchvision: 64/1024)
BACKBONE_REAL = 32       # stand-in for backbone.out_channels = 1024
HEAD_REAL = 64           # stand-in for representation_size = 1024
NUM_CLASSES = 4
PROPOSALS_PER_IMAGE = 8


def init_params(key):
    ks = jax.random.split(key, 10)
    A = NUM_ANCHORS

    def nrm(k, shape, scale=0.05):
        return scale * jax.random.normal(k, shape, jnp.float32)

    def conv_w(k, kh, kw, cin_real, cin_pad, cout_real, scale=0.05):
        # real weight (kh*kw, cin_real, cout_real) zero-padded per position to
        # (kh*kw, cin_pad, 128) so it matches the padded im2col channel layout.
        w = nrm(k, (kh * kw, cin_real, cout_real), scale)
        w = jnp.pad(w, ((0, 0), (0, cin_pad - cin_real), (0, C_PAD - cout_real)))
        return w.reshape(kh * kw * cin_pad, C_PAD).astype(jnp.bfloat16)

    def pad2(w_real):
        r, c = w_real.shape
        w = jnp.pad(w_real, ((0, C_PAD - r), (0, C_PAD - c)))
        return w.astype(jnp.bfloat16)

    def bias():
        return jnp.zeros((1, C_PAD), jnp.float32)

    # fused sibling heads: [objectness | box deltas], [cls_score | bbox_pred]
    rpn_head_real = jnp.concatenate(
        [nrm(ks[3], (BACKBONE_REAL, A)),
         nrm(ks[4], (BACKBONE_REAL, A * 4), scale=0.01)], axis=1)      # (32, 75)
    det_head_real = jnp.concatenate(
        [nrm(ks[7], (HEAD_REAL, NUM_CLASSES)),
         nrm(ks[8], (HEAD_REAL, NUM_CLASSES * 4), scale=0.01)], axis=1)  # (64, 20)

    fc1 = nrm(ks[5], (7 * 7, BACKBONE_REAL, HEAD_REAL))
    fc1 = jnp.pad(fc1, ((0, 0), (0, C_PAD - BACKBONE_REAL), (0, C_PAD - HEAD_REAL)))
    fc1 = fc1.reshape(7 * 7 * C_PAD, C_PAD).astype(jnp.bfloat16)        # (6272, 128)

    return {
        "bb1_w": conv_w(ks[0], 3, 3, 3, 3, BB1_REAL),                   # (27, 128)
        "bb1_b": bias(),
        "bb2_w": conv_w(ks[1], 3, 3, BB1_REAL, C_PAD, BACKBONE_REAL),   # (1152, 128)
        "bb2_b": bias(),
        "rpn_conv_w": conv_w(ks[2], 3, 3, BACKBONE_REAL, C_PAD, BACKBONE_REAL),
        "rpn_conv_b": bias(),
        "rpn_head_w": pad2(rpn_head_real),                              # (128, 128)
        "rpn_head_b": bias(),
        "fc1_w": fc1,                                                   # (6272, 128)
        "fc1_b": bias(),
        "fc2_w": pad2(nrm(ks[6], (HEAD_REAL, HEAD_REAL))),              # (128, 128)
        "fc2_b": bias(),
        "det_head_w": pad2(det_head_real),                              # (128, 128)
        "det_head_b": bias(),
    }


# -----------------------------------------------------------------------------
# Forward pass (FasterRCNN.forward semantics, scaled down).
# -----------------------------------------------------------------------------


def faster_rcnn_forward(params, images_nchw, targets=None):
    # images_nchw: (N, 3, H, W) float32  (PyTorch layout)
    del targets  # TODO(synk): anchor matching + loss computation not implemented
    N, _, H, W = images_nchw.shape
    # Single f32->bf16 cast; every later activation leaves a kernel as bf16.
    x = jnp.transpose(images_nchw, (0, 2, 3, 1)).astype(jnp.bfloat16)   # NHWC

    # --- backbone (Pallas conv kernels, bf16 outputs, 128-channel padded) ---
    f = pallas_conv2d(x, params["bb1_w"], params["bb1_b"],
                      kh=3, kw=3, stride=2, pad=1, relu=True)
    feat = pallas_conv2d(f, params["bb2_w"], params["bb2_b"],
                         kh=3, kw=3, stride=1, pad=1, relu=True)
    _, Hf, Wf, C = feat.shape                 # C == C_PAD (only first 32 nonzero)
    stride = H // Hf

    # --- RPN head (Pallas conv + fused 1x1 objectness/box matmul, f32 out) ---
    rpn_feat = pallas_conv2d(feat, params["rpn_conv_w"], params["rpn_conv_b"],
                             kh=3, kw=3, stride=1, pad=1, relu=True)
    flat = rpn_feat.reshape(N * Hf * Wf, C)
    rpn_out = pallas_linear(flat, params["rpn_head_w"], params["rpn_head_b"],
                            relu=False, out_dtype=jnp.float32)
    A = NUM_ANCHORS
    objectness = rpn_out[:, :A].reshape(N, Hf * Wf * A)
    rpn_deltas = rpn_out[:, A:5 * A].reshape(N, Hf * Wf * A, 4)

    # --- proposals (decode + top-k; NMS omitted) ---
    anchors = make_anchors(Hf, Wf, float(stride))

    def per_image(obj_i, dlt_i):
        boxes = decode_boxes(anchors, dlt_i, (H, W))
        scores, idx = jax.lax.top_k(obj_i, PROPOSALS_PER_IMAGE)
        return boxes[idx], scores

    proposals, proposal_scores = jax.vmap(per_image)(objectness, rpn_deltas)
    # proposals: (N, K, 4)

    # --- RoIAlign (output_size=7, sampling_ratio=2), bf16 matmul form ---
    def align_image(feat_i, rois_i):
        return roi_align_matmul(feat_i, rois_i, out_size=7,
                                spatial_scale=1.0 / stride, sampling=2)

    pooled = jax.vmap(align_image)(feat, proposals)     # (N, K, 7, 7, C) f32
    R = N * PROPOSALS_PER_IMAGE
    pooled = pooled.reshape(R, 7 * 7 * C).astype(jnp.bfloat16)

    # --- box head: fused TwoMLPHead + cls/bbox predictors (one Pallas kernel) ---
    det = pallas_box_head(pooled,
                          params["fc1_w"], params["fc1_b"],
                          params["fc2_w"], params["fc2_b"],
                          params["det_head_w"], params["det_head_b"])
    class_logits = det[:, :NUM_CLASSES]
    box_regression = det[:, NUM_CLASSES:5 * NUM_CLASSES]

    return {
        "proposals": proposals,                    # (N, K, 4)
        "proposal_scores": proposal_scores,        # (N, K)
        "class_logits": class_logits,              # (N*K, num_classes)
        "box_regression": box_regression,          # (N*K, num_classes*4)
        "rpn_objectness": objectness,              # (N, Hf*Wf*A)
        "rpn_box_deltas": rpn_deltas,              # (N, Hf*Wf*A, 4)
    }


# -----------------------------------------------------------------------------


if __name__ == "__main__":
    key = jax.random.PRNGKey(0)
    pkey, ikey, tkey = jax.random.split(key, 3)

    params = init_params(pkey)

    # Small deterministic inputs: batch=2, 3-channel 32x32 images (NCHW).
    images = jax.random.uniform(ikey, (2, 3, 32, 32), jnp.float32)

    # Dummy targets (boxes xyxy + labels), present to mirror the torch signature.
    targets = {
        "boxes": jax.random.uniform(tkey, (2, 2, 4), jnp.float32) * 32.0,
        "labels": jnp.array([[1, 2], [3, 1]], jnp.int32),
    }

    fwd = jax.jit(faster_rcnn_forward)
    out = fwd(params, images, targets)
    out = jax.block_until_ready(out)

    assert out["class_logits"].shape == (2 * PROPOSALS_PER_IMAGE, NUM_CLASSES)
    assert out["box_regression"].shape == (2 * PROPOSALS_PER_IMAGE, NUM_CLASSES * 4)
    assert out["proposals"].shape == (2, PROPOSALS_PER_IMAGE, 4)
    print("KERNEL_OK")
</pallas_src>

<mosaic_0001>
module attributes {stable_mosaic.version = 11 : i64} {
  func.func @_matmul_bias_act_kernel(%arg0: i32, %arg1: memref<512x27xbf16, #tpu.memory_space<vmem>>, %arg2: memref<27x128xbf16, #tpu.memory_space<vmem>>, %arg3: memref<1x128xf32, #tpu.memory_space<vmem>>, %arg4: memref<512x128xbf16, #tpu.memory_space<vmem>>) attributes {dimension_semantics = [#tpu.dimension_semantics<parallel>], iteration_bounds = array<i64: 1>, scalar_prefetch = 0 : i64, scratch_operands = 0 : i64, tpu.core_type = #tpu.core_type<tc>, window_params = [{transform_indices = @transform_0, window_bounds = array<i64: 512, 27>}, {pipeline_mode = #tpu.pipeline_mode<synchronous>, transform_indices = @transform_1, window_bounds = array<i64: 27, 128>}, {pipeline_mode = #tpu.pipeline_mode<synchronous>, transform_indices = @transform_2, window_bounds = array<i64: 1, 128>}, {transform_indices = @transform_3, window_bounds = array<i64: 512, 128>}]} {
    %c0 = arith.constant 0 : index
    %c0_0 = arith.constant 0 : index
    %0 = vector.load %arg1[%c0, %c0_0] : memref<512x27xbf16, #tpu.memory_space<vmem>>, vector<512x27xbf16>
    %c0_1 = arith.constant 0 : index
    %c0_2 = arith.constant 0 : index
    %1 = vector.load %arg2[%c0_1, %c0_2] : memref<27x128xbf16, #tpu.memory_space<vmem>>, vector<27x128xbf16>
    %cst = arith.constant dense<0.000000e+00> : vector<512x128xf32>
    %2 = tpu.matmul %0, %1, %cst {dimension_numbers = #tpu.dot_dimension_numbers<[1], [0], [0], [1], [0, 0, 1, 1], [], []>} : vector<512x27xbf16>, vector<27x128xbf16>, vector<512x128xf32> -> vector<512x128xf32>
    %c0_3 = arith.constant 0 : index
    %c0_4 = arith.constant 0 : index
    %3 = vector.load %arg3[%c0_3, %c0_4] : memref<1x128xf32, #tpu.memory_space<vmem>>, vector<1x128xf32>
    %4 = vector.broadcast %3 : vector<1x128xf32> to vector<512x128xf32>
    %5 = arith.addf %2, %4 : vector<512x128xf32>
    %cst_5 = arith.constant 0.000000e+00 : f32
    %6 = vector.broadcast %cst_5 : f32 to vector<512x128xf32>
    %7 = arith.maximumf %5, %6 : vector<512x128xf32>
    %8 = arith.truncf %7 : vector<512x128xf32> to vector<512x128xbf16>
    %c0_6 = arith.constant 0 : index
    %c0_7 = arith.constant 0 : index
    %9 = vector.load %arg4[%c0_6, %c0_7] : memref<512x128xbf16, #tpu.memory_space<vmem>>, vector<512x128xbf16>
    tpu.vector_store %arg4[%c0_6, %c0_7], %8 {strides = array<i32>} : memref<512x128xbf16, #tpu.memory_space<vmem>>, vector<512x128xbf16>,
    return
  }
  func.func @transform_0(%arg0: i32) -> (i32, i32) {
    %c0_i32 = arith.constant 0 : i32
    %c0_i32_0 = arith.constant 0 : i32
    return %arg0, %c0_i32 : i32, i32
  }
  func.func @transform_1(%arg0: i32) -> (i32, i32) {
    %c0_i32 = arith.constant 0 : i32
    %c0_i32_0 = arith.constant 0 : i32
    %c0_i32_1 = arith.constant 0 : i32
    return %c0_i32, %c0_i32_0 : i32, i32
  }
  func.func @transform_2(%arg0: i32) -> (i32, i32) {
    %c0_i32 = arith.constant 0 : i32
    %c0_i32_0 = arith.constant 0 : i32
    %c0_i32_1 = arith.constant 0 : i32
    return %c0_i32, %c0_i32_0 : i32, i32
  }
  func.func @transform_3(%arg0: i32) -> (i32, i32) {
    %c0_i32 = arith.constant 0 : i32
    %c0_i32_0 = arith.constant 0 : i32
    return %arg0, %c0_i32 : i32, i32
  }
}

module attributes {stable_mosaic.version = 11 : i64} {
  func.func @_matmul_bias_act_kernel(%arg0: i32, %arg1: memref<512x128xbf16, #tpu.memory_space<vmem>>, %arg2: memref<128x128xbf16, #tpu.memory_space<vmem>>, %arg3: memref<1x128xf32, #tpu.memory_space<vmem>>, %arg4: memref<512x128xf32, #tpu.memory_space<vmem>>) attributes {dimension_semantics = [#tpu.dimension_semantics<parallel>], iteration_bounds = array<i64: 1>, scalar_prefetch = 0 : i64, scratch_operands = 0 : i64, tpu.core_type = #tpu.core_type<tc>, window_params = [{transform_indices = @transform_0, window_bounds = array<i64: 512, 128>}, {pipeline_mode = #tpu.pipeline_mode<synchronous>, transform_indices = @transform_1, window_bounds = array<i64: 128, 128>}, {pipeline_mode = #tpu.pipeline_mode<synchronous>, transform_indices = @transform_2, window_bounds = array<i64: 1, 128>}, {transform_indices = @transform_3, window_bounds = array<i64: 512, 128>}]} {
    %c0 = arith.constant 0 : index
    %c0_0 = arith.constant 0 : index
    %0 = vector.load %arg1[%c0, %c0_0] : memref<512x128xbf16, #tpu.memory_space<vmem>>, vector<512x128xbf16>
    %c0_1 = arith.constant 0 : index
    %c0_2 = arith.constant 0 : index
    %1 = vector.load %arg2[%c0_1, %c0_2] : memref<128x128xbf16, #tpu.memory_space<vmem>>, vector<128x128xbf16>
    %cst = arith.constant dense<0.000000e+00> : vector<512x128xf32>
    %2 = tpu.matmul %0, %1, %cst {dimension_numbers = #tpu.dot_dimension_numbers<[1], [0], [0], [1], [0, 0, 1, 1], [], []>} : vector<512x128xbf16>, vector<128x128xbf16>, vector<512x128xf32> -> vector<512x128xf32>
    %c0_3 = arith.constant 0 : index
    %c0_4 = arith.constant 0 : index
    %3 = vector.load %arg3[%c0_3, %c0_4] : memref<1x128xf32, #tpu.memory_space<vmem>>, vector<1x128xf32>
    %4 = vector.broadcast %3 : vector<1x128xf32> to vector<512x128xf32>
    %5 = arith.addf %2, %4 : vector<512x128xf32>
    %c0_5 = arith.constant 0 : index
    %c0_6 = arith.constant 0 : index
    %6 = vector.load %arg4[%c0_5, %c0_6] : memref<512x128xf32, #tpu.memory_space<vmem>>, vector<512x128xf32>
    tpu.vector_store %arg4[%c0_5, %c0_6], %5 {strides = array<i32>} : memref<512x128xf32, #tpu.memory_space<vmem>>, vector<512x128xf32>,
    return
  }
  func.func @transform_0(%arg0: i32) -> (i32, i32) {
    %c0_i32 = arith.constant 0 : i32
    %c0_i32_0 = arith.constant 0 : i32
    return %arg0, %c0_i32 : i32, i32
  }
  func.func @transform_1(%arg0: i32) -> (i32, i32) {
    %c0_i32 = arith.constant 0 : i32
    %c0_i32_0 = arith.constant 0 : i32
    %c0_i32_1 = arith.constant 0 : i32
    return %c0_i32, %c0_i32_0 : i32, i32
  }
  func.func @transform_2(%arg0: i32) -> (i32, i32) {
    %c0_i32 = arith.constant 0 : i32
    %c0_i32_0 = arith.constant 0 : i32
    %c0_i32_1 = arith.constant 0 : i32
    return %c0_i32, %c0_i32_0 : i32, i32
  }
  func.func @transform_3(%arg0: i32) -> (i32, i32) {
    %c0_i32 = arith.constant 0 : i32
    %c0_i32_0 = arith.constant 0 : i32
    return %arg0, %c0_i32 : i32, i32
  }
}

module attributes {stable_mosaic.version = 11 : i64} {
  func.func @_matmul_bias_act_kernel(%arg0: i32, %arg1: memref<512x1152xbf16, #tpu.memory_space<vmem>>, %arg2: memref<1152x128xbf16, #tpu.memory_space<vmem>>, %arg3: memref<1x128xf32, #tpu.memory_space<vmem>>, %arg4: memref<512x128xbf16, #tpu.memory_space<vmem>>) attributes {dimension_semantics = [#tpu.dimension_semantics<parallel>], iteration_bounds = array<i64: 1>, scalar_prefetch = 0 : i64, scratch_operands = 0 : i64, tpu.core_type = #tpu.core_type<tc>, window_params = [{transform_indices = @transform_0, window_bounds = array<i64: 512, 1152>}, {pipeline_mode = #tpu.pipeline_mode<synchronous>, transform_indices = @transform_1, window_bounds = array<i64: 1152, 128>}, {pipeline_mode = #tpu.pipeline_mode<synchronous>, transform_indices = @transform_2, window_bounds = array<i64: 1, 128>}, {transform_indices = @transform_3, window_bounds = array<i64: 512, 128>}]} {
    %c0 = arith.constant 0 : index
    %c0_0 = arith.constant 0 : index
    %0 = vector.load %arg1[%c0, %c0_0] : memref<512x1152xbf16, #tpu.memory_space<vmem>>, vector<512x1152xbf16>
    %c0_1 = arith.constant 0 : index
    %c0_2 = arith.constant 0 : index
    %1 = vector.load %arg2[%c0_1, %c0_2] : memref<1152x128xbf16, #tpu.memory_space<vmem>>, vector<1152x128xbf16>
    %cst = arith.constant dense<0.000000e+00> : vector<512x128xf32>
    %2 = tpu.matmul %0, %1, %cst {dimension_numbers = #tpu.dot_dimension_numbers<[1], [0], [0], [1], [0, 0, 1, 1], [], []>} : vector<512x1152xbf16>, vector<1152x128xbf16>, vector<512x128xf32> -> vector<512x128xf32>
    %c0_3 = arith.constant 0 : index
    %c0_4 = arith.constant 0 : index
    %3 = vector.load %arg3[%c0_3, %c0_4] : memref<1x128xf32, #tpu.memory_space<vmem>>, vector<1x128xf32>
    %4 = vector.broadcast %3 : vector<1x128xf32> to vector<512x128xf32>
    %5 = arith.addf %2, %4 : vector<512x128xf32>
    %cst_5 = arith.constant 0.000000e+00 : f32
    %6 = vector.broadcast %cst_5 : f32 to vector<512x128xf32>
    %7 = arith.maximumf %5, %6 : vector<512x128xf32>
    %8 = arith.truncf %7 : vector<512x128xf32> to vector<512x128xbf16>
    %c0_6 = arith.constant 0 : index
    %c0_7 = arith.constant 0 : index
    %9 = vector.load %arg4[%c0_6, %c0_7] : memref<512x128xbf16, #tpu.memory_space<vmem>>, vector<512x128xbf16>
    tpu.vector_store %arg4[%c0_6, %c0_7], %8 {strides = array<i32>} : memref<512x128xbf16, #tpu.memory_space<vmem>>, vector<512x128xbf16>,
    return
  }
  func.func @transform_0(%arg0: i32) -> (i32, i32) {
    %c0_i32 = arith.constant 0 : i32
    %c0_i32_0 = arith.constant 0 : i32
    return %arg0, %c0_i32 : i32, i32
  }
  func.func @transform_1(%arg0: i32) -> (i32, i32) {
    %c0_i32 = arith.constant 0 : i32
    %c0_i32_0 = arith.constant 0 : i32
    %c0_i32_1 = arith.constant 0 : i32
    return %c0_i32, %c0_i32_0 : i32, i32
  }
  func.func @transform_2(%arg0: i32) -> (i32, i32) {
    %c0_i32 = arith.constant 0 : i32
    %c0_i32_0 = arith.constant 0 : i32
    %c0_i32_1 = arith.constant 0 : i32
    return %c0_i32, %c0_i32_0 : i32, i32
  }
  func.func @transform_3(%arg0: i32) -> (i32, i32) {
    %c0_i32 = arith.constant 0 : i32
    %c0_i32_0 = arith.constant 0 : i32
    return %arg0, %c0_i32 : i32, i32
  }
}

module attributes {stable_mosaic.version = 11 : i64} {
  func.func @_box_head_kernel(%arg0: i32, %arg1: memref<16x6272xbf16, #tpu.memory_space<vmem>>, %arg2: memref<6272x128xbf16, #tpu.memory_space<vmem>>, %arg3: memref<1x128xf32, #tpu.memory_space<vmem>>, %arg4: memref<128x128xbf16, #tpu.memory_space<vmem>>, %arg5: memref<1x128xf32, #tpu.memory_space<vmem>>, %arg6: memref<128x128xbf16, #tpu.memory_space<vmem>>, %arg7: memref<1x128xf32, #tpu.memory_space<vmem>>, %arg8: memref<16x128xf32, #tpu.memory_space<vmem>>) attributes {dimension_semantics = [#tpu.dimension_semantics<arbitrary>], iteration_bounds = array<i64: 1>, scalar_prefetch = 0 : i64, scratch_operands = 0 : i64, tpu.core_type = #tpu.core_type<tc>, window_params = [{pipeline_mode = #tpu.pipeline_mode<synchronous>, transform_indices = @transform_0, window_bounds = array<i64: 16, 6272>}, {pipeline_mode = #tpu.pipeline_mode<synchronous>, transform_indices = @transform_1, window_bounds = array<i64: 6272, 128>}, {pipeline_mode = #tpu.pipeline_mode<synchronous>, transform_indices = @transform_2, window_bounds = array<i64: 1, 128>}, {pipeline_mode = #tpu.pipeline_mode<synchronous>, transform_indices = @transform_3, window_bounds = array<i64: 128, 128>}, {pipeline_mode = #tpu.pipeline_mode<synchronous>, transform_indices = @transform_4, window_bounds = array<i64: 1, 128>}, {pipeline_mode = #tpu.pipeline_mode<synchronous>, transform_indices = @transform_5, window_bounds = array<i64: 128, 128>}, {pipeline_mode = #tpu.pipeline_mode<synchronous>, transform_indices = @transform_6, window_bounds = array<i64: 1, 128>}, {pipeline_mode = #tpu.pipeline_mode<synchronous>, transform_indices = @transform_7, window_bounds = array<i64: 16, 128>}]} {
    %c0 = arith.constant 0 : index
    %c0_0 = arith.constant 0 : index
    %0 = vector.load %arg1[%c0, %c0_0] : memref<16x6272xbf16, #tpu.memory_space<vmem>>, vector<16x6272xbf16>
    %c0_1 = arith.constant 0 : index
    %c0_2 = arith.constant 0 : index
    %1 = vector.load %arg2[%c0_1, %c0_2] : memref<6272x128xbf16, #tpu.memory_space<vmem>>, vector<6272x128xbf16>
    %cst = arith.constant dense<0.000000e+00> : vector<16x128xf32>
    %2 = tpu.matmul %0, %1, %cst {dimension_numbers = #tpu.dot_dimension_numbers<[1], [0], [0], [1], [0, 0, 1, 1], [], []>} : vector<16x6272xbf16>, vector<6272x128xbf16>, vector<16x128xf32> -> vector<16x128xf32>
    %c0_3 = arith.constant 0 : index
    %c0_4 = arith.constant 0 : index
    %3 = vector.load %arg3[%c0_3, %c0_4] : memref<1x128xf32, #tpu.memory_space<vmem>>, vector<1x128xf32>
    %4 = vector.broadcast %3 : vector<1x128xf32> to vector<16x128xf32>
    %5 = arith.addf %2, %4 : vector<16x128xf32>
    %cst_5 = arith.constant 0.000000e+00 : f32
    %6 = vector.broadcast %cst_5 : f32 to vector<16x128xf32>
    %7 = arith.maximumf %5, %6 : vector<16x128xf32>
    %8 = arith.truncf %7 : vector<16x128xf32> to vector<16x128xbf16>
    %c0_6 = arith.constant 0 : index
    %c0_7 = arith.constant 0 : index
    %9 = vector.load %arg4[%c0_6, %c0_7] : memref<128x128xbf16, #tpu.memory_space<vmem>>, vector<128x128xbf16>
    %cst_8 = arith.constant dense<0.000000e+00> : vector<16x128xf32>
    %10 = tpu.matmul %8, %9, %cst_8 {dimension_numbers = #tpu.dot_dimension_numbers<[1], [0], [0], [1], [0, 0, 1, 1], [], []>} : vector<16x128xbf16>, vector<128x128xbf16>, vector<16x128xf32> -> vector<16x128xf32>
    %c0_9 = arith.constant 0 : index
    %c0_10 = arith.constant 0 : index
    %11 = vector.load %arg5[%c0_9, %c0_10] : memref<1x128xf32, #tpu.memory_space<vmem>>, vector<1x128xf32>
    %12 = vector.broadcast %11 : vector<1x128xf32> to vector<16x128xf32>
    %13 = arith.addf %10, %12 : vector<16x128xf32>
    %cst_11 = arith.constant 0.000000e+00 : f32
    %14 = vector.broadcast %cst_11 : f32 to vector<16x128xf32>
    %15 = arith.maximumf %13, %14 : vector<16x128xf32>
    %16 = arith.truncf %15 : vector<16x128xf32> to vector<16x128xbf16>
    %c0_12 = arith.constant 0 : index
    %c0_13 = arith.constant 0 : index
    %17 = vector.load %arg6[%c0_12, %c0_13] : memref<128x128xbf16, #tpu.memory_space<vmem>>, vector<128x128xbf16>
    %cst_14 = arith.constant dense<0.000000e+00> : vector<16x128xf32>
    %18 = tpu.matmul %16, %17, %cst_14 {dimension_numbers = #tpu.dot_dimension_numbers<[1], [0], [0], [1], [0, 0, 1, 1], [], []>} : vector<16x128xbf16>, vector<128x128xbf16>, vector<16x128xf32> -> vector<16x128xf32>
    %c0_15 = arith.constant 0 : index
    %c0_16 = arith.constant 0 : index
    %19 = vector.load %arg7[%c0_15, %c0_16] : memref<1x128xf32, #tpu.memory_space<vmem>>, vector<1x128xf32>
    %20 = vector.broadcast %19 : vector<1x128xf32> to vector<16x128xf32>
    %21 = arith.addf %18, %20 : vector<16x128xf32>
    %c0_17 = arith.constant 0 : index
    %c0_18 = arith.constant 0 : index
    %22 = vector.load %arg8[%c0_17, %c0_18] : memref<16x128xf32, #tpu.memory_space<vmem>>, vector<16x128xf32>
    tpu.vector_store %arg8[%c0_17, %c0_18], %21 {strides = array<i32>} : memref<16x128xf32, #tpu.memory_space<vmem>>, vector<16x128xf32>,
    return
  }
  func.func @transform_0(%arg0: i32) -> (i32, i32) {
    %c0_i32 = arith.constant 0 : i32
    %c0_i32_0 = arith.constant 0 : i32
    %c0_i32_1 = arith.constant 0 : i32
    return %c0_i32, %c0_i32_0 : i32, i32
  }
  func.func @transform_1(%arg0: i32) -> (i32, i32) {
    %c0_i32 = arith.constant 0 : i32
    %c0_i32_0 = arith.constant 0 : i32
    %c0_i32_1 = arith.constant 0 : i32
    return %c0_i32, %c0_i32_0 : i32, i32
  }
  func.func @transform_2(%arg0: i32) -> (i32, i32) {
    %c0_i32 = arith.constant 0 : i32
    %c0_i32_0 = arith.constant 0 : i32
    %c0_i32_1 = arith.constant 0 : i32
    return %c0_i32, %c0_i32_0 : i32, i32
  }
  func.func @transform_3(%arg0: i32) -> (i32, i32) {
    %c0_i32 = arith.constant 0 : i32
    %c0_i32_0 = arith.constant 0 : i32
    %c0_i32_1 = arith.constant 0 : i32
    return %c0_i32, %c0_i32_0 : i32, i32
  }
  func.func @transform_4(%arg0: i32) -> (i32, i32) {
    %c0_i32 = arith.constant 0 : i32
    %c0_i32_0 = arith.constant 0 : i32
    %c0_i32_1 = arith.constant 0 : i32
    return %c0_i32, %c0_i32_0 : i32, i32
  }
  func.func @transform_5(%arg0: i32) -> (i32, i32) {
    %c0_i32 = arith.constant 0 : i32
    %c0_i32_0 = arith.constant 0 : i32
    %c0_i32_1 = arith.constant 0 : i32
    return %c0_i32, %c0_i32_0 : i32, i32
  }
  func.func @transform_6(%arg0: i32) -> (i32, i32) {
    %c0_i32 = arith.constant 0 : i32
    %c0_i32_0 = arith.constant 0 : i32
    %c0_i32_1 = arith.constant 0 : i32
    return %c0_i32, %c0_i32_0 : i32, i32
  }
  func.func @transform_7(%arg0: i32) -> (i32, i32) {
    %c0_i32 = arith.constant 0 : i32
    %c0_i32_0 = arith.constant 0 : i32
    %c0_i32_1 = arith.constant 0 : i32
    return %c0_i32, %c0_i32_0 : i32, i32
  }
}

</mosaic_0001>

<bundles_post_ra>
// kernel: neg.19
= control target key start
LH: loop header
LB: loop body
LE: loop exit
PB: predicated region body
PF: predicated region fallthrough
CT: control target
= control target key end

     0   :  { %s24_s0 = inlined_call_operand.vmem [shape: f32[15,1], index: 0, kind: input, shape index: {}]   ;;  %s25_s1 = inlined_call_operand.vmem [shape: f32[15,1], index: 1, kind: output, shape index: {}]  }
   0x1   :  { %v2_v0 = vld [vmem:[%s24_s0] sm:$0x1] }
   0x2   :  { %v5_v1 = vxor.u32 2147483648, %v2_v0 }
   0x4   :  { %7 = vst [vmem:[%s25_s1] sm:$0x1] %v5_v1 }

// kernel: faster_rcnn_forward.5
= control target key start
LH: loop header
LB: loop body
LE: loop exit
PB: predicated region body
PF: predicated region fallthrough
CT: control target
= control target key end

     0   :  { %vm358_vm0 = vcmask 1044480   ;;  %vm359_vm1 = vcmask 1045504   ;;  %vm261_vm2 = vcmask 220160   ;;  %v1569_v1 = vmov 65535   ;;  %s1889_s1 = inlined_call_operand.vmem [shape: bf16[27,128], index: 1, kind: input, shape index: {}]   ;;  %s1890_s0 = inlined_call_operand.vmem [shape: bf16[512,27], index: 0, kind: input, shape index: {}]   ;;  %s1891_s2 = inlined_call_operand.vmem [shape: f32[1,128], index: 2, kind: input, shape index: {}]   ;;  %s1892_s3 = inlined_call_operand.vmem [shape: bf16[512,128], index: 3, kind: output, shape index: {}]  }
   0x1   :  { %v1535_v0 = vld [vmem:[%s1889_s1] sm:$0xff]   ;;  %v360_v2 = vsel %vm358_vm0, 4294967295, %v1569_v1  ;;  %v1536_v3 = vld [vmem:[%s1889_s1 + $0x8] sm:$0x3f]   ;;  %v1541_v10 = vld [vmem:[%s1890_s0 + $0x10] sm:$0xff]  }
   0x2   :  { %1462 = vmatprep.subr.bf16.mxu0 %v1535_v0  ;;  %1530 = vmatprep.subr.bf16.mxu1 %v1535_v0  ;;  %v361_v4 = vsel %vm359_vm1, %v360_v2, 0  ;;  %v1537_v5 = vld [vmem:[%s1890_s0] sm:$0xff]   ;;  %v1539_v8 = vld [vmem:[%s1890_s0 + $0x8] sm:$0xff]   ;;  %v1542_v11 = vld [vmem:[%s1890_s0 + $0x90] sm:$0xff]  }
   0x3   :  { %1463 = vmatpush3.bf16.msra.mxu0 %v1535_v0  ;;  %1532 = vmatpush3.bf16.msra.mxu1 %v1535_v0  ;;  %v363_v6 = vand.u32 %v1536_v3, %v361_v4  ;;  %v1538_v7 = vld [vmem:[%s1890_s0 + $0x80] sm:$0xff]   ;;  %v1540_v9 = vld [vmem:[%s1890_s0 + $0x88] sm:$0xff]   ;;  %v1543_v12 = vld [vmem:[%s1890_s0 + $0x18] sm:$0xff]  }
   0x4   :  { %1466 = vmatprep.mubr.msk.bf16.mxu0 %vm261_vm2, %v1537_v5  ;;  %1498 = vmatprep.mubr.msk.bf16.mxu1 %vm261_vm2, %v1538_v7  ;;  %v1544_v13 = vld [vmem:[%s1890_s0 + $0x98] sm:$0xff]   ;;  %v1545_v14 = vld [vmem:[%s1890_s0 + $0x20] sm:$0xff]   ;;  %v1547_v16 = vld [vmem:[%s1890_s0 + $0x28] sm:$0xff]  }
   0x5   :  { %1464 = vmatprep.subr.bf16.mxu0 %v363_v6  ;;  %1531 = vmatprep.subr.bf16.mxu1 %v363_v6  ;;  %v1546_v15 = vld [vmem:[%s1890_s0 + $0xa0] sm:$0xff]   ;;  %v1548_v17 = vld [vmem:[%s1890_s0 + $0xa8] sm:$0xff]   ;;  %v1549_v18 = vld [vmem:[%s1890_s0 + $0x30] sm:$0xff]  }
   0x6   :  { %v1550_v19 = vld [vmem:[%s1890_s0 + $0xb0] sm:$0xff]   ;;  %v1551_v20 = vld [vmem:[%s1890_s0 + $0x38] sm:$0xff]   ;;  %v1553_v22 = vld [vmem:[%s1890_s0 + $0x40] sm:$0xff]  }
   0x7   :  { %1465 = vmatpush3.bf16.msra.mxu0 %v363_v6  ;;  %1533 = vmatpush3.bf16.msra.mxu1 %v363_v6  ;;  %v1552_v21 = vld [vmem:[%s1890_s0 + $0xb8] sm:$0xff]   ;;  %v1554_v23 = vld [vmem:[%s1890_s0 + $0xc0] sm:$0xff]   ;;  %v1555_v24 = vld [vmem:[%s1890_s0 + $0x48] sm:$0xff]  }
   0x8   :  { %v1556_v25 = vld [vmem:[%s1890_s0 + $0xc8] sm:$0xff]   ;;  %v1557_v26 = vld [vmem:[%s1890_s0 + $0x50] sm:$0xff]   ;;  %v1559_v28 = vld [vmem:[%s1890_s0 + $0x58] sm:$0xff]  }
   0x9   :  { %v1558_v27 = vld [vmem:[%s1890_s0 + $0xd0] sm:$0xff]   ;;  %v1560_v29 = vld [vmem:[%s1890_s0 + $0xd8] sm:$0xff]   ;;  %v1561_v30 = vld [vmem:[%s1890_s0 + $0x60] sm:$0xff]  }
   0xa   :  { %1467 = vmatmul.mubr.msk.bf16.vlgmr.msra.gmra.mrb[0].mxu0 %vm261_vm2, %v1539_v8  ;;  %1499 = vmatmul.mubr.msk.bf16.vlgmr.msra.gmra.mrb[0].mxu1 %vm261_vm2, %v1540_v9  ;;  %v1562_v31 = vld [vmem:[%s1890_s0 + $0xe0] sm:$0xff]   ;;  %v1563_v32 = vld [vmem:[%s1890_s0 + $0x68] sm:$0xff]   ;;  %v1565_v34 = vld [vmem:[%s1890_s0 + $0x70] sm:$0xff]  }
   0xb   :  { %1470 = vmatprep.mubr.msk.bf16.mxu0 %vm261_vm2, %v1541_v10  ;;  %1502 = vmatprep.mubr.msk.bf16.mxu1 %vm261_vm2, %v1542_v11  ;;  %v1564_v33 = vld [vmem:[%s1890_s0 + $0xe8] sm:$0xff]   ;;  %v1566_v35 = vld [vmem:[%s1890_s0 + $0xf0] sm:$0xff]   ;;  %v1567_v36 = vld [vmem:[%s1890_s0 + $0x78] sm:$0xff]  }
   0xc   :  { %v1568_v37 = vld [vmem:[%s1890_s0 + $0xf8] sm:$0xff]   ;;  %v1727_v38 = vld [vmem:[%s1891_s2] ss:$0 sm:$0xff] }
  0x12   :  { %1471 = vmatmul.mubr.msk.bf16.gmra.mrb[4].mxu0 %vm261_vm2, %v1543_v12  ;;  %1503 = vmatmul.mubr.msk.bf16.gmra.mrb[4].mxu1 %vm261_vm2, %v1544_v13 }
  0x13   :  { %1474 = vmatprep.mubr.msk.bf16.mxu0 %vm261_vm2, %v1545_v14  ;;  %1506 = vmatprep.mubr.msk.bf16.mxu1 %vm261_vm2, %v1546_v15 }
  0x1a   :  { %1475 = vmatmul.mubr.msk.bf16.gmra.mrb[8].mxu0 %vm261_vm2, %v1547_v16  ;;  %1507 = vmatmul.mubr.msk.bf16.gmra.mrb[8].mxu1 %vm261_vm2, %v1548_v17 }
  0x1b   :  { %1478 = vmatprep.mubr.msk.bf16.mxu0 %vm261_vm2, %v1549_v18  ;;  %1510 = vmatprep.mubr.msk.bf16.mxu1 %vm261_vm2, %v1550_v19 }
  0x22   :  { %1479 = vmatmul.mubr.msk.bf16.gmra.mrb[12].mxu0 %vm261_vm2, %v1551_v20  ;;  %1511 = vmatmul.mubr.msk.bf16.gmra.mrb[12].mxu1 %vm261_vm2, %v1552_v21 }
  0x23   :  { %1482 = vmatprep.mubr.msk.bf16.mxu0 %vm261_vm2, %v1553_v22  ;;  %1514 = vmatprep.mubr.msk.bf16.mxu1 %vm261_vm2, %v1554_v23 }
  0x2a   :  { %1483 = vmatmul.mubr.msk.bf16.gmra.mrb[16].mxu0 %vm261_vm2, %v1555_v24  ;;  %1515 = vmatmul.mubr.msk.bf16.gmra.mrb[16].mxu1 %vm261_vm2, %v1556_v25 }
  0x2b   :  { %1486 = vmatprep.mubr.msk.bf16.mxu0 %vm261_vm2, %v1557_v26  ;;  %1518 = vmatprep.mubr.msk.bf16.mxu1 %vm261_vm2, %v1558_v27 }
  0x32   :  { %1487 = vmatmul.mubr.msk.bf16.gmra.mrb[20].mxu0 %vm261_vm2, %v1559_v28  ;;  %1519 = vmatmul.mubr.msk.bf16.gmra.mrb[20].mxu1 %vm261_vm2, %v1560_v29 }
  0x33   :  { %1490 = vmatprep.mubr.msk.bf16.mxu0 %vm261_vm2, %v1561_v30  ;;  %1522 = vmatprep.mubr.msk.bf16.mxu1 %vm261_vm2, %v1562_v31 }
  0x3a   :  { %1491 = vmatmul.mubr.msk.bf16.gmra.mrb[24].mxu0 %vm261_vm2, %v1563_v32  ;;  %1523 = vmatmul.mubr.msk.bf16.gmra.mrb[24].mxu1 %vm261_vm2, %v1564_v33 }
  0x3b   :  { %1494 = vmatprep.mubr.msk.bf16.mxu0 %vm261_vm2, %v1565_v34  ;;  %1526 = vmatprep.mubr.msk.bf16.mxu1 %vm261_vm2, %v1566_v35 }
  0x42   :  { %1495 = vmatmul.mubr.msk.bf16.gmra.mrb[28].mxu0 %vm261_vm2, %v1567_v36  ;;  %1527 = vmatmul.mubr.msk.bf16.gmra.mrb[28].mxu1 %vm261_vm2, %v1568_v37 }
  0xdd   :  { %v1468_v39 = vpop.f32.mrb[0].mxu0  ;;  %v1500_v40 = vpop.f32.mrb[0].mxu1 }
  0xde   :  { %v408_v41 = vadd.f32 %v1468_v39, %v1727_v38  ;;  %v536_v42 = vadd.f32 %v1500_v40, %v1727_v38  ;;  %v399_v43 = vpop.f32.mrb[1].mxu0  ;;  %v527_v44 = vpop.f32.mrb[1].mxu1 }
  0xdf   :  { %v400_v45 = vadd.f32 %v1727_v38, %v399_v43  ;;  %v528_v46 = vadd.f32 %v1727_v38, %v527_v44  ;;  %v1469_v47 = vpop.f32.mrb[2].mxu0  ;;  %v1501_v48 = vpop.f32.mrb[2].mxu1 }
  0xe0   :  { %v411_v49 = vadd.f32 %v1469_v47, %v1727_v38  ;;  %v539_v50 = vadd.f32 %v1501_v48, %v1727_v38  ;;  %v402_v51 = vpop.f32.mrb[3].mxu0  ;;  %v530_v52 = vpop.f32.mrb[3].mxu1  ;;  %v656_v55 = vmax.f32 %v408_v41, 0.0  ;;  %v688_v56 = vmax.f32 %v536_v42, 0.0 }
  0xe1   :  { %v403_v53 = vadd.f32 %v1727_v38, %v402_v51  ;;  %v531_v54 = vadd.f32 %v1727_v38, %v530_v52  ;;  %v654_v59 = vmax.f32 %v400_v45, 0.0  ;;  %v686_v60 = vmax.f32 %v528_v46, 0.0 }
  0xe2   :  { %v657_v57 = vmax.f32 %v411_v49, 0.0  ;;  %v689_v58 = vmax.f32 %v539_v50, 0.0 }
  0xe3   :  { %v655_v61 = vmax.f32 %v403_v53, 0.0  ;;  %v687_v62 = vmax.f32 %v531_v54, 0.0 }
  0xe4   :  { %v1245_v63 = vpack.c.bf16 %v657_v57, %v656_v55  ;;  %v1325_v0 = vpack.c.bf16 %v689_v58, %v688_v56 }
  0xe5   :  { %v1240_v1 = vpack.c.bf16 %v655_v61, %v654_v59  ;;  %v1320_v2 = vpack.c.bf16 %v687_v62, %v686_v60  ;;  %v1472_v3 = vpop.f32.mrb[4].mxu0  ;;  %v1504_v4 = vpop.f32.mrb[4].mxu1 }
  0xe6   :  { %1397 = vst [vmem:[%s1892_s3 + $0x8] sm:$0xff] %v1245_v63   ;;  %1413 = vst [vmem:[%s1892_s3 + $0x88] sm:$0xff] %v1325_v0   ;;  %v424_v5 = vadd.f32 %v1472_v3, %v1727_v38  ;;  %v552_v6 = vadd.f32 %v1504_v4, %v1727_v38  ;;  %v415_v7 = vpop.f32.mrb[5].mxu0  ;;  %v543_v8 = vpop.f32.mrb[5].mxu1 }
  0xe7   :  { %1241 = vst [vmem:[%s1892_s3] sm:$0xff] %v1240_v1   ;;  %1412 = vst [vmem:[%s1892_s3 + $0x80] sm:$0xff] %v1320_v2   ;;  %v416_v9 = vadd.f32 %v1727_v38, %v415_v7  ;;  %v544_v10 = vadd.f32 %v1727_v38, %v543_v8  ;;  %v1473_v11 = vpop.f32.mrb[6].mxu0  ;;  %v1505_v12 = vpop.f32.mrb[6].mxu1 }
  0xe8   :  { %v427_v13 = vadd.f32 %v1473_v11, %v1727_v38  ;;  %v555_v14 = vadd.f32 %v1505_v12, %v1727_v38  ;;  %v418_v15 = vpop.f32.mrb[7].mxu0  ;;  %v546_v16 = vpop.f32.mrb[7].mxu1  ;;  %v660_v19 = vmax.f32 %v424_v5, 0.0  ;;  %v692_v20 = vmax.f32 %v552_v6, 0.0 }
  0xe9   :  { %v419_v17 = vadd.f32 %v1727_v38, %v418_v15  ;;  %v547_v18 = vadd.f32 %v1727_v38, %v546_v16  ;;  %v658_v23 = vmax.f32 %v416_v9, 0.0  ;;  %v690_v24 = vmax.f32 %v544_v10, 0.0 }
  0xea   :  { %v661_v21 = vmax.f32 %v427_v13, 0.0  ;;  %v693_v22 = vmax.f32 %v555_v14, 0.0 }
  0xeb   :  { %v659_v25 = vmax.f32 %v419_v17, 0.0  ;;  %v691_v26 = vmax.f32 %v547_v18, 0.0 }
  0xec   :  { %v1255_v27 = vpack.c.bf16 %v661_v21, %v660_v19  ;;  %v1335_v28 = vpack.c.bf16 %v693_v22, %v692_v20 }
  0xed   :  { %v1250_v29 = vpack.c.bf16 %v659_v25, %v658_v23  ;;  %v1330_v30 = vpack.c.bf16 %v691_v26, %v690_v24  ;;  %v1476_v31 = vpop.f32.mrb[8].mxu0  ;;  %v1508_v32 = vpop.f32.mrb[8].mxu1 }
  0xee   :  { %1399 = vst [vmem:[%s1892_s3 + $0x18] sm:$0xff] %v1255_v27   ;;  %1415 = vst [vmem:[%s1892_s3 + $0x98] sm:$0xff] %v1335_v28   ;;  %v440_v33 = vadd.f32 %v1476_v31, %v1727_v38  ;;  %v568_v34 = vadd.f32 %v1508_v32, %v1727_v38  ;;  %v431_v35 = vpop.f32.mrb[9].mxu0  ;;  %v559_v36 = vpop.f32.mrb[9].mxu1 }
  0xef   :  { %1398 = vst [vmem:[%s1892_s3 + $0x10] sm:$0xff] %v1250_v29   ;;  %1414 = vst [vmem:[%s1892_s3 + $0x90] sm:$0xff] %v1330_v30   ;;  %v432_v37 = vadd.f32 %v1727_v38, %v431_v35  ;;  %v560_v39 = vadd.f32 %v1727_v38, %v559_v36  ;;  %v1477_v40 = vpop.f32.mrb[10].mxu0  ;;  %v1509_v41 = vpop.f32.mrb[10].mxu1 }
  0xf0   :  { %v443_v42 = vadd.f32 %v1477_v40, %v1727_v38  ;;  %v571_v43 = vadd.f32 %v1509_v41, %v1727_v38  ;;  %v434_v44 = vpop.f32.mrb[11].mxu0  ;;  %v562_v45 = vpop.f32.mrb[11].mxu1  ;;  %v664_v48 = vmax.f32 %v440_v33, 0.0  ;;  %v696_v49 = vmax.f32 %v568_v34, 0.0 }
  0xf1   :  { %v435_v46 = vadd.f32 %v1727_v38, %v434_v44  ;;  %v563_v47 = vadd.f32 %v1727_v38, %v562_v45  ;;  %v662_v52 = vmax.f32 %v432_v37, 0.0  ;;  %v694_v53 = vmax.f32 %v560_v39, 0.0 }
  0xf2   :  { %v665_v50 = vmax.f32 %v443_v42, 0.0  ;;  %v697_v51 = vmax.f32 %v571_v43, 0.0 }
  0xf3   :  { %v663_v54 = vmax.f32 %v435_v46, 0.0  ;;  %v695_v55 = vmax.f32 %v563_v47, 0.0 }
  0xf4   :  { %v1265_v56 = vpack.c.bf16 %v665_v50, %v664_v48  ;;  %v1345_v57 = vpack.c.bf16 %v697_v51, %v696_v49 }
  0xf5   :  { %v1260_v58 = vpack.c.bf16 %v663_v54, %v662_v52  ;;  %v1340_v59 = vpack.c.bf16 %v695_v55, %v694_v53  ;;  %v1480_v60 = vpop.f32.mrb[12].mxu0  ;;  %v1512_v61 = vpop.f32.mrb[12].mxu1 }
  0xf6   :  { %1401 = vst [vmem:[%s1892_s3 + $0x28] sm:$0xff] %v1265_v56   ;;  %1417 = vst [vmem:[%s1892_s3 + $0xa8] sm:$0xff] %v1345_v57   ;;  %v456_v62 = vadd.f32 %v1480_v60, %v1727_v38  ;;  %v584_v63 = vadd.f32 %v1512_v61, %v1727_v38  ;;  %v447_v0 = vpop.f32.mrb[13].mxu0  ;;  %v575_v1 = vpop.f32.mrb[13].mxu1 }
  0xf7   :  { %1400 = vst [vmem:[%s1892_s3 + $0x20] sm:$0xff] %v1260_v58   ;;  %1416 = vst [vmem:[%s1892_s3 + $0xa0] sm:$0xff] %v1340_v59   ;;  %v448_v2 = vadd.f32 %v1727_v38, %v447_v0  ;;  %v576_v3 = vadd.f32 %v1727_v38, %v575_v1  ;;  %v1481_v4 = vpop.f32.mrb[14].mxu0  ;;  %v1513_v5 = vpop.f32.mrb[14].mxu1 }
  0xf8   :  { %v459_v6 = vadd.f32 %v1481_v4, %v1727_v38  ;;  %v587_v7 = vadd.f32 %v1513_v5, %v1727_v38  ;;  %v450_v8 = vpop.f32.mrb[15].mxu0  ;;  %v578_v9 = vpop.f32.mrb[15].mxu1  ;;  %v668_v12 = vmax.f32 %v456_v62, 0.0  ;;  %v700_v13 = vmax.f32 %v584_v63, 0.0 }
  0xf9   :  { %v451_v10 = vadd.f32 %v1727_v38, %v450_v8  ;;  %v579_v11 = vadd.f32 %v1727_v38, %v578_v9  ;;  %v666_v16 = vmax.f32 %v448_v2, 0.0  ;;  %v698_v17 = vmax.f32 %v576_v3, 0.0 }
  0xfa   :  { %v669_v14 = vmax.f32 %v459_v6, 0.0  ;;  %v701_v15 = vmax.f32 %v587_v7, 0.0 }
  0xfb   :  { %v667_v18 = vmax.f32 %v451_v10, 0.0  ;;  %v699_v19 = vmax.f32 %v579_v11, 0.0 }
  0xfc   :  { %v1275_v20 = vpack.c.bf16 %v669_v14, %v668_v12  ;;  %v1355_v21 = vpack.c.bf16 %v701_v15, %v700_v13 }
  0xfd   :  { %v1270_v22 = vpack.c.bf16 %v667_v18, %v666_v16  ;;  %v1350_v23 = vpack.c.bf16 %v699_v19, %v698_v17  ;;  %v1484_v24 = vpop.f32.mrb[16].mxu0  ;;  %v1516_v25 = vpop.f32.mrb[16].mxu1 }
  0xfe   :  { %1403 = vst [vmem:[%s1892_s3 + $0x38] sm:$0xff] %v1275_v20   ;;  %1419 = vst [vmem:[%s1892_s3 + $0xb8] sm:$0xff] %v1355_v21   ;;  %v472_v26 = vadd.f32 %v1484_v24, %v1727_v38  ;;  %v600_v27 = vadd.f32 %v1516_v25, %v1727_v38  ;;  %v463_v28 = vpop.f32.mrb[17].mxu0  ;;  %v591_v29 = vpop.f32.mrb[17].mxu1 }
  0xff   :  { %1402 = vst [vmem:[%s1892_s3 + $0x30] sm:$0xff] %v1270_v22   ;;  %1418 = vst [vmem:[%s1892_s3 + $0xb0] sm:$0xff] %v1350_v23   ;;  %v464_v30 = vadd.f32 %v1727_v38, %v463_v28  ;;  %v592_v31 = vadd.f32 %v1727_v38, %v591_v29  ;;  %v1485_v32 = vpop.f32.mrb[18].mxu0  ;;  %v1517_v33 = vpop.f32.mrb[18].mxu1 }
 0x100   :  { %v475_v34 = vadd.f32 %v1485_v32, %v1727_v38  ;;  %v603_v35 = vadd.f32 %v1517_v33, %v1727_v38  ;;  %v466_v36 = vpop.f32.mrb[19].mxu0  ;;  %v594_v37 = vpop.f32.mrb[19].mxu1  ;;  %v672_v41 = vmax.f32 %v472_v26, 0.0  ;;  %v704_v42 = vmax.f32 %v600_v27, 0.0 }
 0x101   :  { %v467_v39 = vadd.f32 %v1727_v38, %v466_v36  ;;  %v595_v40 = vadd.f32 %v1727_v38, %v594_v37  ;;  %v670_v45 = vmax.f32 %v464_v30, 0.0  ;;  %v702_v46 = vmax.f32 %v592_v31, 0.0 }
 0x102   :  { %v673_v43 = vmax.f32 %v475_v34, 0.0  ;;  %v705_v44 = vmax.f32 %v603_v35, 0.0 }
 0x103   :  { %v671_v47 = vmax.f32 %v467_v39, 0.0  ;;  %v703_v48 = vmax.f32 %v595_v40, 0.0 }
 0x104   :  { %v1285_v49 = vpack.c.bf16 %v673_v43, %v672_v41  ;;  %v1365_v50 = vpack.c.bf16 %v705_v44, %v704_v42 }
 0x105   :  { %v1280_v51 = vpack.c.bf16 %v671_v47, %v670_v45  ;;  %v1360_v52 = vpack.c.bf16 %v703_v48, %v702_v46  ;;  %v1488_v53 = vpop.f32.mrb[20].mxu0  ;;  %v1520_v54 = vpop.f32.mrb[20].mxu1 }
 0x106   :  { %1405 = vst [vmem:[%s1892_s3 + $0x48] sm:$0xff] %v1285_v49   ;;  %1421 = vst [vmem:[%s1892_s3 + $0xc8] sm:$0xff] %v1365_v50   ;;  %v488_v55 = vadd.f32 %v1488_v53, %v1727_v38  ;;  %v616_v56 = vadd.f32 %v1520_v54, %v1727_v38  ;;  %v479_v57 = vpop.f32.mrb[21].mxu0  ;;  %v607_v58 = vpop.f32.mrb[21].mxu1 }
 0x107   :  { %1404 = vst [vmem:[%s1892_s3 + $0x40] sm:$0xff] %v1280_v51   ;;  %1420 = vst [vmem:[%s1892_s3 + $0xc0] sm:$0xff] %v1360_v52   ;;  %v480_v59 = vadd.f32 %v1727_v38, %v479_v57  ;;  %v608_v60 = vadd.f32 %v1727_v38, %v607_v58  ;;  %v1489_v61 = vpop.f32.mrb[22].mxu0  ;;  %v1521_v62 = vpop.f32.mrb[22].mxu1 }
 0x108   :  { %v491_v63 = vadd.f32 %v1489_v61, %v1727_v38  ;;  %v619_v0 = vadd.f32 %v1521_v62, %v1727_v38  ;;  %v482_v1 = vpop.f32.mrb[23].mxu0  ;;  %v610_v2 = vpop.f32.mrb[23].mxu1  ;;  %v676_v5 = vmax.f32 %v488_v55, 0.0  ;;  %v708_v6 = vmax.f32 %v616_v56, 0.0 }
 0x109   :  { %v483_v3 = vadd.f32 %v1727_v38, %v482_v1  ;;  %v611_v4 = vadd.f32 %v1727_v38, %v610_v2  ;;  %v674_v9 = vmax.f32 %v480_v59, 0.0  ;;  %v706_v10 = vmax.f32 %v608_v60, 0.0 }
 0x10a   :  { %v677_v7 = vmax.f32 %v491_v63, 0.0  ;;  %v709_v8 = vmax.f32 %v619_v0, 0.0 }
 0x10b   :  { %v675_v11 = vmax.f32 %v483_v3, 0.0  ;;  %v707_v12 = vmax.f32 %v611_v4, 0.0 }
 0x10c   :  { %v1295_v13 = vpack.c.bf16 %v677_v7, %v676_v5  ;;  %v1375_v14 = vpack.c.bf16 %v709_v8, %v708_v6 }
 0x10d   :  { %v1290_v15 = vpack.c.bf16 %v675_v11, %v674_v9  ;;  %v1370_v16 = vpack.c.bf16 %v707_v12, %v706_v10  ;;  %v1492_v17 = vpop.f32.mrb[24].mxu0  ;;  %v1524_v18 = vpop.f32.mrb[24].mxu1 }
 0x10e   :  { %1407 = vst [vmem:[%s1892_s3 + $0x58] sm:$0xff] %v1295_v13   ;;  %1423 = vst [vmem:[%s1892_s3 + $0xd8] sm:$0xff] %v1375_v14   ;;  %v504_v19 = vadd.f32 %v1492_v17, %v1727_v38  ;;  %v632_v20 = vadd.f32 %v1524_v18, %v1727_v38  ;;  %v495_v21 = vpop.f32.mrb[25].mxu0  ;;  %v623_v22 = vpop.f32.mrb[25].mxu1 }
 0x10f   :  { %1406 = vst [vmem:[%s1892_s3 + $0x50] sm:$0xff] %v1290_v15   ;;  %1422 = vst [vmem:[%s1892_s3 + $0xd0] sm:$0xff] %v1370_v16   ;;  %v496_v23 = vadd.f32 %v1727_v38, %v495_v21  ;;  %v624_v24 = vadd.f32 %v1727_v38, %v623_v22  ;;  %v1493_v25 = vpop.f32.mrb[26].mxu0  ;;  %v1525_v26 = vpop.f32.mrb[26].mxu1 }
 0x110   :  { %v507_v27 = vadd.f32 %v1493_v25, %v1727_v38  ;;  %v635_v28 = vadd.f32 %v1525_v26, %v1727_v38  ;;  %v498_v29 = vpop.f32.mrb[27].mxu0  ;;  %v626_v30 = vpop.f32.mrb[27].mxu1  ;;  %v680_v33 = vmax.f32 %v504_v19, 0.0  ;;  %v712_v34 = vmax.f32 %v632_v20, 0.0 }
 0x111   :  { %v499_v31 = vadd.f32 %v1727_v38, %v498_v29  ;;  %v627_v32 = vadd.f32 %v1727_v38, %v626_v30  ;;  %v678_v37 = vmax.f32 %v496_v23, 0.0  ;;  %v710_v39 = vmax.f32 %v624_v24, 0.0 }
 0x112   :  { %v681_v35 = vmax.f32 %v507_v27, 0.0  ;;  %v713_v36 = vmax.f32 %v635_v28, 0.0 }
 0x113   :  { %v679_v40 = vmax.f32 %v499_v31, 0.0  ;;  %v711_v41 = vmax.f32 %v627_v32, 0.0 }
 0x114   :  { %v1305_v42 = vpack.c.bf16 %v681_v35, %v680_v33  ;;  %v1385_v43 = vpack.c.bf16 %v713_v36, %v712_v34 }
 0x115   :  { %v1300_v44 = vpack.c.bf16 %v679_v40, %v678_v37  ;;  %v1380_v45 = vpack.c.bf16 %v711_v41, %v710_v39  ;;  %v1496_v46 = vpop.f32.mrb[28].mxu0  ;;  %v1528_v47 = vpop.f32.mrb[28].mxu1 }
 0x116   :  { %1409 = vst [vmem:[%s1892_s3 + $0x68] sm:$0xff] %v1305_v42   ;;  %1425 = vst [vmem:[%s1892_s3 + $0xe8] sm:$0xff] %v1385_v43   ;;  %v520_v48 = vadd.f32 %v1496_v46, %v1727_v38  ;;  %v648_v49 = vadd.f32 %v1528_v47, %v1727_v38  ;;  %v511_v50 = vpop.f32.mrb[29].mxu0  ;;  %v639_v51 = vpop.f32.mrb[29].mxu1 }
 0x117   :  { %1408 = vst [vmem:[%s1892_s3 + $0x60] sm:$0xff] %v1300_v44   ;;  %1424 = vst [vmem:[%s1892_s3 + $0xe0] sm:$0xff] %v1380_v45   ;;  %v512_v52 = vadd.f32 %v1727_v38, %v511_v50  ;;  %v640_v53 = vadd.f32 %v1727_v38, %v639_v51  ;;  %v1497_v54 = vpop.f32.mrb[30].mxu0  ;;  %v1529_v55 = vpop.f32.mrb[30].mxu1 }
 0x118   :  { %v523_v56 = vadd.f32 %v1497_v54, %v1727_v38  ;;  %v651_v57 = vadd.f32 %v1529_v55, %v1727_v38  ;;  %v514_v58 = vpop.f32.mrb[31].mxu0  ;;  %v642_v59 = vpop.f32.mrb[31].mxu1  ;;  %v684_v62 = vmax.f32 %v520_v48, 0.0  ;;  %v716_v63 = vmax.f32 %v648_v49, 0.0 }
 0x119   :  { %v515_v60 = vadd.f32 %v1727_v38, %v514_v58  ;;  %v643_v61 = vadd.f32 %v1727_v38, %v642_v59  ;;  %v682_v2 = vmax.f32 %v512_v52, 0.0  ;;  %v714_v3 = vmax.f32 %v640_v53, 0.0 }
 0x11a   :  { %v685_v0 = vmax.f32 %v523_v56, 0.0  ;;  %v717_v1 = vmax.f32 %v651_v57, 0.0 }
 0x11b   :  { %v683_v4 = vmax.f32 %v515_v60, 0.0  ;;  %v715_v5 = vmax.f32 %v643_v61, 0.0 }
 0x11c   :  { %v1315_v6 = vpack.c.bf16 %v685_v0, %v684_v62  ;;  %v1395_v7 = vpack.c.bf16 %v717_v1, %v716_v63 }
 0x11d   :  { %v1310_v8 = vpack.c.bf16 %v683_v4, %v682_v2  ;;  %v1390_v9 = vpack.c.bf16 %v715_v5, %v714_v3 }
 0x11e   :  { %1411 = vst [vmem:[%s1892_s3 + $0x78] sm:$0xff] %v1315_v6   ;;  %1427 = vst [vmem:[%s1892_s3 + $0xf8] sm:$0xff] %v1395_v7  }
 0x11f   :  { %1410 = vst [vmem:[%s1892_s3 + $0x70] sm:$0xff] %v1310_v8   ;;  %1426 = vst [vmem:[%s1892_s3 + $0xf0] sm:$0xff] %v1390_v9  }

// kernel: custom-call
= control target key start
LH: loop header
LB: loop body
LE: loop exit
PB: predicated region body
PF: predicated region fallthrough
CT: control target
= control target key end

     0   :  { %5 = vsyncpa [#allocation9], 0  ;;  %v1248_v0 = vmov 2147483648   ;;  %v1249_v1 = vmov 2147483647   ;;  %s1404_s0 = inlined_call_operand.vmem [shape: f32[2,3840], index: 0, kind: input, shape index: {}]   ;;  %s1405_s1 = inlined_call_operand.hbm [shape: f32[2,8], index: 1, kind: output, shape index: {0}]   ;;  %s1406_s2 = inlined_call_operand.vmem [shape: s32[2,8], index: 2, kind: output, shape index: {1}]  }
   0x1   :  { %7 = vst [vmem:[#allocation12] sm:$0xff] %v1248_v0  ;;  %8 = vst [vmem:[#allocation14] sm:$0xff] %v1249_v1 }
   0x2   :  { %v27_v2 = vld [vmem:[%s1404_s0] sm:$0xff]  ;;  %v29_v3 = vld [vmem:[%s1404_s0 + $0x8] sm:$0xff]  ;;  %v55_v4 = vlaneseq  ;;  %v31_v5 = vld [vmem:[%s1404_s0 + $0x10] sm:$0xff]  ;;  %v1250_v7 = vmov 2147483648   ;;  %v1251_v8 = vmov 2147483647  }
   0x3   :  { %v33_v6 = vld [vmem:[%s1404_s0 + $0x18] sm:$0xff]  ;;  %168 = vst [vmem:[#allocation13] sm:$0xff] %v1250_v7  ;;  %169 = vst [vmem:[#allocation15] sm:$0xff] %v1251_v8  ;;  %v35_v9 = vld [vmem:[%s1404_s0 + $0x20] sm:$0xff]  ;;  %vm65_vm0 = vcmp.lt.s32.totalorder %v27_v2, 0  ;;  %vm74_vm1 = vcmp.lt.s32.totalorder %v29_v3, 0 }
   0x4   :  { %v37_v10 = vld [vmem:[%s1404_s0 + $0x28] sm:$0xff]  ;;  %v1184_v11 = vld [vmem:[%s1404_s0 + $0x38] sm:$0xf]  ;;  %v1295_v12 = vshrl.u32 %v55_v4, 7  ;;  %v39_v13 = vld [vmem:[%s1404_s0 + $0x30] sm:$0xff]  ;;  %v56_v14 = vand.u32 127, %v55_v4 }
   0x5   :  { %51 = vst [vmem:[#allocation16 + $0x38] sm:$0xf] %v1184_v11  ;;  %v66_v15 = vsub.s32 2147483647, %v27_v2  ;;  %v75_v17 = vsub.s32 2147483647, %v29_v3 }
   0x6   :  { %v59_v16 = vshrl.u32 %v1295_v12, 1  ;;  %vm83_vm2 = vcmp.lt.s32.totalorder %v31_v5, 0  ;;  %v84_v18 = vsub.s32 2147483647, %v31_v5  ;;  %vm92_vm3 = vcmp.lt.s32.totalorder %v33_v6, 0  ;;  %s1305_s0 = smov 0  }
   0x7   :  { %v93_v19 = vsub.s32 2147483647, %v33_v6  ;;  %vm101_vm4 = vcmp.lt.s32.totalorder %v35_v9, 0  ;;  %v102_v20 = vsub.s32 2147483647, %v35_v9  ;;  %vm110_vm5 = vcmp.lt.s32.totalorder %v37_v10, 0 }
   0x8   :  { %v61_v21 = vmul.u32 128, %v59_v16  ;;  %v111_v22 = vsub.s32 2147483647, %v37_v10  ;;  %vm119_vm6 = vcmp.lt.s32.totalorder %v39_v13, 0  ;;  %v120_v23 = vsub.s32 2147483647, %v39_v13 }
   0x9   :  { %v67_v25 = vsel %vm65_vm0, %v66_v15, %v27_v2  ;;  %v76_v26 = vsel %vm74_vm1, %v75_v17, %v29_v3  ;;  %v85_v27 = vsel %vm83_vm2, %v84_v18, %v31_v5  ;;  %v94_v28 = vsel %vm92_vm3, %v93_v19, %v33_v6 }
   0xa   :  { %v62_v24 = vadd.s32 %v61_v21, %v56_v14  ;;  %v103_v29 = vsel %vm101_vm4, %v102_v20, %v35_v9  ;;  %v112_v30 = vsel %vm110_vm5, %v111_v22, %v37_v10  ;;  %v121_v31 = vsel %vm119_vm6, %v120_v23, %v39_v13 }
   0xc   :  { %vm69_vm7 = vcmp.lt.s32.totalorder %v62_v24, 3840  ;;  %v77_v32 = vadd.s32 512, %v62_v24  ;;  %v86_v33 = vadd.s32 1024, %v62_v24  ;;  %v95_v34 = vadd.s32 1536, %v62_v24  ;;  %v127_v35 = vld [vmem:[#allocation16 + $0x38] sm:$0xff]  ;;  %145 = vst [vmem:[#allocation17] sm:$0xff] %v62_v24 }
   0xd   :  { %v70_v36 = vsel %vm69_vm7, %v67_v25, 2147483648  ;;  %v104_v37 = vadd.s32 2048, %v62_v24  ;;  %v113_v38 = vadd.s32 2560, %v62_v24  ;;  %v122_v39 = vadd.s32 3072, %v62_v24 }
   0xe   :  { %71 = vst [vmem:[#allocation16] sm:$0xff] %v70_v36  ;;  %vm78_vm8 = vcmp.lt.s32.totalorder %v77_v32, 3840  ;;  %vm87_vm9 = vcmp.lt.s32.totalorder %v86_v33, 3840  ;;  %vm96_vm10 = vcmp.lt.s32.totalorder %v95_v34, 3840  ;;  %vm128_vm11 = vcmp.lt.s32.totalorder %v127_v35, 0  ;;  %148 = vst [vmem:[#allocation17 + $0x8] sm:$0xff] %v77_v32 }
   0xf   :  { %151 = vst [vmem:[#allocation17 + $0x10] sm:$0xff] %v86_v33  ;;  %154 = vst [vmem:[#allocation17 + $0x18] sm:$0xff] %v95_v34  ;;  %v79_v40 = vsel %vm78_vm8, %v76_v26, 2147483648  ;;  %v88_v41 = vsel %vm87_vm9, %v85_v27, 2147483648  ;;  %v97_v42 = vsel %vm96_vm10, %v94_v28, 2147483648  ;;  %vm105_vm12 = vcmp.lt.s32.totalorder %v104_v37, 3840 }
  0x10   :  { %157 = vst [vmem:[#allocation17 + $0x20] sm:$0xff] %v104_v37  ;;  %160 = vst [vmem:[#allocation17 + $0x28] sm:$0xff] %v113_v38  ;;  %v106_v43 = vsel %vm105_vm12, %v103_v29, 2147483648  ;;  %vm114_vm13 = vcmp.lt.s32.totalorder %v113_v38, 3840  ;;  %vm123_vm14 = vcmp.lt.s32.totalorder %v122_v39, 3840  ;;  %v131_v47 = vadd.s32 3584, %v62_v24 }
  0x11   :  { %163 = vst [vmem:[#allocation17 + $0x30] sm:$0xff] %v122_v39  ;;  %80 = vst [vmem:[#allocation16 + $0x8] sm:$0xff] %v79_v40  ;;  %v129_v44 = vsub.s32 2147483647, %v127_v35  ;;  %v115_v45 = vsel %vm114_vm13, %v112_v30, 2147483648  ;;  %v124_v46 = vsel %vm123_vm14, %v121_v31, 2147483648 }
  0x12   :  { %89 = vst [vmem:[#allocation16 + $0x10] sm:$0xff] %v88_v41  ;;  %98 = vst [vmem:[#allocation16 + $0x18] sm:$0xff] %v97_v42  ;;  %vm132_vm15 = vcmp.lt.s32.totalorder %v131_v47, 3840 }
  0x13   :  { %107 = vst [vmem:[#allocation16 + $0x20] sm:$0xff] %v106_v43  ;;  %116 = vst [vmem:[#allocation16 + $0x28] sm:$0xff] %v115_v45  ;;  %v130_v48 = vsel %vm128_vm11, %v129_v44, %v127_v35 }
  0x14   :  { %125 = vst [vmem:[#allocation16 + $0x30] sm:$0xff] %v124_v46  ;;  %166 = vst [vmem:[#allocation17 + $0x38] sm:$0xff] %v131_v47  ;;  %v133_v49 = vsel %vm132_vm15, %v130_v48, 2147483648 }
  0x15   :  { %134 = vst [vmem:[#allocation16 + $0x38] sm:$0xff] %v133_v49 }
  0x16 LB: > { %v177_v50 = vld [vmem:[#allocation16] sm:$0xff]  ;;  %v183_v53 = vld [vmem:[#allocation17 + $0x8] sm:$0xff]  ;;  %v196_v55 = vld [vmem:[#allocation17 + $0x10] sm:$0xff]  ;;  %s581_s25 = scalar_lea.vmem [#allocation13], %s1246_s0  ;;  %s583_s26 = scalar_lea.vmem [#allocation15], %s1246_s0  ;;  %s1246_s0 = sphi %s1305_s0, %s176_s0  }
  0x17   : > { %v178_v51 = vld [vmem:[#allocation17] sm:$0xff]  ;;  %v209_v59 = vld [vmem:[#allocation17 + $0x18] sm:$0xff]  ;;  %v235_v3 = vld [vmem:[#allocation17 + $0x28] sm:$0xff]  ;;  %s176_s0 = sadd.s32 1, %s1246_s0  }
  0x18   : > { %v181_v52 = vld [vmem:[#allocation16 + $0x8] sm:$0xff]  ;;  %vm187_vm2 = vcmp.lt.s32.totalorder %v183_v53, %v178_v51  ;;  %v222_v63 = vld [vmem:[#allocation17 + $0x20] sm:$0xff]  ;;  %v248_v8 = vld [vmem:[#allocation17 + $0x30] sm:$0xff]  ;;  %p173_p2 = scmp.ge.s32.totalorder %s176_s0, 8  }
  0x19   : > { %vm185_vm0 = vcmp.gt.s32.totalorder %v181_v52, %v177_v50  ;;  %vm186_vm1 = vcmp.eq.s32.totalorder %v181_v52, %v177_v50  ;;  %v194_v54 = vld [vmem:[#allocation16 + $0x10] sm:$0xff]  ;;  %v207_v58 = vld [vmem:[#allocation16 + $0x18] sm:$0xff]  ;;  %s1257_s0 = smov (%p173_p2), [#allocation8]  }
  0x1a   : > { %vm188_vm3 = vmand %vm186_vm1, %vm187_vm2  ;;  %v220_v62 = vld [vmem:[#allocation16 + $0x20] sm:$0xff]  ;;  %v233_v2 = vld [vmem:[#allocation16 + $0x28] sm:$0xff] }
  0x1b   : > { %vm189_vm4 = vmor %vm185_vm0, %vm188_vm3  ;;  %v246_v7 = vld [vmem:[#allocation16 + $0x30] sm:$0xff]  ;;  %v261_v13 = vld [vmem:[#allocation17 + $0x38] sm:$0xff] }
  0x1c   : > { %v190_v56 = vsel %vm189_vm4, %v181_v52, %v177_v50  ;;  %v191_v57 = vsel %vm189_vm4, %v183_v53, %v178_v51  ;;  %v259_v11 = vld [vmem:[#allocation16 + $0x38] sm:$0xff] }
  0x1d   : > { %vm198_vm5 = vcmp.gt.s32.totalorder %v194_v54, %v190_v56  ;;  %vm199_vm6 = vcmp.eq.s32.totalorder %v194_v54, %v190_v56  ;;  %vm200_vm7 = vcmp.lt.s32.totalorder %v196_v55, %v191_v57 }
  0x1e   : > { %vm201_vm8 = vmand %vm199_vm6, %vm200_vm7 }
  0x1f   : > { %vm202_vm9 = vmor %vm198_vm5, %vm201_vm8 }
  0x20   : > { %v203_v60 = vsel %vm202_vm9, %v194_v54, %v190_v56  ;;  %v204_v61 = vsel %vm202_vm9, %v196_v55, %v191_v57 }
  0x21   : > { %vm211_vm10 = vcmp.gt.s32.totalorder %v207_v58, %v203_v60  ;;  %vm212_vm11 = vcmp.eq.s32.totalorder %v207_v58, %v203_v60  ;;  %vm213_vm12 = vcmp.lt.s32.totalorder %v209_v59, %v204_v61 }
  0x22   : > { %vm214_vm13 = vmand %vm212_vm11, %vm213_vm12 }
  0x23   : > { %vm215_vm14 = vmor %vm211_vm10, %vm214_vm13 }
  0x24   : > { %v216_v0 = vsel %vm215_vm14, %v207_v58, %v203_v60  ;;  %v217_v1 = vsel %vm215_vm14, %v209_v59, %v204_v61 }
  0x25   : > { %vm224_vm15 = vcmp.gt.s32.totalorder %v220_v62, %v216_v0  ;;  %vm225_vm0 = vcmp.eq.s32.totalorder %v220_v62, %v216_v0  ;;  %vm226_vm1 = vcmp.lt.s32.totalorder %v222_v63, %v217_v1 }
  0x26   : > { %vm227_vm2 = vmand %vm225_vm0, %vm226_vm1 }
  0x27   : > { %vm228_vm3 = vmor %vm224_vm15, %vm227_vm2 }
  0x28   : > { %v229_v5 = vsel %vm228_vm3, %v220_v62, %v216_v0  ;;  %v230_v6 = vsel %vm228_vm3, %v222_v63, %v217_v1 }
  0x29   : > { %vm237_vm4 = vcmp.gt.s32.totalorder %v233_v2, %v229_v5  ;;  %vm238_vm5 = vcmp.eq.s32.totalorder %v233_v2, %v229_v5  ;;  %vm239_vm6 = vcmp.lt.s32.totalorder %v235_v3, %v230_v6 }
  0x2a   : > { %vm240_vm7 = vmand %vm238_vm5, %vm239_vm6 }
  0x2b   : > { %vm241_vm8 = vmor %vm237_vm4, %vm240_vm7 }
  0x2c   : > { %v242_v9 = vsel %vm241_vm8, %v233_v2, %v229_v5  ;;  %v243_v10 = vsel %vm241_vm8, %v235_v3, %v230_v6 }
  0x2d   : > { %vm250_vm9 = vcmp.gt.s32.totalorder %v246_v7, %v242_v9  ;;  %vm251_vm10 = vcmp.eq.s32.totalorder %v246_v7, %v242_v9  ;;  %vm252_vm11 = vcmp.lt.s32.totalorder %v248_v8, %v243_v10 }
  0x2e   : > { %vm253_vm12 = vmand %vm251_vm10, %vm252_vm11 }
  0x2f   : > { %vm254_vm13 = vmor %vm250_vm9, %vm253_vm12 }
  0x30   : > { %v255_v14 = vsel %vm254_vm13, %v246_v7, %v242_v9  ;;  %v256_v15 = vsel %vm254_vm13, %v248_v8, %v243_v10 }
  0x31   : > { %vm263_vm14 = vcmp.gt.s32.totalorder %v259_v11, %v255_v14  ;;  %vm264_vm15 = vcmp.eq.s32.totalorder %v259_v11, %v255_v14  ;;  %vm265_vm0 = vcmp.lt.s32.totalorder %v261_v13, %v256_v15 }
  0x32   : > { %vm266_vm1 = vmand %vm264_vm15, %vm265_vm0 }
  0x33   : > { %vm267_vm2 = vmor %vm263_vm14, %vm266_vm1 }
  0x34   : > { %v268_v16 = vsel %vm267_vm2, %v259_v11, %v255_v14  ;;  %v269_v17 = vsel %vm267_vm2, %v261_v13, %v256_v15 }
  0x35   : > { %v271_v18 = vrot.slane %v268_v16, 2  ;;  %v272_v19 = vrot.slane %v269_v17, 2 }
  0x37   : > { %vm274_vm3 = vcmp.gt.s32.totalorder %v271_v18, %v268_v16  ;;  %vm275_vm4 = vcmp.eq.s32.totalorder %v271_v18, %v268_v16  ;;  %vm276_vm5 = vcmp.lt.s32.totalorder %v272_v19, %v269_v17 }
  0x38   : > { %vm277_vm6 = vmand %vm275_vm4, %vm276_vm5 }
  0x39   : > { %vm278_vm7 = vmor %vm274_vm3, %vm277_vm6 }
  0x3a   : > { %v279_v20 = vsel %vm278_vm7, %v271_v18, %v268_v16  ;;  %v280_v21 = vsel %vm278_vm7, %v272_v19, %v269_v17 }
  0x3b   : > { %v282_v22 = vrot.slane %v279_v20, 2  ;;  %v283_v23 = vrot.slane %v280_v21, 2 }
  0x3d   : > { %vm285_vm8 = vcmp.gt.s32.totalorder %v282_v22, %v279_v20  ;;  %vm286_vm9 = vcmp.eq.s32.totalorder %v282_v22, %v279_v20  ;;  %vm287_vm10 = vcmp.lt.s32.totalorder %v283_v23, %v280_v21 }
  0x3e   : > { %vm288_vm11 = vmand %vm286_vm9, %vm287_vm10 }
  0x3f   : > { %vm289_vm12 = vmor %vm285_vm8, %vm288_vm11 }
  0x40   : > { %v290_v24 = vsel %vm289_vm12, %v282_v22, %v279_v20  ;;  %v291_v25 = vsel %vm289_vm12, %v283_v23, %v280_v21 }
  0x41   : > { %v293_v26 = vrot.slane %v290_v24, 2  ;;  %v294_v27 = vrot.slane %v291_v25, 2 }
  0x43   : > { %vm296_vm13 = vcmp.gt.s32.totalorder %v293_v26, %v290_v24  ;;  %vm297_vm14 = vcmp.eq.s32.totalorder %v293_v26, %v290_v24  ;;  %vm298_vm15 = vcmp.lt.s32.totalorder %v294_v27, %v291_v25 }
  0x44   : > { %vm299_vm0 = vmand %vm297_vm14, %vm298_vm15 }
  0x45   : > { %vm300_vm1 = vmor %vm296_vm13, %vm299_vm0 }
  0x46   : > { %v302_v28 = vsel %vm300_vm1, %v294_v27, %v291_v25  ;;  %v301_v29 = vsel %vm300_vm1, %v293_v26, %v290_v24 }
  0x47   : > { %336 = vxpose.xlu1.b32.start [1/16] %v302_v28, 128  ;;  %304 = vxpose.xlu0.b32.start [1/16] %v301_v29, 128 }
  0x4b   : > { %337 = vxpose.xlu1.b32.cont [2/16] %v302_v28, 128  ;;  %305 = vxpose.xlu0.b32.cont [2/16] %v301_v29, 128 }
  0x4f   : > { %338 = vxpose.xlu1.b32.cont [3/16] %v302_v28, 128  ;;  %306 = vxpose.xlu0.b32.cont [3/16] %v301_v29, 128 }
  0x53   : > { %339 = vxpose.xlu1.b32.cont [4/16] %v302_v28, 128  ;;  %307 = vxpose.xlu0.b32.cont [4/16] %v301_v29, 128 }
  0x57   : > { %340 = vxpose.xlu1.b32.cont [5/16] %v302_v28, 128  ;;  %308 = vxpose.xlu0.b32.cont [5/16] %v301_v29, 128 }
  0x5b   : > { %341 = vxpose.xlu1.b32.cont [6/16] %v302_v28, 128  ;;  %309 = vxpose.xlu0.b32.cont [6/16] %v301_v29, 128 }
  0x5f   : > { %342 = vxpose.xlu1.b32.cont [7/16] %v302_v28, 128  ;;  %310 = vxpose.xlu0.b32.cont [7/16] %v301_v29, 128 }
  0x63   : > { %343 = vxpose.xlu1.b32.cont [8/16] %v302_v28, 128  ;;  %311 = vxpose.xlu0.b32.cont [8/16] %v301_v29, 128 }
  0x67   : > { %344 = vxpose.xlu1.b32.cont [9/16] %v302_v28, 128  ;;  %312 = vxpose.xlu0.b32.cont [9/16] %v301_v29, 128 }
  0x6b   : > { %345 = vxpose.xlu1.b32.cont [10/16] %v302_v28, 128  ;;  %313 = vxpose.xlu0.b32.cont [10/16] %v301_v29, 128 }
  0x6f   : > { %346 = vxpose.xlu1.b32.cont [11/16] %v302_v28, 128  ;;  %314 = vxpose.xlu0.b32.cont [11/16] %v301_v29, 128 }
  0x73   : > { %347 = vxpose.xlu1.b32.cont [12/16] %v302_v28, 128  ;;  %315 = vxpose.xlu0.b32.cont [12/16] %v301_v29, 128 }
  0x77   : > { %348 = vxpose.xlu1.b32.cont [13/16] %v302_v28, 128  ;;  %316 = vxpose.xlu0.b32.cont [13/16] %v301_v29, 128 }
  0x7b   : > { %349 = vxpose.xlu1.b32.cont [14/16] %v302_v28, 128  ;;  %317 = vxpose.xlu0.b32.cont [14/16] %v301_v29, 128 }
  0x7f   : > { %350 = vxpose.xlu1.b32.cont [15/16] %v302_v28, 128  ;;  %318 = vxpose.xlu0.b32.cont [15/16] %v301_v29, 128 }
  0x83   : > { %351 = vxpose.xlu1.b32.end [16/16] %v302_v28, 128  ;;  %319 = vxpose.xlu0.b32.end [16/16] %v301_v29, 128 }
  0xc7   : > { %v352_v30 = vpop.trf.xlu1  ;;  %v320_v31 = vpop.trf.xlu0 }
  0xcb   : > { %v353_v32 = vpop.trf.xlu1  ;;  %v321_v33 = vpop.trf.xlu0 }
  0xcc   : > { %vm372_vm2 = vcmp.lt.s32.totalorder %v353_v32, %v352_v30  ;;  %vm370_vm3 = vcmp.gt.s32.totalorder %v321_v33, %v320_v31  ;;  %vm371_vm4 = vcmp.eq.s32.totalorder %v321_v33, %v320_v31 }
  0xcd   : > { %vm373_vm5 = vmand %vm371_vm4, %vm372_vm2 }
  0xce   : > { %vm374_vm6 = vmor %vm370_vm3, %vm373_vm5 }
  0xcf   : > { %v375_v34 = vsel %vm374_vm6, %v321_v33, %v320_v31  ;;  %v354_v35 = vpop.trf.xlu1  ;;  %v376_v36 = vsel %vm374_vm6, %v353_v32, %v352_v30  ;;  %v322_v37 = vpop.trf.xlu0 }
  0xd0   : > { %vm381_vm7 = vcmp.lt.s32.totalorder %v354_v35, %v376_v36  ;;  %vm379_vm8 = vcmp.gt.s32.totalorder %v322_v37, %v375_v34  ;;  %vm380_vm9 = vcmp.eq.s32.totalorder %v322_v37, %v375_v34 }
  0xd1   : > { %vm382_vm10 = vmand %vm380_vm9, %vm381_vm7 }
  0xd2   : > { %vm383_vm11 = vmor %vm379_vm8, %vm382_vm10 }
  0xd3   : > { %v384_v38 = vsel %vm383_vm11, %v322_v37, %v375_v34  ;;  %v355_v39 = vpop.trf.xlu1  ;;  %v385_v40 = vsel %vm383_vm11, %v354_v35, %v376_v36  ;;  %v323_v41 = vpop.trf.xlu0 }
  0xd4   : > { %vm390_vm12 = vcmp.lt.s32.totalorder %v355_v39, %v385_v40  ;;  %vm388_vm13 = vcmp.gt.s32.totalorder %v323_v41, %v384_v38  ;;  %vm389_vm14 = vcmp.eq.s32.totalorder %v323_v41, %v384_v38 }
  0xd5   : > { %vm391_vm15 = vmand %vm389_vm14, %vm390_vm12 }
  0xd6   : > { %vm392_vm0 = vmor %vm388_vm13, %vm391_vm15 }
  0xd7   : > { %v393_v42 = vsel %vm392_vm0, %v323_v41, %v384_v38  ;;  %v356_v43 = vpop.trf.xlu1  ;;  %v394_v44 = vsel %vm392_vm0, %v355_v39, %v385_v40  ;;  %v324_v45 = vpop.trf.xlu0 }
  0xd8   : > { %vm399_vm1 = vcmp.lt.s32.totalorder %v356_v43, %v394_v44  ;;  %vm397_vm2 = vcmp.gt.s32.totalorder %v324_v45, %v393_v42  ;;  %vm398_vm3 = vcmp.eq.s32.totalorder %v324_v45, %v393_v42 }
  0xd9   : > { %vm400_vm4 = vmand %vm398_vm3, %vm399_vm1 }
  0xda   : > { %vm401_vm5 = vmor %vm397_vm2, %vm400_vm4 }
  0xdb   : > { %v402_v46 = vsel %vm401_vm5, %v324_v45, %v393_v42  ;;  %v357_v47 = vpop.trf.xlu1  ;;  %v403_v48 = vsel %vm401_vm5, %v356_v43, %v394_v44  ;;  %v325_v49 = vpop.trf.xlu0 }
  0xdc   : > { %vm408_vm6 = vcmp.lt.s32.totalorder %v357_v47, %v403_v48  ;;  %vm406_vm7 = vcmp.gt.s32.totalorder %v325_v49, %v402_v46  ;;  %vm407_vm8 = vcmp.eq.s32.totalorder %v325_v49, %v402_v46 }
  0xdd   : > { %vm409_vm9 = vmand %vm407_vm8, %vm408_vm6 }
  0xde   : > { %vm410_vm10 = vmor %vm406_vm7, %vm409_vm9 }
  0xdf   : > { %v411_v50 = vsel %vm410_vm10, %v325_v49, %v402_v46  ;;  %v358_v51 = vpop.trf.xlu1  ;;  %v412_v52 = vsel %vm410_vm10, %v357_v47, %v403_v48  ;;  %v326_v53 = vpop.trf.xlu0 }
  0xe0   : > { %vm417_vm11 = vcmp.lt.s32.totalorder %v358_v51, %v412_v52  ;;  %vm415_vm12 = vcmp.gt.s32.totalorder %v326_v53, %v411_v50  ;;  %vm416_vm13 = vcmp.eq.s32.totalorder %v326_v53, %v411_v50 }
  0xe1   : > { %vm418_vm14 = vmand %vm416_vm13, %vm417_vm11 }
  0xe2   : > { %vm419_vm15 = vmor %vm415_vm12, %vm418_vm14 }
  0xe3   : > { %v420_v54 = vsel %vm419_vm15, %v326_v53, %v411_v50  ;;  %v359_v55 = vpop.trf.xlu1  ;;  %v421_v56 = vsel %vm419_vm15, %v358_v51, %v412_v52  ;;  %v327_v57 = vpop.trf.xlu0 }
  0xe4   : > { %vm426_vm0 = vcmp.lt.s32.totalorder %v359_v55, %v421_v56  ;;  %vm424_vm1 = vcmp.gt.s32.totalorder %v327_v57, %v420_v54  ;;  %vm425_vm2 = vcmp.eq.s32.totalorder %v327_v57, %v420_v54 }
  0xe5   : > { %vm427_vm3 = vmand %vm425_vm2, %vm426_vm0 }
  0xe6   : > { %vm428_vm4 = vmor %vm424_vm1, %vm427_vm3 }
  0xe7   : > { %v429_v58 = vsel %vm428_vm4, %v327_v57, %v420_v54  ;;  %v360_v59 = vpop.trf.xlu1  ;;  %v430_v60 = vsel %vm428_vm4, %v359_v55, %v421_v56  ;;  %v328_v61 = vpop.trf.xlu0 }
  0xe8   : > { %vm435_vm5 = vcmp.lt.s32.totalorder %v360_v59, %v430_v60  ;;  %vm433_vm6 = vcmp.gt.s32.totalorder %v328_v61, %v429_v58  ;;  %vm434_vm7 = vcmp.eq.s32.totalorder %v328_v61, %v429_v58 }
  0xe9   : > { %vm436_vm8 = vmand %vm434_vm7, %vm435_vm5 }
  0xea   : > { %vm437_vm9 = vmor %vm433_vm6, %vm436_vm8 }
  0xeb   : > { %v438_v62 = vsel %vm437_vm9, %v328_v61, %v429_v58  ;;  %v361_v63 = vpop.trf.xlu1  ;;  %v439_v0 = vsel %vm437_vm9, %v360_v59, %v430_v60  ;;  %v329_v1 = vpop.trf.xlu0  ;;  %v1252_v61 = vmov 2147483648  }
  0xec   : > { %vm444_vm10 = vcmp.lt.s32.totalorder %v361_v63, %v439_v0  ;;  %vm442_vm11 = vcmp.gt.s32.totalorder %v329_v1, %v438_v62  ;;  %vm443_vm12 = vcmp.eq.s32.totalorder %v329_v1, %v438_v62 }
  0xed   : > { %vm445_vm13 = vmand %vm443_vm12, %vm444_vm10 }
  0xee   : > { %vm446_vm14 = vmor %vm442_vm11, %vm445_vm13 }
  0xef   : > { %v447_v2 = vsel %vm446_vm14, %v329_v1, %v438_v62  ;;  %v362_v3 = vpop.trf.xlu1  ;;  %v448_v5 = vsel %vm446_vm14, %v361_v63, %v439_v0  ;;  %v330_v6 = vpop.trf.xlu0  ;;  %v1253_v62 = vmov 2147483647  }
  0xf0   : > { %vm453_vm15 = vcmp.lt.s32.totalorder %v362_v3, %v448_v5  ;;  %vm451_vm0 = vcmp.gt.s32.totalorder %v330_v6, %v447_v2  ;;  %vm452_vm1 = vcmp.eq.s32.totalorder %v330_v6, %v447_v2 }
  0xf1   : > { %vm454_vm2 = vmand %vm452_vm1, %vm453_vm15 }
  0xf2   : > { %vm455_vm3 = vmor %vm451_vm0, %vm454_vm2 }
  0xf3   : > { %v456_v7 = vsel %vm455_vm3, %v330_v6, %v447_v2  ;;  %v363_v8 = vpop.trf.xlu1  ;;  %v457_v9 = vsel %vm455_vm3, %v362_v3, %v448_v5  ;;  %v331_v10 = vpop.trf.xlu0  ;;  %v679_v3 = vld [vmem:[#allocation12] sm:$0xff] (%p173_p2)  ;;  %v680_v5 = vld [vmem:[#allocation14] sm:$0xff] (%p173_p2)  ;;  %v1254_v6 = vmov (%p173_p2), 839939668  }
  0xf4   : > { %vm462_vm4 = vcmp.lt.s32.totalorder %v363_v8, %v457_v9  ;;  %vm460_vm5 = vcmp.gt.s32.totalorder %v331_v10, %v456_v7  ;;  %vm461_vm6 = vcmp.eq.s32.totalorder %v331_v10, %v456_v7 }
  0xf5   : > { %vm463_vm7 = vmand %vm461_vm6, %vm462_vm4 }
  0xf6   : > { %vm464_vm8 = vmor %vm460_vm5, %vm463_vm7 }
  0xf7   : > { %v465_v11 = vsel %vm464_vm8, %v331_v10, %v456_v7  ;;  %v364_v13 = vpop.trf.xlu1  ;;  %v466_v14 = vsel %vm464_vm8, %v363_v8, %v457_v9  ;;  %v332_v15 = vpop.trf.xlu0  ;;  %v704_v7 = vunpack.c.l.s4 (%p173_p2), %v1254_v6  ;;  %v1255_v8 = vmov (%p173_p2), 1417023538  }
  0xf8   : > { %vm471_vm9 = vcmp.lt.s32.totalorder %v364_v13, %v466_v14  ;;  %vm469_vm10 = vcmp.gt.s32.totalorder %v332_v15, %v465_v11  ;;  %vm470_vm11 = vcmp.eq.s32.totalorder %v332_v15, %v465_v11  ;;  %v732_v9 = vunpack.c.l.s4 (%p173_p2), %v1255_v8 }
  0xf9   : > { %vm472_vm12 = vmand %vm470_vm11, %vm471_vm9  ;;  %v705_v10 = vunpack.c.0.s8 (%p173_p2), %v704_v7 }
  0xfa   : > { %vm473_vm13 = vmor %vm469_vm10, %vm472_vm12 }
  0xfb   : > { %v474_v16 = vsel %vm473_vm13, %v332_v15, %v465_v11  ;;  %v365_v17 = vpop.trf.xlu1  ;;  %v475_v18 = vsel %vm473_vm13, %v364_v13, %v466_v14  ;;  %v333_v19 = vpop.trf.xlu0  ;;  %v725_v15 = vand.u32 (%p173_p2), 4, %v1295_v12 }
  0xfc   : > { %vm480_vm14 = vcmp.lt.s32.totalorder %v365_v17, %v475_v18  ;;  %vm478_vm15 = vcmp.gt.s32.totalorder %v333_v19, %v474_v16  ;;  %vm479_vm0 = vcmp.eq.s32.totalorder %v333_v19, %v474_v16 }
  0xfd   : > { %vm481_vm1 = vmand %vm479_vm0, %vm480_vm14 }
  0xfe   : > { %vm482_vm2 = vmor %vm478_vm15, %vm481_vm1 }
  0xff   : > { %v483_v20 = vsel %vm482_vm2, %v333_v19, %v474_v16  ;;  %v366_v21 = vpop.trf.xlu1  ;;  %v484_v22 = vsel %vm482_vm2, %v365_v17, %v475_v18  ;;  %v334_v23 = vpop.trf.xlu0  ;;  %v733_v17 = vunpack.c.0.s8 (%p173_p2), %v732_v9 }
 0x100   : > { %vm489_vm3 = vcmp.lt.s32.totalorder %v366_v21, %v484_v22  ;;  %vm487_vm4 = vcmp.gt.s32.totalorder %v334_v23, %v483_v20  ;;  %vm488_vm5 = vcmp.eq.s32.totalorder %v334_v23, %v483_v20 }
 0x101   : > { %vm490_vm6 = vmand %vm488_vm5, %vm489_vm3 }
 0x102   : > { %vm491_vm7 = vmor %vm487_vm4, %vm490_vm6 }
 0x103   : > { %v492_v24 = vsel %vm491_vm7, %v334_v23, %v483_v20  ;;  %v367_v25 = vpop.trf.xlu1  ;;  %v493_v26 = vsel %vm491_vm7, %v366_v21, %v484_v22  ;;  %v335_v27 = vpop.trf.xlu0  ;;  %v1256_v23 = vmov (%p173_p2), 1732584193  }
 0x104   : > { %vm498_vm8 = vcmp.lt.s32.totalorder %v367_v25, %v493_v26  ;;  %vm496_vm9 = vcmp.gt.s32.totalorder %v335_v27, %v492_v24  ;;  %vm497_vm10 = vcmp.eq.s32.totalorder %v335_v27, %v492_v24 }
 0x105   : > { %vm499_vm11 = vmand %vm497_vm10, %vm498_vm8 }
 0x106   : > { %vm500_vm12 = vmor %vm496_vm9, %vm499_vm11 }
 0x107   : > { %v501_v28 = vsel %vm500_vm12, %v335_v27, %v492_v24  ;;  %v502_v29 = vsel %vm500_vm12, %v367_v25, %v493_v26  ;;  %v760_v24 = vunpack.c.l.s4 (%p173_p2), %v1256_v23  ;;  %v1330_v25 = vsub.s32 (%p173_p2), %v733_v17, %v1295_v12 }
 0x108   : > { %v504_v30 = vrot.slane %v501_v28, 1  ;;  %v505_v31 = vrot.slane %v502_v29, 1  ;;  %v753_v26 = vand.u32 (%p173_p2), 2, %v1295_v12 }
 0x10a   : > { %vm507_vm13 = vcmp.gt.s32.totalorder %v504_v30, %v501_v28  ;;  %vm508_vm14 = vcmp.eq.s32.totalorder %v504_v30, %v501_v28  ;;  %vm509_vm15 = vcmp.lt.s32.totalorder %v505_v31, %v502_v29 }
 0x10b   : > { %vm510_vm0 = vmand %vm508_vm14, %vm509_vm15 }
 0x10c   : > { %vm511_vm1 = vmor %vm507_vm13, %vm510_vm0 }
 0x10d   : > { %v512_v32 = vsel %vm511_vm1, %v504_v30, %v501_v28  ;;  %v513_v33 = vsel %vm511_vm1, %v505_v31, %v502_v29  ;;  %v761_v29 = vunpack.c.0.s8 (%p173_p2), %v760_v24 }
 0x10e   : > { %v515_v34 = vrot.slane %v512_v32, 1  ;;  %v516_v35 = vrot.slane %v513_v33, 1 }
 0x110   : > { %vm518_vm2 = vcmp.gt.s32.totalorder %v515_v34, %v512_v32  ;;  %vm519_vm3 = vcmp.eq.s32.totalorder %v515_v34, %v512_v32  ;;  %vm520_vm4 = vcmp.lt.s32.totalorder %v516_v35, %v513_v33 }
 0x111   : > { %vm521_vm5 = vmand %vm519_vm3, %vm520_vm4 }
 0x112   : > { %vm522_vm6 = vmor %vm518_vm2, %vm521_vm5 }
 0x113   : > { %v523_v36 = vsel %vm522_vm6, %v515_v34, %v512_v32  ;;  %v524_v37 = vsel %vm522_vm6, %v516_v35, %v513_v33  ;;  %v1344_v34 = vsub.s32 (%p173_p2), %v761_v29, %v1295_v12 }
 0x114   : > { %v526_v38 = vrot.slane %v523_v36, 1  ;;  %v527_v39 = vrot.slane %v524_v37, 1 }
 0x116   : > { %vm531_vm7 = vcmp.lt.s32.totalorder %v527_v39, %v524_v37  ;;  %vm529_vm8 = vcmp.gt.s32.totalorder %v526_v38, %v523_v36  ;;  %vm530_vm9 = vcmp.eq.s32.totalorder %v526_v38, %v523_v36 }
 0x117   : > { %vm532_vm10 = vmand %vm530_vm9, %vm531_vm7 }
 0x118   : > { %vm533_vm11 = vmor %vm529_vm8, %vm532_vm10 }
 0x119   : > { %v534_v40 = vsel %vm533_vm11, %v526_v38, %v523_v36  ;;  %v535_v41 = vsel %vm533_vm11, %v527_v39, %v524_v37  ;;  %v781_v38 = vand.u32 (%p173_p2), 1, %v1295_v12 }
 0x11a   : > { %v537_v42 = vrot.slane %v534_v40, 1  ;;  %v538_v43 = vrot.slane %v535_v41, 1 }
 0x11c   : > { %vm540_vm12 = vcmp.gt.s32.totalorder %v537_v42, %v534_v40  ;;  %vm541_vm13 = vcmp.eq.s32.totalorder %v537_v42, %v534_v40  ;;  %vm542_vm14 = vcmp.lt.s32.totalorder %v538_v43, %v535_v41 }
 0x11d   : > { %vm543_vm15 = vmand %vm541_vm13, %vm542_vm14 }
 0x11e   : > { %vm544_vm0 = vmor %vm540_vm12, %vm543_vm15 }
 0x11f   : > { %v545_v44 = vsel %vm544_vm0, %v537_v42, %v534_v40  ;;  %v546_v45 = vsel %vm544_vm0, %v538_v43, %v535_v41 }
 0x120   : > { %v548_v46 = vrot.slane %v545_v44, 1  ;;  %v549_v47 = vrot.slane %v546_v45, 1 }
 0x122   : > { %vm551_vm1 = vcmp.gt.s32.totalorder %v548_v46, %v545_v44  ;;  %vm552_vm2 = vcmp.eq.s32.totalorder %v548_v46, %v545_v44  ;;  %vm553_vm3 = vcmp.lt.s32.totalorder %v549_v47, %v546_v45 }
 0x123   : > { %vm554_vm4 = vmand %vm552_vm2, %vm553_vm3 }
 0x124   : > { %vm555_vm5 = vmor %vm551_vm1, %vm554_vm4 }
 0x125   : > { %v556_v48 = vsel %vm555_vm5, %v548_v46, %v545_v44  ;;  %v557_v49 = vsel %vm555_vm5, %v549_v47, %v546_v45 }
 0x126   : > { %v559_v50 = vrot.slane %v556_v48, 1  ;;  %v560_v51 = vrot.slane %v557_v49, 1 }
 0x128   : > { %vm562_vm6 = vcmp.gt.s32.totalorder %v559_v50, %v556_v48  ;;  %vm563_vm7 = vcmp.eq.s32.totalorder %v559_v50, %v556_v48  ;;  %vm564_vm8 = vcmp.lt.s32.totalorder %v560_v51, %v557_v49 }
 0x129   : > { %vm565_vm9 = vmand %vm563_vm7, %vm564_vm8  ;;  %vm1324_vm7 = vcmp.ne.s32.totalorder (%p173_p2), %v725_v15, 0 }
 0x12a   : > { %vm566_vm10 = vmor %vm562_vm6, %vm565_vm9 }
 0x12b   : > { %v567_v52 = vsel %vm566_vm10, %v559_v50, %v556_v48  ;;  %v568_v53 = vsel %vm566_vm10, %v560_v51, %v557_v49 }
 0x12c   : > { %v570_v54 = vrot.slane %v567_v52, 1  ;;  %v571_v55 = vrot.slane %v568_v53, 1 }
 0x12e   : > { %vm573_vm11 = vcmp.gt.s32.totalorder %v570_v54, %v567_v52  ;;  %vm574_vm12 = vcmp.eq.s32.totalorder %v570_v54, %v567_v52  ;;  %vm575_vm13 = vcmp.lt.s32.totalorder %v571_v55, %v568_v53 }
 0x12f   : > { %vm576_vm14 = vmand %vm574_vm12, %vm575_vm13 }
 0x130   : > { %vm577_vm15 = vmor %vm573_vm11, %vm576_vm14 }
 0x131   : > { %v579_v56 = vsel %vm577_vm15, %v571_v55, %v568_v53  ;;  %v578_v57 = vsel %vm577_vm15, %v570_v54, %v567_v52 }
 0x132   : > { %586 = vxpose.xlu0.b32.start.end [1/1] (short) (narrow) %v579_v56, 8  ;;  %582 = vst [vmem:[%s581_s25] sm:$0x1] %v578_v57  ;;  %584 = vst [vmem:[%s583_s26] sm:$0x1] %v579_v56  ;;  %s1120_s25 = sshll.u32 (%p173_p2), %s1257_s0, 4  ;;  %s1121_s25 = int_to_ptr.vmem [resolvable:$true] %s1120_s25 }
 0x133   :  { %s1216_s26 = scalar_lea.vmem (%p173_p2), %s1121_s25, 32  ;;  %p1221_p4 = scmp.lt.s32.totalorder (%p173_p2), %s1121_s25, %s1121_s25 }
 0x134   :  { %p1217_p3 = scmp.ne.s32.totalorder (%p173_p2), %s1121_s25, %s1216_s26  ;;  %p1222_p5 = scmp.lt.s32.totalorder (%p173_p2), %s1216_s26, %s1216_s26 }
 0x136   :  { %p1223_p6 = por (%p173_p2), %p1222_p5, %p1221_p4 }
 0x138   :  { %p1224_p7 = pnand (%p173_p2), %p1223_p6, %p1217_p3 }
 0x139   :  { %v667_v1 = vld [vmem:[#allocation13 + $0x7] ss:$-1 sm:$0xff] (%p173_p2)  ;;  %v673_v2 = vld [vmem:[#allocation15 + $0x7] ss:$-1 sm:$0xff] (%p173_p2) }
 0x13a   :  { %vm685_vm2 = vcmp.gt.s32.totalorder (%p173_p2), %v679_v3, %v667_v1  ;;  %vm686_vm3 = vcmp.eq.s32.totalorder (%p173_p2), %v679_v3, %v667_v1  ;;  %vm687_vm4 = vcmp.lt.s32.totalorder (%p173_p2), %v680_v5, %v673_v2 }
 0x13b   :  { %vm688_vm5 = vmand (%p173_p2), %vm686_vm3, %vm687_vm4  ;;  %vm1337_vm3 = vcmp.ne.s32.totalorder (%p173_p2), %v753_v26, 0 }
 0x13c   :  { %vm689_vm6 = vmor (%p173_p2), %vm685_vm2, %vm688_vm5 }
 0x13d   :  { %v690_v11 = vsel (%p173_p2), %vm689_vm6, %v679_v3, %v667_v1  ;;  %v692_v13 = vsel (%p173_p2), %vm689_vm6, %v667_v1, %v679_v3  ;;  %v694_v14 = vsel (%p173_p2), %vm689_vm6, %v680_v5, %v673_v2  ;;  %v696_v16 = vsel (%p173_p2), %vm689_vm6, %v673_v2, %v680_v5 }
 0x1b2   : > { %v602_v58 = vpop.trf.xlu0 }
 0x1b3   : > { %v641_v59 = vrot.slane %v602_v58, 1  ;;  %1193 = vpush %v602_v58 }
 0x1b5   : > { %1195 = vpush %v641_v59 }
 0x1e4   : > { %s1194_s27 = spop %1193 }
 0x1e5   : > { %s619_s28 = sshrl.u32 %s1194_s27, 9  ;;  %s621_s29 = ssub.s32 0, %s1194_s27 }
 0x1e6   : > { %p620_p0 = scmp.lt.s32.totalorder %s1194_s27, 0  ;;  %s1185_s30 = smin.u32 %s1194_s27, %s621_s29 }
 0x1e7   : > { %s623_s3 = sand.u32 511, %s1185_s30   ;;  %s1187_s4 = sshll.u32 %s619_s28, 3 }
 0x1e8   : > { %s624_s5 = ssub.s32 0, %s623_s3  ;;  %s1196_s6 = spop %1195 }
 0x1e9   : > { %s1414_s5 = smov (!%p620_p0, %s624_s5), %s623_s3  ;;  %s645_s10 = ssub.s32 0, %s1196_s6 }
 0x1ea   : > { %s626_s7 = sshrl.u32 %s1414_s5, 7  ;;  %s628_s8 = sand.u32 127, %s1414_s5  }
 0x1eb   : > { %s1186_s9 = sshll.u32 %s626_s7, 8  ;;  %s1189_s12 = smin.u32 %s1196_s6, %s645_s10 }
 0x1ec   : > { %s629_s11 = sadd.s32 %s1186_s9, %s628_s8  ;;  %p644_p1 = scmp.lt.s32.totalorder %s1196_s6, 0 }
 0x1ed   : > { %v631_v60 = vstv %s629_s11  ;;  %s647_s13 = sand.u32 511, %s1189_s12   ;;  %s635_s15 = scalar_lea.vmem [#allocation16], %s1187_s4 }
 0x1ee   : > { %vm633_vm0 = vcmp.eq.s32.totalorder %v55_v4, %v631_v60  ;;  %s648_s14 = ssub.s32 0, %s647_s13  ;;  %s638_s16 = scalar_lea.vmem [#allocation17], %s1187_s4 }
 0x1ef   : > { %636 = vst.msk [vmem:[%s635_s15] sm:$0xff] %vm633_vm0, %v1252_v61  ;;  %639 = vst.msk [vmem:[%s638_s16] sm:$0xff] %vm633_vm0, %v1253_v62  ;;  %s1416_s14 = smov (!%p644_p1, %s648_s14), %s647_s13  ;;  %s643_s17 = sshrl.u32 %s1196_s6, 9 }
 0x1f0   : > { %s650_s18 = sshrl.u32 %s1416_s14, 7  ;;  %s652_s19 = sand.u32 127, %s1416_s14  }
 0x1f1   : > { %s1190_s20 = sshll.u32 %s650_s18, 8  ;;  %s1191_s22 = sshll.u32 %s643_s17, 3 }
 0x1f2   : > { %s653_s21 = sadd.s32 %s1190_s20, %s652_s19  ;;  %s659_s23 = scalar_lea.vmem [#allocation16], %s1191_s22 }
 0x1f3   : > { %v655_v63 = vstv %s653_s21  ;;  %s662_s24 = scalar_lea.vmem [#allocation17], %s1191_s22 }
 0x1f4   : > { %v656_v0 = vadd.s32 128, %v655_v63  ;;  %175 = sbr.rel (!%p173_p2) target bundleno = 22 (0x16), region = 131 }
 0x1f6   : > { %vm657_vm1 = vcmp.eq.s32.totalorder %v55_v4, %v656_v0  ;;  %v1319_v4 = vsub.s32 (%p173_p2), %v705_v10, %v1295_v12 }
 0x1f7   : > { %660 = vst.msk [vmem:[%s659_s23] sm:$0xff] %vm657_vm1, %v1252_v61  ;;  %663 = vst.msk [vmem:[%s662_s24] sm:$0xff] %vm657_vm1, %v1253_v62 }
 0x1f8   :  { %v709_v18 = vrot.slane (%p173_p2), %v690_v11, %v1319_v4  ;;  %v716_v19 = vrot.slane (%p173_p2), %v694_v14, %v1319_v4  ;;  %v890_v20 = vrot.slane (%p173_p2), %v692_v13, %v1319_v4  ;;  %v897_v22 = vrot.slane (%p173_p2), %v696_v16, %v1319_v4 }
 0x1fa   :  { %vm718_vm8 = vcmp.gt.s32.totalorder (%p173_p2), %v690_v11, %v709_v18  ;;  %vm719_vm9 = vcmp.eq.s32.totalorder (%p173_p2), %v690_v11, %v709_v18  ;;  %vm720_vm10 = vcmp.lt.s32.totalorder (%p173_p2), %v694_v14, %v716_v19  ;;  %vm900_vm12 = vcmp.eq.s32.totalorder (%p173_p2), %v692_v13, %v890_v20 }
 0x1fb   :  { %vm721_vm11 = vmand %vm719_vm9, %vm720_vm10  ;;  %vm901_vm13 = vcmp.lt.s32.totalorder %v696_v16, %v897_v22  ;;  %vm899_vm15 = vcmp.gt.s32.totalorder %v692_v13, %v890_v20 }
 0x1fc   :  { %vm722_vm14 = vmor %vm718_vm8, %vm721_vm11 }
 0x1fd   :  { %vm727_vm0 = vmxor %vm722_vm14, %vm1324_vm7 }
 0x1fe   :  { %v728_v27 = vsel %vm727_vm0, %v690_v11, %v709_v18  ;;  %v729_v28 = vsel %vm727_vm0, %v694_v14, %v716_v19  ;;  %vm902_vm1 = vmand %vm900_vm12, %vm901_vm13 }
 0x1ff   :  { %v737_v30 = vrot.slane %v728_v27, %v1330_v25  ;;  %v744_v31 = vrot.slane %v729_v28, %v1330_v25  ;;  %vm903_vm2 = vmor %vm899_vm15, %vm902_vm1 }
 0x200   :  { %vm908_vm4 = vmxor %vm903_vm2, %vm1324_vm7 }
 0x201   :  { %vm746_vm5 = vcmp.gt.s32.totalorder %v728_v27, %v737_v30  ;;  %vm747_vm6 = vcmp.eq.s32.totalorder %v728_v27, %v737_v30  ;;  %vm748_vm8 = vcmp.lt.s32.totalorder %v729_v28, %v744_v31  ;;  %v909_v33 = vsel %vm908_vm4, %v692_v13, %v890_v20 }
 0x202   :  { %vm749_vm9 = vmand %vm747_vm6, %vm748_vm8  ;;  %v910_v35 = vsel %vm908_vm4, %v696_v16, %v897_v22  ;;  %v918_v36 = vrot.slane %v909_v33, %v1330_v25 }
 0x203   :  { %vm750_vm10 = vmor %vm746_vm5, %vm749_vm9  ;;  %v925_v37 = vrot.slane %v910_v35, %v1330_v25  ;;  %vm1353_vm5 = vcmp.ne.s32.totalorder %v781_v38, 0 }
 0x204   :  { %vm755_vm11 = vmxor %vm750_vm10, %vm1337_vm3  ;;  %vm927_vm12 = vcmp.gt.s32.totalorder %v909_v33, %v918_v36  ;;  %vm928_vm13 = vcmp.eq.s32.totalorder %v909_v33, %v918_v36 }
 0x205   :  { %v756_v39 = vsel %vm755_vm11, %v728_v27, %v737_v30  ;;  %v757_v40 = vsel %vm755_vm11, %v729_v28, %v744_v31  ;;  %vm929_vm14 = vcmp.lt.s32.totalorder %v910_v35, %v925_v37 }
 0x206   :  { %v765_v41 = vrot.slane %v756_v39, %v1344_v34  ;;  %v772_v42 = vrot.slane %v757_v40, %v1344_v34  ;;  %vm930_vm15 = vmand %vm928_vm13, %vm929_vm14 }
 0x207   :  { %vm931_vm0 = vmor %vm927_vm12, %vm930_vm15 }
 0x208   :  { %vm774_vm1 = vcmp.gt.s32.totalorder %v756_v39, %v765_v41  ;;  %vm775_vm2 = vcmp.eq.s32.totalorder %v756_v39, %v765_v41  ;;  %vm776_vm4 = vcmp.lt.s32.totalorder %v757_v40, %v772_v42  ;;  %vm936_vm6 = vmxor %vm931_vm0, %vm1337_vm3 }
 0x209   :  { %vm777_vm8 = vmand %vm775_vm2, %vm776_vm4  ;;  %v937_v12 = vsel %vm936_vm6, %v909_v33, %v918_v36  ;;  %v938_v44 = vsel %vm936_vm6, %v910_v35, %v925_v37 }
 0x20a   :  { %vm778_vm9 = vmor %vm774_vm1, %vm777_vm8  ;;  %v946_v45 = vrot.slane %v937_v12, %v1344_v34  ;;  %v953_v46 = vrot.slane %v938_v44, %v1344_v34 }
 0x20b   :  { %vm783_vm10 = vmxor %vm778_vm9, %vm1353_vm5 }
 0x20c   :  { %v784_v47 = vsel %vm783_vm10, %v756_v39, %v765_v41  ;;  %v785_v48 = vsel %vm783_vm10, %v757_v40, %v772_v42  ;;  %vm955_vm11 = vcmp.gt.s32.totalorder %v937_v12, %v946_v45  ;;  %vm956_vm12 = vcmp.eq.s32.totalorder %v937_v12, %v946_v45 }
 0x20d   :  { %v799_v49 = vrot.slane %v784_v47, %v1319_v4  ;;  %v806_v50 = vrot.slane %v785_v48, %v1319_v4  ;;  %vm957_vm13 = vcmp.lt.s32.totalorder %v938_v44, %v953_v46 }
 0x20e   :  { %vm958_vm14 = vmand %vm956_vm12, %vm957_vm13 }
 0x20f   :  { %vm808_vm15 = vcmp.gt.s32.totalorder %v784_v47, %v799_v49  ;;  %vm809_vm0 = vcmp.eq.s32.totalorder %v784_v47, %v799_v49  ;;  %vm810_vm1 = vcmp.lt.s32.totalorder %v785_v48, %v806_v50  ;;  %vm959_vm2 = vmor %vm955_vm11, %vm958_vm14 }
 0x210   :  { %vm811_vm4 = vmand %vm809_vm0, %vm810_vm1 }
 0x211   :  { %vm812_vm6 = vmor %vm808_vm15, %vm811_vm4 }
 0x212   :  { %vm817_vm8 = vmxor %vm812_vm6, %vm1324_vm7 }
 0x213   :  { %v818_v51 = vsel %vm817_vm8, %v784_v47, %v799_v49  ;;  %v819_v52 = vsel %vm817_vm8, %v785_v48, %v806_v50  ;;  %vm964_vm9 = vmxor %vm959_vm2, %vm1353_vm5 }
 0x214   :  { %v827_v53 = vrot.slane %v818_v51, %v1330_v25  ;;  %v834_v54 = vrot.slane %v819_v52, %v1330_v25  ;;  %v965_v55 = vsel %vm964_vm9, %v937_v12, %v946_v45  ;;  %v966_v56 = vsel %vm964_vm9, %v938_v44, %v953_v46 }
 0x215   :  { %v980_v57 = vrot.slane %v965_v55, %v1319_v4  ;;  %v987_v58 = vrot.slane %v966_v56, %v1319_v4 }
 0x216   :  { %vm836_vm10 = vcmp.gt.s32.totalorder %v818_v51, %v827_v53  ;;  %vm837_vm11 = vcmp.eq.s32.totalorder %v818_v51, %v827_v53  ;;  %vm838_vm12 = vcmp.lt.s32.totalorder %v819_v52, %v834_v54 }
 0x217   :  { %vm839_vm13 = vmand %vm837_vm11, %vm838_vm12  ;;  %vm990_vm14 = vcmp.eq.s32.totalorder %v965_v55, %v980_v57  ;;  %vm991_vm15 = vcmp.lt.s32.totalorder %v966_v56, %v987_v58  ;;  %vm989_vm1 = vcmp.gt.s32.totalorder %v965_v55, %v980_v57 }
 0x218   :  { %vm840_vm0 = vmor %vm836_vm10, %vm839_vm13 }
 0x219   :  { %vm845_vm2 = vmxor %vm840_vm0, %vm1337_vm3 }
 0x21a   :  { %v846_v59 = vsel %vm845_vm2, %v818_v51, %v827_v53  ;;  %v847_v60 = vsel %vm845_vm2, %v819_v52, %v834_v54  ;;  %vm992_vm4 = vmand %vm990_vm14, %vm991_vm15 }
 0x21b   :  { %v855_v61 = vrot.slane %v846_v59, %v1344_v34  ;;  %v862_v62 = vrot.slane %v847_v60, %v1344_v34  ;;  %vm993_vm6 = vmor %vm989_vm1, %vm992_vm4 }
 0x21c   :  { %vm998_vm8 = vmxor %vm993_vm6, %vm1324_vm7 }
 0x21d   :  { %vm864_vm9 = vcmp.gt.s32.totalorder %v846_v59, %v855_v61  ;;  %vm865_vm11 = vcmp.eq.s32.totalorder %v846_v59, %v855_v61  ;;  %vm866_vm12 = vcmp.lt.s32.totalorder %v847_v60, %v862_v62  ;;  %v999_v63 = vsel %vm998_vm8, %v965_v55, %v980_v57 }
 0x21e   :  { %vm867_vm10 = vmand %vm865_vm11, %vm866_vm12  ;;  %v1000_v0 = vsel %vm998_vm8, %v966_v56, %v987_v58  ;;  %v1008_v1 = vrot.slane %v999_v63, %v1330_v25 }
 0x21f   :  { %vm868_vm13 = vmor %vm864_vm9, %vm867_vm10  ;;  %v1015_v2 = vrot.slane %v1000_v0, %v1330_v25 }
 0x220   :  { %vm873_vm14 = vmxor %vm868_vm13, %vm1353_vm5  ;;  %vm1017_vm15 = vcmp.gt.s32.totalorder %v999_v63, %v1008_v1  ;;  %vm1018_vm0 = vcmp.eq.s32.totalorder %v999_v63, %v1008_v1 }
 0x221   :  { %v874_v3 = vsel %vm873_vm14, %v846_v59, %v855_v61  ;;  %v875_v5 = vsel %vm873_vm14, %v847_v60, %v862_v62  ;;  %vm1019_vm1 = vcmp.lt.s32.totalorder %v1000_v0, %v1015_v2 }
 0x222   :  { %877 = vst [vmem:[#allocation12] sm:$0xff] %v874_v3  ;;  %878 = vst [vmem:[#allocation14] sm:$0xff] %v875_v5 }
 0x223   :  { %vm1020_vm7 = vmand %vm1018_vm0, %vm1019_vm1 }
 0x224   :  { %vm1021_vm2 = vmor %vm1017_vm15, %vm1020_vm7 }
 0x225   :  { %vm1026_vm4 = vmxor %vm1021_vm2, %vm1337_vm3 }
 0x226   :  { %v1027_v6 = vsel %vm1026_vm4, %v999_v63, %v1008_v1  ;;  %v1028_v7 = vsel %vm1026_vm4, %v1000_v0, %v1015_v2 }
 0x227   :  { %v1036_v8 = vrot.slane %v1027_v6, %v1344_v34  ;;  %v1043_v9 = vrot.slane %v1028_v7, %v1344_v34 }
 0x229   :  { %vm1045_vm6 = vcmp.gt.s32.totalorder %v1027_v6, %v1036_v8  ;;  %vm1046_vm8 = vcmp.eq.s32.totalorder %v1027_v6, %v1036_v8  ;;  %vm1047_vm9 = vcmp.lt.s32.totalorder %v1028_v7, %v1043_v9  ;;  %v1085_v13 = vld [vmem:[#allocation14] sm:$0xff]  ;;  %v1061_v14 = vld [vmem:[#allocation12] sm:$0xff] }
 0x22a   :  { %vm1048_vm11 = vmand %vm1046_vm8, %vm1047_vm9  ;;  %1086 = vxpose.xlu0.b32.start.end [1/1] (short) (narrow) %v1085_v13, 8  ;;  %vm1062_vm3 = vcmp.lt.s32.totalorder %v1061_v14, 0  ;;  %v1063_v15 = vsub.s32 2147483647, %v1061_v14 }
 0x22b   :  { %vm1049_vm12 = vmor %vm1045_vm6, %vm1048_vm11 }
 0x22c   :  { %vm1054_vm10 = vmxor %vm1049_vm12, %vm1353_vm5  ;;  %v1064_v16 = vsel %vm1062_vm3, %v1063_v15, %v1061_v14 }
 0x22d   :  { %v1055_v10 = vsel %vm1054_vm10, %v1027_v6, %v1036_v8  ;;  %v1056_v11 = vsel %vm1054_vm10, %v1028_v7, %v1043_v9  ;;  %1065 = vst [vmem:[#allocation12] sm:$0xff] %v1064_v16 }
 0x22e   :  { %1058 = vst [vmem:[#allocation13] sm:$0xff] %v1055_v10  ;;  %1059 = vst [vmem:[#allocation15] sm:$0xff] %v1056_v11  ;;  %1067 = vxpose.xlu0.b32.start.end [1/1] (short) (narrow) %v1064_v16, 8 }
 0x2aa   :  { %v1087_v4 = vpop.trf.xlu0 }
 0x2ab   :  { %1103 = vst [vmem:[#allocation10] sm:$0xff] %v1087_v4 }
 0x2ae   :  { %v1068_v17 = vpop.trf.xlu0 }
 0x2af   :  { %1084 = vst [vmem:[#allocation7] sm:$0xff] %v1068_v17 }
 0x2b2   :  { %v1113_v18 = vld [vmem:[#allocation10] sm:$0x3] }
 0x2b3   :  { %1115 = vst [vmem:[#allocation11] sm:$0x3] %v1113_v18 }
 0x2b6   :  { %v1107_v19 = vld [vmem:[#allocation7] sm:$0x3] }
 0x2b7   :  { %1109 = vst [vmem:[#allocation8] sm:$0x3] %v1107_v19 }
 0x2b8   :  { %1227 = shalt.err (!%p1224_p7)
}
 0x2b9   :  { %s1228_s29 = scalar_lea.hbm %s1405_s1, 32 }
 0x2ba   :  { %p1229_p8 = scmp.ne.s32.totalorder %s1405_s1, %s1228_s29  ;;  %p1232_p9 = scmp.lt.u32.totalorder %s1228_s29, %s1405_s1 }
 0x2bc   :  { %p1234_p10 = pnand %p1232_p9, %p1229_p8 }
 0x2be   :  { %1237 = shalt.err (!%p1234_p10)
}
 0x2bf   :  { %1123 = dma.vmem_to_hbm [thread:$0]  %s1121_s25, 32, %s1405_s1, [#allocation9]   ;;  %v1139_v20 = vld [vmem:[#allocation11] sm:$0x3] }
 0x2c0   :  { %1140 = vst [vmem:[%s1406_s2] sm:$0x3] %v1139_v20 }
 0x2c1   :  { %1242 = dma.done.wait [#allocation9], 32  }
 0x2c2   :  { %1243 = vsyncadd [#allocation9], 4294967264 }
 0x2c3   :  { %1156 = vsyncpa [#allocation9], 1 }

// kernel: faster_rcnn_forward.8
= control target key start
LH: loop header
LB: loop body
LE: loop exit
PB: predicated region body
PF: predicated region fallthrough
CT: control target
= control target key end

     0   :  { %s1317_s1 = inlined_call_operand.vmem [shape: bf16[128,128], index: 1, kind: input, shape index: {}]   ;;  %s1318_s0 = inlined_call_operand.vmem [shape: bf16[512,128], index: 0, kind: input, shape index: {}]   ;;  %s1319_s2 = inlined_call_operand.vmem [shape: f32[1,128], index: 2, kind: input, shape index: {}]   ;;  %s1320_s3 = inlined_call_operand.vmem [shape: f32[512,128], index: 3, kind: output, shape index: {}]  }
   0x1   :  { %v876_v0 = vld [vmem:[%s1317_s1] sm:$0xff]   ;;  %v877_v1 = vld [vmem:[%s1317_s1 + $0x8] sm:$0xff]   ;;  %v878_v2 = vld [vmem:[%s1317_s1 + $0x10] sm:$0xff]  }
   0x2   :  { %780 = vmatprep.subr.bf16.mxu0 %v876_v0  ;;  %860 = vmatprep.subr.bf16.mxu1 %v876_v0  ;;  %v879_v3 = vld [vmem:[%s1317_s1 + $0x18] sm:$0xff]   ;;  %v884_v4 = vld [vmem:[%s1318_s0] sm:$0xff]   ;;  %v881_v7 = vld [vmem:[%s1317_s1 + $0x28] sm:$0xff]  }
   0x3   :  { %781 = vmatpush3.bf16.msra.mxu0 %v876_v0  ;;  %868 = vmatpush3.bf16.msra.mxu1 %v876_v0  ;;  %v885_v5 = vld [vmem:[%s1318_s0 + $0x80] sm:$0xff]   ;;  %v882_v8 = vld [vmem:[%s1317_s1 + $0x30] sm:$0xff]   ;;  %v883_v9 = vld [vmem:[%s1317_s1 + $0x38] sm:$0xff]  }
   0x4   :  { %782 = vmatprep.subr.bf16.mxu0 %v877_v1  ;;  %861 = vmatprep.subr.bf16.mxu1 %v877_v1  ;;  %v880_v6 = vld [vmem:[%s1317_s1 + $0x20] sm:$0xff]   ;;  %v886_v10 = vld [vmem:[%s1318_s0 + $0x8] sm:$0xff]   ;;  %v888_v12 = vld [vmem:[%s1318_s0 + $0x10] sm:$0xff]  }
   0x5   :  { %796 = vmatprep.mubr.bf16.mxu0 %v884_v4  ;;  %828 = vmatprep.mubr.bf16.mxu1 %v885_v5  ;;  %v887_v11 = vld [vmem:[%s1318_s0 + $0x88] sm:$0xff]   ;;  %v889_v13 = vld [vmem:[%s1318_s0 + $0x90] sm:$0xff]   ;;  %v890_v14 = vld [vmem:[%s1318_s0 + $0x18] sm:$0xff]  }
   0x6   :  { %v891_v15 = vld [vmem:[%s1318_s0 + $0x98] sm:$0xff]   ;;  %v892_v16 = vld [vmem:[%s1318_s0 + $0x20] sm:$0xff]   ;;  %v894_v18 = vld [vmem:[%s1318_s0 + $0x28] sm:$0xff]  }
   0x7   :  { %783 = vmatpush3.bf16.msra.mxu0 %v877_v1  ;;  %869 = vmatpush3.bf16.msra.mxu1 %v877_v1  ;;  %v893_v17 = vld [vmem:[%s1318_s0 + $0xa0] sm:$0xff]   ;;  %v895_v19 = vld [vmem:[%s1318_s0 + $0xa8] sm:$0xff]   ;;  %v896_v20 = vld [vmem:[%s1318_s0 + $0x30] sm:$0xff]  }
   0x8   :  { %784 = vmatprep.subr.bf16.mxu0 %v878_v2  ;;  %862 = vmatprep.subr.bf16.mxu1 %v878_v2  ;;  %v897_v21 = vld [vmem:[%s1318_s0 + $0xb0] sm:$0xff]   ;;  %v898_v22 = vld [vmem:[%s1318_s0 + $0x38] sm:$0xff]   ;;  %v900_v24 = vld [vmem:[%s1318_s0 + $0x40] sm:$0xff]  }
   0x9   :  { %v899_v23 = vld [vmem:[%s1318_s0 + $0xb8] sm:$0xff]   ;;  %v901_v25 = vld [vmem:[%s1318_s0 + $0xc0] sm:$0xff]   ;;  %v902_v26 = vld [vmem:[%s1318_s0 + $0x48] sm:$0xff]  }
   0xa   :  { %v903_v27 = vld [vmem:[%s1318_s0 + $0xc8] sm:$0xff]   ;;  %v904_v28 = vld [vmem:[%s1318_s0 + $0x50] sm:$0xff]   ;;  %v906_v30 = vld [vmem:[%s1318_s0 + $0x58] sm:$0xff]  }
   0xb   :  { %785 = vmatpush3.bf16.msra.mxu0 %v878_v2  ;;  %870 = vmatpush3.bf16.msra.mxu1 %v878_v2  ;;  %v905_v29 = vld [vmem:[%s1318_s0 + $0xd0] sm:$0xff]   ;;  %v907_v31 = vld [vmem:[%s1318_s0 + $0xd8] sm:$0xff]   ;;  %v908_v32 = vld [vmem:[%s1318_s0 + $0x60] sm:$0xff]  }
   0xc   :  { %786 = vmatprep.subr.bf16.mxu0 %v879_v3  ;;  %863 = vmatprep.subr.bf16.mxu1 %v879_v3  ;;  %v909_v33 = vld [vmem:[%s1318_s0 + $0xe0] sm:$0xff]   ;;  %v910_v34 = vld [vmem:[%s1318_s0 + $0x68] sm:$0xff]   ;;  %v912_v36 = vld [vmem:[%s1318_s0 + $0x70] sm:$0xff]  }
   0xd   :  { %v911_v35 = vld [vmem:[%s1318_s0 + $0xe8] sm:$0xff]   ;;  %v913_v37 = vld [vmem:[%s1318_s0 + $0xf0] sm:$0xff]   ;;  %v914_v38 = vld [vmem:[%s1318_s0 + $0x78] sm:$0xff]  }
   0xe   :  { %v915_v39 = vld [vmem:[%s1318_s0 + $0xf8] sm:$0xff]   ;;  %v1059_v40 = vld [vmem:[%s1319_s2] ss:$0 sm:$0xff] }
   0xf   :  { %787 = vmatpush3.bf16.msra.mxu0 %v879_v3  ;;  %871 = vmatpush3.bf16.msra.mxu1 %v879_v3 }
  0x10   :  { %788 = vmatprep.subr.bf16.mxu0 %v880_v6  ;;  %864 = vmatprep.subr.bf16.mxu1 %v880_v6 }
  0x13   :  { %789 = vmatpush3.bf16.msra.mxu0 %v880_v6  ;;  %872 = vmatpush3.bf16.msra.mxu1 %v880_v6 }
  0x14   :  { %790 = vmatprep.subr.bf16.mxu0 %v881_v7  ;;  %865 = vmatprep.subr.bf16.mxu1 %v881_v7 }
  0x17   :  { %791 = vmatpush3.bf16.msra.mxu0 %v881_v7  ;;  %873 = vmatpush3.bf16.msra.mxu1 %v881_v7 }
  0x18   :  { %792 = vmatprep.subr.bf16.mxu0 %v882_v8  ;;  %866 = vmatprep.subr.bf16.mxu1 %v882_v8 }
  0x1b   :  { %793 = vmatpush3.bf16.msra.mxu0 %v882_v8  ;;  %874 = vmatpush3.bf16.msra.mxu1 %v882_v8 }
  0x1c   :  { %794 = vmatprep.subr.bf16.mxu0 %v883_v9  ;;  %867 = vmatprep.subr.bf16.mxu1 %v883_v9 }
  0x1f   :  { %795 = vmatpush3.bf16.msra.mxu0 %v883_v9  ;;  %875 = vmatpush3.bf16.msra.mxu1 %v883_v9 }
  0x22   :  { %797 = vmatmul.mubr.bf16.vlgmr.msra.gmra.mrb[0].mxu0 %v886_v10  ;;  %829 = vmatmul.mubr.bf16.vlgmr.msra.gmra.mrb[0].mxu1 %v887_v11 }
  0x23   :  { %800 = vmatprep.mubr.bf16.mxu0 %v888_v12  ;;  %832 = vmatprep.mubr.bf16.mxu1 %v889_v13 }
  0x2a   :  { %801 = vmatmul.mubr.bf16.gmra.mrb[4].mxu0 %v890_v14  ;;  %833 = vmatmul.mubr.bf16.gmra.mrb[4].mxu1 %v891_v15 }
  0x2b   :  { %804 = vmatprep.mubr.bf16.mxu0 %v892_v16  ;;  %836 = vmatprep.mubr.bf16.mxu1 %v893_v17 }
  0x32   :  { %805 = vmatmul.mubr.bf16.gmra.mrb[8].mxu0 %v894_v18  ;;  %837 = vmatmul.mubr.bf16.gmra.mrb[8].mxu1 %v895_v19 }
  0x33   :  { %808 = vmatprep.mubr.bf16.mxu0 %v896_v20  ;;  %840 = vmatprep.mubr.bf16.mxu1 %v897_v21 }
  0x3a   :  { %809 = vmatmul.mubr.bf16.gmra.mrb[12].mxu0 %v898_v22  ;;  %841 = vmatmul.mubr.bf16.gmra.mrb[12].mxu1 %v899_v23 }
  0x3b   :  { %812 = vmatprep.mubr.bf16.mxu0 %v900_v24  ;;  %844 = vmatprep.mubr.bf16.mxu1 %v901_v25 }
  0x42   :  { %813 = vmatmul.mubr.bf16.gmra.mrb[16].mxu0 %v902_v26  ;;  %845 = vmatmul.mubr.bf16.gmra.mrb[16].mxu1 %v903_v27 }
  0x43   :  { %816 = vmatprep.mubr.bf16.mxu0 %v904_v28  ;;  %848 = vmatprep.mubr.bf16.mxu1 %v905_v29 }
  0x4a   :  { %817 = vmatmul.mubr.bf16.gmra.mrb[20].mxu0 %v906_v30  ;;  %849 = vmatmul.mubr.bf16.gmra.mrb[20].mxu1 %v907_v31 }
  0x4b   :  { %820 = vmatprep.mubr.bf16.mxu0 %v908_v32  ;;  %852 = vmatprep.mubr.bf16.mxu1 %v909_v33 }
  0x52   :  { %821 = vmatmul.mubr.bf16.gmra.mrb[24].mxu0 %v910_v34  ;;  %853 = vmatmul.mubr.bf16.gmra.mrb[24].mxu1 %v911_v35 }
  0x53   :  { %824 = vmatprep.mubr.bf16.mxu0 %v912_v36  ;;  %856 = vmatprep.mubr.bf16.mxu1 %v913_v37 }
  0x5a   :  { %825 = vmatmul.mubr.bf16.gmra.mrb[28].mxu0 %v914_v38  ;;  %857 = vmatmul.mubr.bf16.gmra.mrb[28].mxu1 %v915_v39 }
  0xf5   :  { %v798_v41 = vpop.f32.mrb[0].mxu0  ;;  %v830_v42 = vpop.f32.mrb[0].mxu1 }
  0xf6   :  { %v385_v43 = vadd.f32 %v798_v41, %v1059_v40  ;;  %v513_v44 = vadd.f32 %v830_v42, %v1059_v40  ;;  %v376_v45 = vpop.f32.mrb[1].mxu0  ;;  %v504_v46 = vpop.f32.mrb[1].mxu1 }
  0xf7   :  { %v377_v47 = vadd.f32 %v1059_v40, %v376_v45  ;;  %v505_v48 = vadd.f32 %v1059_v40, %v504_v46  ;;  %v799_v49 = vpop.f32.mrb[2].mxu0  ;;  %v831_v50 = vpop.f32.mrb[2].mxu1 }
  0xf8   :  { %633 = vst [vmem:[%s1320_s3 + $0x10] sm:$0xff] %v385_v43  ;;  %665 = vst [vmem:[%s1320_s3 + $0x110] sm:$0xff] %v513_v44  ;;  %v388_v51 = vadd.f32 %v799_v49, %v1059_v40  ;;  %v516_v52 = vadd.f32 %v831_v50, %v1059_v40  ;;  %v379_v53 = vpop.f32.mrb[3].mxu0  ;;  %v507_v54 = vpop.f32.mrb[3].mxu1 }
  0xf9   :  { %631 = vst [vmem:[%s1320_s3] sm:$0xff] %v377_v47  ;;  %663 = vst [vmem:[%s1320_s3 + $0x100] sm:$0xff] %v505_v48  ;;  %v380_v55 = vadd.f32 %v1059_v40, %v379_v53  ;;  %v508_v56 = vadd.f32 %v1059_v40, %v507_v54 }
  0xfa   :  { %634 = vst [vmem:[%s1320_s3 + $0x18] sm:$0xff] %v388_v51  ;;  %666 = vst [vmem:[%s1320_s3 + $0x118] sm:$0xff] %v516_v52 }
  0xfb   :  { %632 = vst [vmem:[%s1320_s3 + $0x8] sm:$0xff] %v380_v55  ;;  %664 = vst [vmem:[%s1320_s3 + $0x108] sm:$0xff] %v508_v56 }
  0xfd   :  { %v802_v57 = vpop.f32.mrb[4].mxu0  ;;  %v834_v58 = vpop.f32.mrb[4].mxu1 }
  0xfe   :  { %v401_v59 = vadd.f32 %v802_v57, %v1059_v40  ;;  %v529_v60 = vadd.f32 %v834_v58, %v1059_v40  ;;  %v392_v61 = vpop.f32.mrb[5].mxu0  ;;  %v520_v62 = vpop.f32.mrb[5].mxu1 }
  0xff   :  { %v393_v63 = vadd.f32 %v1059_v40, %v392_v61  ;;  %v521_v0 = vadd.f32 %v1059_v40, %v520_v62  ;;  %v803_v1 = vpop.f32.mrb[6].mxu0  ;;  %v835_v2 = vpop.f32.mrb[6].mxu1 }
 0x100   :  { %637 = vst [vmem:[%s1320_s3 + $0x30] sm:$0xff] %v401_v59  ;;  %669 = vst [vmem:[%s1320_s3 + $0x130] sm:$0xff] %v529_v60  ;;  %v404_v3 = vadd.f32 %v803_v1, %v1059_v40  ;;  %v532_v4 = vadd.f32 %v835_v2, %v1059_v40  ;;  %v395_v5 = vpop.f32.mrb[7].mxu0  ;;  %v523_v6 = vpop.f32.mrb[7].mxu1 }
 0x101   :  { %635 = vst [vmem:[%s1320_s3 + $0x20] sm:$0xff] %v393_v63  ;;  %667 = vst [vmem:[%s1320_s3 + $0x120] sm:$0xff] %v521_v0  ;;  %v396_v7 = vadd.f32 %v1059_v40, %v395_v5  ;;  %v524_v8 = vadd.f32 %v1059_v40, %v523_v6 }
 0x102   :  { %638 = vst [vmem:[%s1320_s3 + $0x38] sm:$0xff] %v404_v3  ;;  %670 = vst [vmem:[%s1320_s3 + $0x138] sm:$0xff] %v532_v4 }
 0x103   :  { %636 = vst [vmem:[%s1320_s3 + $0x28] sm:$0xff] %v396_v7  ;;  %668 = vst [vmem:[%s1320_s3 + $0x128] sm:$0xff] %v524_v8 }
 0x105   :  { %v806_v9 = vpop.f32.mrb[8].mxu0  ;;  %v838_v10 = vpop.f32.mrb[8].mxu1 }
 0x106   :  { %v417_v11 = vadd.f32 %v806_v9, %v1059_v40  ;;  %v545_v12 = vadd.f32 %v838_v10, %v1059_v40  ;;  %v408_v13 = vpop.f32.mrb[9].mxu0  ;;  %v536_v14 = vpop.f32.mrb[9].mxu1 }
 0x107   :  { %v409_v15 = vadd.f32 %v1059_v40, %v408_v13  ;;  %v537_v16 = vadd.f32 %v1059_v40, %v536_v14  ;;  %v807_v17 = vpop.f32.mrb[10].mxu0  ;;  %v839_v18 = vpop.f32.mrb[10].mxu1 }
 0x108   :  { %641 = vst [vmem:[%s1320_s3 + $0x50] sm:$0xff] %v417_v11  ;;  %673 = vst [vmem:[%s1320_s3 + $0x150] sm:$0xff] %v545_v12  ;;  %v420_v19 = vadd.f32 %v807_v17, %v1059_v40  ;;  %v548_v20 = vadd.f32 %v839_v18, %v1059_v40  ;;  %v411_v21 = vpop.f32.mrb[11].mxu0  ;;  %v539_v22 = vpop.f32.mrb[11].mxu1 }
 0x109   :  { %639 = vst [vmem:[%s1320_s3 + $0x40] sm:$0xff] %v409_v15  ;;  %671 = vst [vmem:[%s1320_s3 + $0x140] sm:$0xff] %v537_v16  ;;  %v412_v23 = vadd.f32 %v1059_v40, %v411_v21  ;;  %v540_v24 = vadd.f32 %v1059_v40, %v539_v22 }
 0x10a   :  { %642 = vst [vmem:[%s1320_s3 + $0x58] sm:$0xff] %v420_v19  ;;  %674 = vst [vmem:[%s1320_s3 + $0x158] sm:$0xff] %v548_v20 }
 0x10b   :  { %640 = vst [vmem:[%s1320_s3 + $0x48] sm:$0xff] %v412_v23  ;;  %672 = vst [vmem:[%s1320_s3 + $0x148] sm:$0xff] %v540_v24 }
 0x10d   :  { %v810_v25 = vpop.f32.mrb[12].mxu0  ;;  %v842_v26 = vpop.f32.mrb[12].mxu1 }
 0x10e   :  { %v433_v27 = vadd.f32 %v810_v25, %v1059_v40  ;;  %v561_v28 = vadd.f32 %v842_v26, %v1059_v40  ;;  %v424_v29 = vpop.f32.mrb[13].mxu0  ;;  %v552_v30 = vpop.f32.mrb[13].mxu1 }
 0x10f   :  { %v425_v31 = vadd.f32 %v1059_v40, %v424_v29  ;;  %v553_v32 = vadd.f32 %v1059_v40, %v552_v30  ;;  %v811_v33 = vpop.f32.mrb[14].mxu0  ;;  %v843_v34 = vpop.f32.mrb[14].mxu1 }
 0x110   :  { %645 = vst [vmem:[%s1320_s3 + $0x70] sm:$0xff] %v433_v27  ;;  %677 = vst [vmem:[%s1320_s3 + $0x170] sm:$0xff] %v561_v28  ;;  %v436_v35 = vadd.f32 %v811_v33, %v1059_v40  ;;  %v564_v36 = vadd.f32 %v843_v34, %v1059_v40  ;;  %v427_v37 = vpop.f32.mrb[15].mxu0  ;;  %v555_v38 = vpop.f32.mrb[15].mxu1 }
 0x111   :  { %643 = vst [vmem:[%s1320_s3 + $0x60] sm:$0xff] %v425_v31  ;;  %675 = vst [vmem:[%s1320_s3 + $0x160] sm:$0xff] %v553_v32  ;;  %v428_v39 = vadd.f32 %v1059_v40, %v427_v37  ;;  %v556_v41 = vadd.f32 %v1059_v40, %v555_v38 }
 0x112   :  { %646 = vst [vmem:[%s1320_s3 + $0x78] sm:$0xff] %v436_v35  ;;  %678 = vst [vmem:[%s1320_s3 + $0x178] sm:$0xff] %v564_v36 }
 0x113   :  { %644 = vst [vmem:[%s1320_s3 + $0x68] sm:$0xff] %v428_v39  ;;  %676 = vst [vmem:[%s1320_s3 + $0x168] sm:$0xff] %v556_v41 }
 0x115   :  { %v814_v42 = vpop.f32.mrb[16].mxu0  ;;  %v846_v43 = vpop.f32.mrb[16].mxu1 }
 0x116   :  { %v449_v44 = vadd.f32 %v814_v42, %v1059_v40  ;;  %v577_v45 = vadd.f32 %v846_v43, %v1059_v40  ;;  %v440_v46 = vpop.f32.mrb[17].mxu0  ;;  %v568_v47 = vpop.f32.mrb[17].mxu1 }
 0x117   :  { %v441_v48 = vadd.f32 %v1059_v40, %v440_v46  ;;  %v569_v49 = vadd.f32 %v1059_v40, %v568_v47  ;;  %v815_v50 = vpop.f32.mrb[18].mxu0  ;;  %v847_v51 = vpop.f32.mrb[18].mxu1 }
 0x118   :  { %649 = vst [vmem:[%s1320_s3 + $0x90] sm:$0xff] %v449_v44  ;;  %681 = vst [vmem:[%s1320_s3 + $0x190] sm:$0xff] %v577_v45  ;;  %v452_v52 = vadd.f32 %v815_v50, %v1059_v40  ;;  %v580_v53 = vadd.f32 %v847_v51, %v1059_v40  ;;  %v443_v54 = vpop.f32.mrb[19].mxu0  ;;  %v571_v55 = vpop.f32.mrb[19].mxu1 }
 0x119   :  { %647 = vst [vmem:[%s1320_s3 + $0x80] sm:$0xff] %v441_v48  ;;  %679 = vst [vmem:[%s1320_s3 + $0x180] sm:$0xff] %v569_v49  ;;  %v444_v56 = vadd.f32 %v1059_v40, %v443_v54  ;;  %v572_v57 = vadd.f32 %v1059_v40, %v571_v55 }
 0x11a   :  { %650 = vst [vmem:[%s1320_s3 + $0x98] sm:$0xff] %v452_v52  ;;  %682 = vst [vmem:[%s1320_s3 + $0x198] sm:$0xff] %v580_v53 }
 0x11b   :  { %648 = vst [vmem:[%s1320_s3 + $0x88] sm:$0xff] %v444_v56  ;;  %680 = vst [vmem:[%s1320_s3 + $0x188] sm:$0xff] %v572_v57 }
 0x11d   :  { %v818_v58 = vpop.f32.mrb[20].mxu0  ;;  %v850_v59 = vpop.f32.mrb[20].mxu1 }
 0x11e   :  { %v465_v60 = vadd.f32 %v818_v58, %v1059_v40  ;;  %v593_v61 = vadd.f32 %v850_v59, %v1059_v40  ;;  %v456_v62 = vpop.f32.mrb[21].mxu0  ;;  %v584_v63 = vpop.f32.mrb[21].mxu1 }
 0x11f   :  { %v457_v0 = vadd.f32 %v1059_v40, %v456_v62  ;;  %v585_v1 = vadd.f32 %v1059_v40, %v584_v63  ;;  %v819_v2 = vpop.f32.mrb[22].mxu0  ;;  %v851_v3 = vpop.f32.mrb[22].mxu1 }
 0x120   :  { %653 = vst [vmem:[%s1320_s3 + $0xb0] sm:$0xff] %v465_v60  ;;  %685 = vst [vmem:[%s1320_s3 + $0x1b0] sm:$0xff] %v593_v61  ;;  %v468_v4 = vadd.f32 %v819_v2, %v1059_v40  ;;  %v596_v5 = vadd.f32 %v851_v3, %v1059_v40  ;;  %v459_v6 = vpop.f32.mrb[23].mxu0  ;;  %v587_v7 = vpop.f32.mrb[23].mxu1 }
 0x121   :  { %651 = vst [vmem:[%s1320_s3 + $0xa0] sm:$0xff] %v457_v0  ;;  %683 = vst [vmem:[%s1320_s3 + $0x1a0] sm:$0xff] %v585_v1  ;;  %v460_v8 = vadd.f32 %v1059_v40, %v459_v6  ;;  %v588_v9 = vadd.f32 %v1059_v40, %v587_v7 }
 0x122   :  { %654 = vst [vmem:[%s1320_s3 + $0xb8] sm:$0xff] %v468_v4  ;;  %686 = vst [vmem:[%s1320_s3 + $0x1b8] sm:$0xff] %v596_v5 }
 0x123   :  { %652 = vst [vmem:[%s1320_s3 + $0xa8] sm:$0xff] %v460_v8  ;;  %684 = vst [vmem:[%s1320_s3 + $0x1a8] sm:$0xff] %v588_v9 }
 0x125   :  { %v822_v10 = vpop.f32.mrb[24].mxu0  ;;  %v854_v11 = vpop.f32.mrb[24].mxu1 }
 0x126   :  { %v481_v12 = vadd.f32 %v822_v10, %v1059_v40  ;;  %v609_v13 = vadd.f32 %v854_v11, %v1059_v40  ;;  %v472_v14 = vpop.f32.mrb[25].mxu0  ;;  %v600_v15 = vpop.f32.mrb[25].mxu1 }
 0x127   :  { %v473_v16 = vadd.f32 %v1059_v40, %v472_v14  ;;  %v601_v17 = vadd.f32 %v1059_v40, %v600_v15  ;;  %v823_v18 = vpop.f32.mrb[26].mxu0  ;;  %v855_v19 = vpop.f32.mrb[26].mxu1 }
 0x128   :  { %657 = vst [vmem:[%s1320_s3 + $0xd0] sm:$0xff] %v481_v12  ;;  %689 = vst [vmem:[%s1320_s3 + $0x1d0] sm:$0xff] %v609_v13  ;;  %v484_v20 = vadd.f32 %v823_v18, %v1059_v40  ;;  %v612_v21 = vadd.f32 %v855_v19, %v1059_v40  ;;  %v475_v22 = vpop.f32.mrb[27].mxu0  ;;  %v603_v23 = vpop.f32.mrb[27].mxu1 }
 0x129   :  { %655 = vst [vmem:[%s1320_s3 + $0xc0] sm:$0xff] %v473_v16  ;;  %687 = vst [vmem:[%s1320_s3 + $0x1c0] sm:$0xff] %v601_v17  ;;  %v476_v24 = vadd.f32 %v1059_v40, %v475_v22  ;;  %v604_v25 = vadd.f32 %v1059_v40, %v603_v23 }
 0x12a   :  { %658 = vst [vmem:[%s1320_s3 + $0xd8] sm:$0xff] %v484_v20  ;;  %690 = vst [vmem:[%s1320_s3 + $0x1d8] sm:$0xff] %v612_v21 }
 0x12b   :  { %656 = vst [vmem:[%s1320_s3 + $0xc8] sm:$0xff] %v476_v24  ;;  %688 = vst [vmem:[%s1320_s3 + $0x1c8] sm:$0xff] %v604_v25 }
 0x12d   :  { %v826_v26 = vpop.f32.mrb[28].mxu0  ;;  %v858_v27 = vpop.f32.mrb[28].mxu1 }
 0x12e   :  { %v497_v28 = vadd.f32 %v826_v26, %v1059_v40  ;;  %v625_v29 = vadd.f32 %v858_v27, %v1059_v40  ;;  %v488_v30 = vpop.f32.mrb[29].mxu0  ;;  %v616_v31 = vpop.f32.mrb[29].mxu1 }
 0x12f   :  { %v489_v32 = vadd.f32 %v1059_v40, %v488_v30  ;;  %v617_v33 = vadd.f32 %v1059_v40, %v616_v31  ;;  %v827_v34 = vpop.f32.mrb[30].mxu0  ;;  %v859_v35 = vpop.f32.mrb[30].mxu1 }
 0x130   :  { %661 = vst [vmem:[%s1320_s3 + $0xf0] sm:$0xff] %v497_v28  ;;  %693 = vst [vmem:[%s1320_s3 + $0x1f0] sm:$0xff] %v625_v29  ;;  %v500_v36 = vadd.f32 %v827_v34, %v1059_v40  ;;  %v628_v37 = vadd.f32 %v859_v35, %v1059_v40  ;;  %v491_v38 = vpop.f32.mrb[31].mxu0  ;;  %v619_v39 = vpop.f32.mrb[31].mxu1 }
 0x131   :  { %659 = vst [vmem:[%s1320_s3 + $0xe0] sm:$0xff] %v489_v32  ;;  %691 = vst [vmem:[%s1320_s3 + $0x1e0] sm:$0xff] %v617_v33  ;;  %v492_v41 = vadd.f32 %v1059_v40, %v491_v38  ;;  %v620_v42 = vadd.f32 %v1059_v40, %v619_v39 }
 0x132   :  { %662 = vst [vmem:[%s1320_s3 + $0xf8] sm:$0xff] %v500_v36  ;;  %694 = vst [vmem:[%s1320_s3 + $0x1f8] sm:$0xff] %v628_v37 }
 0x133   :  { %660 = vst [vmem:[%s1320_s3 + $0xe8] sm:$0xff] %v492_v41  ;;  %692 = vst [vmem:[%s1320_s3 + $0x1e8] sm:$0xff] %v620_v42 }

// kernel: faster_rcnn_forward.6
= control target key start
LH: loop header
LB: loop body
LE: loop exit
PB: predicated region body
PF: predicated region fallthrough
CT: control target
= control target key end

     0   :  { %v5929_v0 = vmov 0   ;;  %s7702_s1 = inlined_call_operand.vmem [shape: bf16[1152,128], index: 1, kind: input, shape index: {}]   ;;  %s7703_s0 = inlined_call_operand.vmem [shape: bf16[512,1152], index: 0, kind: input, shape index: {}]   ;;  %s7704_s2 = inlined_call_operand.vmem [shape: f32[1,128], index: 2, kind: input, shape index: {}]   ;;  %s7705_s3 = inlined_call_operand.vmem [shape: bf16[512,128], index: 3, kind: output, shape index: {}]  }
   0x1   :  { %2390 = vmatprep.subr.bf16.mxu1 %v5929_v0  ;;  %2679 = vmatprep.subr.bf16.mxu0 %v5929_v0  ;;  %v5440_v1 = vld [vmem:[%s7702_s1] sm:$0xff]   ;;  %v5442_v3 = vld [vmem:[%s7702_s1 + $0x8] sm:$0xff]   ;;  %v5444_v5 = vld [vmem:[%s7702_s1 + $0x10] sm:$0xff]  }
   0x2   :  { %v5958_v2 = vld [vmem:[%s7702_s1 + $0x80] sm:$0xff]   ;;  %2391 = vmatpush1.bf16.msra.mxu1 %v5440_v1  ;;  %v5968_v4 = vld [vmem:[%s7702_s1 + $0x88] sm:$0xff]   ;;  %v5979_v6 = vld [vmem:[%s7702_s1 + $0x90] sm:$0xff]  }
   0x3   :  { %2680 = vmatpush1.bf16.msra.mxu0 %v5958_v2  ;;  %2392 = vmatprep.subr.bf16.mxu1 %v5929_v0  ;;  %v5446_v7 = vld [vmem:[%s7702_s1 + $0x18] sm:$0xff]   ;;  %v5448_v9 = vld [vmem:[%s7702_s1 + $0x20] sm:$0xff]   ;;  %v5450_v11 = vld [vmem:[%s7702_s1 + $0x28] sm:$0xff]  }
   0x4   :  { %2681 = vmatprep.subr.bf16.mxu0 %v5929_v0  ;;  %v5990_v8 = vld [vmem:[%s7702_s1 + $0x98] sm:$0xff]   ;;  %v6001_v10 = vld [vmem:[%s7702_s1 + $0xa0] sm:$0xff]   ;;  %v6012_v12 = vld [vmem:[%s7702_s1 + $0xa8] sm:$0xff]  }
   0x5   :  { %v5452_v13 = vld [vmem:[%s7702_s1 + $0x30] sm:$0xff]   ;;  %v5454_v15 = vld [vmem:[%s7702_s1 + $0x38] sm:$0xff]   ;;  %v5456_v17 = vld [vmem:[%s7702_s1 + $0x40] sm:$0xff]  }
   0x6   :  { %2393 = vmatpush1.bf16.msra.mxu1 %v5442_v3  ;;  %v6023_v14 = vld [vmem:[%s7702_s1 + $0xb0] sm:$0xff]   ;;  %v6034_v16 = vld [vmem:[%s7702_s1 + $0xb8] sm:$0xff]   ;;  %v6045_v18 = vld [vmem:[%s7702_s1 + $0xc0] sm:$0xff]  }
   0x7   :  { %2682 = vmatpush1.bf16.msra.mxu0 %v5968_v4  ;;  %2394 = vmatprep.subr.bf16.mxu1 %v5929_v0  ;;  %v5474_v19 = vld [vmem:[%s7703_s0 + $0x4] ss:$36 sps:$4 sm:$0xff]   ;;  %v5477_v21 = vld [vmem:[%s7703_s0 + $0xc] ss:$36 sps:$4 sm:$0xff]   ;;  %v5462_v25 = vld [vmem:[%s7702_s1 + $0x58] sm:$0xff]  }
   0x8   :  { %2683 = vmatprep.subr.bf16.mxu0 %v5929_v0  ;;  %v5458_v20 = vld [vmem:[%s7702_s1 + $0x48] sm:$0xff]   ;;  %2422 = vmatprep.mubr.bf16.mxu1 %v5474_v19  ;;  %v5460_v23 = vld [vmem:[%s7702_s1 + $0x50] sm:$0xff]   ;;  %v6084_v26 = vld [vmem:[%s7702_s1 + $0xd8] sm:$0xff]  }
   0x9   :  { %v6062_v22 = vld [vmem:[%s7702_s1 + $0xc8] sm:$0xff]   ;;  %2711 = vmatprep.mubr.bf16.mxu0 %v5477_v21  ;;  %v6073_v24 = vld [vmem:[%s7702_s1 + $0xd0] sm:$0xff]   ;;  %v5464_v27 = vld [vmem:[%s7702_s1 + $0x60] sm:$0xff]  }
   0xa   :  { %2395 = vmatpush1.bf16.msra.mxu1 %v5444_v5  ;;  %v6095_v28 = vld [vmem:[%s7702_s1 + $0xe0] sm:$0xff]   ;;  %v5466_v29 = vld [vmem:[%s7702_s1 + $0x68] sm:$0xff]   ;;  %v5468_v31 = vld [vmem:[%s7702_s1 + $0x70] sm:$0xff]  }
   0xb   :  { %2684 = vmatpush1.bf16.msra.mxu0 %v5979_v6  ;;  %2396 = vmatprep.subr.bf16.mxu1 %v5929_v0  ;;  %v6106_v30 = vld [vmem:[%s7702_s1 + $0xe8] sm:$0xff]   ;;  %v6117_v32 = vld [vmem:[%s7702_s1 + $0xf0] sm:$0xff]   ;;  %v5470_v33 = vld [vmem:[%s7702_s1 + $0x78] sm:$0xff]  }
   0xc   :  { %2685 = vmatprep.subr.bf16.mxu0 %v5929_v0  ;;  %v6128_v34 = vld [vmem:[%s7702_s1 + $0xf8] sm:$0xff]   ;;  %v5472_v35 = vld [vmem:[%s7703_s0] ss:$36 sps:$4 sm:$0xff]   ;;  %v5475_v36 = vld [vmem:[%s7703_s0 + $0x8] ss:$36 sps:$4 sm:$0xff]  }
   0xd   :  { %v5478_v37 = vld [vmem:[%s7702_s1 + $0x100] sm:$0xff]   ;;  %v5480_v38 = vld [vmem:[%s7703_s0 + $0x4c] ss:$36 sps:$4 sm:$0xff]   ;;  %v5482_v39 = vld [vmem:[%s7703_s0 + $0x54] ss:$36 sps:$4 sm:$0xff]  }
   0xe   :  { %2397 = vmatpush1.bf16.msra.mxu1 %v5446_v7  ;;  %v5479_v40 = vld [vmem:[%s7702_s1 + $0x108] sm:$0xff]   ;;  %v5485_v42 = vld [vmem:[%s7703_s0 + $0x50] ss:$36 sps:$4 sm:$0xff]   ;;  %v5490_v45 = vld [vmem:[%s7703_s0 + $0x9c] ss:$36 sps:$4 sm:$0xff]  }
   0xf   :  { %2686 = vmatpush1.bf16.msra.mxu0 %v5990_v8  ;;  %2398 = vmatprep.subr.bf16.mxu1 %v5929_v0  ;;  %v5484_v41 = vld [vmem:[%s7703_s0 + $0x48] ss:$36 sps:$4 sm:$0xff]   ;;  %v5488_v43 = vld [vmem:[%s7703_s0 + $0x94] ss:$36 sps:$4 sm:$0xff]   ;;  %v5494_v49 = vld [vmem:[%s7702_s1 + $0x120] sm:$0xff]  }
  0x10   :  { %2687 = vmatprep.subr.bf16.mxu0 %v5929_v0  ;;  %v5486_v44 = vld [vmem:[%s7702_s1 + $0x110] sm:$0xff]   ;;  %v5487_v46 = vld [vmem:[%s7702_s1 + $0x118] sm:$0xff]   ;;  %v5498_v51 = vld [vmem:[%s7703_s0 + $0xe4] ss:$36 sps:$4 sm:$0xff]  }
  0x11   :  { %v5492_v47 = vld [vmem:[%s7703_s0 + $0x90] ss:$36 sps:$4 sm:$0xff]   ;;  %v5493_v48 = vld [vmem:[%s7703_s0 + $0x98] ss:$36 sps:$4 sm:$0xff]   ;;  %v5495_v52 = vld [vmem:[%s7702_s1 + $0x128] sm:$0xff]  }
  0x12   :  { %2399 = vmatpush1.bf16.msra.mxu1 %v5448_v9  ;;  %v5496_v50 = vld [vmem:[%s7703_s0 + $0xdc] ss:$36 sps:$4 sm:$0xff]   ;;  %v5504_v55 = vld [vmem:[%s7703_s0 + $0x124] ss:$36 sps:$4 sm:$0xff]   ;;  %v5502_v56 = vld [vmem:[%s7702_s1 + $0x130] sm:$0xff]  }
  0x13   :  { %2688 = vmatpush1.bf16.msra.mxu0 %v6001_v10  ;;  %2400 = vmatprep.subr.bf16.mxu1 %v5929_v0  ;;  %v5500_v53 = vld [vmem:[%s7703_s0 + $0xd8] ss:$36 sps:$4 sm:$0xff]   ;;  %v5501_v54 = vld [vmem:[%s7703_s0 + $0xe0] ss:$36 sps:$4 sm:$0xff]   ;;  %v5506_v57 = vld [vmem:[%s7703_s0 + $0x12c] ss:$36 sps:$4 sm:$0xff]  }
  0x14   :  { %2689 = vmatprep.subr.bf16.mxu0 %v5929_v0  ;;  %v5503_v58 = vld [vmem:[%s7702_s1 + $0x138] sm:$0xff]   ;;  %v5508_v59 = vld [vmem:[%s7703_s0 + $0x120] ss:$36 sps:$4 sm:$0xff]   ;;  %v5509_v60 = vld [vmem:[%s7703_s0 + $0x128] ss:$36 sps:$4 sm:$0xff]  }
  0x15   :  { %v5510_v61 = vld [vmem:[%s7702_s1 + $0x140] sm:$0xff]   ;;  %v5512_v62 = vld [vmem:[%s7703_s0 + $0x16c] ss:$36 sps:$4 sm:$0xff]   ;;  %v5514_v63 = vld [vmem:[%s7703_s0 + $0x174] ss:$36 sps:$4 sm:$0xff]  }
  0x16   :  { %2401 = vmatpush1.bf16.msra.mxu1 %v5450_v11  ;;  %v5511_v1 = vld [vmem:[%s7702_s1 + $0x148] sm:$0xff]   ;;  %v5517_v3 = vld [vmem:[%s7703_s0 + $0x170] ss:$36 sps:$4 sm:$0xff]   ;;  %v5519_v7 = vld [vmem:[%s7702_s1 + $0x158] sm:$0xff]  }
  0x17   :  { %2690 = vmatpush1.bf16.msra.mxu0 %v6012_v12  ;;  %2402 = vmatprep.subr.bf16.mxu1 %v5929_v0  ;;  %v5518_v5 = vld [vmem:[%s7702_s1 + $0x150] sm:$0xff]   ;;  %v5525_v9 = vld [vmem:[%s7703_s0 + $0x1b8] ss:$36 sps:$4 sm:$0xff]  }
  0x18   :  { %2691 = vmatprep.subr.bf16.mxu0 %v5929_v0  ;;  %v5528_v11 = vld [vmem:[%s7703_s0 + $0x1fc] ss:$36 sps:$4 sm:$0xff]   ;;  %v5538_v21 = vld [vmem:[%s7703_s0 + $0x10] ss:$36 sps:$4 sm:$0xff]  }
  0x19   :  { %v5535_v19 = vld [vmem:[%s7702_s1 + $0x178] sm:$0xff]  }
  0x1a   :  { %2403 = vmatpush1.bf16.msra.mxu1 %v5452_v13  ;;  %v5527_v13 = vld [vmem:[%s7702_s1 + $0x168] sm:$0xff]  }
  0x1b   :  { %2692 = vmatpush1.bf16.msra.mxu0 %v6023_v14  ;;  %2404 = vmatprep.subr.bf16.mxu1 %v5929_v0 }
  0x1c   :  { %2693 = vmatprep.subr.bf16.mxu0 %v5929_v0 }
  0x1e   :  { %2405 = vmatpush1.bf16.msra.mxu1 %v5454_v15  ;;  %v5533_v15 = vld [vmem:[%s7703_s0 + $0x200] ss:$36 sps:$4 sm:$0xff]  }
  0x1f   :  { %2694 = vmatpush1.bf16.msra.mxu0 %v6034_v16  ;;  %2406 = vmatprep.subr.bf16.mxu1 %v5929_v0 }
  0x20   :  { %2695 = vmatprep.subr.bf16.mxu0 %v5929_v0 }
  0x22   :  { %2407 = vmatpush1.bf16.msra.mxu1 %v5456_v17  ;;  %v5534_v17 = vld [vmem:[%s7702_s1 + $0x170] sm:$0xff]  }
  0x23   :  { %2696 = vmatpush1.bf16.msra.mxu0 %v6045_v18  ;;  %2408 = vmatprep.subr.bf16.mxu1 %v5929_v0 }
  0x24   :  { %2697 = vmatprep.subr.bf16.mxu0 %v5929_v0 }
  0x26   :  { %2409 = vmatpush1.bf16.msra.mxu1 %v5458_v20  ;;  %v5541_v20 = vld [vmem:[%s7703_s0 + $0x240] ss:$36 sps:$4 sm:$0xff]  }
  0x27   :  { %2698 = vmatpush1.bf16.msra.mxu0 %v6062_v22  ;;  %2410 = vmatprep.subr.bf16.mxu1 %v5929_v0 }
  0x28   :  { %2699 = vmatprep.subr.bf16.mxu0 %v5929_v0 }
  0x2a   :  { %2411 = vmatpush1.bf16.msra.mxu1 %v5460_v23  ;;  %v5542_v23 = vld [vmem:[%s7702_s1 + $0x180] sm:$0xff]  }
  0x2b   :  { %2700 = vmatpush1.bf16.msra.mxu0 %v6073_v24  ;;  %2412 = vmatprep.subr.bf16.mxu1 %v5929_v0 }
  0x2c   :  { %2701 = vmatprep.subr.bf16.mxu0 %v5929_v0 }
  0x2e   :  { %2413 = vmatpush1.bf16.msra.mxu1 %v5462_v25  ;;  %v5547_v25 = vld [vmem:[%s7703_s0 + $0x288] ss:$36 sps:$4 sm:$0xff]  }
  0x2f   :  { %2702 = vmatpush1.bf16.msra.mxu0 %v6084_v26  ;;  %2414 = vmatprep.subr.bf16.mxu1 %v5929_v0 }
  0x30   :  { %2703 = vmatprep.subr.bf16.mxu0 %v5929_v0 }
  0x32   :  { %2415 = vmatpush1.bf16.msra.mxu1 %v5464_v27  ;;  %v5548_v27 = vld [vmem:[%s7703_s0 + $0x58] ss:$36 sps:$4 sm:$0xff]  }
  0x33   :  { %2704 = vmatpush1.bf16.msra.mxu0 %v6095_v28  ;;  %2416 = vmatprep.subr.bf16.mxu1 %v5929_v0 }
  0x34   :  { %2705 = vmatprep.subr.bf16.mxu0 %v5929_v0 }
  0x36   :  { %2417 = vmatpush1.bf16.msra.mxu1 %v5466_v29  ;;  %v5551_v29 = vld [vmem:[%s7703_s0 + $0xa4] ss:$36 sps:$4 sm:$0xff]  }
  0x37   :  { %2706 = vmatpush1.bf16.msra.mxu0 %v6106_v30  ;;  %2418 = vmatprep.subr.bf16.mxu1 %v5929_v0 }
  0x38   :  { %2707 = vmatprep.subr.bf16.mxu0 %v5929_v0 }
  0x3a   :  { %2419 = vmatpush1.bf16.msra.mxu1 %v5468_v31  ;;  %v5553_v31 = vld [vmem:[%s7703_s0 + $0x2d0] ss:$36 sps:$4 sm:$0xff]  }
  0x3b   :  { %2708 = vmatpush1.bf16.msra.mxu0 %v6117_v32  ;;  %2420 = vmatprep.subr.bf16.mxu1 %v5929_v0 }
  0x3c   :  { %2709 = vmatprep.subr.bf16.mxu0 %v5929_v0 }
  0x3e   :  { %2421 = vmatpush1.bf16.msra.mxu1 %v5470_v33  ;;  %v5554_v33 = vld [vmem:[%s7703_s0 + $0xa0] ss:$36 sps:$4 sm:$0xff]  }
  0x3f   :  { %2710 = vmatpush1.bf16.msra.mxu0 %v6128_v34  ;;  %5023 = vmatprep.subr.bf16.mxu1 %v5929_v0 }
  0x40   :  { %2968 = vmatprep.subr.bf16.mxu0 %v5929_v0 }
  0x41   :  { %2423 = vmatmul.mubr.bf16.vlgmr.msra.gmra.mrb[0].mxu1 %v5472_v35  ;;  %v5558_v35 = vld [vmem:[%s7703_s0 + $0xec] ss:$36 sps:$4 sm:$0xff]  }
  0x42   :  { %2712 = vmatmul.mubr.bf16.vlgmr.msra.gmra.mrb[0].mxu0 %v5475_v36  ;;  %5039 = vmatpush1.bf16.msra.mxu1 %v5958_v2  ;;  %v5516_v2 = vld [vmem:[%s7703_s0 + $0x168] ss:$36 sps:$4 sm:$0xff]   ;;  %v5594_v36 = vld [vmem:[%s7702_s1 + $0x1a0] sm:$0xff]  }
  0x43   :  { %2969 = vmatpush1.bf16.msra.mxu0 %v5478_v37  ;;  %2430 = vmatprep.mubr.bf16.mxu1 %v5480_v38  ;;  %v5560_v37 = vld [vmem:[%s7703_s0 + $0x318] ss:$36 sps:$4 sm:$0xff]   ;;  %v5607_v38 = vld [vmem:[%s7702_s1 + $0x1a8] sm:$0xff]  }
  0x44   :  { %2970 = vmatprep.subr.bf16.mxu0 %v5929_v0  ;;  %2719 = vmatprep.mubr.bf16.mxu0 %v5482_v39  ;;  %v5561_v39 = vld [vmem:[%s7703_s0 + $0xe8] ss:$36 sps:$4 sm:$0xff]  }
  0x45   :  { %5024 = vmatprep.subr.bf16.mxu1 %v5929_v0 }
  0x46   :  { %5040 = vmatpush1.bf16.msra.mxu1 %v5968_v4  ;;  %v5520_v4 = vld [vmem:[%s7703_s0 + $0x1b4] ss:$36 sps:$4 sm:$0xff]  }
  0x47   :  { %2971 = vmatpush1.bf16.msra.mxu0 %v5479_v40  ;;  %5025 = vmatprep.subr.bf16.mxu1 %v5929_v0  ;;  %v5562_v40 = vld [vmem:[%s7703_s0 + $0x364] ss:$36 sps:$4 sm:$0xff]  }
  0x48   :  { %2972 = vmatprep.subr.bf16.mxu0 %v5929_v0 }
  0x49   :  { %2431 = vmatmul.mubr.bf16.gmra.mrb[4].mxu1 %v5484_v41  ;;  %v5564_v41 = vld [vmem:[%s7703_s0 + $0x134] ss:$36 sps:$4 sm:$0xff]  }
  0x4a   :  { %2720 = vmatmul.mubr.bf16.gmra.mrb[4].mxu0 %v5485_v42  ;;  %2438 = vmatprep.mubr.bf16.mxu1 %v5488_v43  ;;  %v5620_v42 = vld [vmem:[%s7702_s1 + $0x1b0] sm:$0xff]   ;;  %v5633_v43 = vld [vmem:[%s7702_s1 + $0x1b8] sm:$0xff]  }
  0x4b   :  { %2973 = vmatpush1.bf16.msra.mxu0 %v5486_v44  ;;  %2727 = vmatprep.mubr.bf16.mxu0 %v5490_v45  ;;  %v5566_v44 = vld [vmem:[%s7703_s0 + $0x360] ss:$36 sps:$4 sm:$0xff]   ;;  %v5567_v45 = vld [vmem:[%s7703_s0 + $0x130] ss:$36 sps:$4 sm:$0xff]  }
  0x4c   :  { %2974 = vmatprep.subr.bf16.mxu0 %v5929_v0  ;;  %5041 = vmatpush1.bf16.msra.mxu1 %v5979_v6  ;;  %v5522_v6 = vld [vmem:[%s7703_s0 + $0x1bc] ss:$36 sps:$4 sm:$0xff]  }
  0x4d   :  { %5026 = vmatprep.subr.bf16.mxu1 %v5929_v0 }
  0x4f   :  { %2975 = vmatpush1.bf16.msra.mxu0 %v5487_v46  ;;  %v5569_v46 = vld [vmem:[%s7703_s0 + $0x3ac] ss:$36 sps:$4 sm:$0xff]  }
  0x50   :  { %2976 = vmatprep.subr.bf16.mxu0 %v5929_v0  ;;  %5042 = vmatpush1.bf16.msra.mxu1 %v5990_v8  ;;  %v5524_v8 = vld [vmem:[%s7703_s0 + $0x1b0] ss:$36 sps:$4 sm:$0xff]  }
  0x51   :  { %2439 = vmatmul.mubr.bf16.gmra.mrb[8].mxu1 %v5492_v47  ;;  %5027 = vmatprep.subr.bf16.mxu1 %v5929_v0  ;;  %v5571_v47 = vld [vmem:[%s7703_s0 + $0x17c] ss:$36 sps:$4 sm:$0xff]  }
  0x52   :  { %2728 = vmatmul.mubr.bf16.gmra.mrb[8].mxu0 %v5493_v48  ;;  %2446 = vmatprep.mubr.bf16.mxu1 %v5496_v50  ;;  %v5646_v48 = vld [vmem:[%s7702_s1 + $0x1c0] sm:$0xff]   ;;  %v5573_v50 = vld [vmem:[%s7703_s0 + $0x3a8] ss:$36 sps:$4 sm:$0xff]  }
  0x53   :  { %2977 = vmatpush1.bf16.msra.mxu0 %v5494_v49  ;;  %2735 = vmatprep.mubr.bf16.mxu0 %v5498_v51  ;;  %v5659_v49 = vld [vmem:[%s7702_s1 + $0x1c8] sm:$0xff]   ;;  %v5574_v51 = vld [vmem:[%s7703_s0 + $0x178] ss:$36 sps:$4 sm:$0xff]  }
  0x54   :  { %2978 = vmatprep.subr.bf16.mxu0 %v5929_v0  ;;  %5043 = vmatpush1.bf16.msra.mxu1 %v6001_v10  ;;  %v5526_v10 = vld [vmem:[%s7702_s1 + $0x160] sm:$0xff]  }
  0x55   :  { %5028 = vmatprep.subr.bf16.mxu1 %v5929_v0 }
  0x57   :  { %2979 = vmatpush1.bf16.msra.mxu0 %v5495_v52  ;;  %v5575_v52 = vld [vmem:[%s7703_s0 + $0x3f4] ss:$36 sps:$4 sm:$0xff]  }
  0x58   :  { %2980 = vmatprep.subr.bf16.mxu0 %v5929_v0  ;;  %5044 = vmatpush1.bf16.msra.mxu1 %v6012_v12  ;;  %v5530_v12 = vld [vmem:[%s7703_s0 + $0x204] ss:$36 sps:$4 sm:$0xff]  }
  0x59   :  { %2447 = vmatmul.mubr.bf16.gmra.mrb[12].mxu1 %v5500_v53  ;;  %5029 = vmatprep.subr.bf16.mxu1 %v5929_v0  ;;  %v5577_v53 = vld [vmem:[%s7703_s0 + $0x1c4] ss:$36 sps:$4 sm:$0xff]  }
  0x5a   :  { %2736 = vmatmul.mubr.bf16.gmra.mrb[12].mxu0 %v5501_v54  ;;  %2454 = vmatprep.mubr.bf16.mxu1 %v5504_v55  ;;  %v5672_v54 = vld [vmem:[%s7702_s1 + $0x1d0] sm:$0xff]  }
  0x5b   :  { %2981 = vmatpush1.bf16.msra.mxu0 %v5502_v56  ;;  %2743 = vmatprep.mubr.bf16.mxu0 %v5506_v57  ;;  %v5579_v55 = vld [vmem:[%s7703_s0 + $0x3f0] ss:$36 sps:$4 sm:$0xff]   ;;  %v5580_v56 = vld [vmem:[%s7703_s0 + $0x1c0] ss:$36 sps:$4 sm:$0xff]  }
  0x5c   :  { %2982 = vmatprep.subr.bf16.mxu0 %v5929_v0  ;;  %5045 = vmatpush1.bf16.msra.mxu1 %v6023_v14  ;;  %v5532_v14 = vld [vmem:[%s7703_s0 + $0x1f8] ss:$36 sps:$4 sm:$0xff]  }
  0x5d   :  { %5030 = vmatprep.subr.bf16.mxu1 %v5929_v0  ;;  %v5582_v57 = vld [vmem:[%s7703_s0 + $0x43c] ss:$36 sps:$4 sm:$0xff]  }
  0x5f   :  { %2983 = vmatpush1.bf16.msra.mxu0 %v5503_v58  ;;  %v5584_v58 = vld [vmem:[%s7703_s0 + $0x20c] ss:$36 sps:$4 sm:$0xff]  }
  0x60   :  { %2984 = vmatprep.subr.bf16.mxu0 %v5929_v0  ;;  %5046 = vmatpush1.bf16.msra.mxu1 %v6034_v16  ;;  %v5536_v16 = vld [vmem:[%s7703_s0 + $0x244] ss:$36 sps:$4 sm:$0xff]  }
  0x61   :  { %2455 = vmatmul.mubr.bf16.gmra.mrb[16].mxu1 %v5508_v59  ;;  %5031 = vmatprep.subr.bf16.mxu1 %v5929_v0  ;;  %v5685_v59 = vld [vmem:[%s7702_s1 + $0x1d8] sm:$0xff]  }
  0x62   :  { %2744 = vmatmul.mubr.bf16.gmra.mrb[16].mxu0 %v5509_v60  ;;  %2462 = vmatprep.mubr.bf16.mxu1 %v5512_v62  ;;  %v5586_v60 = vld [vmem:[%s7703_s0 + $0x438] ss:$36 sps:$4 sm:$0xff]   ;;  %v5588_v62 = vld [vmem:[%s7703_s0 + $0x484] ss:$36 sps:$4 sm:$0xff]  }
  0x63   :  { %2985 = vmatpush1.bf16.msra.mxu0 %v5510_v61  ;;  %2751 = vmatprep.mubr.bf16.mxu0 %v5514_v63  ;;  %v5587_v61 = vld [vmem:[%s7703_s0 + $0x208] ss:$36 sps:$4 sm:$0xff]   ;;  %v5590_v63 = vld [vmem:[%s7703_s0 + $0x254] ss:$36 sps:$4 sm:$0xff]  }
  0x64   :  { %2986 = vmatprep.subr.bf16.mxu0 %v5929_v0  ;;  %5047 = vmatpush1.bf16.msra.mxu1 %v6045_v18  ;;  %v5540_v18 = vld [vmem:[%s7703_s0 + $0x14] ss:$36 sps:$4 sm:$0xff]  }
  0x65   :  { %5032 = vmatprep.subr.bf16.mxu1 %v5929_v0 }
  0x67   :  { %2987 = vmatpush1.bf16.msra.mxu0 %v5511_v1  ;;  %v5592_v1 = vld [vmem:[%s7703_s0 + $0x480] ss:$36 sps:$4 sm:$0xff]  }
  0x68   :  { %2988 = vmatprep.subr.bf16.mxu0 %v5929_v0  ;;  %5048 = vmatpush1.bf16.msra.mxu1 %v6062_v22  ;;  %v5543_v22 = vld [vmem:[%s7703_s0 + $0x28c] ss:$36 sps:$4 sm:$0xff]  }
  0x69   :  { %2463 = vmatmul.mubr.bf16.gmra.mrb[20].mxu1 %v5516_v2  ;;  %5033 = vmatprep.subr.bf16.mxu1 %v5929_v0  ;;  %v5593_v2 = vld [vmem:[%s7703_s0 + $0x250] ss:$36 sps:$4 sm:$0xff]  }
  0x6a   :  { %2752 = vmatmul.mubr.bf16.gmra.mrb[20].mxu0 %v5517_v3  ;;  %2470 = vmatprep.mubr.bf16.mxu1 %v5520_v4  ;;  %v5595_v3 = vld [vmem:[%s7703_s0 + $0x4cc] ss:$36 sps:$4 sm:$0xff]   ;;  %v5597_v4 = vld [vmem:[%s7703_s0 + $0x29c] ss:$36 sps:$4 sm:$0xff]  }
  0x6b   :  { %2989 = vmatpush1.bf16.msra.mxu0 %v5518_v5  ;;  %2759 = vmatprep.mubr.bf16.mxu0 %v5522_v6  ;;  %v5698_v5 = vld [vmem:[%s7702_s1 + $0x1e0] sm:$0xff]  }
  0x6c   :  { %2990 = vmatprep.subr.bf16.mxu0 %v5929_v0  ;;  %5049 = vmatpush1.bf16.msra.mxu1 %v6073_v24  ;;  %v5545_v24 = vld [vmem:[%s7703_s0 + $0x5c] ss:$36 sps:$4 sm:$0xff]  }
  0x6d   :  { %5034 = vmatprep.subr.bf16.mxu1 %v5929_v0  ;;  %v6487_v6 = vld [vmem:[%s7702_s1 + $0x200] sm:$0xff]  }
  0x6f   :  { %2991 = vmatpush1.bf16.msra.mxu0 %v5519_v7  ;;  %v5599_v7 = vld [vmem:[%s7703_s0 + $0x4c8] ss:$36 sps:$4 sm:$0xff]  }
  0x70   :  { %2992 = vmatprep.subr.bf16.mxu0 %v5929_v0  ;;  %5050 = vmatpush1.bf16.msra.mxu1 %v6084_v26  ;;  %v5555_v26 = vld [vmem:[%s7702_s1 + $0x188] sm:$0xff]  }
  0x71   :  { %2471 = vmatmul.mubr.bf16.gmra.mrb[24].mxu1 %v5524_v8  ;;  %5035 = vmatprep.subr.bf16.mxu1 %v5929_v0  ;;  %v5600_v8 = vld [vmem:[%s7703_s0 + $0x298] ss:$36 sps:$4 sm:$0xff]  }
  0x72   :  { %2760 = vmatmul.mubr.bf16.gmra.mrb[24].mxu0 %v5525_v9  ;;  %2478 = vmatprep.mubr.bf16.mxu1 %v5528_v11  ;;  %v5601_v9 = vld [vmem:[%s7703_s0 + $0x514] ss:$36 sps:$4 sm:$0xff]  }
  0x73   :  { %2993 = vmatpush1.bf16.msra.mxu0 %v5526_v10  ;;  %2767 = vmatprep.mubr.bf16.mxu0 %v5530_v12  ;;  %v5603_v10 = vld [vmem:[%s7703_s0 + $0x2e4] ss:$36 sps:$4 sm:$0xff]   ;;  %v5605_v11 = vld [vmem:[%s7703_s0 + $0x510] ss:$36 sps:$4 sm:$0xff]  }
  0x74   :  { %2994 = vmatprep.subr.bf16.mxu0 %v5929_v0  ;;  %5051 = vmatpush1.bf16.msra.mxu1 %v6095_v28  ;;  %v5549_v28 = vld [vmem:[%s7703_s0 + $0x2d4] ss:$36 sps:$4 sm:$0xff]   ;;  %v5606_v12 = vld [vmem:[%s7703_s0 + $0x2e0] ss:$36 sps:$4 sm:$0xff]  }
  0x75   :  { %5036 = vmatprep.subr.bf16.mxu1 %v5929_v0 }
  0x77   :  { %2995 = vmatpush1.bf16.msra.mxu0 %v5527_v13  ;;  %v5608_v13 = vld [vmem:[%s7703_s0 + $0x55c] ss:$36 sps:$4 sm:$0xff]  }
  0x78   :  { %2996 = vmatprep.subr.bf16.mxu0 %v5929_v0  ;;  %5052 = vmatpush1.bf16.msra.mxu1 %v6106_v30  ;;  %v5568_v30 = vld [vmem:[%s7702_s1 + $0x190] sm:$0xff]  }
  0x79   :  { %2479 = vmatmul.mubr.bf16.gmra.mrb[28].mxu1 %v5532_v14  ;;  %5037 = vmatprep.subr.bf16.mxu1 %v5929_v0  ;;  %v5610_v14 = vld [vmem:[%s7703_s0 + $0x32c] ss:$36 sps:$4 sm:$0xff]  }
  0x7a   :  { %2768 = vmatmul.mubr.bf16.gmra.mrb[28].mxu0 %v5533_v15  ;;  %2486 = vmatprep.mubr.bf16.mxu1 %v5536_v16  ;;  %v5712_v15 = vld [vmem:[%s7702_s1 + $0x1e8] sm:$0xff]   ;;  %v5612_v16 = vld [vmem:[%s7703_s0 + $0x558] ss:$36 sps:$4 sm:$0xff]  }
  0x7b   :  { %2997 = vmatpush1.bf16.msra.mxu0 %v5534_v17  ;;  %3000 = vmatprep.mubr.bf16.mxu0 %v5540_v18  ;;  %v5613_v17 = vld [vmem:[%s7703_s0 + $0x328] ss:$36 sps:$4 sm:$0xff]  }
  0x7c   :  { %2998 = vmatprep.subr.bf16.mxu0 %v5929_v0  ;;  %5053 = vmatpush1.bf16.msra.mxu1 %v6117_v32  ;;  %v5581_v32 = vld [vmem:[%s7702_s1 + $0x198] sm:$0xff]   ;;  %v5614_v18 = vld [vmem:[%s7703_s0 + $0x5a4] ss:$36 sps:$4 sm:$0xff]  }
  0x7d   :  { %5038 = vmatprep.subr.bf16.mxu1 %v5929_v0 }
  0x7f   :  { %2999 = vmatpush1.bf16.msra.mxu0 %v5535_v19  ;;  %v5616_v19 = vld [vmem:[%s7703_s0 + $0x374] ss:$36 sps:$4 sm:$0xff]  }
  0x80   :  { %3257 = vmatprep.subr.bf16.mxu0 %v5929_v0  ;;  %5054 = vmatpush1.bf16.msra.mxu1 %v6128_v34  ;;  %v5556_v34 = vld [vmem:[%s7703_s0 + $0x31c] ss:$36 sps:$4 sm:$0xff]  }
  0x81   :  { %2487 = vmatmul.mubr.bf16.gmra.mrb[32].mxu1 %v5541_v20  ;;  %4943 = vmatprep.subr.bf16.mxu1 %v6487_v6  ;;  %v5618_v20 = vld [vmem:[%s7703_s0 + $0x5a0] ss:$36 sps:$4 sm:$0xff]  }
  0x82   :  { %3001 = vmatmul.mubr.bf16.vlgmr.msra.gmra.mrb[0].mxu0 %v5538_v21  ;;  %2494 = vmatprep.mubr.bf16.mxu1 %v5543_v22  ;;  %v5619_v21 = vld [vmem:[%s7703_s0 + $0x370] ss:$36 sps:$4 sm:$0xff]  }
  0x83   :  { %3258 = vmatpush1.bf16.msra.mxu0 %v5542_v23  ;;  %3008 = vmatprep.mubr.bf16.mxu0 %v5545_v24  ;;  %v5621_v22 = vld [vmem:[%s7703_s0 + $0x5ec] ss:$36 sps:$4 sm:$0xff]   ;;  %v5623_v23 = vld [vmem:[%s7703_s0 + $0x3bc] ss:$36 sps:$4 sm:$0xff]  }
  0x84   :  { %3259 = vmatprep.subr.bf16.mxu0 %v5929_v0  ;;  %v5726_v24 = vld [vmem:[%s7702_s1 + $0x1f0] sm:$0xff]  }
  0x87   :  { %3260 = vmatpush1.bf16.msra.mxu0 %v5555_v26  ;;  %v5626_v26 = vld [vmem:[%s7703_s0 + $0x3b8] ss:$36 sps:$4 sm:$0xff]  }
  0x88   :  { %3261 = vmatprep.subr.bf16.mxu0 %v5929_v0 }
  0x89   :  { %2495 = vmatmul.mubr.bf16.gmra.mrb[36].mxu1 %v5547_v25  ;;  %v5625_v25 = vld [vmem:[%s7703_s0 + $0x5e8] ss:$36 sps:$4 sm:$0xff]  }
  0x8a   :  { %3009 = vmatmul.mubr.bf16.gmra.mrb[4].mxu0 %v5548_v27  ;;  %2502 = vmatprep.mubr.bf16.mxu1 %v5549_v28  ;;  %v5627_v27 = vld [vmem:[%s7703_s0 + $0x634] ss:$36 sps:$4 sm:$0xff]   ;;  %v5629_v28 = vld [vmem:[%s7703_s0 + $0x404] ss:$36 sps:$4 sm:$0xff]  }
  0x8b   :  { %3016 = vmatprep.mubr.bf16.mxu0 %v5551_v29  ;;  %3262 = vmatpush1.bf16.msra.mxu0 %v5568_v30  ;;  %v5632_v29 = vld [vmem:[%s7703_s0 + $0x400] ss:$36 sps:$4 sm:$0xff]  }
  0x8c   :  { %3263 = vmatprep.subr.bf16.mxu0 %v5929_v0  ;;  %v5634_v30 = vld [vmem:[%s7703_s0 + $0x67c] ss:$36 sps:$4 sm:$0xff]  }
  0x8f   :  { %3264 = vmatpush1.bf16.msra.mxu0 %v5581_v32  ;;  %v5739_v32 = vld [vmem:[%s7702_s1 + $0x1f8] sm:$0xff]  }
  0x90   :  { %3265 = vmatprep.subr.bf16.mxu0 %v5929_v0 }
  0x91   :  { %2503 = vmatmul.mubr.bf16.gmra.mrb[40].mxu1 %v5553_v31  ;;  %v5636_v31 = vld [vmem:[%s7703_s0 + $0x44c] ss:$36 sps:$4 sm:$0xff]  }
  0x92   :  { %3017 = vmatmul.mubr.bf16.gmra.mrb[8].mxu0 %v5554_v33  ;;  %2510 = vmatprep.mubr.bf16.mxu1 %v5556_v34  ;;  %v5638_v33 = vld [vmem:[%s7703_s0 + $0x678] ss:$36 sps:$4 sm:$0xff]   ;;  %v5639_v34 = vld [vmem:[%s7703_s0 + $0x448] ss:$36 sps:$4 sm:$0xff]  }
  0x93   :  { %3024 = vmatprep.mubr.bf16.mxu0 %v5558_v35  ;;  %3266 = vmatpush1.bf16.msra.mxu0 %v5594_v36  ;;  %v5640_v35 = vld [vmem:[%s7703_s0 + $0x6c4] ss:$36 sps:$4 sm:$0xff]   ;;  %v5642_v36 = vld [vmem:[%s7703_s0 + $0x494] ss:$36 sps:$4 sm:$0xff]  }
  0x94   :  { %3267 = vmatprep.subr.bf16.mxu0 %v5929_v0 }
  0x97   :  { %3268 = vmatpush1.bf16.msra.mxu0 %v5607_v38  ;;  %v5645_v38 = vld [vmem:[%s7703_s0 + $0x490] ss:$36 sps:$4 sm:$0xff]  }
  0x98   :  { %3269 = vmatprep.subr.bf16.mxu0 %v5929_v0 }
  0x99   :  { %2511 = vmatmul.mubr.bf16.gmra.mrb[44].mxu1 %v5560_v37  ;;  %v5644_v37 = vld [vmem:[%s7703_s0 + $0x6c0] ss:$36 sps:$4 sm:$0xff]  }
  0x9a   :  { %3025 = vmatmul.mubr.bf16.gmra.mrb[12].mxu0 %v5561_v39  ;;  %2518 = vmatprep.mubr.bf16.mxu1 %v5562_v40  ;;  %v5647_v39 = vld [vmem:[%s7703_s0 + $0x70c] ss:$36 sps:$4 sm:$0xff]   ;;  %v5649_v40 = vld [vmem:[%s7703_s0 + $0x4dc] ss:$36 sps:$4 sm:$0xff]  }
  0x9b   :  { %3032 = vmatprep.mubr.bf16.mxu0 %v5564_v41  ;;  %3270 = vmatpush1.bf16.msra.mxu0 %v5620_v42  ;;  %v5651_v41 = vld [vmem:[%s7703_s0 + $0x708] ss:$36 sps:$4 sm:$0xff]   ;;  %v5652_v42 = vld [vmem:[%s7703_s0 + $0x4d8] ss:$36 sps:$4 sm:$0xff]  }
  0x9c   :  { %3271 = vmatprep.subr.bf16.mxu0 %v5929_v0 }
  0x9f   :  { %3272 = vmatpush1.bf16.msra.mxu0 %v5633_v43  ;;  %v5653_v43 = vld [vmem:[%s7703_s0 + $0x754] ss:$36 sps:$4 sm:$0xff]  }
  0xa0   :  { %3273 = vmatprep.subr.bf16.mxu0 %v5929_v0 }
  0xa1   :  { %2519 = vmatmul.mubr.bf16.gmra.mrb[48].mxu1 %v5566_v44  ;;  %v5655_v44 = vld [vmem:[%s7703_s0 + $0x524] ss:$36 sps:$4 sm:$0xff]  }
  0xa2   :  { %3033 = vmatmul.mubr.bf16.gmra.mrb[16].mxu0 %v5567_v45  ;;  %2526 = vmatprep.mubr.bf16.mxu1 %v5569_v46  ;;  %v5657_v45 = vld [vmem:[%s7703_s0 + $0x750] ss:$36 sps:$4 sm:$0xff]   ;;  %v5658_v46 = vld [vmem:[%s7703_s0 + $0x520] ss:$36 sps:$4 sm:$0xff]  }
  0xa3   :  { %3040 = vmatprep.mubr.bf16.mxu0 %v5571_v47  ;;  %3274 = vmatpush1.bf16.msra.mxu0 %v5646_v48  ;;  %v5660_v47 = vld [vmem:[%s7703_s0 + $0x79c] ss:$36 sps:$4 sm:$0xff]   ;;  %v5662_v48 = vld [vmem:[%s7703_s0 + $0x56c] ss:$36 sps:$4 sm:$0xff]  }
  0xa4   :  { %3275 = vmatprep.subr.bf16.mxu0 %v5929_v0 }
  0xa7   :  { %3276 = vmatpush1.bf16.msra.mxu0 %v5659_v49 }
  0xa8   :  { %3277 = vmatprep.subr.bf16.mxu0 %v5929_v0 }
  0xa9   :  { %2527 = vmatmul.mubr.bf16.gmra.mrb[52].mxu1 %v5573_v50 }
  0xaa   :  { %3041 = vmatmul.mubr.bf16.gmra.mrb[20].mxu0 %v5574_v51  ;;  %2534 = vmatprep.mubr.bf16.mxu1 %v5575_v52  ;;  %v5664_v51 = vld [vmem:[%s7703_s0 + $0x798] ss:$36 sps:$4 sm:$0xff]  }
  0xab   :  { %3048 = vmatprep.mubr.bf16.mxu0 %v5577_v53  ;;  %3278 = vmatpush1.bf16.msra.mxu0 %v5672_v54  ;;  %v5665_v53 = vld [vmem:[%s7703_s0 + $0x568] ss:$36 sps:$4 sm:$0xff]  }
  0xac   :  { %3279 = vmatprep.subr.bf16.mxu0 %v5929_v0  ;;  %v5666_v54 = vld [vmem:[%s7703_s0 + $0x7e4] ss:$36 sps:$4 sm:$0xff]  }
  0xaf   :  { %3280 = vmatpush1.bf16.msra.mxu0 %v5685_v59  ;;  %v5670_v59 = vld [vmem:[%s7703_s0 + $0x7e0] ss:$36 sps:$4 sm:$0xff]  }
  0xb0   :  { %3281 = vmatprep.subr.bf16.mxu0 %v5929_v0 }
  0xb1   :  { %2535 = vmatmul.mubr.bf16.gmra.mrb[56].mxu1 %v5579_v55 }
  0xb2   :  { %3049 = vmatmul.mubr.bf16.gmra.mrb[24].mxu0 %v5580_v56  ;;  %2542 = vmatprep.mubr.bf16.mxu1 %v5582_v57  ;;  %v5668_v56 = vld [vmem:[%s7703_s0 + $0x5b4] ss:$36 sps:$4 sm:$0xff]  }
  0xb3   :  { %3056 = vmatprep.mubr.bf16.mxu0 %v5584_v58  ;;  %3282 = vmatpush1.bf16.msra.mxu0 %v5698_v5 }
  0xb4   :  { %3283 = vmatprep.subr.bf16.mxu0 %v5929_v0 }
  0xb7   :  { %3284 = vmatpush1.bf16.msra.mxu0 %v5712_v15  ;;  %v5684_v15 = vld [vmem:[%s7703_s0 + $0x640] ss:$36 sps:$4 sm:$0xff]  }
  0xb8   :  { %3285 = vmatprep.subr.bf16.mxu0 %v5929_v0 }
  0xb9   :  { %2543 = vmatmul.mubr.bf16.gmra.mrb[60].mxu1 %v5586_v60 }
  0xba   :  { %3057 = vmatmul.mubr.bf16.gmra.mrb[28].mxu0 %v5587_v61  ;;  %2550 = vmatprep.mubr.bf16.mxu1 %v5588_v62  ;;  %v5671_v61 = vld [vmem:[%s7703_s0 + $0x5b0] ss:$36 sps:$4 sm:$0xff]  }
  0xbb   :  { %3064 = vmatprep.mubr.bf16.mxu0 %v5590_v63  ;;  %3286 = vmatpush1.bf16.msra.mxu0 %v5726_v24  ;;  %v5673_v62 = vld [vmem:[%s7703_s0 + $0x82c] ss:$36 sps:$4 sm:$0xff]  }
  0xbc   :  { %3287 = vmatprep.subr.bf16.mxu0 %v5929_v0  ;;  %v5631_v0 = vld [vmem:[%s7703_s0 + $0x630] ss:$36 sps:$4 sm:$0xff]  }
  0xbd   :  { %v5694_v24 = vld [vmem:[%s7703_s0 + $0x24c] ss:$36 sps:$4 sm:$0xff]  }
  0xbf   :  { %3288 = vmatpush1.bf16.msra.mxu0 %v5739_v32  ;;  %v5700_v32 = vld [vmem:[%s7703_s0 + $0x294] ss:$36 sps:$4 sm:$0xff]  }
  0xc1   :  { %2551 = vmatmul.mubr.bf16.gmra.mrb[64].mxu1 %v5592_v1  ;;  %v5675_v1 = vld [vmem:[%s7703_s0 + $0x5fc] ss:$36 sps:$4 sm:$0xff]  }
  0xc2   :  { %3065 = vmatmul.mubr.bf16.gmra.mrb[32].mxu0 %v5593_v2  ;;  %2558 = vmatprep.mubr.bf16.mxu1 %v5595_v3 }
  0xc3   :  { %3072 = vmatprep.mubr.bf16.mxu0 %v5597_v4  ;;  %v5677_v4 = vld [vmem:[%s7703_s0 + $0x828] ss:$36 sps:$4 sm:$0xff]  }
  0xc9   :  { %2559 = vmatmul.mubr.bf16.gmra.mrb[68].mxu1 %v5599_v7  ;;  %v5678_v7 = vld [vmem:[%s7703_s0 + $0x5f8] ss:$36 sps:$4 sm:$0xff]  }
  0xca   :  { %3073 = vmatmul.mubr.bf16.gmra.mrb[36].mxu0 %v5600_v8  ;;  %2566 = vmatprep.mubr.bf16.mxu1 %v5601_v9  ;;  %v5679_v8 = vld [vmem:[%s7703_s0 + $0x874] ss:$36 sps:$4 sm:$0xff]  }
  0xcb   :  { %3080 = vmatprep.mubr.bf16.mxu0 %v5603_v10  ;;  %v5681_v10 = vld [vmem:[%s7703_s0 + $0x644] ss:$36 sps:$4 sm:$0xff]  }
  0xd1   :  { %2567 = vmatmul.mubr.bf16.gmra.mrb[72].mxu1 %v5605_v11 }
  0xd2   :  { %3081 = vmatmul.mubr.bf16.gmra.mrb[40].mxu0 %v5606_v12  ;;  %2574 = vmatprep.mubr.bf16.mxu1 %v5608_v13  ;;  %v5683_v13 = vld [vmem:[%s7703_s0 + $0x870] ss:$36 sps:$4 sm:$0xff]  }
  0xd3   :  { %3088 = vmatprep.mubr.bf16.mxu0 %v5610_v14 }
  0xd9   :  { %2575 = vmatmul.mubr.bf16.gmra.mrb[76].mxu1 %v5612_v16  ;;  %v5686_v16 = vld [vmem:[%s7703_s0 + $0x8bc] ss:$36 sps:$4 sm:$0xff]  }
  0xda   :  { %3089 = vmatmul.mubr.bf16.gmra.mrb[44].mxu0 %v5613_v17  ;;  %2582 = vmatprep.mubr.bf16.mxu1 %v5614_v18  ;;  %v5688_v18 = vld [vmem:[%s7703_s0 + $0x68c] ss:$36 sps:$4 sm:$0xff]  }
  0xdb   :  { %3096 = vmatprep.mubr.bf16.mxu0 %v5616_v19 }
  0xe1   :  { %2583 = vmatmul.mubr.bf16.gmra.mrb[80].mxu1 %v5618_v20 }
  0xe2   :  { %3097 = vmatmul.mubr.bf16.gmra.mrb[48].mxu0 %v5619_v21  ;;  %2590 = vmatprep.mubr.bf16.mxu1 %v5621_v22  ;;  %v5690_v21 = vld [vmem:[%s7703_s0 + $0x8b8] ss:$36 sps:$4 sm:$0xff]  }
  0xe3   :  { %3104 = vmatprep.mubr.bf16.mxu0 %v5623_v23  ;;  %v5691_v23 = vld [vmem:[%s7703_s0 + $0x688] ss:$36 sps:$4 sm:$0xff]  }
  0xe9   :  { %2591 = vmatmul.mubr.bf16.gmra.mrb[84].mxu1 %v5625_v25 }
  0xea   :  { %3105 = vmatmul.mubr.bf16.gmra.mrb[52].mxu0 %v5626_v26  ;;  %2598 = vmatprep.mubr.bf16.mxu1 %v5627_v27  ;;  %v5695_v26 = vld [vmem:[%s7703_s0 + $0x6d4] ss:$36 sps:$4 sm:$0xff]  }
  0xeb   :  { %3112 = vmatprep.mubr.bf16.mxu0 %v5629_v28 }
  0xf1   :  { %2599 = vmatmul.mubr.bf16.gmra.mrb[88].mxu1 %v5631_v0  ;;  %v5692_v0 = vld [vmem:[%s7703_s0 + $0x248] ss:$36 sps:$4 sm:$0xff]  }
  0xf2   :  { %3113 = vmatmul.mubr.bf16.gmra.mrb[56].mxu0 %v5632_v29  ;;  %2606 = vmatprep.mubr.bf16.mxu1 %v5634_v30  ;;  %v5697_v30 = vld [vmem:[%s7703_s0 + $0x6d0] ss:$36 sps:$4 sm:$0xff]  }
  0xf3   :  { %3120 = vmatprep.mubr.bf16.mxu0 %v5636_v31 }
  0xf9   :  { %2607 = vmatmul.mubr.bf16.gmra.mrb[92].mxu1 %v5638_v33  ;;  %v5702_v33 = vld [vmem:[%s7703_s0 + $0x71c] ss:$36 sps:$4 sm:$0xff]  }
  0xfa   :  { %3121 = vmatmul.mubr.bf16.gmra.mrb[60].mxu0 %v5639_v34  ;;  %2614 = vmatprep.mubr.bf16.mxu1 %v5640_v35  ;;  %v5719_v34 = vld [vmem:[%s7702_s1 + $0x208] sm:$0xff]   ;;  %v5740_v35 = vld [vmem:[%s7702_s1 + $0x210] sm:$0xff]  }
  0xfb   :  { %3128 = vmatprep.mubr.bf16.mxu0 %v5642_v36 }
 0x101   :  { %2615 = vmatmul.mubr.bf16.gmra.mrb[96].mxu1 %v5644_v37 }
 0x102   :  { %3129 = vmatmul.mubr.bf16.gmra.mrb[64].mxu0 %v5645_v38  ;;  %2622 = vmatprep.mubr.bf16.mxu1 %v5647_v39  ;;  %v5704_v38 = vld [vmem:[%s7703_s0 + $0x290] ss:$36 sps:$4 sm:$0xff]  }
 0x103   :  { %3136 = vmatprep.mubr.bf16.mxu0 %v5649_v40  ;;  %v5706_v40 = vld [vmem:[%s7703_s0 + $0x2dc] ss:$36 sps:$4 sm:$0xff]  }
 0x109   :  { %2623 = vmatmul.mubr.bf16.gmra.mrb[100].mxu1 %v5651_v41 }
 0x10a   :  { %3137 = vmatmul.mubr.bf16.gmra.mrb[68].mxu0 %v5652_v42  ;;  %2630 = vmatprep.mubr.bf16.mxu1 %v5653_v43  ;;  %v5708_v42 = vld [vmem:[%s7703_s0 + $0x764] ss:$36 sps:$4 sm:$0xff]   ;;  %v5759_v43 = vld [vmem:[%s7702_s1 + $0x218] sm:$0xff]  }
 0x10b   :  { %3144 = vmatprep.mubr.bf16.mxu0 %v5655_v44 }
 0x111   :  { %2631 = vmatmul.mubr.bf16.gmra.mrb[104].mxu1 %v5657_v45  ;;  %v5778_v45 = vld [vmem:[%s7702_s1 + $0x220] sm:$0xff]  }
 0x112   :  { %3145 = vmatmul.mubr.bf16.gmra.mrb[72].mxu0 %v5658_v46  ;;  %2638 = vmatprep.mubr.bf16.mxu1 %v5660_v47  ;;  %v5710_v47 = vld [vmem:[%s7703_s0 + $0x2d8] ss:$36 sps:$4 sm:$0xff]  }
 0x113   :  { %3152 = vmatprep.mubr.bf16.mxu0 %v5662_v48 }
 0x114   :  { %v6622_v49 = vpop.f32.mrb[0].mxu1 }
 0x115   :  { %v2426_v50 = vpop.f32.mrb[1].mxu1 }
 0x116   :  { %v6627_v52 = vpop.f32.mrb[2].mxu1  ;;  %v5711_v50 = vld [vmem:[%s7703_s0 + $0x760] ss:$36 sps:$4 sm:$0xff]  }
 0x117   :  { %v2429_v55 = vpop.f32.mrb[3].mxu1 }
 0x118   :  { %v5797_v55 = vld [vmem:[%s7702_s1 + $0x228] sm:$0xff]  }
 0x119   :  { %2639 = vmatmul.mubr.bf16.gmra.mrb[108].mxu1 %v5664_v51  ;;  %v5713_v51 = vld [vmem:[%s7703_s0 + $0x324] ss:$36 sps:$4 sm:$0xff]  }
 0x11a   :  { %3153 = vmatmul.mubr.bf16.gmra.mrb[76].mxu0 %v5665_v53  ;;  %2646 = vmatprep.mubr.bf16.mxu1 %v5666_v54  ;;  %v5715_v54 = vld [vmem:[%s7703_s0 + $0x7ac] ss:$36 sps:$4 sm:$0xff]  }
 0x11b   :  { %3160 = vmatprep.mubr.bf16.mxu0 %v5668_v56  ;;  %v5816_v56 = vld [vmem:[%s7702_s1 + $0x230] sm:$0xff]  }
 0x11c   :  { %v6638_v57 = vpop.f32.mrb[4].mxu1 }
 0x11d   :  { %v2434_v58 = vpop.f32.mrb[5].mxu1 }
 0x11e   :  { %v6643_v60 = vpop.f32.mrb[6].mxu1  ;;  %v5717_v58 = vld [vmem:[%s7703_s0 + $0x320] ss:$36 sps:$4 sm:$0xff]  }
 0x11f   :  { %v2437_v63 = vpop.f32.mrb[7].mxu1 }
 0x120   :  { %v5724_v63 = vld [vmem:[%s7703_s0 + $0x368] ss:$36 sps:$4 sm:$0xff]  }
 0x121   :  { %2647 = vmatmul.mubr.bf16.gmra.mrb[112].mxu1 %v5670_v59  ;;  %v5718_v59 = vld [vmem:[%s7703_s0 + $0x7a8] ss:$36 sps:$4 sm:$0xff]  }
 0x122   :  { %3161 = vmatmul.mubr.bf16.gmra.mrb[80].mxu0 %v5671_v61  ;;  %2654 = vmatprep.mubr.bf16.mxu1 %v5673_v62  ;;  %v5720_v61 = vld [vmem:[%s7703_s0 + $0x36c] ss:$36 sps:$4 sm:$0xff]   ;;  %v5722_v62 = vld [vmem:[%s7703_s0 + $0x7f4] ss:$36 sps:$4 sm:$0xff]  }
 0x123   :  { %3168 = vmatprep.mubr.bf16.mxu0 %v5675_v1  ;;  %v5725_v1 = vld [vmem:[%s7703_s0 + $0x7f0] ss:$36 sps:$4 sm:$0xff]  }
 0x124   :  { %v6654_v2 = vpop.f32.mrb[8].mxu1 }
 0x125   :  { %v2442_v3 = vpop.f32.mrb[9].mxu1 }
 0x126   :  { %v6659_v5 = vpop.f32.mrb[10].mxu1  ;;  %v5727_v3 = vld [vmem:[%s7703_s0 + $0x3b4] ss:$36 sps:$4 sm:$0xff]  }
 0x127   :  { %v2445_v9 = vpop.f32.mrb[11].mxu1 }
 0x128   :  { %v5733_v9 = vld [vmem:[%s7703_s0 + $0x3fc] ss:$36 sps:$4 sm:$0xff]  }
 0x129   :  { %2655 = vmatmul.mubr.bf16.gmra.mrb[116].mxu1 %v5677_v4  ;;  %v5729_v4 = vld [vmem:[%s7703_s0 + $0x83c] ss:$36 sps:$4 sm:$0xff]  }
 0x12a   :  { %3169 = vmatmul.mubr.bf16.gmra.mrb[84].mxu0 %v5678_v7  ;;  %2662 = vmatprep.mubr.bf16.mxu1 %v5679_v8  ;;  %v5731_v7 = vld [vmem:[%s7703_s0 + $0x3b0] ss:$36 sps:$4 sm:$0xff]   ;;  %v5732_v8 = vld [vmem:[%s7703_s0 + $0x838] ss:$36 sps:$4 sm:$0xff]  }
 0x12b   :  { %3176 = vmatprep.mubr.bf16.mxu0 %v5681_v10  ;;  %v5735_v10 = vld [vmem:[%s7703_s0 + $0x884] ss:$36 sps:$4 sm:$0xff]  }
 0x12c   :  { %v6670_v11 = vpop.f32.mrb[12].mxu1 }
 0x12d   :  { %v2450_v12 = vpop.f32.mrb[13].mxu1 }
 0x12e   :  { %v6675_v14 = vpop.f32.mrb[14].mxu1  ;;  %v5835_v12 = vld [vmem:[%s7702_s1 + $0x238] sm:$0xff]  }
 0x12f   :  { %v2453_v17 = vpop.f32.mrb[15].mxu1 }
 0x130   :  { %v5743_v17 = vld [vmem:[%s7703_s0 + $0x8cc] ss:$36 sps:$4 sm:$0xff]  }
 0x131   :  { %2663 = vmatmul.mubr.bf16.gmra.mrb[120].mxu1 %v5683_v13  ;;  %v5737_v13 = vld [vmem:[%s7703_s0 + $0x3f8] ss:$36 sps:$4 sm:$0xff]  }
 0x132   :  { %3177 = vmatmul.mubr.bf16.gmra.mrb[88].mxu0 %v5684_v15  ;;  %2670 = vmatprep.mubr.bf16.mxu1 %v5686_v16  ;;  %v5738_v15 = vld [vmem:[%s7703_s0 + $0x880] ss:$36 sps:$4 sm:$0xff]  }
 0x133   :  { %3184 = vmatprep.mubr.bf16.mxu0 %v5688_v18  ;;  %v5741_v16 = vld [vmem:[%s7703_s0 + $0x444] ss:$36 sps:$4 sm:$0xff]  }
 0x134   :  { %v6686_v19 = vpop.f32.mrb[16].mxu1  ;;  %v5745_v18 = vld [vmem:[%s7703_s0 + $0x440] ss:$36 sps:$4 sm:$0xff]  }
 0x135   :  { %v2458_v20 = vpop.f32.mrb[17].mxu1 }
 0x136   :  { %v6691_v22 = vpop.f32.mrb[18].mxu1  ;;  %v5746_v20 = vld [vmem:[%s7703_s0 + $0x8c8] ss:$36 sps:$4 sm:$0xff]  }
 0x137   :  { %v2461_v25 = vpop.f32.mrb[19].mxu1 }
 0x138   :  { %v5749_v25 = vld [vmem:[%s7703_s0 + $0x18] ss:$36 sps:$4 sm:$0xff]  }
 0x139   :  { %2671 = vmatmul.mubr.bf16.gmra.mrb[124].mxu1 %v5690_v21  ;;  %v5747_v21 = vld [vmem:[%s7703_s0 + $0x48c] ss:$36 sps:$4 sm:$0xff]  }
 0x13a   :  { %3185 = vmatmul.mubr.bf16.gmra.mrb[92].mxu0 %v5691_v23  ;;  %2775 = vmatprep.mubr.bf16.mxu1 %v5694_v24  ;;  %v5751_v23 = vld [vmem:[%s7703_s0 + $0x1c] ss:$36 sps:$4 sm:$0xff]   ;;  %v5752_v24 = vld [vmem:[%s7703_s0 + $0x488] ss:$36 sps:$4 sm:$0xff]  }
 0x13b   :  { %3192 = vmatprep.mubr.bf16.mxu0 %v5695_v26  ;;  %v5753_v26 = vld [vmem:[%s7703_s0 + $0x4d4] ss:$36 sps:$4 sm:$0xff]  }
 0x13c   :  { %v6702_v27 = vpop.f32.mrb[20].mxu1 }
 0x13d   :  { %v2466_v28 = vpop.f32.mrb[21].mxu1 }
 0x13e   :  { %v6707_v29 = vpop.f32.mrb[22].mxu1  ;;  %v5755_v28 = vld [vmem:[%s7703_s0 + $0x64] ss:$36 sps:$4 sm:$0xff]  }
 0x13f   :  { %v2469_v31 = vpop.f32.mrb[23].mxu1 }
 0x140   :  { %v5760_v31 = vld [vmem:[%s7703_s0 + $0x51c] ss:$36 sps:$4 sm:$0xff]  }
 0x141   :  { %2776 = vmatmul.mubr.bf16.vlgmr.msra.gmra.mrb[32].mxu1 %v5692_v0  ;;  %v5757_v0 = vld [vmem:[%s7703_s0 + $0x4d0] ss:$36 sps:$4 sm:$0xff]  }
 0x142   :  { %3193 = vmatmul.mubr.bf16.gmra.mrb[96].mxu0 %v5697_v30  ;;  %4944 = vmatpush3.bf16.msra.mxu1 %v6487_v6  ;;  %v5705_v6 = vld [vmem:[%s7703_s0 + $0x718] ss:$36 sps:$4 sm:$0xff]   ;;  %v5758_v30 = vld [vmem:[%s7703_s0 + $0x60] ss:$36 sps:$4 sm:$0xff]  }
 0x143   :  { %2783 = vmatprep.mubr.bf16.mxu1 %v5700_v32  ;;  %3200 = vmatprep.mubr.bf16.mxu0 %v5702_v33  ;;  %v5762_v32 = vld [vmem:[%s7703_s0 + $0xac] ss:$36 sps:$4 sm:$0xff]   ;;  %v5764_v33 = vld [vmem:[%s7703_s0 + $0x518] ss:$36 sps:$4 sm:$0xff]  }
 0x144   :  { %v6725_v36 = vpop.f32.mrb[24].mxu1  ;;  %4945 = vmatprep.subr.bf16.mxu1 %v5719_v34 }
 0x145   :  { %v2474_v37 = vpop.f32.mrb[25].mxu1 }
 0x146   :  { %v6730_v39 = vpop.f32.mrb[26].mxu1  ;;  %4946 = vmatpush3.bf16.msra.mxu1 %v5719_v34  ;;  %v5765_v34 = vld [vmem:[%s7703_s0 + $0xa8] ss:$36 sps:$4 sm:$0xff]   ;;  %v5768_v37 = vld [vmem:[%s7703_s0 + $0xf4] ss:$36 sps:$4 sm:$0xff]  }
 0x147   :  { %v2477_v41 = vpop.f32.mrb[27].mxu1  ;;  %4947 = vmatprep.subr.bf16.mxu1 %v5740_v35 }
 0x148   :  { %v5774_v41 = vld [vmem:[%s7703_s0 + $0x13c] ss:$36 sps:$4 sm:$0xff]  }
 0x149   :  { %2784 = vmatmul.mubr.bf16.gmra.mrb[36].mxu1 %v5704_v38  ;;  %v5770_v38 = vld [vmem:[%s7703_s0 + $0x560] ss:$36 sps:$4 sm:$0xff]  }
 0x14a   :  { %3201 = vmatmul.mubr.bf16.gmra.mrb[100].mxu0 %v5705_v6  ;;  %2791 = vmatprep.mubr.bf16.mxu1 %v5706_v40  ;;  %v5771_v6 = vld [vmem:[%s7703_s0 + $0xf0] ss:$36 sps:$4 sm:$0xff]  }
 0x14b   :  { %3208 = vmatprep.mubr.bf16.mxu0 %v5708_v42  ;;  %4948 = vmatpush3.bf16.msra.mxu1 %v5740_v35  ;;  %v5766_v35 = vld [vmem:[%s7703_s0 + $0x564] ss:$36 sps:$4 sm:$0xff]   ;;  %v5772_v40 = vld [vmem:[%s7703_s0 + $0x5ac] ss:$36 sps:$4 sm:$0xff]  }
 0x14c   :  { %v6744_v44 = vpop.f32.mrb[28].mxu1  ;;  %4949 = vmatprep.subr.bf16.mxu1 %v5759_v43  ;;  %v5776_v42 = vld [vmem:[%s7703_s0 + $0x5a8] ss:$36 sps:$4 sm:$0xff]  }
 0x14d   :  { %v2482_v46 = vpop.f32.mrb[29].mxu1 }
 0x14e   :  { %v6752_v48 = vpop.f32.mrb[30].mxu1  ;;  %v5781_v46 = vld [vmem:[%s7703_s0 + $0x184] ss:$36 sps:$4 sm:$0xff]  }
 0x14f   :  { %v2485_v53 = vpop.f32.mrb[31].mxu1  ;;  %4950 = vmatpush3.bf16.msra.mxu1 %v5759_v43  ;;  %v5777_v43 = vld [vmem:[%s7703_s0 + $0x138] ss:$36 sps:$4 sm:$0xff]  }
 0x150   :  { %4951 = vmatprep.subr.bf16.mxu1 %v5778_v45  ;;  %v5787_v53 = vld [vmem:[%s7703_s0 + $0x1cc] ss:$36 sps:$4 sm:$0xff]  }
 0x151   :  { %2792 = vmatmul.mubr.bf16.gmra.mrb[40].mxu1 %v5710_v47  ;;  %v5783_v47 = vld [vmem:[%s7703_s0 + $0x5f0] ss:$36 sps:$4 sm:$0xff]  }
 0x152   :  { %3209 = vmatmul.mubr.bf16.gmra.mrb[104].mxu0 %v5711_v50  ;;  %2799 = vmatprep.mubr.bf16.mxu1 %v5713_v51  ;;  %v5784_v50 = vld [vmem:[%s7703_s0 + $0x180] ss:$36 sps:$4 sm:$0xff]  }
 0x153   :  { %3216 = vmatprep.mubr.bf16.mxu0 %v5715_v54  ;;  %4952 = vmatpush3.bf16.msra.mxu1 %v5778_v45  ;;  %v5779_v45 = vld [vmem:[%s7703_s0 + $0x5f4] ss:$36 sps:$4 sm:$0xff]   ;;  %v5785_v51 = vld [vmem:[%s7703_s0 + $0x63c] ss:$36 sps:$4 sm:$0xff]  }
 0x154   :  { %4953 = vmatprep.subr.bf16.mxu1 %v5797_v55  ;;  %v5789_v54 = vld [vmem:[%s7703_s0 + $0x638] ss:$36 sps:$4 sm:$0xff]  }
 0x157   :  { %4954 = vmatpush3.bf16.msra.mxu1 %v5797_v55  ;;  %v5790_v55 = vld [vmem:[%s7703_s0 + $0x1c8] ss:$36 sps:$4 sm:$0xff]  }
 0x158   :  { %4955 = vmatprep.subr.bf16.mxu1 %v5816_v56 }
 0x159   :  { %2800 = vmatmul.mubr.bf16.gmra.mrb[44].mxu1 %v5717_v58  ;;  %v5793_v58 = vld [vmem:[%s7703_s0 + $0x214] ss:$36 sps:$4 sm:$0xff]  }
 0x15a   :  { %3217 = vmatmul.mubr.bf16.gmra.mrb[108].mxu0 %v5718_v59  ;;  %2807 = vmatprep.mubr.bf16.mxu1 %v5720_v61  ;;  %v5795_v59 = vld [vmem:[%s7703_s0 + $0x680] ss:$36 sps:$4 sm:$0xff]   ;;  %v5796_v61 = vld [vmem:[%s7703_s0 + $0x210] ss:$36 sps:$4 sm:$0xff]  }
 0x15b   :  { %3224 = vmatprep.mubr.bf16.mxu0 %v5722_v62  ;;  %4956 = vmatpush3.bf16.msra.mxu1 %v5816_v56  ;;  %v5791_v56 = vld [vmem:[%s7703_s0 + $0x684] ss:$36 sps:$4 sm:$0xff]   ;;  %v5798_v62 = vld [vmem:[%s7703_s0 + $0x6cc] ss:$36 sps:$4 sm:$0xff]  }
 0x15c   :  { %4957 = vmatprep.subr.bf16.mxu1 %v5835_v12 }
 0x15f   :  { %4958 = vmatpush3.bf16.msra.mxu1 %v5835_v12  ;;  %v5812_v12 = vld [vmem:[%s7703_s0 + $0x2ec] ss:$36 sps:$4 sm:$0xff]  }
 0x161   :  { %2808 = vmatmul.mubr.bf16.gmra.mrb[48].mxu1 %v5724_v63  ;;  %v5800_v63 = vld [vmem:[%s7703_s0 + $0x25c] ss:$36 sps:$4 sm:$0xff]  }
 0x162   :  { %3225 = vmatmul.mubr.bf16.gmra.mrb[112].mxu0 %v5725_v1  ;;  %2815 = vmatprep.mubr.bf16.mxu1 %v5727_v3  ;;  %v5802_v1 = vld [vmem:[%s7703_s0 + $0x6c8] ss:$36 sps:$4 sm:$0xff]   ;;  %v5803_v3 = vld [vmem:[%s7703_s0 + $0x258] ss:$36 sps:$4 sm:$0xff]  }
 0x163   :  { %3232 = vmatprep.mubr.bf16.mxu0 %v5729_v4  ;;  %v5804_v4 = vld [vmem:[%s7703_s0 + $0x714] ss:$36 sps:$4 sm:$0xff]  }
 0x169   :  { %2816 = vmatmul.mubr.bf16.gmra.mrb[52].mxu1 %v5731_v7  ;;  %v5806_v7 = vld [vmem:[%s7703_s0 + $0x2a4] ss:$36 sps:$4 sm:$0xff]  }
 0x16a   :  { %3233 = vmatmul.mubr.bf16.gmra.mrb[116].mxu0 %v5732_v8  ;;  %2823 = vmatprep.mubr.bf16.mxu1 %v5733_v9  ;;  %v5808_v8 = vld [vmem:[%s7703_s0 + $0x710] ss:$36 sps:$4 sm:$0xff]   ;;  %v5809_v9 = vld [vmem:[%s7703_s0 + $0x2a0] ss:$36 sps:$4 sm:$0xff]  }
 0x16b   :  { %3240 = vmatprep.mubr.bf16.mxu0 %v5735_v10  ;;  %v5810_v10 = vld [vmem:[%s7703_s0 + $0x75c] ss:$36 sps:$4 sm:$0xff]  }
 0x171   :  { %2824 = vmatmul.mubr.bf16.gmra.mrb[56].mxu1 %v5737_v13  ;;  %v5814_v13 = vld [vmem:[%s7703_s0 + $0x758] ss:$36 sps:$4 sm:$0xff]  }
 0x172   :  { %3241 = vmatmul.mubr.bf16.gmra.mrb[120].mxu0 %v5738_v15  ;;  %2831 = vmatprep.mubr.bf16.mxu1 %v5741_v16  ;;  %v5815_v15 = vld [vmem:[%s7703_s0 + $0x2e8] ss:$36 sps:$4 sm:$0xff]  }
 0x173   :  { %3248 = vmatprep.mubr.bf16.mxu0 %v5743_v17  ;;  %v5817_v16 = vld [vmem:[%s7703_s0 + $0x7a4] ss:$36 sps:$4 sm:$0xff]   ;;  %v5819_v17 = vld [vmem:[%s7703_s0 + $0x334] ss:$36 sps:$4 sm:$0xff]  }
 0x179   :  { %2832 = vmatmul.mubr.bf16.gmra.mrb[60].mxu1 %v5745_v18  ;;  %v5821_v18 = vld [vmem:[%s7703_s0 + $0x7a0] ss:$36 sps:$4 sm:$0xff]  }
 0x17a   :  { %3249 = vmatmul.mubr.bf16.gmra.mrb[124].mxu0 %v5746_v20  ;;  %2839 = vmatprep.mubr.bf16.mxu1 %v5747_v21  ;;  %v5822_v20 = vld [vmem:[%s7703_s0 + $0x330] ss:$36 sps:$4 sm:$0xff]  }
 0x17b   :  { %3289 = vmatprep.mubr.bf16.mxu0 %v5751_v23  ;;  %v5823_v21 = vld [vmem:[%s7703_s0 + $0x7ec] ss:$36 sps:$4 sm:$0xff]   ;;  %v5825_v23 = vld [vmem:[%s7703_s0 + $0x37c] ss:$36 sps:$4 sm:$0xff]  }
 0x181   :  { %2840 = vmatmul.mubr.bf16.gmra.mrb[64].mxu1 %v5752_v24  ;;  %v5827_v24 = vld [vmem:[%s7703_s0 + $0x7e8] ss:$36 sps:$4 sm:$0xff]  }
 0x182   :  { %3290 = vmatmul.mubr.bf16.vlgmr.msra.gmra.mrb[0].mxu0 %v5749_v25  ;;  %2847 = vmatprep.mubr.bf16.mxu1 %v5753_v26  ;;  %v5828_v25 = vld [vmem:[%s7703_s0 + $0x378] ss:$36 sps:$4 sm:$0xff]  }
 0x183   :  { %3297 = vmatprep.mubr.bf16.mxu0 %v5755_v28  ;;  %v5829_v26 = vld [vmem:[%s7703_s0 + $0x834] ss:$36 sps:$4 sm:$0xff]   ;;  %v5831_v28 = vld [vmem:[%s7703_s0 + $0x3c4] ss:$36 sps:$4 sm:$0xff]  }
 0x189   :  { %2848 = vmatmul.mubr.bf16.gmra.mrb[68].mxu1 %v5757_v0  ;;  %v5833_v0 = vld [vmem:[%s7703_s0 + $0x830] ss:$36 sps:$4 sm:$0xff]  }
 0x18a   :  { %3298 = vmatmul.mubr.bf16.gmra.mrb[4].mxu0 %v5758_v30  ;;  %2855 = vmatprep.mubr.bf16.mxu1 %v5760_v31  ;;  %v5834_v30 = vld [vmem:[%s7703_s0 + $0x3c0] ss:$36 sps:$4 sm:$0xff]  }
 0x18b   :  { %3305 = vmatprep.mubr.bf16.mxu0 %v5762_v32  ;;  %v5836_v31 = vld [vmem:[%s7703_s0 + $0x87c] ss:$36 sps:$4 sm:$0xff]   ;;  %v5838_v32 = vld [vmem:[%s7703_s0 + $0x40c] ss:$36 sps:$4 sm:$0xff]  }
 0x191   :  { %2856 = vmatmul.mubr.bf16.gmra.mrb[72].mxu1 %v5764_v33  ;;  %v5840_v33 = vld [vmem:[%s7703_s0 + $0x878] ss:$36 sps:$4 sm:$0xff]  }
 0x192   :  { %3306 = vmatmul.mubr.bf16.gmra.mrb[8].mxu0 %v5765_v34  ;;  %2863 = vmatprep.mubr.bf16.mxu1 %v5766_v35  ;;  %v5841_v34 = vld [vmem:[%s7703_s0 + $0x408] ss:$36 sps:$4 sm:$0xff]  }
 0x193   :  { %3313 = vmatprep.mubr.bf16.mxu0 %v5768_v37  ;;  %v5842_v35 = vld [vmem:[%s7703_s0 + $0x8c4] ss:$36 sps:$4 sm:$0xff]   ;;  %v5844_v37 = vld [vmem:[%s7703_s0 + $0x454] ss:$36 sps:$4 sm:$0xff]  }
 0x199   :  { %2864 = vmatmul.mubr.bf16.gmra.mrb[76].mxu1 %v5770_v38  ;;  %v5846_v38 = vld [vmem:[%s7703_s0 + $0x8c0] ss:$36 sps:$4 sm:$0xff]  }
 0x19a   :  { %3314 = vmatmul.mubr.bf16.gmra.mrb[12].mxu0 %v5771_v6  ;;  %2871 = vmatprep.mubr.bf16.mxu1 %v5772_v40  ;;  %v5847_v6 = vld [vmem:[%s7703_s0 + $0x450] ss:$36 sps:$4 sm:$0xff]   ;;  %v5850_v40 = vld [vmem:[%s7703_s0 + $0x20] ss:$36 sps:$4 sm:$0xff]  }
 0x19b   :  { %3321 = vmatprep.mubr.bf16.mxu0 %v5774_v41  ;;  %v5848_v41 = vld [vmem:[%s7703_s0 + $0x49c] ss:$36 sps:$4 sm:$0xff]  }
 0x1a1   :  { %2872 = vmatmul.mubr.bf16.gmra.mrb[80].mxu1 %v5776_v42  ;;  %v5852_v42 = vld [vmem:[%s7703_s0 + $0x68] ss:$36 sps:$4 sm:$0xff]  }
 0x1a2   :  { %3322 = vmatmul.mubr.bf16.gmra.mrb[16].mxu0 %v5777_v43  ;;  %2879 = vmatprep.mubr.bf16.mxu1 %v5779_v45  ;;  %v5851_v43 = vld [vmem:[%s7703_s0 + $0x498] ss:$36 sps:$4 sm:$0xff]   ;;  %v5855_v45 = vld [vmem:[%s7703_s0 + $0xb0] ss:$36 sps:$4 sm:$0xff]  }
 0x1a3   :  { %3329 = vmatprep.mubr.bf16.mxu0 %v5781_v46  ;;  %v5853_v46 = vld [vmem:[%s7703_s0 + $0x4e4] ss:$36 sps:$4 sm:$0xff]  }
 0x1a9   :  { %2880 = vmatmul.mubr.bf16.gmra.mrb[84].mxu1 %v5783_v47  ;;  %v5857_v47 = vld [vmem:[%s7703_s0 + $0xf8] ss:$36 sps:$4 sm:$0xff]  }
 0x1aa   :  { %3330 = vmatmul.mubr.bf16.gmra.mrb[20].mxu0 %v5784_v50  ;;  %2887 = vmatprep.mubr.bf16.mxu1 %v5785_v51  ;;  %v5856_v50 = vld [vmem:[%s7703_s0 + $0x4e0] ss:$36 sps:$4 sm:$0xff]  }
 0x1ab   :  { %3337 = vmatprep.mubr.bf16.mxu0 %v5787_v53  ;;  %v5860_v51 = vld [vmem:[%s7703_s0 + $0x140] ss:$36 sps:$4 sm:$0xff]   ;;  %v5858_v53 = vld [vmem:[%s7703_s0 + $0x52c] ss:$36 sps:$4 sm:$0xff]  }
 0x1b1   :  { %2888 = vmatmul.mubr.bf16.gmra.mrb[88].mxu1 %v5789_v54  ;;  %v5862_v54 = vld [vmem:[%s7703_s0 + $0x188] ss:$36 sps:$4 sm:$0xff]  }
 0x1b2   :  { %3338 = vmatmul.mubr.bf16.gmra.mrb[24].mxu0 %v5790_v55  ;;  %2895 = vmatprep.mubr.bf16.mxu1 %v5791_v56  ;;  %v5861_v55 = vld [vmem:[%s7703_s0 + $0x528] ss:$36 sps:$4 sm:$0xff]   ;;  %v5865_v56 = vld [vmem:[%s7703_s0 + $0x1d0] ss:$36 sps:$4 sm:$0xff]  }
 0x1b3   :  { %3345 = vmatprep.mubr.bf16.mxu0 %v5793_v58  ;;  %v5863_v58 = vld [vmem:[%s7703_s0 + $0x574] ss:$36 sps:$4 sm:$0xff]  }
 0x1b9   :  { %2896 = vmatmul.mubr.bf16.gmra.mrb[92].mxu1 %v5795_v59 }
 0x1ba   :  { %3346 = vmatmul.mubr.bf16.gmra.mrb[28].mxu0 %v5796_v61  ;;  %2903 = vmatprep.mubr.bf16.mxu1 %v5798_v62  ;;  %v5867_v62 = vld [vmem:[%s7703_s0 + $0x218] ss:$36 sps:$4 sm:$0xff]  }
 0x1bb   :  { %3353 = vmatprep.mubr.bf16.mxu0 %v5800_v63 }
 0x1c1   :  { %2904 = vmatmul.mubr.bf16.gmra.mrb[96].mxu1 %v5802_v1  ;;  %v5866_v1 = vld [vmem:[%s7703_s0 + $0x570] ss:$36 sps:$4 sm:$0xff]  }
 0x1c2   :  { %3354 = vmatmul.mubr.bf16.gmra.mrb[32].mxu0 %v5803_v3  ;;  %2911 = vmatprep.mubr.bf16.mxu1 %v5804_v4  ;;  %v5870_v3 = vld [vmem:[%s7703_s0 + $0x260] ss:$36 sps:$4 sm:$0xff]  }
 0x1c3   :  { %3361 = vmatprep.mubr.bf16.mxu0 %v5806_v7  ;;  %v5868_v7 = vld [vmem:[%s7703_s0 + $0x5bc] ss:$36 sps:$4 sm:$0xff]  }
 0x1c9   :  { %2912 = vmatmul.mubr.bf16.gmra.mrb[100].mxu1 %v5808_v8 }
 0x1ca   :  { %3362 = vmatmul.mubr.bf16.gmra.mrb[36].mxu0 %v5809_v9  ;;  %2919 = vmatprep.mubr.bf16.mxu1 %v5810_v10  ;;  %v5872_v10 = vld [vmem:[%s7703_s0 + $0x2a8] ss:$36 sps:$4 sm:$0xff]  }
 0x1cb   :  { %3369 = vmatprep.mubr.bf16.mxu0 %v5812_v12 }
 0x1d1   :  { %2920 = vmatmul.mubr.bf16.gmra.mrb[104].mxu1 %v5814_v13  ;;  %v5871_v13 = vld [vmem:[%s7703_s0 + $0x5b8] ss:$36 sps:$4 sm:$0xff]  }
 0x1d2   :  { %3370 = vmatmul.mubr.bf16.gmra.mrb[40].mxu0 %v5815_v15  ;;  %2927 = vmatprep.mubr.bf16.mxu1 %v5817_v16  ;;  %v5875_v15 = vld [vmem:[%s7703_s0 + $0x2f0] ss:$36 sps:$4 sm:$0xff]  }
 0x1d3   :  { %3377 = vmatprep.mubr.bf16.mxu0 %v5819_v17  ;;  %v5873_v17 = vld [vmem:[%s7703_s0 + $0x604] ss:$36 sps:$4 sm:$0xff]  }
 0x1d9   :  { %2928 = vmatmul.mubr.bf16.gmra.mrb[108].mxu1 %v5821_v18 }
 0x1da   :  { %3378 = vmatmul.mubr.bf16.gmra.mrb[44].mxu0 %v5822_v20  ;;  %2935 = vmatprep.mubr.bf16.mxu1 %v5823_v21  ;;  %v5877_v21 = vld [vmem:[%s7703_s0 + $0x338] ss:$36 sps:$4 sm:$0xff]  }
 0x1db   :  { %3385 = vmatprep.mubr.bf16.mxu0 %v5825_v23 }
 0x1e1   :  { %2936 = vmatmul.mubr.bf16.gmra.mrb[112].mxu1 %v5827_v24  ;;  %v5876_v24 = vld [vmem:[%s7703_s0 + $0x600] ss:$36 sps:$4 sm:$0xff]  }
 0x1e2   :  { %3386 = vmatmul.mubr.bf16.gmra.mrb[48].mxu0 %v5828_v25  ;;  %2943 = vmatprep.mubr.bf16.mxu1 %v5829_v26  ;;  %v5880_v25 = vld [vmem:[%s7703_s0 + $0x380] ss:$36 sps:$4 sm:$0xff]  }
 0x1e3   :  { %3393 = vmatprep.mubr.bf16.mxu0 %v5831_v28  ;;  %v5878_v28 = vld [vmem:[%s7703_s0 + $0x64c] ss:$36 sps:$4 sm:$0xff]  }
 0x1e9   :  { %2944 = vmatmul.mubr.bf16.gmra.mrb[116].mxu1 %v5833_v0 }
 0x1ea   :  { %3394 = vmatmul.mubr.bf16.gmra.mrb[52].mxu0 %v5834_v30  ;;  %2951 = vmatprep.mubr.bf16.mxu1 %v5836_v31  ;;  %v5882_v31 = vld [vmem:[%s7703_s0 + $0x3c8] ss:$36 sps:$4 sm:$0xff]  }
 0x1eb   :  { %3401 = vmatprep.mubr.bf16.mxu0 %v5838_v32 }
 0x1f1   :  { %2952 = vmatmul.mubr.bf16.gmra.mrb[120].mxu1 %v5840_v33  ;;  %v5881_v33 = vld [vmem:[%s7703_s0 + $0x648] ss:$36 sps:$4 sm:$0xff]  }
 0x1f2   :  { %3402 = vmatmul.mubr.bf16.gmra.mrb[56].mxu0 %v5841_v34  ;;  %2959 = vmatprep.mubr.bf16.mxu1 %v5842_v35  ;;  %v5885_v34 = vld [vmem:[%s7703_s0 + $0x410] ss:$36 sps:$4 sm:$0xff]  }
 0x1f3   :  { %3409 = vmatprep.mubr.bf16.mxu0 %v5844_v37  ;;  %v5883_v37 = vld [vmem:[%s7703_s0 + $0x694] ss:$36 sps:$4 sm:$0xff]  }
 0x1f9   :  { %2960 = vmatmul.mubr.bf16.gmra.mrb[124].mxu1 %v5846_v38 }
 0x1fa   :  { %3410 = vmatmul.mubr.bf16.gmra.mrb[60].mxu0 %v5847_v6  ;;  %4959 = vmatprep.mubr.bf16.mxu1 %v5850_v40  ;;  %v5887_v40 = vld [vmem:[%s7703_s0 + $0x458] ss:$36 sps:$4 sm:$0xff]  }
 0x1fb   :  { %3417 = vmatprep.mubr.bf16.mxu0 %v5848_v41 }
 0x201   :  { %4960 = vmatmul.mubr.bf16.vlgmr.msra.gmra.mrb[128].mxu1 %v5852_v42  ;;  %v5886_v42 = vld [vmem:[%s7703_s0 + $0x690] ss:$36 sps:$4 sm:$0xff]  }
 0x202   :  { %3418 = vmatmul.mubr.bf16.gmra.mrb[64].mxu0 %v5851_v43  ;;  %4963 = vmatprep.mubr.bf16.mxu1 %v5855_v45  ;;  %v5890_v43 = vld [vmem:[%s7703_s0 + $0x4a0] ss:$36 sps:$4 sm:$0xff]  }
 0x203   :  { %3425 = vmatprep.mubr.bf16.mxu0 %v5853_v46  ;;  %v5888_v46 = vld [vmem:[%s7703_s0 + $0x6dc] ss:$36 sps:$4 sm:$0xff]  }
 0x209   :  { %4964 = vmatmul.mubr.bf16.gmra.mrb[132].mxu1 %v5857_v47 }
 0x20a   :  { %3426 = vmatmul.mubr.bf16.gmra.mrb[68].mxu0 %v5856_v50  ;;  %4967 = vmatprep.mubr.bf16.mxu1 %v5860_v51  ;;  %v5892_v51 = vld [vmem:[%s7703_s0 + $0x4e8] ss:$36 sps:$4 sm:$0xff]  }
 0x20b   :  { %3433 = vmatprep.mubr.bf16.mxu0 %v5858_v53 }
 0x211   :  { %4968 = vmatmul.mubr.bf16.gmra.mrb[136].mxu1 %v5862_v54  ;;  %v5891_v54 = vld [vmem:[%s7703_s0 + $0x6d8] ss:$36 sps:$4 sm:$0xff]  }
 0x212   :  { %3434 = vmatmul.mubr.bf16.gmra.mrb[72].mxu0 %v5861_v55  ;;  %4971 = vmatprep.mubr.bf16.mxu1 %v5865_v56  ;;  %v5895_v55 = vld [vmem:[%s7703_s0 + $0x530] ss:$36 sps:$4 sm:$0xff]  }
 0x213   :  { %3441 = vmatprep.mubr.bf16.mxu0 %v5863_v58  ;;  %v5893_v58 = vld [vmem:[%s7703_s0 + $0x724] ss:$36 sps:$4 sm:$0xff]  }
 0x214   :  { %v7060_v59 = vpop.f32.mrb[32].mxu1 }
 0x215   :  { %v2779_v61 = vpop.f32.mrb[33].mxu1 }
 0x216   :  { %v7065_v63 = vpop.f32.mrb[34].mxu1 }
 0x217   :  { %v2782_v4 = vpop.f32.mrb[35].mxu1 }
 0x218   :  { %v5896_v4 = vld [vmem:[%s7703_s0 + $0x720] ss:$36 sps:$4 sm:$0xff]  }
 0x219   :  { %4972 = vmatmul.mubr.bf16.gmra.mrb[140].mxu1 %v5867_v62 }
 0x21a   :  { %3442 = vmatmul.mubr.bf16.gmra.mrb[76].mxu0 %v5866_v1  ;;  %4975 = vmatprep.mubr.bf16.mxu1 %v5870_v3  ;;  %v5897_v1 = vld [vmem:[%s7703_s0 + $0x578] ss:$36 sps:$4 sm:$0xff]  }
 0x21b   :  { %3449 = vmatprep.mubr.bf16.mxu0 %v5868_v7  ;;  %v5900_v7 = vld [vmem:[%s7703_s0 + $0x5c0] ss:$36 sps:$4 sm:$0xff]  }
 0x21c   :  { %v7076_v8 = vpop.f32.mrb[36].mxu1 }
 0x21d   :  { %v2787_v9 = vpop.f32.mrb[37].mxu1 }
 0x21e   :  { %v7081_v12 = vpop.f32.mrb[38].mxu1 }
 0x21f   :  { %v2790_v16 = vpop.f32.mrb[39].mxu1 }
 0x220   :  { %v5902_v16 = vld [vmem:[%s7703_s0 + $0x608] ss:$36 sps:$4 sm:$0xff]  }
 0x221   :  { %4976 = vmatmul.mubr.bf16.gmra.mrb[144].mxu1 %v5872_v10  ;;  %v5898_v10 = vld [vmem:[%s7703_s0 + $0x76c] ss:$36 sps:$4 sm:$0xff]  }
 0x222   :  { %3450 = vmatmul.mubr.bf16.gmra.mrb[80].mxu0 %v5871_v13  ;;  %4979 = vmatprep.mubr.bf16.mxu1 %v5875_v15 }
 0x223   :  { %3457 = vmatprep.mubr.bf16.mxu0 %v5873_v17 }
 0x224   :  { %v7092_v18 = vpop.f32.mrb[40].mxu1 }
 0x225   :  { %v2795_v20 = vpop.f32.mrb[41].mxu1 }
 0x226   :  { %v7097_v23 = vpop.f32.mrb[42].mxu1  ;;  %v5901_v20 = vld [vmem:[%s7703_s0 + $0x768] ss:$36 sps:$4 sm:$0xff]  }
 0x227   :  { %v2798_v26 = vpop.f32.mrb[43].mxu1 }
 0x228   :  { %v7191_v26 = vld [vmem:[%s7704_s2] ss:$0 sm:$0xff] }
 0x229   :  { %4980 = vmatmul.mubr.bf16.gmra.mrb[148].mxu1 %v5877_v21  ;;  %v5905_v21 = vld [vmem:[%s7703_s0 + $0x650] ss:$36 sps:$4 sm:$0xff]  }
 0x22a   :  { %3458 = vmatmul.mubr.bf16.gmra.mrb[84].mxu0 %v5876_v24  ;;  %4983 = vmatprep.mubr.bf16.mxu1 %v5880_v25  ;;  %v5903_v25 = vld [vmem:[%s7703_s0 + $0x7b4] ss:$36 sps:$4 sm:$0xff]  }
 0x22b   :  { %3465 = vmatprep.mubr.bf16.mxu0 %v5878_v28  ;;  %v2425_v28 = vadd.f32 %v7191_v26, %v6622_v49  ;;  %v5906_v49 = vld [vmem:[%s7703_s0 + $0x7b0] ss:$36 sps:$4 sm:$0xff]  }
 0x22c   :  { %v7108_v0 = vpop.f32.mrb[44].mxu1 }
 0x22d   :  { %v2803_v30 = vpop.f32.mrb[45].mxu1 }
 0x22e   :  { %v7113_v32 = vpop.f32.mrb[46].mxu1 }
 0x22f   :  { %v2806_v35 = vpop.f32.mrb[47].mxu1 }
 0x230   :  { %v2428_v35 = vadd.f32 %v7191_v26, %v6627_v52 }
 0x231   :  { %4984 = vmatmul.mubr.bf16.gmra.mrb[152].mxu1 %v5882_v31 }
 0x232   :  { %3466 = vmatmul.mubr.bf16.gmra.mrb[88].mxu0 %v5881_v33  ;;  %4987 = vmatprep.mubr.bf16.mxu1 %v5885_v34  ;;  %v5907_v34 = vld [vmem:[%s7703_s0 + $0x698] ss:$36 sps:$4 sm:$0xff]  }
 0x233   :  { %3473 = vmatprep.mubr.bf16.mxu0 %v5883_v37 }
 0x234   :  { %v7124_v38 = vpop.f32.mrb[48].mxu1 }
 0x235   :  { %v2811_v6 = vpop.f32.mrb[49].mxu1 }
 0x236   :  { %v7129_v41 = vpop.f32.mrb[50].mxu1 }
 0x237   :  { %v2814_v45 = vpop.f32.mrb[51].mxu1 }
 0x239   :  { %4988 = vmatmul.mubr.bf16.gmra.mrb[156].mxu1 %v5887_v40 }
 0x23a   :  { %3474 = vmatmul.mubr.bf16.gmra.mrb[92].mxu0 %v5886_v42  ;;  %4991 = vmatprep.mubr.bf16.mxu1 %v5890_v43  ;;  %v5910_v42 = vld [vmem:[%s7703_s0 + $0x6e0] ss:$36 sps:$4 sm:$0xff]  }
 0x23b   :  { %3481 = vmatprep.mubr.bf16.mxu0 %v5888_v46  ;;  %v5908_v46 = vld [vmem:[%s7703_s0 + $0x7fc] ss:$36 sps:$4 sm:$0xff]  }
 0x23c   :  { %v7140_v47 = vpop.f32.mrb[52].mxu1 }
 0x23d   :  { %v2819_v50 = vpop.f32.mrb[53].mxu1 }
 0x23e   :  { %v7145_v53 = vpop.f32.mrb[54].mxu1 }
 0x23f   :  { %v2822_v56 = vpop.f32.mrb[55].mxu1 }
 0x241   :  { %4992 = vmatmul.mubr.bf16.gmra.mrb[160].mxu1 %v5892_v51  ;;  %v2433_v51 = vadd.f32 %v7191_v26, %v6638_v57  ;;  %v5911_v57 = vld [vmem:[%s7703_s0 + $0x7f8] ss:$36 sps:$4 sm:$0xff]  }
 0x242   :  { %3482 = vmatmul.mubr.bf16.gmra.mrb[96].mxu0 %v5891_v54  ;;  %4995 = vmatprep.mubr.bf16.mxu1 %v5895_v55 }
 0x243   :  { %3489 = vmatprep.mubr.bf16.mxu0 %v5893_v58  ;;  %v5912_v58 = vld [vmem:[%s7703_s0 + $0x728] ss:$36 sps:$4 sm:$0xff]  }
 0x244   :  { %v7156_v61 = vpop.f32.mrb[56].mxu1 }
 0x245   :  { %v2827_v62 = vpop.f32.mrb[57].mxu1 }
 0x246   :  { %v7161_v3 = vpop.f32.mrb[58].mxu1  ;;  %v2436_v62 = vadd.f32 %v7191_v26, %v6643_v60 }
 0x247   :  { %v2830_v9 = vpop.f32.mrb[59].mxu1 }
 0x248   :  { %v5915_v9 = vld [vmem:[%s7703_s0 + $0x770] ss:$36 sps:$4 sm:$0xff]  }
 0x249   :  { %4996 = vmatmul.mubr.bf16.gmra.mrb[164].mxu1 %v5897_v1 }
 0x24a   :  { %3490 = vmatmul.mubr.bf16.gmra.mrb[100].mxu0 %v5896_v4  ;;  %4999 = vmatprep.mubr.bf16.mxu1 %v5900_v7 }
 0x24b   :  { %3497 = vmatprep.mubr.bf16.mxu0 %v5898_v10 }
 0x24c   :  { %v7172_v13 = vpop.f32.mrb[60].mxu1 }
 0x24d   :  { %v2835_v15 = vpop.f32.mrb[61].mxu1 }
 0x24e   :  { %v7177_v17 = vpop.f32.mrb[62].mxu1 }
 0x24f   :  { %v2838_v24 = vpop.f32.mrb[63].mxu1 }
 0x251   :  { %5000 = vmatmul.mubr.bf16.gmra.mrb[168].mxu1 %v5902_v16  ;;  %v5913_v16 = vld [vmem:[%s7703_s0 + $0x844] ss:$36 sps:$4 sm:$0xff]  }
 0x252   :  { %3498 = vmatmul.mubr.bf16.gmra.mrb[104].mxu0 %v5901_v20  ;;  %5003 = vmatprep.mubr.bf16.mxu1 %v5905_v21  ;;  %v2441_v21 = vadd.f32 %v7191_v26, %v6654_v2  ;;  %v5916_v2 = vld [vmem:[%s7703_s0 + $0x840] ss:$36 sps:$4 sm:$0xff]  }
 0x253   :  { %3505 = vmatprep.mubr.bf16.mxu0 %v5903_v25 }
 0x254   :  { %v7195_v30 = vpop.f32.mrb[64].mxu1 }
 0x255   :  { %v3291_v31 = vpop.f32.mrb[0].mxu0  ;;  %v2843_v33 = vpop.f32.mrb[65].mxu1 }
 0x256   :  { %v7202_v37 = vadd.f32 %v3291_v31, %v2425_v28  ;;  %v3293_v6 = vpop.f32.mrb[1].mxu0  ;;  %v7204_v40 = vpop.f32.mrb[66].mxu1  ;;  %v5917_v31 = vld [vmem:[%s7703_s0 + $0x7b8] ss:$36 sps:$4 sm:$0xff]   ;;  %v2444_v33 = vadd.f32 %v7191_v26, %v6659_v5 }
 0x257   :  { %v3294_v43 = vpop.f32.mrb[2].mxu0  ;;  %v2846_v45 = vpop.f32.mrb[67].mxu1 }
 0x258   :  { %v7215_v52 = vadd.f32 %v3294_v43, %v2428_v35  ;;  %v3296_v50 = vpop.f32.mrb[3].mxu0  ;;  %v5918_v45 = vld [vmem:[%s7703_s0 + $0x88c] ss:$36 sps:$4 sm:$0xff]  }
 0x259   :  { %5004 = vmatmul.mubr.bf16.gmra.mrb[172].mxu1 %v5907_v34  ;;  %v2449_v50 = vadd.f32 %v7191_v26, %v6670_v11  ;;  %v5921_v11 = vld [vmem:[%s7703_s0 + $0x888] ss:$36 sps:$4 sm:$0xff]  }
 0x25a   :  { %3506 = vmatmul.mubr.bf16.gmra.mrb[108].mxu0 %v5906_v49  ;;  %5007 = vmatprep.mubr.bf16.mxu1 %v5910_v42  ;;  %v5920_v49 = vld [vmem:[%s7703_s0 + $0x800] ss:$36 sps:$4 sm:$0xff]  }
 0x25b   :  { %3513 = vmatprep.mubr.bf16.mxu0 %v5908_v46 }
 0x25c   :  { %v7219_v54 = vpop.f32.mrb[68].mxu1 }
 0x25d   :  { %v3299_v55 = vpop.f32.mrb[4].mxu0  ;;  %v2851_v56 = vpop.f32.mrb[69].mxu1 }
 0x25e   :  { %v7226_v1 = vadd.f32 %v3299_v55, %v2433_v51  ;;  %v3301_v4 = vpop.f32.mrb[5].mxu0  ;;  %v7228_v7 = vpop.f32.mrb[70].mxu1 }
 0x25f   :  { %v3302_v10 = vpop.f32.mrb[6].mxu0  ;;  %v2854_v15 = vpop.f32.mrb[71].mxu1 }
 0x260   :  { %v7239_v60 = vadd.f32 %v3302_v10, %v2436_v62  ;;  %v3304_v20 = vpop.f32.mrb[7].mxu0  ;;  %v2452_v62 = vadd.f32 %v7191_v26, %v6675_v14  ;;  %v5925_v10 = vld [vmem:[%s7703_s0 + $0x890] ss:$36 sps:$4 sm:$0xff]  }
 0x261   :  { %5008 = vmatmul.mubr.bf16.gmra.mrb[176].mxu1 %v5912_v58  ;;  %v5922_v58 = vld [vmem:[%s7703_s0 + $0x848] ss:$36 sps:$4 sm:$0xff]   ;;  %v5923_v20 = vld [vmem:[%s7703_s0 + $0x8d4] ss:$36 sps:$4 sm:$0xff]  }
 0x262   :  { %3514 = vmatmul.mubr.bf16.gmra.mrb[112].mxu0 %v5911_v57  ;;  %5011 = vmatprep.mubr.bf16.mxu1 %v5915_v9 }
 0x263   :  { %3521 = vmatprep.mubr.bf16.mxu0 %v5913_v16 }
 0x264   :  { %v7243_v24 = vpop.f32.mrb[72].mxu1 }
 0x265   :  { %v3307_v25 = vpop.f32.mrb[8].mxu0  ;;  %v2859_v28 = vpop.f32.mrb[73].mxu1 }
 0x266   :  { %v7250_v34 = vadd.f32 %v3307_v25, %v2441_v21  ;;  %v3309_v35 = vpop.f32.mrb[9].mxu0  ;;  %v7252_v6 = vpop.f32.mrb[74].mxu1  ;;  %v2457_v25 = vadd.f32 %v7191_v26, %v6686_v19  ;;  %v5926_v19 = vld [vmem:[%s7703_s0 + $0x8d0] ss:$36 sps:$4 sm:$0xff]  }
 0x267   :  { %v3310_v42 = vpop.f32.mrb[10].mxu0  ;;  %v2862_v43 = vpop.f32.mrb[75].mxu1  ;;  %v5927_v35 = vld [vmem:[%s7703_s0 + $0x8d8] ss:$36 sps:$4 sm:$0xff]  }
 0x268   :  { %v7263_v5 = vadd.f32 %v3310_v42, %v2444_v33  ;;  %v3312_v46 = vpop.f32.mrb[11].mxu0 }
 0x269   :  { %5012 = vmatmul.mubr.bf16.gmra.mrb[180].mxu1 %v5917_v31 }
 0x26a   :  { %3522 = vmatmul.mubr.bf16.gmra.mrb[116].mxu0 %v5916_v2  ;;  %5015 = vmatprep.mubr.bf16.mxu1 %v5920_v49  ;;  %v2460_v2 = vadd.f32 %v7191_v26, %v6691_v22 }
 0x26b   :  { %3529 = vmatprep.mubr.bf16.mxu0 %v5918_v45 }
 0x26c   :  { %v7267_v51 = vpop.f32.mrb[76].mxu1 }
 0x26d   :  { %v3315_v55 = vpop.f32.mrb[12].mxu0  ;;  %v2867_v56 = vpop.f32.mrb[77].mxu1 }
 0x26e   :  { %v7274_v4 = vadd.f32 %v3315_v55, %v2449_v50  ;;  %v3317_v57 = vpop.f32.mrb[13].mxu0  ;;  %v7276_v9 = vpop.f32.mrb[78].mxu1  ;;  %v2465_v56 = vadd.f32 %v7191_v26, %v6702_v27  ;;  %v2473_v27 = vadd.f32 %v7191_v26, %v6725_v36  ;;  %v2481_v36 = vadd.f32 %v7191_v26, %v6744_v44 }
 0x26f   :  { %v3318_v15 = vpop.f32.mrb[14].mxu0  ;;  %v2870_v16 = vpop.f32.mrb[79].mxu1  ;;  %v2468_v57 = vadd.f32 %v7191_v26, %v6707_v29  ;;  %v2476_v29 = vadd.f32 %v7191_v26, %v6730_v39  ;;  %v2484_v39 = vadd.f32 %v7191_v26, %v6752_v48  ;;  %v5087_v44 = vadd.f32 %v7191_v26, %v7060_v59 }
 0x270   :  { %v7287_v14 = vadd.f32 %v3318_v15, %v2452_v62  ;;  %v3320_v21 = vpop.f32.mrb[15].mxu0  ;;  %v5089_v48 = vadd.f32 %v7191_v26, %v7065_v63  ;;  %v5091_v59 = vadd.f32 %v7191_v26, %v7076_v8  ;;  %v5093_v63 = vadd.f32 %v7191_v26, %v7081_v12 }
 0x271   :  { %5016 = vmatmul.mubr.bf16.gmra.mrb[184].mxu1 %v5922_v58  ;;  %v5095_v8 = vadd.f32 %v7191_v26, %v7092_v18  ;;  %v5097_v12 = vadd.f32 %v7191_v26, %v7097_v23  ;;  %v5099_v18 = vadd.f32 %v7191_v26, %v7108_v0  ;;  %v5101_v23 = vadd.f32 %v7191_v26, %v7113_v32 }
 0x272   :  { %3530 = vmatmul.mubr.bf16.gmra.mrb[120].mxu0 %v5921_v11  ;;  %5019 = vmatprep.mubr.bf16.mxu1 %v5925_v10  ;;  %v5103_v0 = vadd.f32 %v7191_v26, %v7124_v38  ;;  %v5105_v32 = vadd.f32 %v7191_v26, %v7129_v41  ;;  %v5107_v38 = vadd.f32 %v7191_v26, %v7140_v47 }
 0x273   :  { %3537 = vmatprep.mubr.bf16.mxu0 %v5923_v20  ;;  %v5109_v41 = vadd.f32 %v7191_v26, %v7145_v53  ;;  %v5111_v47 = vadd.f32 %v7191_v26, %v7156_v61  ;;  %v5113_v53 = vadd.f32 %v7191_v26, %v7161_v3  ;;  %v5115_v61 = vadd.f32 %v7191_v26, %v7172_v13 }
 0x274   :  { %v7291_v28 = vpop.f32.mrb[80].mxu1  ;;  %v5117_v3 = vadd.f32 %v7191_v26, %v7177_v17  ;;  %v5119_v13 = vadd.f32 %v7191_v26, %v7195_v30  ;;  %v5121_v17 = vadd.f32 %v7191_v26, %v7204_v40 }
 0x275   :  { %v3323_v31 = vpop.f32.mrb[16].mxu0  ;;  %v2875_v33 = vpop.f32.mrb[81].mxu1 }
 0x276   :  { %v7298_v49 = vadd.f32 %v3323_v31, %v2457_v25  ;;  %v3325_v42 = vpop.f32.mrb[17].mxu0  ;;  %v7300_v43 = vpop.f32.mrb[82].mxu1 }
 0x277   :  { %v3326_v45 = vpop.f32.mrb[18].mxu0  ;;  %v2878_v46 = vpop.f32.mrb[83].mxu1 }
 0x278   :  { %v7305_v50 = vadd.f32 %v3326_v45, %v2460_v2  ;;  %v3328_v55 = vpop.f32.mrb[19].mxu0 }
 0x279   :  { %5020 = vmatmul.mubr.bf16.gmra.mrb[188].mxu1 %v5927_v35 }
 0x27a   :  { %3538 = vmatmul.mubr.bf16.gmra.mrb[124].mxu0 %v5926_v19 }
 0x27c   :  { %v7309_v22 = vpop.f32.mrb[84].mxu1 }
 0x27d   :  { %v3331_v58 = vpop.f32.mrb[20].mxu0  ;;  %v2883_v62 = vpop.f32.mrb[85].mxu1 }
 0x27e   :  { %v7313_v11 = vadd.f32 %v3331_v58, %v2465_v56  ;;  %v3333_v10 = vpop.f32.mrb[21].mxu0  ;;  %v7315_v15 = vpop.f32.mrb[86].mxu1 }
 0x27f   :  { %v3334_v16 = vpop.f32.mrb[22].mxu0  ;;  %v2886_v20 = vpop.f32.mrb[87].mxu1 }
 0x280   :  { %v7317_v21 = vadd.f32 %v3334_v16, %v2468_v57  ;;  %v3336_v25 = vpop.f32.mrb[23].mxu0 }
 0x284   :  { %v7321_v31 = vpop.f32.mrb[88].mxu1 }
 0x285   :  { %v3339_v33 = vpop.f32.mrb[24].mxu0  ;;  %v2891_v35 = vpop.f32.mrb[89].mxu1 }
 0x286   :  { %v7325_v2 = vadd.f32 %v3339_v33, %v2473_v27  ;;  %v3341_v42 = vpop.f32.mrb[25].mxu0  ;;  %v7327_v19 = vpop.f32.mrb[90].mxu1 }
 0x287   :  { %v3342_v45 = vpop.f32.mrb[26].mxu0  ;;  %v2894_v46 = vpop.f32.mrb[91].mxu1 }
 0x288   :  { %v7329_v55 = vadd.f32 %v3342_v45, %v2476_v29  ;;  %v3344_v56 = vpop.f32.mrb[27].mxu0 }
 0x28c   :  { %v7333_v58 = vpop.f32.mrb[92].mxu1 }
 0x28d   :  { %v3347_v62 = vpop.f32.mrb[28].mxu0  ;;  %v2899_v57 = vpop.f32.mrb[93].mxu1 }
 0x28e   :  { %v7337_v10 = vadd.f32 %v3347_v62, %v2481_v36  ;;  %v3349_v16 = vpop.f32.mrb[29].mxu0  ;;  %v7339_v20 = vpop.f32.mrb[94].mxu1 }
 0x28f   :  { %v3350_v25 = vpop.f32.mrb[30].mxu0  ;;  %v2902_v27 = vpop.f32.mrb[95].mxu1 }
 0x290   :  { %v7341_v33 = vadd.f32 %v3350_v25, %v2484_v39  ;;  %v3352_v35 = vpop.f32.mrb[31].mxu0 }
 0x294   :  { %v7345_v29 = vpop.f32.mrb[96].mxu1 }
 0x295   :  { %7706 = vst [vmem:[#allocation2_spill] sm:$0xff] %v7345_v29  ;;  %v3355_v42 = vpop.f32.mrb[32].mxu0  ;;  %v2907_v45 = vpop.f32.mrb[97].mxu1 }
 0x296   :  { %v7349_v46 = vadd.f32 %v5087_v44, %v3355_v42  ;;  %v3357_v56 = vpop.f32.mrb[33].mxu0  ;;  %v7351_v36 = vpop.f32.mrb[98].mxu1 }
 0x297   :  { %7707 = vst [vmem:[#allocation3_spill] sm:$0xff] %v7351_v36  ;;  %v3358_v62 = vpop.f32.mrb[34].mxu0  ;;  %v2910_v57 = vpop.f32.mrb[99].mxu1 }
 0x298   :  { %v7353_v39 = vadd.f32 %v5089_v48, %v3358_v62  ;;  %v3360_v16 = vpop.f32.mrb[35].mxu0 }
 0x29c   :  { %v7357_v25 = vpop.f32.mrb[100].mxu1 }
 0x29d   :  { %7708 = vst [vmem:[#allocation4_spill] sm:$0xff] %v7357_v25  ;;  %v3363_v27 = vpop.f32.mrb[36].mxu0  ;;  %v2915_v35 = vpop.f32.mrb[101].mxu1 }
 0x29e   :  { %v7361_v44 = vadd.f32 %v5091_v59, %v3363_v27  ;;  %v3365_v42 = vpop.f32.mrb[37].mxu0  ;;  %v7363_v45 = vpop.f32.mrb[102].mxu1 }
 0x29f   :  { %7709 = vst [vmem:[#allocation5_spill] sm:$0xff] %v7363_v45  ;;  %v3366_v56 = vpop.f32.mrb[38].mxu0  ;;  %v2918_v57 = vpop.f32.mrb[103].mxu1 }
 0x2a0   :  { %v7365_v48 = vadd.f32 %v5093_v63, %v3366_v56  ;;  %v3368_v62 = vpop.f32.mrb[39].mxu0 }
 0x2a4   :  { %v7369_v16 = vpop.f32.mrb[104].mxu1 }
 0x2a5   :  { %7710 = vst [vmem:[#allocation6_spill] sm:$0xff] %v7369_v16  ;;  %v3371_v25 = vpop.f32.mrb[40].mxu0  ;;  %v2923_v35 = vpop.f32.mrb[105].mxu1 }
 0x2a6   :  { %v7373_v59 = vadd.f32 %v5095_v8, %v3371_v25  ;;  %v3373_v27 = vpop.f32.mrb[41].mxu0  ;;  %v7375_v42 = vpop.f32.mrb[106].mxu1 }
 0x2a7   :  { %7711 = vst [vmem:[#allocation7_spill] sm:$0xff] %v7375_v42  ;;  %v3374_v45 = vpop.f32.mrb[42].mxu0  ;;  %v2926_v57 = vpop.f32.mrb[107].mxu1 }
 0x2a8   :  { %v7377_v63 = vadd.f32 %v5097_v12, %v3374_v45  ;;  %v3376_v56 = vpop.f32.mrb[43].mxu0 }
 0x2ac   :  { %v7381_v62 = vpop.f32.mrb[108].mxu1 }
 0x2ad   :  { %7712 = vst [vmem:[#allocation8_spill] sm:$0xff] %v7381_v62  ;;  %v3379_v16 = vpop.f32.mrb[44].mxu0  ;;  %v2931_v35 = vpop.f32.mrb[109].mxu1 }
 0x2ae   :  { %v7385_v25 = vadd.f32 %v5099_v18, %v3379_v16  ;;  %v3381_v8 = vpop.f32.mrb[45].mxu0  ;;  %v7387_v27 = vpop.f32.mrb[110].mxu1 }
 0x2af   :  { %7713 = vst [vmem:[#allocation9_spill] sm:$0xff] %v7387_v27  ;;  %v3382_v42 = vpop.f32.mrb[46].mxu0  ;;  %v2934_v57 = vpop.f32.mrb[111].mxu1 }
 0x2b0   :  { %v7389_v45 = vadd.f32 %v5101_v23, %v3382_v42  ;;  %v3384_v12 = vpop.f32.mrb[47].mxu0 }
 0x2b4   :  { %v7393_v56 = vpop.f32.mrb[112].mxu1 }
 0x2b5   :  { %7714 = vst [vmem:[#allocation10_spill] sm:$0xff] %v7393_v56  ;;  %v3387_v62 = vpop.f32.mrb[48].mxu0  ;;  %v2939_v35 = vpop.f32.mrb[113].mxu1 }
 0x2b6   :  { %v7397_v16 = vadd.f32 %v5103_v0, %v3387_v62  ;;  %v3389_v18 = vpop.f32.mrb[49].mxu0  ;;  %v7399_v8 = vpop.f32.mrb[114].mxu1 }
 0x2b7   :  { %7715 = vst [vmem:[#allocation11_spill] sm:$0xff] %v7399_v8  ;;  %v3390_v27 = vpop.f32.mrb[50].mxu0  ;;  %v2942_v57 = vpop.f32.mrb[115].mxu1 }
 0x2b8   :  { %v7401_v42 = vadd.f32 %v5105_v32, %v3390_v27  ;;  %v3392_v23 = vpop.f32.mrb[51].mxu0 }
 0x2bc   :  { %v7405_v12 = vpop.f32.mrb[116].mxu1 }
 0x2bd   :  { %7716 = vst [vmem:[#allocation12_spill] sm:$0xff] %v7405_v12  ;;  %v3395_v56 = vpop.f32.mrb[52].mxu0  ;;  %v2947_v35 = vpop.f32.mrb[117].mxu1 }
 0x2be   :  { %v7409_v62 = vadd.f32 %v5107_v38, %v3395_v56  ;;  %v3397_v0 = vpop.f32.mrb[53].mxu0  ;;  %v7411_v18 = vpop.f32.mrb[118].mxu1 }
 0x2bf   :  { %7717 = vst [vmem:[#allocation13_spill] sm:$0xff] %v7411_v18  ;;  %v3398_v8 = vpop.f32.mrb[54].mxu0  ;;  %v2950_v57 = vpop.f32.mrb[119].mxu1 }
 0x2c0   :  { %v7413_v27 = vadd.f32 %v5109_v41, %v3398_v8  ;;  %v3400_v32 = vpop.f32.mrb[55].mxu0 }
 0x2c4   :  { %v7417_v23 = vpop.f32.mrb[120].mxu1 }
 0x2c5   :  { %7718 = vst [vmem:[#allocation14_spill] sm:$0xff] %v7417_v23  ;;  %v3403_v12 = vpop.f32.mrb[56].mxu0  ;;  %v2955_v35 = vpop.f32.mrb[121].mxu1 }
 0x2c6   :  { %v7421_v56 = vadd.f32 %v5111_v47, %v3403_v12  ;;  %v3405_v38 = vpop.f32.mrb[57].mxu0  ;;  %v7423_v0 = vpop.f32.mrb[122].mxu1 }
 0x2c7   :  { %7719 = vst [vmem:[#allocation15_spill] sm:$0xff] %v7423_v0  ;;  %v3406_v18 = vpop.f32.mrb[58].mxu0  ;;  %v2958_v57 = vpop.f32.mrb[123].mxu1 }
 0x2c8   :  { %v7425_v8 = vadd.f32 %v5113_v53, %v3406_v18  ;;  %v3408_v41 = vpop.f32.mrb[59].mxu0 }
 0x2ca   :  { %7720 = vst [vmem:[#allocation16_spill] sm:$0xff] %v7425_v8 }
 0x2cc   :  { %v7429_v32 = vpop.f32.mrb[124].mxu1 }
 0x2cd   :  { %7721 = vst [vmem:[#allocation17_spill] sm:$0xff] %v7429_v32  ;;  %v3411_v23 = vpop.f32.mrb[60].mxu0  ;;  %v2963_v35 = vpop.f32.mrb[125].mxu1 }
 0x2ce   :  { %v7433_v12 = vadd.f32 %v5115_v61, %v3411_v23  ;;  %v3413_v47 = vpop.f32.mrb[61].mxu0  ;;  %v7435_v38 = vpop.f32.mrb[126].mxu1 }
 0x2cf   :  { %7722 = vst [vmem:[#allocation18_spill] sm:$0xff] %v7435_v38  ;;  %v3414_v0 = vpop.f32.mrb[62].mxu0  ;;  %v2966_v57 = vpop.f32.mrb[127].mxu1 }
 0x2d0   :  { %v7437_v18 = vadd.f32 %v5117_v3, %v3414_v0  ;;  %v3416_v53 = vpop.f32.mrb[63].mxu0 }
 0x2d2   :  { %7723 = vst [vmem:[#allocation19_spill] sm:$0xff] %v7437_v18 }
 0x2d4   :  { %v4961_v41 = vpop.f32.mrb[128].mxu1 }
 0x2d5   :  { %v3419_v32 = vpop.f32.mrb[64].mxu0  ;;  %v3589_v35 = vadd.f32 %v7226_v1, %v4961_v41  ;;  %v3580_v36 = vpop.f32.mrb[129].mxu1 }
 0x2d6   :  { %v7444_v23 = vadd.f32 %v5119_v13, %v3419_v32  ;;  %v3421_v61 = vpop.f32.mrb[65].mxu0  ;;  %v3581_v47 = vadd.f32 %v7202_v37, %v3580_v36  ;;  %v4962_v57 = vpop.f32.mrb[130].mxu1  ;;  %v5123_v32 = vadd.f32 %v7191_v26, %v7219_v54 }
 0x2d7   :  { %v3422_v0 = vpop.f32.mrb[66].mxu0  ;;  %v3592_v3 = vadd.f32 %v7239_v60, %v4962_v57  ;;  %v3583_v53 = vpop.f32.mrb[131].mxu1  ;;  %v3837_v1 = vmax.f32 %v3589_v35, 0.0 }
 0x2d8   :  { %v7448_v38 = vadd.f32 %v5121_v17, %v3422_v0  ;;  %v3424_v30 = vpop.f32.mrb[67].mxu0  ;;  %v3584_v29 = vadd.f32 %v7215_v52, %v3583_v53  ;;  %v3835_v8 = vmax.f32 %v3581_v47, 0.0  ;;  %v5125_v52 = vadd.f32 %v7191_v26, %v7228_v7 }
 0x2d9   :  { %v3838_v41 = vmax.f32 %v3592_v3, 0.0 }
 0x2da   :  { %v3836_v18 = vmax.f32 %v3584_v29, 0.0 }
 0x2db   :  { %v4720_v40 = vpack.c.bf16 %v3838_v41, %v3837_v1  ;;  %v5127_v41 = vadd.f32 %v7191_v26, %v7243_v24 }
 0x2dc   :  { %v4715_v13 = vpack.c.bf16 %v3836_v18, %v3835_v8  ;;  %v4965_v37 = vpop.f32.mrb[132].mxu1 }
 0x2dd   :  { %4872 = vst [vmem:[%s7705_s3 + $0x8] sm:$0xff] %v4720_v40   ;;  %v3427_v60 = vpop.f32.mrb[68].mxu0  ;;  %v3605_v36 = vadd.f32 %v7274_v4, %v4965_v37  ;;  %v3596_v17 = vpop.f32.mrb[133].mxu1 }
 0x2de   :  { %4716 = vst [vmem:[%s7705_s3] sm:$0xff] %v4715_v13   ;;  %v7462_v29 = vadd.f32 %v5123_v32, %v3427_v60  ;;  %v3429_v54 = vpop.f32.mrb[69].mxu0  ;;  %v3597_v8 = vadd.f32 %v7250_v34, %v3596_v17  ;;  %v4966_v18 = vpop.f32.mrb[134].mxu1 }
 0x2df   :  { %v3430_v35 = vpop.f32.mrb[70].mxu0  ;;  %v3608_v61 = vadd.f32 %v7287_v14, %v4966_v18  ;;  %v3599_v47 = vpop.f32.mrb[135].mxu1  ;;  %v3841_v7 = vmax.f32 %v3605_v36, 0.0 }
 0x2e0   :  { %v7466_v57 = vadd.f32 %v5125_v52, %v3430_v35  ;;  %v3432_v4 = vpop.f32.mrb[71].mxu0  ;;  %v3600_v0 = vadd.f32 %v7263_v5, %v3599_v47  ;;  %v3839_v53 = vmax.f32 %v3597_v8, 0.0  ;;  %v5129_v5 = vadd.f32 %v7191_v26, %v7252_v6 }
 0x2e1   :  { %v3842_v3 = vmax.f32 %v3608_v61, 0.0 }
 0x2e2   :  { %v3840_v30 = vmax.f32 %v3600_v0, 0.0  ;;  %v5131_v0 = vadd.f32 %v7191_v26, %v7267_v51 }
 0x2e3   :  { %v4730_v1 = vpack.c.bf16 %v3842_v3, %v3841_v7 }
 0x2e4   :  { %v4725_v40 = vpack.c.bf16 %v3840_v30, %v3839_v53  ;;  %v4969_v34 = vpop.f32.mrb[136].mxu1 }
 0x2e5   :  { %4874 = vst [vmem:[%s7705_s3 + $0x18] sm:$0xff] %v4730_v1   ;;  %v3435_v14 = vpop.f32.mrb[72].mxu0  ;;  %v3621_v32 = vadd.f32 %v7313_v11, %v4969_v34  ;;  %v3612_v13 = vpop.f32.mrb[137].mxu1 }
 0x2e6   :  { %4873 = vst [vmem:[%s7705_s3 + $0x10] sm:$0xff] %v4725_v40   ;;  %v7480_v37 = vadd.f32 %v5127_v41, %v3435_v14  ;;  %v3437_v24 = vpop.f32.mrb[73].mxu0  ;;  %v3613_v60 = vadd.f32 %v7298_v49, %v3612_v13  ;;  %v4970_v36 = vpop.f32.mrb[138].mxu1 }
 0x2e7   :  { %v3438_v17 = vpop.f32.mrb[74].mxu0  ;;  %v3624_v52 = vadd.f32 %v7317_v21, %v4970_v36  ;;  %v3615_v54 = vpop.f32.mrb[139].mxu1  ;;  %v3845_v6 = vmax.f32 %v3621_v32, 0.0 }
 0x2e8   :  { %v7484_v8 = vadd.f32 %v5129_v5, %v3438_v17  ;;  %v3440_v11 = vpop.f32.mrb[75].mxu0  ;;  %v3616_v18 = vadd.f32 %v7305_v50, %v3615_v54  ;;  %v3843_v61 = vmax.f32 %v3613_v60, 0.0  ;;  %v5133_v50 = vadd.f32 %v7191_v26, %v7276_v9 }
 0x2e9   :  { %v3846_v35 = vmax.f32 %v3624_v52, 0.0  ;;  %v5135_v17 = vadd.f32 %v7191_v26, %v7291_v28 }
 0x2ea   :  { %v3844_v47 = vmax.f32 %v3616_v18, 0.0 }
 0x2eb   :  { %v4740_v4 = vpack.c.bf16 %v3846_v35, %v3845_v6 }
 0x2ec   :  { %v4735_v7 = vpack.c.bf16 %v3844_v47, %v3843_v61  ;;  %v4973_v49 = vpop.f32.mrb[140].mxu1 }
 0x2ed   :  { %4876 = vst [vmem:[%s7705_s3 + $0x28] sm:$0xff] %v4740_v4   ;;  %v3443_v21 = vpop.f32.mrb[76].mxu0  ;;  %v3637_v3 = vadd.f32 %v7337_v10, %v4973_v49  ;;  %v3628_v53 = vpop.f32.mrb[141].mxu1 }
 0x2ee   :  { %4875 = vst [vmem:[%s7705_s3 + $0x20] sm:$0xff] %v4735_v7   ;;  %v7498_v30 = vadd.f32 %v5131_v0, %v3443_v21  ;;  %v3445_v51 = vpop.f32.mrb[77].mxu0  ;;  %v3629_v1 = vadd.f32 %v7325_v2, %v3628_v53  ;;  %v4974_v41 = vpop.f32.mrb[142].mxu1 }
 0x2ef   :  { %v3446_v40 = vpop.f32.mrb[78].mxu0  ;;  %v3640_v34 = vadd.f32 %v7341_v33, %v4974_v41  ;;  %v3631_v14 = vpop.f32.mrb[143].mxu1  ;;  %v3849_v9 = vmax.f32 %v3637_v3, 0.0 }
 0x2f0   :  { %v7502_v32 = vadd.f32 %v5133_v50, %v3446_v40  ;;  %v3448_v10 = vpop.f32.mrb[79].mxu0  ;;  %v3632_v13 = vadd.f32 %v7329_v55, %v3631_v14  ;;  %v3847_v24 = vmax.f32 %v3629_v1, 0.0  ;;  %v5137_v55 = vadd.f32 %v7191_v26, %v7300_v43 }
 0x2f1   :  { %v3850_v5 = vmax.f32 %v3640_v34, 0.0  ;;  %v5139_v50 = vadd.f32 %v7191_v26, %v7309_v22 }
 0x2f2   :  { %v3848_v60 = vmax.f32 %v3632_v13, 0.0 }
 0x2f3   :  { %v4750_v36 = vpack.c.bf16 %v3850_v5, %v3849_v9 }
 0x2f4   :  { %v4745_v52 = vpack.c.bf16 %v3848_v60, %v3847_v24  ;;  %v4977_v2 = vpop.f32.mrb[144].mxu1 }
 0x2f5   :  { %4878 = vst [vmem:[%s7705_s3 + $0x38] sm:$0xff] %v4750_v36   ;;  %v3451_v33 = vpop.f32.mrb[80].mxu0  ;;  %v3653_v54 = vadd.f32 %v7361_v44, %v4977_v2  ;;  %v3644_v11 = vpop.f32.mrb[145].mxu1  ;;  %v5143_v2 = vadd.f32 %v7191_v26, %v7321_v31 }
 0x2f6   :  { %4877 = vst [vmem:[%s7705_s3 + $0x30] sm:$0xff] %v4745_v52   ;;  %v7516_v18 = vadd.f32 %v5135_v17, %v3451_v33  ;;  %v3453_v28 = vpop.f32.mrb[81].mxu0  ;;  %v3645_v6 = vadd.f32 %v7349_v46, %v3644_v11  ;;  %v4978_v35 = vpop.f32.mrb[146].mxu1 }
 0x2f7   :  { %v3454_v61 = vpop.f32.mrb[82].mxu0  ;;  %v3656_v47 = vadd.f32 %v7365_v48, %v4978_v35  ;;  %v3647_v4 = vpop.f32.mrb[147].mxu1  ;;  %v3853_v43 = vmax.f32 %v3653_v54, 0.0 }
 0x2f8   :  { %v7520_v0 = vadd.f32 %v5137_v55, %v3454_v61  ;;  %v3456_v44 = vpop.f32.mrb[83].mxu0  ;;  %v3648_v7 = vadd.f32 %v7353_v39, %v3647_v4  ;;  %v3851_v21 = vmax.f32 %v3645_v6, 0.0  ;;  %v5141_v39 = vadd.f32 %v7191_v26, %v7315_v15 }
 0x2f9   :  { %v3854_v49 = vmax.f32 %v3656_v47, 0.0 }
 0x2fa   :  { %v3852_v3 = vmax.f32 %v3648_v7, 0.0 }
 0x2fb   :  { %v4760_v53 = vpack.c.bf16 %v3854_v49, %v3853_v43 }
 0x2fc   :  { %v4755_v51 = vpack.c.bf16 %v3852_v3, %v3851_v21  ;;  %v4981_v46 = vpop.f32.mrb[148].mxu1  ;;  %v5147_v3 = vadd.f32 %v7191_v26, %v7333_v58 }
 0x2fd   :  { %4880 = vst [vmem:[%s7705_s3 + $0x48] sm:$0xff] %v4760_v53   ;;  %v3459_v48 = vpop.f32.mrb[84].mxu0  ;;  %v3669_v1 = vadd.f32 %v7385_v25, %v4981_v46  ;;  %v3660_v41 = vpop.f32.mrb[149].mxu1 }
 0x2fe   :  { %4879 = vst [vmem:[%s7705_s3 + $0x40] sm:$0xff] %v4755_v51   ;;  %v7534_v40 = vadd.f32 %v5139_v50, %v3459_v48  ;;  %v3461_v22 = vpop.f32.mrb[85].mxu0  ;;  %v3661_v34 = vadd.f32 %v7373_v59, %v3660_v41  ;;  %v4982_v14 = vpop.f32.mrb[150].mxu1 }
 0x2ff   :  { %v3462_v10 = vpop.f32.mrb[86].mxu0  ;;  %v3672_v13 = vadd.f32 %v7389_v45, %v4982_v14  ;;  %v3663_v9 = vpop.f32.mrb[151].mxu1  ;;  %v3857_v15 = vmax.f32 %v3669_v1, 0.0 }
 0x300   :  { %v7538_v5 = vadd.f32 %v5141_v39, %v3462_v10  ;;  %v3464_v25 = vpop.f32.mrb[87].mxu0  ;;  %v3664_v24 = vadd.f32 %v7377_v63, %v3663_v9  ;;  %v3855_v36 = vmax.f32 %v3661_v34, 0.0  ;;  %v5145_v63 = vadd.f32 %v7191_v26, %v7327_v19  ;;  %v7724_v39 = vld [vmem:[#allocation19_spill] sm:$0xff]  ;;  %v7725_v10 = vld [vmem:[#allocation16_spill] sm:$0xff] }
 0x301   :  { %v3858_v60 = vmax.f32 %v3672_v13, 0.0 }
 0x302   :  { %v3856_v17 = vmax.f32 %v3664_v24, 0.0 }
 0x303   :  { %v4770_v52 = vpack.c.bf16 %v3858_v60, %v3857_v15  ;;  %v7726_v60 = vld [vmem:[#allocation2_spill] sm:$0xff] }
 0x304   :  { %v4765_v33 = vpack.c.bf16 %v3856_v17, %v3855_v36  ;;  %v4985_v59 = vpop.f32.mrb[152].mxu1  ;;  %v5151_v36 = vadd.f32 %v7191_v26, %v7726_v60 }
 0x305   :  { %4882 = vst [vmem:[%s7705_s3 + $0x58] sm:$0xff] %v4770_v52   ;;  %v3467_v45 = vpop.f32.mrb[88].mxu0  ;;  %v3685_v54 = vadd.f32 %v7409_v62, %v4985_v59  ;;  %v3676_v11 = vpop.f32.mrb[153].mxu1  ;;  %v7727_v59 = vld [vmem:[#allocation3_spill] sm:$0xff] }
 0x306   :  { %4881 = vst [vmem:[%s7705_s3 + $0x50] sm:$0xff] %v4765_v33   ;;  %v7552_v55 = vadd.f32 %v5143_v2, %v3467_v45  ;;  %v3469_v31 = vpop.f32.mrb[89].mxu0  ;;  %v3677_v28 = vadd.f32 %v7397_v16, %v3676_v11  ;;  %v4986_v6 = vpop.f32.mrb[154].mxu1  ;;  %v5153_v45 = vadd.f32 %v7191_v26, %v7727_v59 }
 0x307   :  { %v3470_v35 = vpop.f32.mrb[90].mxu0  ;;  %v3688_v61 = vadd.f32 %v7413_v27, %v4986_v6  ;;  %v3679_v47 = vpop.f32.mrb[155].mxu1  ;;  %v3861_v19 = vmax.f32 %v3685_v54, 0.0 }
 0x308   :  { %v7556_v4 = vadd.f32 %v5145_v63, %v3470_v35  ;;  %v3472_v62 = vpop.f32.mrb[91].mxu0  ;;  %v3680_v44 = vadd.f32 %v7401_v42, %v3679_v47  ;;  %v3859_v43 = vmax.f32 %v3677_v28, 0.0  ;;  %v5149_v42 = vadd.f32 %v7191_v26, %v7339_v20 }
 0x309   :  { %v3862_v7 = vmax.f32 %v3688_v61, 0.0 }
 0x30a   :  { %v3860_v49 = vmax.f32 %v3680_v44, 0.0 }
 0x30b   :  { %v4780_v21 = vpack.c.bf16 %v3862_v7, %v3861_v19 }
 0x30c   :  { %v4775_v53 = vpack.c.bf16 %v3860_v49, %v3859_v43  ;;  %v4989_v16 = vpop.f32.mrb[156].mxu1  ;;  %v7728_v49 = vld [vmem:[#allocation4_spill] sm:$0xff] }
 0x30d   :  { %4884 = vst [vmem:[%s7705_s3 + $0x68] sm:$0xff] %v4780_v21   ;;  %v3475_v27 = vpop.f32.mrb[92].mxu0  ;;  %v3701_v50 = vadd.f32 %v7433_v12, %v4989_v16  ;;  %v3692_v51 = vpop.f32.mrb[157].mxu1  ;;  %v5155_v21 = vadd.f32 %v7191_v26, %v7728_v49 }
 0x30e   :  { %4883 = vst [vmem:[%s7705_s3 + $0x60] sm:$0xff] %v4775_v53   ;;  %v7570_v46 = vadd.f32 %v5147_v3, %v3475_v27  ;;  %v3477_v58 = vpop.f32.mrb[93].mxu0  ;;  %v3693_v48 = vadd.f32 %v7421_v56, %v3692_v51  ;;  %v4990_v1 = vpop.f32.mrb[158].mxu1  ;;  %v7729_v27 = vld [vmem:[#allocation5_spill] sm:$0xff] }
 0x30f   :  { %v3478_v41 = vpop.f32.mrb[94].mxu0  ;;  %v3704_v22 = vadd.f32 %v7724_v39, %v4990_v1  ;;  %v3695_v34 = vpop.f32.mrb[159].mxu1  ;;  %v3865_v20 = vmax.f32 %v3701_v50, 0.0 }
 0x310   :  { %v7574_v14 = vadd.f32 %v5149_v42, %v3478_v41  ;;  %v3480_v12 = vpop.f32.mrb[95].mxu0  ;;  %v3696_v13 = vadd.f32 %v7725_v10, %v3695_v34  ;;  %v3863_v25 = vmax.f32 %v3693_v48, 0.0 }
 0x311   :  { %v3866_v9 = vmax.f32 %v3704_v22, 0.0 }
 0x312   :  { %v3864_v24 = vmax.f32 %v3696_v13, 0.0 }
 0x313   :  { %v4790_v15 = vpack.c.bf16 %v3866_v9, %v3865_v20  ;;  %v7730_v9 = vld [vmem:[#allocation6_spill] sm:$0xff] }
 0x314   :  { %v4785_v17 = vpack.c.bf16 %v3864_v24, %v3863_v25  ;;  %v4993_v56 = vpop.f32.mrb[160].mxu1  ;;  %v5159_v25 = vadd.f32 %v7191_v26, %v7730_v9 }
 0x315   :  { %4886 = vst [vmem:[%s7705_s3 + $0x78] sm:$0xff] %v4790_v15   ;;  %v3483_v52 = vpop.f32.mrb[96].mxu0  ;;  %v3717_v2 = vadd.f32 %v7462_v29, %v4993_v56  ;;  %v3708_v33 = vpop.f32.mrb[161].mxu1 }
 0x316   :  { %4885 = vst [vmem:[%s7705_s3 + $0x70] sm:$0xff] %v4785_v17   ;;  %v7588_v54 = vadd.f32 %v5151_v36, %v3483_v52  ;;  %v3485_v11 = vpop.f32.mrb[97].mxu0  ;;  %v3709_v63 = vadd.f32 %v7444_v23, %v3708_v33  ;;  %v4994_v31 = vpop.f32.mrb[162].mxu1  ;;  %v7731_v36 = vld [vmem:[#allocation7_spill] sm:$0xff] }
 0x317   :  { %v3486_v28 = vpop.f32.mrb[98].mxu0  ;;  %v3720_v6 = vadd.f32 %v7466_v57, %v4994_v31  ;;  %v3711_v35 = vpop.f32.mrb[163].mxu1  ;;  %v3869_v62 = vmax.f32 %v3717_v2, 0.0 }
 0x318   :  { %v7592_v61 = vadd.f32 %v5153_v45, %v3486_v28  ;;  %v3488_v29 = vpop.f32.mrb[99].mxu0  ;;  %v3712_v47 = vadd.f32 %v7448_v38, %v3711_v35  ;;  %v3867_v19 = vmax.f32 %v3709_v63, 0.0  ;;  %v5157_v38 = vadd.f32 %v7191_v26, %v7729_v27 }
 0x319   :  { %v3870_v44 = vmax.f32 %v3720_v6, 0.0 }
 0x31a   :  { %v3868_v7 = vmax.f32 %v3712_v47, 0.0  ;;  %v7732_v47 = vld [vmem:[#allocation8_spill] sm:$0xff] }
 0x31b   :  { %v4800_v43 = vpack.c.bf16 %v3870_v44, %v3869_v62  ;;  %v5163_v62 = vadd.f32 %v7191_v26, %v7732_v47 }
 0x31c   :  { %v4795_v3 = vpack.c.bf16 %v3868_v7, %v3867_v19  ;;  %v4997_v23 = vpop.f32.mrb[164].mxu1 }
 0x31d   :  { %4888 = vst [vmem:[%s7705_s3 + $0x88] sm:$0xff] %v4800_v43   ;;  %v3491_v57 = vpop.f32.mrb[100].mxu0  ;;  %v3733_v53 = vadd.f32 %v7498_v30, %v4997_v23  ;;  %v3724_v16 = vpop.f32.mrb[165].mxu1  ;;  %v7733_v43 = vld [vmem:[#allocation9_spill] sm:$0xff] }
 0x31e   :  { %4887 = vst [vmem:[%s7705_s3 + $0x80] sm:$0xff] %v4795_v3   ;;  %v7606_v50 = vadd.f32 %v5155_v21, %v3491_v57  ;;  %v3493_v51 = vpop.f32.mrb[101].mxu0  ;;  %v3725_v42 = vadd.f32 %v7480_v37, %v3724_v16  ;;  %v4998_v58 = vpop.f32.mrb[166].mxu1 }
 0x31f   :  { %v3494_v48 = vpop.f32.mrb[102].mxu0  ;;  %v3736_v1 = vadd.f32 %v7502_v32, %v4998_v58  ;;  %v3727_v41 = vpop.f32.mrb[167].mxu1  ;;  %v3873_v34 = vmax.f32 %v3733_v53, 0.0 }
 0x320   :  { %v7610_v39 = vadd.f32 %v5157_v38, %v3494_v48  ;;  %v3496_v30 = vpop.f32.mrb[103].mxu0  ;;  %v3728_v22 = vadd.f32 %v7484_v8, %v3727_v41  ;;  %v3871_v10 = vmax.f32 %v3725_v42, 0.0  ;;  %v5161_v8 = vadd.f32 %v7191_v26, %v7731_v36 }
 0x321   :  { %v3874_v12 = vmax.f32 %v3736_v1, 0.0  ;;  %v7648_v1 = vld [vmem:[%s7704_s2] ss:$0 sm:$0xff] }
 0x322   :  { %v3872_v13 = vmax.f32 %v3728_v22, 0.0 }
 0x323   :  { %v4810_v20 = vpack.c.bf16 %v3874_v12, %v3873_v34  ;;  %v7735_v12 = vld [vmem:[#allocation11_spill] sm:$0xff] }
 0x324   :  { %v4805_v24 = vpack.c.bf16 %v3872_v13, %v3871_v10  ;;  %v5001_v37 = vpop.f32.mrb[168].mxu1  ;;  %v5169_v10 = vadd.f32 %v7648_v1, %v7735_v12 }
 0x325   :  { %4890 = vst [vmem:[%s7705_s3 + $0x98] sm:$0xff] %v4810_v20   ;;  %v3499_v32 = vpop.f32.mrb[104].mxu0  ;;  %v3749_v15 = vadd.f32 %v7534_v40, %v5001_v37  ;;  %v3740_v60 = vpop.f32.mrb[169].mxu1 }
 0x326   :  { %4889 = vst [vmem:[%s7705_s3 + $0x90] sm:$0xff] %v4805_v24   ;;  %v7624_v17 = vadd.f32 %v5159_v25, %v3499_v32  ;;  %v3501_v56 = vpop.f32.mrb[105].mxu0  ;;  %v3741_v52 = vadd.f32 %v7516_v18, %v3740_v60  ;;  %v5002_v2 = vpop.f32.mrb[170].mxu1 }
 0x327   :  { %v3502_v33 = vpop.f32.mrb[106].mxu0  ;;  %v3752_v59 = vadd.f32 %v7538_v5, %v5002_v2  ;;  %v3743_v45 = vpop.f32.mrb[171].mxu1  ;;  %v3877_v31 = vmax.f32 %v3749_v15, 0.0 }
 0x328   :  { %v7628_v11 = vadd.f32 %v5161_v8, %v3502_v33  ;;  %v3504_v40 = vpop.f32.mrb[107].mxu0  ;;  %v3744_v63 = vadd.f32 %v7520_v0, %v3743_v45  ;;  %v3875_v6 = vmax.f32 %v3741_v52, 0.0  ;;  %v5165_v0 = vadd.f32 %v7191_v26, %v7733_v43  ;;  %v7736_v33 = vld [vmem:[#allocation12_spill] sm:$0xff] }
 0x329   :  { %v3878_v28 = vmax.f32 %v3752_v59, 0.0  ;;  %v5171_v59 = vadd.f32 %v7648_v1, %v7736_v33 }
 0x32a   :  { %v3876_v35 = vmax.f32 %v3744_v63, 0.0 }
 0x32b   :  { %v4820_v29 = vpack.c.bf16 %v3878_v28, %v3877_v31  ;;  %v7737_v31 = vld [vmem:[#allocation13_spill] sm:$0xff] }
 0x32c   :  { %v4815_v44 = vpack.c.bf16 %v3876_v35, %v3875_v6  ;;  %v5005_v18 = vpop.f32.mrb[172].mxu1 }
 0x32d   :  { %4892 = vst [vmem:[%s7705_s3 + $0xa8] sm:$0xff] %v4820_v29   ;;  %v3507_v5 = vpop.f32.mrb[108].mxu0  ;;  %v3765_v19 = vadd.f32 %v7570_v46, %v5005_v18  ;;  %v3756_v7 = vpop.f32.mrb[173].mxu1 }
 0x32e   :  { %4891 = vst [vmem:[%s7705_s3 + $0xa0] sm:$0xff] %v4815_v44   ;;  %v5164_v49 = vadd.f32 %v5163_v62, %v3507_v5  ;;  %v3509_v21 = vpop.f32.mrb[109].mxu0  ;;  %v3757_v3 = vadd.f32 %v7552_v55, %v3756_v7  ;;  %v5006_v23 = vpop.f32.mrb[174].mxu1  ;;  %v7734_v55 = vld [vmem:[#allocation10_spill] sm:$0xff] }
 0x32f   :  { %v3510_v57 = vpop.f32.mrb[110].mxu0  ;;  %v3768_v53 = vadd.f32 %v7574_v14, %v5006_v23  ;;  %v3759_v16 = vpop.f32.mrb[175].mxu1  ;;  %v3881_v51 = vmax.f32 %v3765_v19, 0.0  ;;  %v5167_v41 = vadd.f32 %v7648_v1, %v7734_v55 }
 0x330   :  { %v5166_v27 = vadd.f32 %v5165_v0, %v3510_v57  ;;  %v3512_v38 = vpop.f32.mrb[111].mxu0  ;;  %v3760_v46 = vadd.f32 %v7556_v4, %v3759_v16  ;;  %v3879_v26 = vmax.f32 %v3757_v3, 0.0  ;;  %v7738_v3 = vld [vmem:[#allocation14_spill] sm:$0xff] }
 0x331   :  { %v3882_v42 = vmax.f32 %v3768_v53, 0.0  ;;  %v5175_v23 = vadd.f32 %v7648_v1, %v7738_v3  ;;  %v7739_v38 = vld [vmem:[#allocation15_spill] sm:$0xff] }
 0x332   :  { %v3880_v58 = vmax.f32 %v3760_v46, 0.0 }
 0x333   :  { %v4830_v48 = vpack.c.bf16 %v3882_v42, %v3881_v51 }
 0x334   :  { %v4825_v30 = vpack.c.bf16 %v3880_v58, %v3879_v26  ;;  %v5009_v14 = vpop.f32.mrb[176].mxu1 }
 0x335   :  { %4894 = vst [vmem:[%s7705_s3 + $0xb8] sm:$0xff] %v4830_v48   ;;  %v3515_v4 = vpop.f32.mrb[112].mxu0  ;;  %v3781_v22 = vadd.f32 %v7606_v50, %v5009_v14  ;;  %v3772_v34 = vpop.f32.mrb[177].mxu1 }
 0x336   :  { %4893 = vst [vmem:[%s7705_s3 + $0xb0] sm:$0xff] %v4825_v30   ;;  %v5168_v13 = vadd.f32 %v5167_v41, %v3515_v4  ;;  %v3517_v20 = vpop.f32.mrb[113].mxu0  ;;  %v3773_v9 = vadd.f32 %v7588_v54, %v3772_v34  ;;  %v5010_v25 = vpop.f32.mrb[178].mxu1 }
 0x337   :  { %v3518_v24 = vpop.f32.mrb[114].mxu0  ;;  %v3784_v37 = vadd.f32 %v7610_v39, %v5010_v25  ;;  %v3775_v32 = vpop.f32.mrb[179].mxu1  ;;  %v3885_v36 = vmax.f32 %v3781_v22, 0.0  ;;  %v7740_v20 = vld [vmem:[#allocation17_spill] sm:$0xff] }
 0x338   :  { %v5170_v15 = vadd.f32 %v5169_v10, %v3518_v24  ;;  %v3520_v60 = vpop.f32.mrb[115].mxu0  ;;  %v3776_v50 = vadd.f32 %v7592_v61, %v3775_v32  ;;  %v3883_v56 = vmax.f32 %v3773_v9, 0.0  ;;  %v5173_v61 = vadd.f32 %v7648_v1, %v7737_v31  ;;  %v7741_v32 = vld [vmem:[#allocation18_spill] sm:$0xff] }
 0x339   :  { %v3886_v8 = vmax.f32 %v3784_v37, 0.0  ;;  %v5179_v9 = vadd.f32 %v7648_v1, %v7740_v20  ;;  %v5181_v60 = vadd.f32 %v7648_v1, %v7741_v32 }
 0x33a   :  { %v3884_v52 = vmax.f32 %v3776_v50, 0.0 }
 0x33b   :  { %v4840_v2 = vpack.c.bf16 %v3886_v8, %v3885_v36 }
 0x33c   :  { %v4835_v45 = vpack.c.bf16 %v3884_v52, %v3883_v56  ;;  %v5013_v40 = vpop.f32.mrb[180].mxu1 }
 0x33d   :  { %4896 = vst [vmem:[%s7705_s3 + $0xc8] sm:$0xff] %v4840_v2   ;;  %v3523_v54 = vpop.f32.mrb[116].mxu0  ;;  %v3797_v39 = vadd.f32 %v5164_v49, %v5013_v40  ;;  %v3788_v63 = vpop.f32.mrb[181].mxu1 }
 0x33e   :  { %4895 = vst [vmem:[%s7705_s3 + $0xc0] sm:$0xff] %v4835_v45   ;;  %v5172_v28 = vadd.f32 %v5171_v59, %v3523_v54  ;;  %v3525_v6 = vpop.f32.mrb[117].mxu0  ;;  %v3789_v35 = vadd.f32 %v7624_v17, %v3788_v63  ;;  %v5014_v29 = vpop.f32.mrb[182].mxu1 }
 0x33f   :  { %v3526_v47 = vpop.f32.mrb[118].mxu0  ;;  %v3800_v62 = vadd.f32 %v5166_v27, %v5014_v29  ;;  %v3791_v44 = vpop.f32.mrb[183].mxu1  ;;  %v3889_v7 = vmax.f32 %v3797_v39, 0.0 }
 0x340   :  { %v5174_v18 = vadd.f32 %v5173_v61, %v3526_v47  ;;  %v3528_v5 = vpop.f32.mrb[119].mxu0  ;;  %v3792_v19 = vadd.f32 %v7628_v11, %v3791_v44  ;;  %v3887_v0 = vmax.f32 %v3789_v35, 0.0  ;;  %v5177_v11 = vadd.f32 %v7648_v1, %v7739_v38 }
 0x341   :  { %v3890_v43 = vmax.f32 %v3800_v62, 0.0 }
 0x342   :  { %v3888_v49 = vmax.f32 %v3792_v19, 0.0 }
 0x343   :  { %v4850_v21 = vpack.c.bf16 %v3890_v43, %v3889_v7 }
 0x344   :  { %v4845_v57 = vpack.c.bf16 %v3888_v49, %v3887_v0  ;;  %v5017_v53 = vpop.f32.mrb[184].mxu1 }
 0x345   :  { %4898 = vst [vmem:[%s7705_s3 + $0xd8] sm:$0xff] %v4850_v21   ;;  %v3531_v17 = vpop.f32.mrb[120].mxu0  ;;  %v3813_v16 = vadd.f32 %v5172_v28, %v5017_v53  ;;  %v3804_v27 = vpop.f32.mrb[185].mxu1 }
 0x346   :  { %4897 = vst [vmem:[%s7705_s3 + $0xd0] sm:$0xff] %v4845_v57   ;;  %v5176_v46 = vadd.f32 %v5175_v23, %v3531_v17  ;;  %v3533_v51 = vpop.f32.mrb[121].mxu0  ;;  %v3805_v42 = vadd.f32 %v5168_v13, %v3804_v27  ;;  %v5018_v26 = vpop.f32.mrb[186].mxu1 }
 0x347   :  { %v3534_v58 = vpop.f32.mrb[122].mxu0  ;;  %v3816_v48 = vadd.f32 %v5174_v18, %v5018_v26  ;;  %v3807_v55 = vpop.f32.mrb[187].mxu1  ;;  %v3893_v4 = vmax.f32 %v3813_v16, 0.0 }
 0x348   :  { %v5178_v41 = vadd.f32 %v5177_v11, %v3534_v58  ;;  %v3536_v30 = vpop.f32.mrb[123].mxu0  ;;  %v3808_v14 = vadd.f32 %v5170_v15, %v3807_v55  ;;  %v3891_v34 = vmax.f32 %v3805_v42, 0.0 }
 0x349   :  { %v3894_v22 = vmax.f32 %v3816_v48, 0.0 }
 0x34a   :  { %v3892_v12 = vmax.f32 %v3808_v14, 0.0 }
 0x34b   :  { %v4860_v10 = vpack.c.bf16 %v3894_v22, %v3893_v4 }
 0x34c   :  { %v4855_v25 = vpack.c.bf16 %v3892_v12, %v3891_v34  ;;  %v5021_v24 = vpop.f32.mrb[188].mxu1 }
 0x34d   :  { %4900 = vst [vmem:[%s7705_s3 + $0xe8] sm:$0xff] %v4860_v10   ;;  %v3539_v13 = vpop.f32.mrb[124].mxu0  ;;  %v3820_v37 = vpop.f32.mrb[189].mxu1 }
 0x34e   :  { %4899 = vst [vmem:[%s7705_s3 + $0xe0] sm:$0xff] %v4855_v25   ;;  %v5180_v15 = vadd.f32 %v5179_v9, %v3539_v13  ;;  %v3541_v50 = vpop.f32.mrb[125].mxu0  ;;  %v3821_v36 = vadd.f32 %v5176_v46, %v3820_v37  ;;  %v5022_v8 = vpop.f32.mrb[190].mxu1 }
 0x34f   :  { %v3542_v56 = vpop.f32.mrb[126].mxu0  ;;  %v3823_v52 = vpop.f32.mrb[191].mxu1 }
 0x350   :  { %v3829_v2 = vadd.f32 %v5180_v15, %v5021_v24  ;;  %v5182_v33 = vadd.f32 %v5181_v60, %v3542_v56  ;;  %v3544_v59 = vpop.f32.mrb[127].mxu0  ;;  %v3824_v45 = vadd.f32 %v5178_v41, %v3823_v52  ;;  %v3895_v40 = vmax.f32 %v3821_v36, 0.0 }
 0x352   :  { %v3832_v54 = vadd.f32 %v5182_v33, %v5022_v8  ;;  %v3896_v39 = vmax.f32 %v3824_v45, 0.0  ;;  %v3897_v63 = vmax.f32 %v3829_v2, 0.0 }
 0x354   :  { %v3898_v31 = vmax.f32 %v3832_v54, 0.0  ;;  %v4865_v1 = vpack.c.bf16 %v3896_v39, %v3895_v40 }
 0x356   :  { %v4870_v61 = vpack.c.bf16 %v3898_v31, %v3897_v63  ;;  %4901 = vst [vmem:[%s7705_s3 + $0xf0] sm:$0xff] %v4865_v1  }
 0x358   :  { %4902 = vst [vmem:[%s7705_s3 + $0xf8] sm:$0xff] %v4870_v61  }

// kernel: faster_rcnn_forward.9
= control target key start
LH: loop header
LB: loop body
LE: loop exit
PB: predicated region body
PF: predicated region fallthrough
CT: control target
= control target key end

     0   :  { %vm6286_vm0 = vmmov 0   ;;  %s7767_s1 = inlined_call_operand.vmem [shape: bf16[6272,128], index: 1, kind: input, shape index: {}]   ;;  %s7768_s0 = inlined_call_operand.vmem [shape: bf16[16,6272], index: 0, kind: input, shape index: {}]   ;;  %s7769_s2 = inlined_call_operand.vmem [shape: f32[1,128], index: 2, kind: input, shape index: {}]   ;;  %s7770_s3 = inlined_call_operand.vmem [shape: bf16[128,128], index: 3, kind: input, shape index: {}]   ;;  %s7771_s5 = inlined_call_operand.vmem [shape: bf16[128,128], index: 5, kind: input, shape index: {}]   ;;  %s7772_s4 = inlined_call_operand.vmem [shape: f32[1,128], index: 4, kind: input, shape index: {}]   ;;  %s7773_s6 = inlined_call_operand.vmem [shape: f32[1,128], index: 6, kind: input, shape index: {}]   ;;  %s7774_s7 = inlined_call_operand.vmem [shape: f32[16,128], index: 7, kind: output, shape index: {}]  }
   0x1   :  { %v5804_v0 = vld [vmem:[%s7767_s1 + $0x40] sm:$0xff]   ;;  %v5808_v4 = vld [vmem:[%s7767_s1 + $0x48] sm:$0xff]   ;;  %v5812_v8 = vld [vmem:[%s7767_s1 + $0x50] sm:$0xff]  }
   0x2   :  { %v5805_v1 = vld [vmem:[%s7767_s1] sm:$0xff]   ;;  %5187 = vmatprep.subr.bf16.mxu0 %v5804_v0  ;;  %v5809_v5 = vld [vmem:[%s7767_s1 + $0x8] sm:$0xff]   ;;  %v5813_v9 = vld [vmem:[%s7767_s1 + $0x10] sm:$0xff]  }
   0x3   :  { %v5806_v2 = vld [vmem:[%s7767_s1 + $0xc0] sm:$0xff]   ;;  %5188 = vmatpush3.bf16.msra.mxu0 %v5805_v1  ;;  %v5810_v6 = vld [vmem:[%s7767_s1 + $0xc8] sm:$0xff]   ;;  %v5814_v10 = vld [vmem:[%s7767_s1 + $0xd0] sm:$0xff]  }
   0x4   :  { %v5807_v3 = vld [vmem:[%s7767_s1 + $0x80] sm:$0xff]   ;;  %5209 = vmatprep.subr.bf16.mxu1 %v5806_v2  ;;  %5189 = vmatprep.subr.bf16.mxu0 %v5808_v4  ;;  %v5811_v7 = vld [vmem:[%s7767_s1 + $0x88] sm:$0xff]   ;;  %v5815_v11 = vld [vmem:[%s7767_s1 + $0x90] sm:$0xff]  }
   0x5   :  { %5210 = vmatpush3.bf16.msra.mxu1 %v5807_v3  ;;  %v5816_v12 = vld [vmem:[%s7767_s1 + $0x58] sm:$0xff]   ;;  %v5820_v16 = vld [vmem:[%s7767_s1 + $0x60] sm:$0xff]   ;;  %v5824_v20 = vld [vmem:[%s7767_s1 + $0x68] sm:$0xff]  }
   0x6   :  { %5211 = vmatprep.subr.bf16.mxu1 %v5810_v6  ;;  %v5817_v13 = vld [vmem:[%s7767_s1 + $0x18] sm:$0xff]   ;;  %v5821_v17 = vld [vmem:[%s7767_s1 + $0x20] sm:$0xff]   ;;  %v5825_v21 = vld [vmem:[%s7767_s1 + $0x28] sm:$0xff]  }
   0x7   :  { %5190 = vmatpush3.bf16.msra.mxu0 %v5809_v5  ;;  %v5818_v14 = vld [vmem:[%s7767_s1 + $0xd8] sm:$0xff]   ;;  %v5822_v18 = vld [vmem:[%s7767_s1 + $0xe0] sm:$0xff]   ;;  %v5826_v22 = vld [vmem:[%s7767_s1 + $0xe8] sm:$0xff]  }
   0x8   :  { %5191 = vmatprep.subr.bf16.mxu0 %v5812_v8  ;;  %v5819_v15 = vld [vmem:[%s7767_s1 + $0x98] sm:$0xff]   ;;  %v5823_v19 = vld [vmem:[%s7767_s1 + $0xa0] sm:$0xff]   ;;  %v5827_v23 = vld [vmem:[%s7767_s1 + $0xa8] sm:$0xff]  }
   0x9   :  { %5212 = vmatpush3.bf16.msra.mxu1 %v5811_v7  ;;  %v5828_v24 = vld [vmem:[%s7767_s1 + $0x70] sm:$0xff]   ;;  %v5832_v28 = vld [vmem:[%s7767_s1 + $0x78] sm:$0xff]   ;;  %v5835_v31 = vld [vmem:[%s7768_s0] ss:$196 sps:$4 sm:$0xff]  }
   0xa   :  { %5213 = vmatprep.subr.bf16.mxu1 %v5814_v10  ;;  %v5829_v25 = vld [vmem:[%s7767_s1 + $0x30] sm:$0xff]   ;;  %v5833_v29 = vld [vmem:[%s7767_s1 + $0x38] sm:$0xff]   ;;  %v5837_v32 = vld [vmem:[%s7768_s0 + $0x4] ss:$196 sps:$4 sm:$0xff]  }
   0xb   :  { %5192 = vmatpush3.bf16.msra.mxu0 %v5813_v9  ;;  %v5830_v26 = vld [vmem:[%s7767_s1 + $0xf0] sm:$0xff]   ;;  %v5834_v30 = vld [vmem:[%s7767_s1 + $0xf8] sm:$0xff]   ;;  %3498 = vmatprep.mubr.bf16.mxu0 %v5837_v32  ;;  %v5839_v34 = vld [vmem:[%s7767_s1 + $0x140] sm:$0xff]  }
   0xc   :  { %5193 = vmatprep.subr.bf16.mxu0 %v5816_v12  ;;  %v5831_v27 = vld [vmem:[%s7767_s1 + $0xb0] sm:$0xff]   ;;  %v5838_v33 = vld [vmem:[%s7767_s1 + $0xb8] sm:$0xff]   ;;  %v5840_v35 = vld [vmem:[%s7768_s0 + $0x8] ss:$196 sps:$4 sm:$0xff]  }
   0xd   :  { %5214 = vmatpush3.bf16.msra.mxu1 %v5815_v11  ;;  %v5842_v36 = vld [vmem:[%s7768_s0 + $0xc] ss:$196 sps:$4 sm:$0xff]   ;;  %v5843_v37 = vld [vmem:[%s7767_s1 + $0x100] sm:$0xff]   ;;  %v5854_v48 = vld [vmem:[%s7767_s1 + $0x158] sm:$0xff]  }
   0xe   :  { %5215 = vmatprep.subr.bf16.mxu1 %v5818_v14  ;;  %3539 = vmatprep.mubr.bf16.mxu1 %v5842_v36  ;;  %v5844_v38 = vld [vmem:[%s7767_s1 + $0x1c0] sm:$0xff]   ;;  %v5846_v40 = vld [vmem:[%s7767_s1 + $0x148] sm:$0xff]   ;;  %v5850_v44 = vld [vmem:[%s7767_s1 + $0x150] sm:$0xff]  }
   0xf   :  { %5194 = vmatpush3.bf16.msra.mxu0 %v5817_v13  ;;  %v5845_v39 = vld [vmem:[%s7767_s1 + $0x180] sm:$0xff]   ;;  %v5847_v41 = vld [vmem:[%s7767_s1 + $0x108] sm:$0xff]   ;;  %v5851_v45 = vld [vmem:[%s7767_s1 + $0x110] sm:$0xff]  }
  0x10   :  { %5195 = vmatprep.subr.bf16.mxu0 %v5820_v16  ;;  %v5848_v42 = vld [vmem:[%s7767_s1 + $0x1c8] sm:$0xff]   ;;  %v5852_v46 = vld [vmem:[%s7767_s1 + $0x1d0] sm:$0xff]   ;;  %v5855_v49 = vld [vmem:[%s7767_s1 + $0x118] sm:$0xff]  }
  0x11   :  { %5216 = vmatpush3.bf16.msra.mxu1 %v5819_v15  ;;  %v5849_v43 = vld [vmem:[%s7767_s1 + $0x188] sm:$0xff]   ;;  %v5853_v47 = vld [vmem:[%s7767_s1 + $0x190] sm:$0xff]   ;;  %v5856_v50 = vld [vmem:[%s7767_s1 + $0x1d8] sm:$0xff]  }
  0x12   :  { %5217 = vmatprep.subr.bf16.mxu1 %v5822_v18  ;;  %v5857_v51 = vld [vmem:[%s7767_s1 + $0x198] sm:$0xff]   ;;  %v5858_v52 = vld [vmem:[%s7767_s1 + $0x160] sm:$0xff]   ;;  %v5862_v56 = vld [vmem:[%s7767_s1 + $0x168] sm:$0xff]  }
  0x13   :  { %5196 = vmatpush3.bf16.msra.mxu0 %v5821_v17  ;;  %v5859_v53 = vld [vmem:[%s7767_s1 + $0x120] sm:$0xff]   ;;  %v5863_v57 = vld [vmem:[%s7767_s1 + $0x128] sm:$0xff]   ;;  %v5866_v60 = vld [vmem:[%s7767_s1 + $0x170] sm:$0xff]  }
  0x14   :  { %5197 = vmatprep.subr.bf16.mxu0 %v5824_v20  ;;  %v5860_v54 = vld [vmem:[%s7767_s1 + $0x1e0] sm:$0xff]   ;;  %v5864_v58 = vld [vmem:[%s7767_s1 + $0x1e8] sm:$0xff]   ;;  %v5867_v61 = vld [vmem:[%s7767_s1 + $0x130] sm:$0xff]  }
  0x15   :  { %5218 = vmatpush3.bf16.msra.mxu1 %v5823_v19  ;;  %v5861_v55 = vld [vmem:[%s7767_s1 + $0x1a0] sm:$0xff]   ;;  %v5865_v59 = vld [vmem:[%s7767_s1 + $0x1a8] sm:$0xff]   ;;  %v5868_v62 = vld [vmem:[%s7767_s1 + $0x1f0] sm:$0xff]  }
  0x16   :  { %5219 = vmatprep.subr.bf16.mxu1 %v5826_v22  ;;  %v5869_v63 = vld [vmem:[%s7767_s1 + $0x1b0] sm:$0xff]   ;;  %v5870_v0 = vld [vmem:[%s7767_s1 + $0x178] sm:$0xff]   ;;  %v5877_v6 = vld [vmem:[%s7767_s1 + $0x240] sm:$0xff]  }
  0x17   :  { %5198 = vmatpush3.bf16.msra.mxu0 %v5825_v21  ;;  %v5871_v1 = vld [vmem:[%s7767_s1 + $0x138] sm:$0xff]   ;;  %v5873_v3 = vld [vmem:[%s7768_s0 + $0x10] ss:$196 sps:$4 sm:$0xff]   ;;  %v5881_v9 = vld [vmem:[%s7767_s1 + $0x200] sm:$0xff]  }
  0x18   :  { %5199 = vmatprep.subr.bf16.mxu0 %v5828_v24  ;;  %v5872_v2 = vld [vmem:[%s7767_s1 + $0x1f8] sm:$0xff]   ;;  %v5882_v10 = vld [vmem:[%s7767_s1 + $0x2c0] sm:$0xff]   ;;  %v5884_v12 = vld [vmem:[%s7767_s1 + $0x248] sm:$0xff]  }
  0x19   :  { %5220 = vmatpush3.bf16.msra.mxu1 %v5827_v23  ;;  %v5875_v4 = vld [vmem:[%s7768_s0 + $0x14] ss:$196 sps:$4 sm:$0xff]   ;;  %v5880_v8 = vld [vmem:[%s7768_s0 + $0x1c] ss:$196 sps:$4 sm:$0xff]   ;;  %v5885_v13 = vld [vmem:[%s7767_s1 + $0x208] sm:$0xff]  }
  0x1a   :  { %5221 = vmatprep.subr.bf16.mxu1 %v5830_v26  ;;  %v5876_v5 = vld [vmem:[%s7767_s1 + $0x1b8] sm:$0xff]   ;;  %v5883_v11 = vld [vmem:[%s7767_s1 + $0x280] sm:$0xff]   ;;  %v5886_v14 = vld [vmem:[%s7767_s1 + $0x2c8] sm:$0xff]  }
  0x1b   :  { %5200 = vmatpush3.bf16.msra.mxu0 %v5829_v25  ;;  %v5878_v7 = vld [vmem:[%s7768_s0 + $0x18] ss:$196 sps:$4 sm:$0xff]   ;;  %v5887_v15 = vld [vmem:[%s7767_s1 + $0x288] sm:$0xff]   ;;  %v5888_v16 = vld [vmem:[%s7767_s1 + $0x250] sm:$0xff]  }
  0x1c   :  { %5201 = vmatprep.subr.bf16.mxu0 %v5832_v28  ;;  %v5889_v17 = vld [vmem:[%s7767_s1 + $0x210] sm:$0xff]   ;;  %v5892_v20 = vld [vmem:[%s7767_s1 + $0x258] sm:$0xff]   ;;  %v5896_v24 = vld [vmem:[%s7767_s1 + $0x260] sm:$0xff]  }
  0x1d   :  { %5222 = vmatpush3.bf16.msra.mxu1 %v5831_v27  ;;  %v5890_v18 = vld [vmem:[%s7767_s1 + $0x2d0] sm:$0xff]   ;;  %v5893_v21 = vld [vmem:[%s7767_s1 + $0x218] sm:$0xff]   ;;  %v5897_v25 = vld [vmem:[%s7767_s1 + $0x220] sm:$0xff]  }
  0x1e   :  { %5223 = vmatprep.subr.bf16.mxu1 %v5834_v30  ;;  %v5891_v19 = vld [vmem:[%s7767_s1 + $0x290] sm:$0xff]   ;;  %v5894_v22 = vld [vmem:[%s7767_s1 + $0x2d8] sm:$0xff]   ;;  %v5898_v26 = vld [vmem:[%s7767_s1 + $0x2e0] sm:$0xff]  }
  0x1f   :  { %5202 = vmatpush3.bf16.msra.mxu0 %v5833_v29  ;;  %v5895_v23 = vld [vmem:[%s7767_s1 + $0x298] sm:$0xff]   ;;  %v5899_v27 = vld [vmem:[%s7767_s1 + $0x2a0] sm:$0xff]   ;;  %v5900_v28 = vld [vmem:[%s7767_s1 + $0x268] sm:$0xff]  }
  0x20   :  { %5231 = vmatprep.subr.bf16.mxu0 %v5839_v34  ;;  %v5901_v29 = vld [vmem:[%s7767_s1 + $0x228] sm:$0xff]   ;;  %v5904_v32 = vld [vmem:[%s7767_s1 + $0x270] sm:$0xff]   ;;  %v5908_v36 = vld [vmem:[%s7767_s1 + $0x278] sm:$0xff]  }
  0x21   :  { %5224 = vmatpush3.bf16.msra.mxu1 %v5838_v33  ;;  %v5902_v30 = vld [vmem:[%s7767_s1 + $0x2e8] sm:$0xff]   ;;  %v5905_v33 = vld [vmem:[%s7767_s1 + $0x230] sm:$0xff]  }
  0x22   :  { %3499 = vmatmul.mubr.bf16.vlgmr.msra.gmra.mrb[0].mxu0 %v5835_v31  ;;  %5253 = vmatprep.subr.bf16.mxu1 %v5844_v38  ;;  %v5903_v31 = vld [vmem:[%s7767_s1 + $0x2a8] sm:$0xff]   ;;  %v5906_v34 = vld [vmem:[%s7767_s1 + $0x2f0] sm:$0xff]   ;;  %v5910_v38 = vld [vmem:[%s7767_s1 + $0x2f8] sm:$0xff]  }
  0x23   :  { %5232 = vmatpush3.bf16.msra.mxu0 %v5843_v37  ;;  %3580 = vmatprep.mubr.bf16.mxu0 %v5875_v4  ;;  %v5909_v37 = vld [vmem:[%s7767_s1 + $0x238] sm:$0xff]   ;;  %v5942_v4 = vld [vmem:[%s7767_s1 + $0x370] sm:$0xff]  }
  0x24   :  { %3540 = vmatmul.mubr.bf16.vlgmr.msra.gmra.mrb[0].mxu1 %v5840_v35  ;;  %5233 = vmatprep.subr.bf16.mxu0 %v5846_v40  ;;  %v5907_v35 = vld [vmem:[%s7767_s1 + $0x2b0] sm:$0xff]   ;;  %v5913_v40 = vld [vmem:[%s7768_s0 + $0x24] ss:$196 sps:$4 sm:$0xff]  }
  0x25   :  { %5254 = vmatpush3.bf16.msra.mxu1 %v5845_v39  ;;  %3621 = vmatprep.mubr.bf16.mxu1 %v5880_v8  ;;  %v5911_v39 = vld [vmem:[%s7768_s0 + $0x20] ss:$196 sps:$4 sm:$0xff]   ;;  %v5946_v8 = vld [vmem:[%s7767_s1 + $0x378] sm:$0xff]  }
  0x26   :  { %5255 = vmatprep.subr.bf16.mxu1 %v5848_v42  ;;  %v5915_v42 = vld [vmem:[%s7767_s1 + $0x340] sm:$0xff]  }
  0x27   :  { %5234 = vmatpush3.bf16.msra.mxu0 %v5847_v41  ;;  %v5914_v41 = vld [vmem:[%s7767_s1 + $0x2b8] sm:$0xff]  }
  0x28   :  { %5235 = vmatprep.subr.bf16.mxu0 %v5850_v44  ;;  %v5918_v44 = vld [vmem:[%s7768_s0 + $0x2c] ss:$196 sps:$4 sm:$0xff]  }
  0x29   :  { %5256 = vmatpush3.bf16.msra.mxu1 %v5849_v43  ;;  %v5916_v43 = vld [vmem:[%s7768_s0 + $0x28] ss:$196 sps:$4 sm:$0xff]  }
  0x2a   :  { %5257 = vmatprep.subr.bf16.mxu1 %v5852_v46  ;;  %v5920_v46 = vld [vmem:[%s7767_s1 + $0x3c0] sm:$0xff]  }
  0x2b   :  { %5236 = vmatpush3.bf16.msra.mxu0 %v5851_v45  ;;  %v5919_v45 = vld [vmem:[%s7767_s1 + $0x300] sm:$0xff]  }
  0x2c   :  { %5237 = vmatprep.subr.bf16.mxu0 %v5854_v48  ;;  %v5922_v48 = vld [vmem:[%s7767_s1 + $0x348] sm:$0xff]  }
  0x2d   :  { %5258 = vmatpush3.bf16.msra.mxu1 %v5853_v47  ;;  %v5921_v47 = vld [vmem:[%s7767_s1 + $0x380] sm:$0xff]  }
  0x2e   :  { %5259 = vmatprep.subr.bf16.mxu1 %v5856_v50  ;;  %v5924_v50 = vld [vmem:[%s7767_s1 + $0x3c8] sm:$0xff]  }
  0x2f   :  { %5238 = vmatpush3.bf16.msra.mxu0 %v5855_v49  ;;  %v5923_v49 = vld [vmem:[%s7767_s1 + $0x308] sm:$0xff]  }
  0x30   :  { %5239 = vmatprep.subr.bf16.mxu0 %v5858_v52  ;;  %v5926_v52 = vld [vmem:[%s7767_s1 + $0x350] sm:$0xff]  }
  0x31   :  { %5260 = vmatpush3.bf16.msra.mxu1 %v5857_v51  ;;  %v5925_v51 = vld [vmem:[%s7767_s1 + $0x388] sm:$0xff]  }
  0x32   :  { %5261 = vmatprep.subr.bf16.mxu1 %v5860_v54  ;;  %v5928_v54 = vld [vmem:[%s7767_s1 + $0x3d0] sm:$0xff]  }
  0x33   :  { %5240 = vmatpush3.bf16.msra.mxu0 %v5859_v53  ;;  %v5927_v53 = vld [vmem:[%s7767_s1 + $0x310] sm:$0xff]  }
  0x34   :  { %5241 = vmatprep.subr.bf16.mxu0 %v5862_v56  ;;  %v5930_v56 = vld [vmem:[%s7767_s1 + $0x358] sm:$0xff]  }
  0x35   :  { %5262 = vmatpush3.bf16.msra.mxu1 %v5861_v55  ;;  %v5929_v55 = vld [vmem:[%s7767_s1 + $0x390] sm:$0xff]  }
  0x36   :  { %5263 = vmatprep.subr.bf16.mxu1 %v5864_v58  ;;  %v5932_v58 = vld [vmem:[%s7767_s1 + $0x3d8] sm:$0xff]  }
  0x37   :  { %5242 = vmatpush3.bf16.msra.mxu0 %v5863_v57  ;;  %v5931_v57 = vld [vmem:[%s7767_s1 + $0x318] sm:$0xff]  }
  0x38   :  { %5243 = vmatprep.subr.bf16.mxu0 %v5866_v60  ;;  %v5934_v60 = vld [vmem:[%s7767_s1 + $0x360] sm:$0xff]  }
  0x39   :  { %5264 = vmatpush3.bf16.msra.mxu1 %v5865_v59  ;;  %v5933_v59 = vld [vmem:[%s7767_s1 + $0x398] sm:$0xff]  }
  0x3a   :  { %5265 = vmatprep.subr.bf16.mxu1 %v5868_v62  ;;  %v5936_v62 = vld [vmem:[%s7767_s1 + $0x3e0] sm:$0xff]  }
  0x3b   :  { %5244 = vmatpush3.bf16.msra.mxu0 %v5867_v61  ;;  %v5935_v61 = vld [vmem:[%s7767_s1 + $0x320] sm:$0xff]  }
  0x3c   :  { %5245 = vmatprep.subr.bf16.mxu0 %v5870_v0  ;;  %v5938_v0 = vld [vmem:[%s7767_s1 + $0x368] sm:$0xff]  }
  0x3d   :  { %5266 = vmatpush3.bf16.msra.mxu1 %v5869_v63  ;;  %v5937_v63 = vld [vmem:[%s7767_s1 + $0x3a0] sm:$0xff]  }
  0x3e   :  { %5267 = vmatprep.subr.bf16.mxu1 %v5872_v2  ;;  %v5940_v2 = vld [vmem:[%s7767_s1 + $0x3e8] sm:$0xff]  }
  0x3f   :  { %5246 = vmatpush3.bf16.msra.mxu0 %v5871_v1  ;;  %v5939_v1 = vld [vmem:[%s7767_s1 + $0x328] sm:$0xff]  }
  0x40   :  { %5275 = vmatprep.subr.bf16.mxu0 %v5877_v6  ;;  %v5944_v6 = vld [vmem:[%s7767_s1 + $0x3f0] sm:$0xff]  }
  0x41   :  { %5268 = vmatpush3.bf16.msra.mxu1 %v5876_v5  ;;  %v5943_v5 = vld [vmem:[%s7767_s1 + $0x330] sm:$0xff]  }
  0x42   :  { %3581 = vmatmul.mubr.bf16.vlgmr.msra.gmra.mrb[4].mxu0 %v5873_v3  ;;  %5297 = vmatprep.subr.bf16.mxu1 %v5882_v10  ;;  %v5941_v3 = vld [vmem:[%s7767_s1 + $0x3a8] sm:$0xff]   ;;  %v5948_v10 = vld [vmem:[%s7767_s1 + $0x3f8] sm:$0xff]  }
  0x43   :  { %5276 = vmatpush3.bf16.msra.mxu0 %v5881_v9  ;;  %3662 = vmatprep.mubr.bf16.mxu0 %v5913_v40  ;;  %v5947_v9 = vld [vmem:[%s7767_s1 + $0x338] sm:$0xff]   ;;  %v5980_v40 = vld [vmem:[%s7767_s1 + $0x470] sm:$0xff]  }
  0x44   :  { %3622 = vmatmul.mubr.bf16.vlgmr.msra.gmra.mrb[4].mxu1 %v5878_v7  ;;  %5277 = vmatprep.subr.bf16.mxu0 %v5884_v12  ;;  %v5945_v7 = vld [vmem:[%s7767_s1 + $0x3b0] sm:$0xff]  }
  0x45   :  { %5298 = vmatpush3.bf16.msra.mxu1 %v5883_v11  ;;  %3703 = vmatprep.mubr.bf16.mxu1 %v5918_v44  ;;  %v5949_v11 = vld [vmem:[%s7768_s0 + $0x30] ss:$196 sps:$4 sm:$0xff]   ;;  %v5984_v44 = vld [vmem:[%s7767_s1 + $0x478] sm:$0xff]  }
  0x46   :  { %5299 = vmatprep.subr.bf16.mxu1 %v5886_v14  ;;  %v5951_v12 = vld [vmem:[%s7768_s0 + $0x34] ss:$196 sps:$4 sm:$0xff]   ;;  %v5953_v14 = vld [vmem:[%s7767_s1 + $0x440] sm:$0xff]  }
  0x47   :  { %5278 = vmatpush3.bf16.msra.mxu0 %v5885_v13  ;;  %v5952_v13 = vld [vmem:[%s7767_s1 + $0x3b8] sm:$0xff]  }
  0x48   :  { %5279 = vmatprep.subr.bf16.mxu0 %v5888_v16  ;;  %v5956_v16 = vld [vmem:[%s7768_s0 + $0x3c] ss:$196 sps:$4 sm:$0xff]  }
  0x49   :  { %5300 = vmatpush3.bf16.msra.mxu1 %v5887_v15  ;;  %v5954_v15 = vld [vmem:[%s7768_s0 + $0x38] ss:$196 sps:$4 sm:$0xff]  }
  0x4a   :  { %5301 = vmatprep.subr.bf16.mxu1 %v5890_v18  ;;  %v5958_v18 = vld [vmem:[%s7767_s1 + $0x4c0] sm:$0xff]  }
  0x4b   :  { %5280 = vmatpush3.bf16.msra.mxu0 %v5889_v17  ;;  %v5957_v17 = vld [vmem:[%s7767_s1 + $0x400] sm:$0xff]  }
  0x4c   :  { %5281 = vmatprep.subr.bf16.mxu0 %v5892_v20  ;;  %v5960_v20 = vld [vmem:[%s7767_s1 + $0x448] sm:$0xff]  }
  0x4d   :  { %5302 = vmatpush3.bf16.msra.mxu1 %v5891_v19  ;;  %v5959_v19 = vld [vmem:[%s7767_s1 + $0x480] sm:$0xff]  }
  0x4e   :  { %5303 = vmatprep.subr.bf16.mxu1 %v5894_v22  ;;  %v5962_v22 = vld [vmem:[%s7767_s1 + $0x4c8] sm:$0xff]  }
  0x4f   :  { %5282 = vmatpush3.bf16.msra.mxu0 %v5893_v21  ;;  %v5961_v21 = vld [vmem:[%s7767_s1 + $0x408] sm:$0xff]  }
  0x50   :  { %5283 = vmatprep.subr.bf16.mxu0 %v5896_v24  ;;  %v5964_v24 = vld [vmem:[%s7767_s1 + $0x450] sm:$0xff]  }
  0x51   :  { %5304 = vmatpush3.bf16.msra.mxu1 %v5895_v23  ;;  %v5963_v23 = vld [vmem:[%s7767_s1 + $0x488] sm:$0xff]  }
  0x52   :  { %5305 = vmatprep.subr.bf16.mxu1 %v5898_v26  ;;  %v5966_v26 = vld [vmem:[%s7767_s1 + $0x4d0] sm:$0xff]  }
  0x53   :  { %5284 = vmatpush3.bf16.msra.mxu0 %v5897_v25  ;;  %v5965_v25 = vld [vmem:[%s7767_s1 + $0x410] sm:$0xff]  }
  0x54   :  { %5285 = vmatprep.subr.bf16.mxu0 %v5900_v28  ;;  %v5968_v28 = vld [vmem:[%s7767_s1 + $0x458] sm:$0xff]  }
  0x55   :  { %5306 = vmatpush3.bf16.msra.mxu1 %v5899_v27  ;;  %v5967_v27 = vld [vmem:[%s7767_s1 + $0x490] sm:$0xff]  }
  0x56   :  { %5307 = vmatprep.subr.bf16.mxu1 %v5902_v30  ;;  %v5970_v30 = vld [vmem:[%s7767_s1 + $0x4d8] sm:$0xff]  }
  0x57   :  { %5286 = vmatpush3.bf16.msra.mxu0 %v5901_v29  ;;  %v5969_v29 = vld [vmem:[%s7767_s1 + $0x418] sm:$0xff]  }
  0x58   :  { %5287 = vmatprep.subr.bf16.mxu0 %v5904_v32  ;;  %v5972_v32 = vld [vmem:[%s7767_s1 + $0x460] sm:$0xff]  }
  0x59   :  { %5308 = vmatpush3.bf16.msra.mxu1 %v5903_v31  ;;  %v5971_v31 = vld [vmem:[%s7767_s1 + $0x498] sm:$0xff]  }
  0x5a   :  { %5309 = vmatprep.subr.bf16.mxu1 %v5906_v34  ;;  %v5974_v34 = vld [vmem:[%s7767_s1 + $0x4e0] sm:$0xff]  }
  0x5b   :  { %5288 = vmatpush3.bf16.msra.mxu0 %v5905_v33  ;;  %v5973_v33 = vld [vmem:[%s7767_s1 + $0x420] sm:$0xff]  }
  0x5c   :  { %5289 = vmatprep.subr.bf16.mxu0 %v5908_v36  ;;  %v5976_v36 = vld [vmem:[%s7767_s1 + $0x468] sm:$0xff]  }
  0x5d   :  { %5310 = vmatpush3.bf16.msra.mxu1 %v5907_v35  ;;  %v5975_v35 = vld [vmem:[%s7767_s1 + $0x4a0] sm:$0xff]  }
  0x5e   :  { %5311 = vmatprep.subr.bf16.mxu1 %v5910_v38  ;;  %v5978_v38 = vld [vmem:[%s7767_s1 + $0x4e8] sm:$0xff]  }
  0x5f   :  { %5290 = vmatpush3.bf16.msra.mxu0 %v5909_v37  ;;  %v5977_v37 = vld [vmem:[%s7767_s1 + $0x428] sm:$0xff]  }
  0x60   :  { %5319 = vmatprep.subr.bf16.mxu0 %v5915_v42  ;;  %v5982_v42 = vld [vmem:[%s7767_s1 + $0x4f0] sm:$0xff]  }
  0x61   :  { %5312 = vmatpush3.bf16.msra.mxu1 %v5914_v41  ;;  %v5981_v41 = vld [vmem:[%s7767_s1 + $0x430] sm:$0xff]  }
  0x62   :  { %3663 = vmatmul.mubr.bf16.vlgmr.msra.gmra.mrb[8].mxu0 %v5911_v39  ;;  %5341 = vmatprep.subr.bf16.mxu1 %v5920_v46  ;;  %v5979_v39 = vld [vmem:[%s7767_s1 + $0x4a8] sm:$0xff]   ;;  %v5986_v46 = vld [vmem:[%s7767_s1 + $0x4f8] sm:$0xff]  }
  0x63   :  { %5320 = vmatpush3.bf16.msra.mxu0 %v5919_v45  ;;  %3744 = vmatprep.mubr.bf16.mxu0 %v5951_v12  ;;  %v5985_v45 = vld [vmem:[%s7767_s1 + $0x438] sm:$0xff]   ;;  %v6018_v12 = vld [vmem:[%s7767_s1 + $0x570] sm:$0xff]  }
  0x64   :  { %3704 = vmatmul.mubr.bf16.vlgmr.msra.gmra.mrb[8].mxu1 %v5916_v43  ;;  %5321 = vmatprep.subr.bf16.mxu0 %v5922_v48  ;;  %v5983_v43 = vld [vmem:[%s7767_s1 + $0x4b0] sm:$0xff]   ;;  %v5989_v48 = vld [vmem:[%s7768_s0 + $0x44] ss:$196 sps:$4 sm:$0xff]  }
  0x65   :  { %5342 = vmatpush3.bf16.msra.mxu1 %v5921_v47  ;;  %3785 = vmatprep.mubr.bf16.mxu1 %v5956_v16  ;;  %v5987_v47 = vld [vmem:[%s7768_s0 + $0x40] ss:$196 sps:$4 sm:$0xff]   ;;  %v6022_v16 = vld [vmem:[%s7767_s1 + $0x578] sm:$0xff]  }
  0x66   :  { %5343 = vmatprep.subr.bf16.mxu1 %v5924_v50  ;;  %v5991_v50 = vld [vmem:[%s7767_s1 + $0x540] sm:$0xff]  }
  0x67   :  { %5322 = vmatpush3.bf16.msra.mxu0 %v5923_v49  ;;  %v5990_v49 = vld [vmem:[%s7767_s1 + $0x4b8] sm:$0xff]  }
  0x68   :  { %5323 = vmatprep.subr.bf16.mxu0 %v5926_v52  ;;  %v5994_v52 = vld [vmem:[%s7768_s0 + $0x4c] ss:$196 sps:$4 sm:$0xff]  }
  0x69   :  { %5344 = vmatpush3.bf16.msra.mxu1 %v5925_v51  ;;  %v5992_v51 = vld [vmem:[%s7768_s0 + $0x48] ss:$196 sps:$4 sm:$0xff]  }
  0x6a   :  { %5345 = vmatprep.subr.bf16.mxu1 %v5928_v54  ;;  %v5996_v54 = vld [vmem:[%s7767_s1 + $0x5c0] sm:$0xff]  }
  0x6b   :  { %5324 = vmatpush3.bf16.msra.mxu0 %v5927_v53  ;;  %v5995_v53 = vld [vmem:[%s7767_s1 + $0x500] sm:$0xff]  }
  0x6c   :  { %5325 = vmatprep.subr.bf16.mxu0 %v5930_v56  ;;  %v5998_v56 = vld [vmem:[%s7767_s1 + $0x548] sm:$0xff]  }
  0x6d   :  { %5346 = vmatpush3.bf16.msra.mxu1 %v5929_v55  ;;  %v5997_v55 = vld [vmem:[%s7767_s1 + $0x580] sm:$0xff]  }
  0x6e   :  { %5347 = vmatprep.subr.bf16.mxu1 %v5932_v58  ;;  %v6000_v58 = vld [vmem:[%s7767_s1 + $0x5c8] sm:$0xff]  }
  0x6f   :  { %5326 = vmatpush3.bf16.msra.mxu0 %v5931_v57  ;;  %v5999_v57 = vld [vmem:[%s7767_s1 + $0x508] sm:$0xff]  }
  0x70   :  { %5327 = vmatprep.subr.bf16.mxu0 %v5934_v60  ;;  %v6002_v60 = vld [vmem:[%s7767_s1 + $0x550] sm:$0xff]  }
  0x71   :  { %5348 = vmatpush3.bf16.msra.mxu1 %v5933_v59  ;;  %v6001_v59 = vld [vmem:[%s7767_s1 + $0x588] sm:$0xff]  }
  0x72   :  { %5349 = vmatprep.subr.bf16.mxu1 %v5936_v62  ;;  %v6004_v62 = vld [vmem:[%s7767_s1 + $0x5d0] sm:$0xff]  }
  0x73   :  { %5328 = vmatpush3.bf16.msra.mxu0 %v5935_v61  ;;  %v6003_v61 = vld [vmem:[%s7767_s1 + $0x510] sm:$0xff]  }
  0x74   :  { %5329 = vmatprep.subr.bf16.mxu0 %v5938_v0  ;;  %v6006_v0 = vld [vmem:[%s7767_s1 + $0x558] sm:$0xff]  }
  0x75   :  { %5350 = vmatpush3.bf16.msra.mxu1 %v5937_v63  ;;  %v6005_v63 = vld [vmem:[%s7767_s1 + $0x590] sm:$0xff]  }
  0x76   :  { %5351 = vmatprep.subr.bf16.mxu1 %v5940_v2  ;;  %v6008_v2 = vld [vmem:[%s7767_s1 + $0x5d8] sm:$0xff]  }
  0x77   :  { %5330 = vmatpush3.bf16.msra.mxu0 %v5939_v1  ;;  %v6007_v1 = vld [vmem:[%s7767_s1 + $0x518] sm:$0xff]  }
  0x78   :  { %5331 = vmatprep.subr.bf16.mxu0 %v5942_v4  ;;  %v6010_v4 = vld [vmem:[%s7767_s1 + $0x560] sm:$0xff]  }
  0x79   :  { %5352 = vmatpush3.bf16.msra.mxu1 %v5941_v3  ;;  %v6009_v3 = vld [vmem:[%s7767_s1 + $0x598] sm:$0xff]  }
  0x7a   :  { %5353 = vmatprep.subr.bf16.mxu1 %v5944_v6  ;;  %v6012_v6 = vld [vmem:[%s7767_s1 + $0x5e0] sm:$0xff]  }
  0x7b   :  { %5332 = vmatpush3.bf16.msra.mxu0 %v5943_v5  ;;  %v6011_v5 = vld [vmem:[%s7767_s1 + $0x520] sm:$0xff]  }
  0x7c   :  { %5333 = vmatprep.subr.bf16.mxu0 %v5946_v8  ;;  %v6014_v8 = vld [vmem:[%s7767_s1 + $0x568] sm:$0xff]  }
  0x7d   :  { %5354 = vmatpush3.bf16.msra.mxu1 %v5945_v7  ;;  %v6013_v7 = vld [vmem:[%s7767_s1 + $0x5a0] sm:$0xff]  }
  0x7e   :  { %5355 = vmatprep.subr.bf16.mxu1 %v5948_v10  ;;  %v6016_v10 = vld [vmem:[%s7767_s1 + $0x5e8] sm:$0xff]  }
  0x7f   :  { %5334 = vmatpush3.bf16.msra.mxu0 %v5947_v9  ;;  %v6015_v9 = vld [vmem:[%s7767_s1 + $0x528] sm:$0xff]  }
  0x80   :  { %5363 = vmatprep.subr.bf16.mxu0 %v5953_v14  ;;  %v6020_v14 = vld [vmem:[%s7767_s1 + $0x5f0] sm:$0xff]  }
  0x81   :  { %5356 = vmatpush3.bf16.msra.mxu1 %v5952_v13  ;;  %v6019_v13 = vld [vmem:[%s7767_s1 + $0x530] sm:$0xff]  }
  0x82   :  { %3745 = vmatmul.mubr.bf16.vlgmr.msra.gmra.mrb[12].mxu0 %v5949_v11  ;;  %5385 = vmatprep.subr.bf16.mxu1 %v5958_v18  ;;  %v6017_v11 = vld [vmem:[%s7767_s1 + $0x5a8] sm:$0xff]   ;;  %v6024_v18 = vld [vmem:[%s7767_s1 + $0x5f8] sm:$0xff]  }
  0x83   :  { %5364 = vmatpush3.bf16.msra.mxu0 %v5957_v17  ;;  %3826 = vmatprep.mubr.bf16.mxu0 %v5989_v48  ;;  %v6023_v17 = vld [vmem:[%s7767_s1 + $0x538] sm:$0xff]   ;;  %v6056_v48 = vld [vmem:[%s7767_s1 + $0x670] sm:$0xff]  }
  0x84   :  { %3786 = vmatmul.mubr.bf16.vlgmr.msra.gmra.mrb[12].mxu1 %v5954_v15  ;;  %5365 = vmatprep.subr.bf16.mxu0 %v5960_v20  ;;  %v6021_v15 = vld [vmem:[%s7767_s1 + $0x5b0] sm:$0xff]  }
  0x85   :  { %5386 = vmatpush3.bf16.msra.mxu1 %v5959_v19  ;;  %3867 = vmatprep.mubr.bf16.mxu1 %v5994_v52  ;;  %v6025_v19 = vld [vmem:[%s7768_s0 + $0x50] ss:$196 sps:$4 sm:$0xff]   ;;  %v6060_v52 = vld [vmem:[%s7767_s1 + $0x678] sm:$0xff]  }
  0x86   :  { %5387 = vmatprep.subr.bf16.mxu1 %v5962_v22  ;;  %v6027_v20 = vld [vmem:[%s7768_s0 + $0x54] ss:$196 sps:$4 sm:$0xff]   ;;  %v6029_v22 = vld [vmem:[%s7767_s1 + $0x640] sm:$0xff]  }
  0x87   :  { %5366 = vmatpush3.bf16.msra.mxu0 %v5961_v21  ;;  %v6028_v21 = vld [vmem:[%s7767_s1 + $0x5b8] sm:$0xff]  }
  0x88   :  { %5367 = vmatprep.subr.bf16.mxu0 %v5964_v24  ;;  %v6032_v24 = vld [vmem:[%s7768_s0 + $0x5c] ss:$196 sps:$4 sm:$0xff]  }
  0x89   :  { %5388 = vmatpush3.bf16.msra.mxu1 %v5963_v23  ;;  %v6030_v23 = vld [vmem:[%s7768_s0 + $0x58] ss:$196 sps:$4 sm:$0xff]  }
  0x8a   :  { %5389 = vmatprep.subr.bf16.mxu1 %v5966_v26  ;;  %v6034_v26 = vld [vmem:[%s7767_s1 + $0x6c0] sm:$0xff]  }
  0x8b   :  { %5368 = vmatpush3.bf16.msra.mxu0 %v5965_v25  ;;  %v6033_v25 = vld [vmem:[%s7767_s1 + $0x600] sm:$0xff]  }
  0x8c   :  { %5369 = vmatprep.subr.bf16.mxu0 %v5968_v28  ;;  %v6036_v28 = vld [vmem:[%s7767_s1 + $0x648] sm:$0xff]  }
  0x8d   :  { %5390 = vmatpush3.bf16.msra.mxu1 %v5967_v27  ;;  %v6035_v27 = vld [vmem:[%s7767_s1 + $0x680] sm:$0xff]  }
  0x8e   :  { %5391 = vmatprep.subr.bf16.mxu1 %v5970_v30  ;;  %v6038_v30 = vld [vmem:[%s7767_s1 + $0x6c8] sm:$0xff]  }
  0x8f   :  { %5370 = vmatpush3.bf16.msra.mxu0 %v5969_v29  ;;  %v6037_v29 = vld [vmem:[%s7767_s1 + $0x608] sm:$0xff]  }
  0x90   :  { %5371 = vmatprep.subr.bf16.mxu0 %v5972_v32  ;;  %v6040_v32 = vld [vmem:[%s7767_s1 + $0x650] sm:$0xff]  }
  0x91   :  { %5392 = vmatpush3.bf16.msra.mxu1 %v5971_v31  ;;  %v6039_v31 = vld [vmem:[%s7767_s1 + $0x688] sm:$0xff]  }
  0x92   :  { %5393 = vmatprep.subr.bf16.mxu1 %v5974_v34  ;;  %v6042_v34 = vld [vmem:[%s7767_s1 + $0x6d0] sm:$0xff]  }
  0x93   :  { %5372 = vmatpush3.bf16.msra.mxu0 %v5973_v33  ;;  %v6041_v33 = vld [vmem:[%s7767_s1 + $0x610] sm:$0xff]  }
  0x94   :  { %5373 = vmatprep.subr.bf16.mxu0 %v5976_v36  ;;  %v6044_v36 = vld [vmem:[%s7767_s1 + $0x658] sm:$0xff]  }
  0x95   :  { %5394 = vmatpush3.bf16.msra.mxu1 %v5975_v35  ;;  %v6043_v35 = vld [vmem:[%s7767_s1 + $0x690] sm:$0xff]  }
  0x96   :  { %5395 = vmatprep.subr.bf16.mxu1 %v5978_v38  ;;  %v6046_v38 = vld [vmem:[%s7767_s1 + $0x6d8] sm:$0xff]  }
  0x97   :  { %5374 = vmatpush3.bf16.msra.mxu0 %v5977_v37  ;;  %v6045_v37 = vld [vmem:[%s7767_s1 + $0x618] sm:$0xff]  }
  0x98   :  { %5375 = vmatprep.subr.bf16.mxu0 %v5980_v40  ;;  %v6048_v40 = vld [vmem:[%s7767_s1 + $0x660] sm:$0xff]  }
  0x99   :  { %5396 = vmatpush3.bf16.msra.mxu1 %v5979_v39  ;;  %v6047_v39 = vld [vmem:[%s7767_s1 + $0x698] sm:$0xff]  }
  0x9a   :  { %5397 = vmatprep.subr.bf16.mxu1 %v5982_v42  ;;  %v6050_v42 = vld [vmem:[%s7767_s1 + $0x6e0] sm:$0xff]  }
  0x9b   :  { %5376 = vmatpush3.bf16.msra.mxu0 %v5981_v41  ;;  %v6049_v41 = vld [vmem:[%s7767_s1 + $0x620] sm:$0xff]  }
  0x9c   :  { %5377 = vmatprep.subr.bf16.mxu0 %v5984_v44  ;;  %v6052_v44 = vld [vmem:[%s7767_s1 + $0x668] sm:$0xff]  }
  0x9d   :  { %5398 = vmatpush3.bf16.msra.mxu1 %v5983_v43  ;;  %v6051_v43 = vld [vmem:[%s7767_s1 + $0x6a0] sm:$0xff]  }
  0x9e   :  { %5399 = vmatprep.subr.bf16.mxu1 %v5986_v46  ;;  %v6054_v46 = vld [vmem:[%s7767_s1 + $0x6e8] sm:$0xff]  }
  0x9f   :  { %5378 = vmatpush3.bf16.msra.mxu0 %v5985_v45  ;;  %v6053_v45 = vld [vmem:[%s7767_s1 + $0x628] sm:$0xff]  }
  0xa0   :  { %5407 = vmatprep.subr.bf16.mxu0 %v5991_v50  ;;  %v6058_v50 = vld [vmem:[%s7767_s1 + $0x6f0] sm:$0xff]  }
  0xa1   :  { %5400 = vmatpush3.bf16.msra.mxu1 %v5990_v49  ;;  %v6057_v49 = vld [vmem:[%s7767_s1 + $0x630] sm:$0xff]  }
  0xa2   :  { %3827 = vmatmul.mubr.bf16.vlgmr.msra.gmra.mrb[16].mxu0 %v5987_v47  ;;  %5429 = vmatprep.subr.bf16.mxu1 %v5996_v54  ;;  %v6055_v47 = vld [vmem:[%s7767_s1 + $0x6a8] sm:$0xff]   ;;  %v6062_v54 = vld [vmem:[%s7767_s1 + $0x6f8] sm:$0xff]  }
  0xa3   :  { %5408 = vmatpush3.bf16.msra.mxu0 %v5995_v53  ;;  %3908 = vmatprep.mubr.bf16.mxu0 %v6027_v20  ;;  %v6061_v53 = vld [vmem:[%s7767_s1 + $0x638] sm:$0xff]  }
  0xa4   :  { %3868 = vmatmul.mubr.bf16.vlgmr.msra.gmra.mrb[16].mxu1 %v5992_v51  ;;  %5409 = vmatprep.subr.bf16.mxu0 %v5998_v56  ;;  %v6059_v51 = vld [vmem:[%s7767_s1 + $0x6b0] sm:$0xff]   ;;  %v6065_v56 = vld [vmem:[%s7768_s0 + $0x64] ss:$196 sps:$4 sm:$0xff]   ;;  %v6082_v20 = vld [vmem:[%s7767_s1 + $0x758] sm:$0xff]  }
  0xa5   :  { %5430 = vmatpush3.bf16.msra.mxu1 %v5997_v55  ;;  %3949 = vmatprep.mubr.bf16.mxu1 %v6032_v24  ;;  %v6063_v55 = vld [vmem:[%s7768_s0 + $0x60] ss:$196 sps:$4 sm:$0xff]  }
  0xa6   :  { %5431 = vmatprep.subr.bf16.mxu1 %v6000_v58  ;;  %v6067_v58 = vld [vmem:[%s7767_s1 + $0x740] sm:$0xff]  }
  0xa7   :  { %5410 = vmatpush3.bf16.msra.mxu0 %v5999_v57  ;;  %v6066_v57 = vld [vmem:[%s7767_s1 + $0x6b8] sm:$0xff]   ;;  %v6086_v24 = vld [vmem:[%s7767_s1 + $0x760] sm:$0xff]  }
  0xa8   :  { %5411 = vmatprep.subr.bf16.mxu0 %v6002_v60  ;;  %v6070_v60 = vld [vmem:[%s7768_s0 + $0x6c] ss:$196 sps:$4 sm:$0xff]  }
  0xa9   :  { %5432 = vmatpush3.bf16.msra.mxu1 %v6001_v59  ;;  %v6068_v59 = vld [vmem:[%s7768_s0 + $0x68] ss:$196 sps:$4 sm:$0xff]  }
  0xaa   :  { %5433 = vmatprep.subr.bf16.mxu1 %v6004_v62  ;;  %v6072_v62 = vld [vmem:[%s7767_s1 + $0x7c0] sm:$0xff]  }
  0xab   :  { %5412 = vmatpush3.bf16.msra.mxu0 %v6003_v61  ;;  %v6071_v61 = vld [vmem:[%s7767_s1 + $0x700] sm:$0xff]  }
  0xac   :  { %5413 = vmatprep.subr.bf16.mxu0 %v6006_v0 }
  0xad   :  { %5434 = vmatpush3.bf16.msra.mxu1 %v6005_v63  ;;  %v6073_v63 = vld [vmem:[%s7767_s1 + $0x780] sm:$0xff]  }
  0xae   :  { %5435 = vmatprep.subr.bf16.mxu1 %v6008_v2 }
  0xaf   :  { %5414 = vmatpush3.bf16.msra.mxu0 %v6007_v1  ;;  %v6074_v1 = vld [vmem:[%s7767_s1 + $0x748] sm:$0xff]  }
  0xb0   :  { %5415 = vmatprep.subr.bf16.mxu0 %v6010_v4 }
  0xb1   :  { %5436 = vmatpush3.bf16.msra.mxu1 %v6009_v3  ;;  %v6075_v3 = vld [vmem:[%s7767_s1 + $0x708] sm:$0xff]  }
  0xb2   :  { %5437 = vmatprep.subr.bf16.mxu1 %v6012_v6  ;;  %v6076_v6 = vld [vmem:[%s7767_s1 + $0x7c8] sm:$0xff]  }
  0xb3   :  { %5416 = vmatpush3.bf16.msra.mxu0 %v6011_v5 }
  0xb4   :  { %5417 = vmatprep.subr.bf16.mxu0 %v6014_v8  ;;  %v6077_v8 = vld [vmem:[%s7767_s1 + $0x788] sm:$0xff]  }
  0xb5   :  { %5438 = vmatpush3.bf16.msra.mxu1 %v6013_v7 }
  0xb6   :  { %5439 = vmatprep.subr.bf16.mxu1 %v6016_v10  ;;  %v6078_v10 = vld [vmem:[%s7767_s1 + $0x750] sm:$0xff]  }
  0xb7   :  { %5418 = vmatpush3.bf16.msra.mxu0 %v6015_v9 }
  0xb8   :  { %5419 = vmatprep.subr.bf16.mxu0 %v6018_v12 }
  0xb9   :  { %5440 = vmatpush3.bf16.msra.mxu1 %v6017_v11 }
  0xba   :  { %5441 = vmatprep.subr.bf16.mxu1 %v6020_v14 }
  0xbb   :  { %5420 = vmatpush3.bf16.msra.mxu0 %v6019_v13  ;;  %v6079_v13 = vld [vmem:[%s7767_s1 + $0x710] sm:$0xff]  }
  0xbc   :  { %5421 = vmatprep.subr.bf16.mxu0 %v6022_v16  ;;  %v6080_v16 = vld [vmem:[%s7767_s1 + $0x7d0] sm:$0xff]  }
  0xbd   :  { %5442 = vmatpush3.bf16.msra.mxu1 %v6021_v15 }
  0xbe   :  { %5443 = vmatprep.subr.bf16.mxu1 %v6024_v18  ;;  %v6081_v18 = vld [vmem:[%s7767_s1 + $0x790] sm:$0xff]  }
  0xbf   :  { %5422 = vmatpush3.bf16.msra.mxu0 %v6023_v17 }
  0xc0   :  { %5451 = vmatprep.subr.bf16.mxu0 %v6029_v22  ;;  %v6084_v22 = vld [vmem:[%s7767_s1 + $0x7d8] sm:$0xff]  }
  0xc1   :  { %5444 = vmatpush3.bf16.msra.mxu1 %v6028_v21  ;;  %v6083_v21 = vld [vmem:[%s7767_s1 + $0x718] sm:$0xff]  }
  0xc2   :  { %3909 = vmatmul.mubr.bf16.vlgmr.msra.gmra.mrb[20].mxu0 %v6025_v19  ;;  %5473 = vmatprep.subr.bf16.mxu1 %v6034_v26  ;;  %v6088_v26 = vld [vmem:[%s7767_s1 + $0x7e0] sm:$0xff]  }
  0xc3   :  { %5452 = vmatpush3.bf16.msra.mxu0 %v6033_v25  ;;  %3990 = vmatprep.mubr.bf16.mxu0 %v6065_v56  ;;  %v6087_v25 = vld [vmem:[%s7767_s1 + $0x720] sm:$0xff]  }
  0xc4   :  { %3950 = vmatmul.mubr.bf16.vlgmr.msra.gmra.mrb[20].mxu1 %v6030_v23  ;;  %5453 = vmatprep.subr.bf16.mxu0 %v6036_v28  ;;  %v6085_v23 = vld [vmem:[%s7767_s1 + $0x798] sm:$0xff]   ;;  %v4727_v28 = vld [vmem:[%s7769_s2] ss:$0 sm:$0xff] }
  0xc5   :  { %5474 = vmatpush3.bf16.msra.mxu1 %v6035_v27  ;;  %4031 = vmatprep.mubr.bf16.mxu1 %v6070_v60  ;;  %v6089_v27 = vld [vmem:[%s7767_s1 + $0x7a0] sm:$0xff]   ;;  %v6114_v60 = vld [vmem:[%s7767_s1 + $0x8c8] sm:$0xff]  }
  0xc6   :  { %5475 = vmatprep.subr.bf16.mxu1 %v6038_v30  ;;  %v6090_v30 = vld [vmem:[%s7767_s1 + $0x768] sm:$0xff]  }
  0xc7   :  { %5454 = vmatpush3.bf16.msra.mxu0 %v6037_v29 }
  0xc8   :  { %5455 = vmatprep.subr.bf16.mxu0 %v6040_v32  ;;  %v6091_v32 = vld [vmem:[%s7767_s1 + $0x728] sm:$0xff]  }
  0xc9   :  { %5476 = vmatpush3.bf16.msra.mxu1 %v6039_v31 }
  0xca   :  { %5477 = vmatprep.subr.bf16.mxu1 %v6042_v34  ;;  %v6092_v34 = vld [vmem:[%s7767_s1 + $0x7e8] sm:$0xff]  }
  0xcb   :  { %5456 = vmatpush3.bf16.msra.mxu0 %v6041_v33 }
  0xcc   :  { %5457 = vmatprep.subr.bf16.mxu0 %v6044_v36  ;;  %v6093_v36 = vld [vmem:[%s7767_s1 + $0x7a8] sm:$0xff]  }
  0xcd   :  { %5478 = vmatpush3.bf16.msra.mxu1 %v6043_v35 }
  0xce   :  { %5479 = vmatprep.subr.bf16.mxu1 %v6046_v38  ;;  %v6095_v38 = vld [vmem:[%s7767_s1 + $0x730] sm:$0xff]  }
  0xcf   :  { %5458 = vmatpush3.bf16.msra.mxu0 %v6045_v37  ;;  %v6094_v37 = vld [vmem:[%s7767_s1 + $0x770] sm:$0xff]  }
  0xd0   :  { %5459 = vmatprep.subr.bf16.mxu0 %v6048_v40  ;;  %v6097_v40 = vld [vmem:[%s7767_s1 + $0x7b0] sm:$0xff]  }
  0xd1   :  { %5480 = vmatpush3.bf16.msra.mxu1 %v6047_v39  ;;  %v6096_v39 = vld [vmem:[%s7767_s1 + $0x7f0] sm:$0xff]  }
  0xd2   :  { %5481 = vmatprep.subr.bf16.mxu1 %v6050_v42  ;;  %v6099_v42 = vld [vmem:[%s7767_s1 + $0x738] sm:$0xff]  }
  0xd3   :  { %5460 = vmatpush3.bf16.msra.mxu0 %v6049_v41  ;;  %v6098_v41 = vld [vmem:[%s7767_s1 + $0x778] sm:$0xff]  }
  0xd4   :  { %5461 = vmatprep.subr.bf16.mxu0 %v6052_v44  ;;  %v6101_v44 = vld [vmem:[%s7768_s0 + $0x70] ss:$196 sps:$4 sm:$0xff]  }
  0xd5   :  { %5482 = vmatpush3.bf16.msra.mxu1 %v6051_v43  ;;  %v6100_v43 = vld [vmem:[%s7767_s1 + $0x7f8] sm:$0xff]  }
  0xd6   :  { %5483 = vmatprep.subr.bf16.mxu1 %v6054_v46  ;;  %v6104_v46 = vld [vmem:[%s7767_s1 + $0x7b8] sm:$0xff]  }
  0xd7   :  { %5462 = vmatpush3.bf16.msra.mxu0 %v6053_v45  ;;  %v6103_v45 = vld [vmem:[%s7768_s0 + $0x74] ss:$196 sps:$4 sm:$0xff]  }
  0xd8   :  { %5463 = vmatprep.subr.bf16.mxu0 %v6056_v48  ;;  %v6106_v48 = vld [vmem:[%s7768_s0 + $0x78] ss:$196 sps:$4 sm:$0xff]  }
  0xd9   :  { %5484 = vmatpush3.bf16.msra.mxu1 %v6055_v47  ;;  %v6105_v47 = vld [vmem:[%s7767_s1 + $0x840] sm:$0xff]  }
  0xda   :  { %5485 = vmatprep.subr.bf16.mxu1 %v6058_v50  ;;  %v6109_v50 = vld [vmem:[%s7767_s1 + $0x800] sm:$0xff]  }
  0xdb   :  { %5464 = vmatpush3.bf16.msra.mxu0 %v6057_v49  ;;  %v6108_v49 = vld [vmem:[%s7768_s0 + $0x7c] ss:$196 sps:$4 sm:$0xff]  }
  0xdc   :  { %5465 = vmatprep.subr.bf16.mxu0 %v6060_v52 }
  0xdd   :  { %5486 = vmatpush3.bf16.msra.mxu1 %v6059_v51  ;;  %v6110_v51 = vld [vmem:[%s7767_s1 + $0x8c0] sm:$0xff]  }
  0xde   :  { %5487 = vmatprep.subr.bf16.mxu1 %v6062_v54 }
  0xdf   :  { %5466 = vmatpush3.bf16.msra.mxu0 %v6061_v53  ;;  %v6111_v53 = vld [vmem:[%s7767_s1 + $0x880] sm:$0xff]  }
  0xe0   :  { %5495 = vmatprep.subr.bf16.mxu0 %v6067_v58  ;;  %v6113_v58 = vld [vmem:[%s7767_s1 + $0x808] sm:$0xff]  }
  0xe1   :  { %5488 = vmatpush3.bf16.msra.mxu1 %v6066_v57 }
  0xe2   :  { %3991 = vmatmul.mubr.bf16.vlgmr.msra.gmra.mrb[24].mxu0 %v6063_v55  ;;  %5517 = vmatprep.subr.bf16.mxu1 %v6072_v62  ;;  %v6112_v55 = vld [vmem:[%s7767_s1 + $0x848] sm:$0xff]  }
  0xe3   :  { %5496 = vmatpush3.bf16.msra.mxu0 %v6071_v61  ;;  %4072 = vmatprep.mubr.bf16.mxu0 %v6103_v45 }
  0xe4   :  { %4032 = vmatmul.mubr.bf16.vlgmr.msra.gmra.mrb[24].mxu1 %v6068_v59  ;;  %5497 = vmatprep.subr.bf16.mxu0 %v6074_v1 }
  0xe5   :  { %5518 = vmatpush3.bf16.msra.mxu1 %v6073_v63  ;;  %4113 = vmatprep.mubr.bf16.mxu1 %v6108_v49 }
  0xe6   :  { %5519 = vmatprep.subr.bf16.mxu1 %v6076_v6  ;;  %v6117_v6 = vld [vmem:[%s7767_s1 + $0x810] sm:$0xff]  }
  0xe7   :  { %5498 = vmatpush3.bf16.msra.mxu0 %v6075_v3 }
  0xe8   :  { %5499 = vmatprep.subr.bf16.mxu0 %v6078_v10 }
  0xe9   :  { %5520 = vmatpush3.bf16.msra.mxu1 %v6077_v8  ;;  %v6118_v8 = vld [vmem:[%s7767_s1 + $0x8d0] sm:$0xff]  }
  0xea   :  { %5521 = vmatprep.subr.bf16.mxu1 %v6080_v16  ;;  %v6123_v16 = vld [vmem:[%s7767_s1 + $0x898] sm:$0xff]  }
  0xeb   :  { %5500 = vmatpush3.bf16.msra.mxu0 %v6079_v13 }
  0xec   :  { %5501 = vmatprep.subr.bf16.mxu0 %v6082_v20  ;;  %v6127_v20 = vld [vmem:[%s7767_s1 + $0x8a0] sm:$0xff]  }
  0xed   :  { %5522 = vmatpush3.bf16.msra.mxu1 %v6081_v18  ;;  %v6125_v18 = vld [vmem:[%s7767_s1 + $0x820] sm:$0xff]  }
  0xee   :  { %5523 = vmatprep.subr.bf16.mxu1 %v6084_v22  ;;  %v6129_v22 = vld [vmem:[%s7767_s1 + $0x828] sm:$0xff]  }
  0xef   :  { %5502 = vmatpush3.bf16.msra.mxu0 %v6083_v21  ;;  %v6128_v21 = vld [vmem:[%s7767_s1 + $0x868] sm:$0xff]  }
  0xf0   :  { %5503 = vmatprep.subr.bf16.mxu0 %v6086_v24  ;;  %v6131_v24 = vld [vmem:[%s7767_s1 + $0x8a8] sm:$0xff]  }
  0xf1   :  { %5524 = vmatpush3.bf16.msra.mxu1 %v6085_v23  ;;  %v6130_v23 = vld [vmem:[%s7767_s1 + $0x8e8] sm:$0xff]  }
  0xf2   :  { %5525 = vmatprep.subr.bf16.mxu1 %v6088_v26  ;;  %v6133_v26 = vld [vmem:[%s7767_s1 + $0x830] sm:$0xff]  }
  0xf3   :  { %5504 = vmatpush3.bf16.msra.mxu0 %v6087_v25  ;;  %v6132_v25 = vld [vmem:[%s7767_s1 + $0x870] sm:$0xff]  }
  0xf4   :  { %5505 = vmatprep.subr.bf16.mxu0 %v6090_v30  ;;  %v6137_v30 = vld [vmem:[%s7767_s1 + $0x838] sm:$0xff]  }
  0xf5   :  { %v5203_v0 = vpop.f32.mrb[0].mxu0  ;;  %5526 = vmatpush3.bf16.msra.mxu1 %v6089_v27  ;;  %v6134_v27 = vld [vmem:[%s7767_s1 + $0x8f0] sm:$0xff]  }
  0xf6   :  { %v5204_v2 = vpop.f32.mrb[1].mxu0  ;;  %5527 = vmatprep.subr.bf16.mxu1 %v6092_v34  ;;  %v6142_v34 = vld [vmem:[%s7767_s1 + $0x8b8] sm:$0xff]  }
  0xf7   :  { %v5205_v4 = vadd.f32 %v5204_v2, %v5203_v0  ;;  %v5206_v5 = vpop.f32.mrb[2].mxu0  ;;  %v5225_v7 = vpop.f32.mrb[0].mxu1  ;;  %5506 = vmatpush3.bf16.msra.mxu0 %v6091_v32  ;;  %v6115_v0 = vld [vmem:[%s7767_s1 + $0x888] sm:$0xff]   ;;  %v6116_v2 = vld [vmem:[%s7767_s1 + $0x850] sm:$0xff]   ;;  %v6139_v32 = vld [vmem:[%s7768_s0 + $0x80] ss:$196 sps:$4 sm:$0xff]  }
  0xf8   :  { %v5207_v9 = vpop.f32.mrb[3].mxu0  ;;  %v5226_v12 = vpop.f32.mrb[1].mxu1  ;;  %5507 = vmatprep.subr.bf16.mxu0 %v6094_v37  ;;  %v6146_v37 = vld [vmem:[%s7768_s0 + $0x8c] ss:$196 sps:$4 sm:$0xff]  }
  0xf9   :  { %v5208_v11 = vadd.f32 %v5207_v9, %v5206_v5  ;;  %v5227_v14 = vadd.f32 %v5226_v12, %v5225_v7  ;;  %v5228_v15 = vpop.f32.mrb[2].mxu1  ;;  %v3501_v29 = vadd.f32 %v5205_v4, %v4727_v28  ;;  %5528 = vmatpush3.bf16.msra.mxu1 %v6093_v36  ;;  %v6120_v12 = vld [vmem:[%s7767_s1 + $0x858] sm:$0xff]   ;;  %v6144_v36 = vld [vmem:[%s7768_s0 + $0x88] ss:$196 sps:$4 sm:$0xff]  }
  0xfa   :  { %v5229_v17 = vpop.f32.mrb[3].mxu1  ;;  %5529 = vmatprep.subr.bf16.mxu1 %v6096_v39  ;;  %v6148_v39 = vld [vmem:[%s7767_s1 + $0x9c0] sm:$0xff]  }
  0xfb   :  { %v5230_v19 = vadd.f32 %v5229_v17, %v5228_v15  ;;  %v3504_v31 = vadd.f32 %v5208_v11, %v4727_v28  ;;  %v3542_v33 = vadd.f32 %v5227_v14, %v3501_v29  ;;  %5508 = vmatpush3.bf16.msra.mxu0 %v6095_v38  ;;  %v6119_v11 = vld [vmem:[%s7767_s1 + $0x890] sm:$0xff]   ;;  %v6121_v14 = vld [vmem:[%s7767_s1 + $0x818] sm:$0xff]   ;;  %v6124_v17 = vld [vmem:[%s7767_s1 + $0x860] sm:$0xff]  }
  0xfc   :  { %5509 = vmatprep.subr.bf16.mxu0 %v6098_v41  ;;  %v6122_v15 = vld [vmem:[%s7767_s1 + $0x8d8] sm:$0xff]   ;;  %v6135_v28 = vld [vmem:[%s7767_s1 + $0x8b0] sm:$0xff]   ;;  %v6147_v38 = vld [vmem:[%s7767_s1 + $0x900] sm:$0xff]  }
  0xfd   :  { %v3545_v35 = vadd.f32 %v5230_v19, %v3504_v31  ;;  %5530 = vmatpush3.bf16.msra.mxu1 %v6097_v40  ;;  %v6126_v19 = vld [vmem:[%s7767_s1 + $0x8e0] sm:$0xff]   ;;  %v6136_v29 = vld [vmem:[%s7767_s1 + $0x878] sm:$0xff]  }
  0xfe   :  { %5531 = vmatprep.subr.bf16.mxu1 %v6100_v43  ;;  %v6138_v31 = vld [vmem:[%s7767_s1 + $0x8f8] sm:$0xff]   ;;  %v6149_v41 = vld [vmem:[%s7767_s1 + $0x980] sm:$0xff]   ;;  %v6150_v43 = vld [vmem:[%s7767_s1 + $0x948] sm:$0xff]  }
  0xff   :  { %5510 = vmatpush3.bf16.msra.mxu0 %v6099_v42 }
 0x100   :  { %5539 = vmatprep.subr.bf16.mxu0 %v6105_v47 }
 0x101   :  { %5532 = vmatpush3.bf16.msra.mxu1 %v6104_v46  ;;  %v6151_v46 = vld [vmem:[%s7767_s1 + $0x908] sm:$0xff]  }
 0x102   :  { %4073 = vmatmul.mubr.bf16.vlgmr.msra.gmra.mrb[28].mxu0 %v6101_v44  ;;  %5561 = vmatprep.subr.bf16.mxu1 %v6110_v51  ;;  %v6153_v51 = vld [vmem:[%s7767_s1 + $0x988] sm:$0xff]  }
 0x103   :  { %5540 = vmatpush3.bf16.msra.mxu0 %v6109_v50 }
 0x104   :  { %4114 = vmatmul.mubr.bf16.vlgmr.msra.gmra.mrb[28].mxu1 %v6106_v48  ;;  %5541 = vmatprep.subr.bf16.mxu0 %v6112_v55  ;;  %v6152_v48 = vld [vmem:[%s7767_s1 + $0x9c8] sm:$0xff]  }
 0x105   :  { %5562 = vmatpush3.bf16.msra.mxu1 %v6111_v53  ;;  %4195 = vmatprep.mubr.bf16.mxu1 %v6146_v37  ;;  %v6191_v37 = vld [vmem:[%s7767_s1 + $0xa88] sm:$0xff]  }
 0x106   :  { %5563 = vmatprep.subr.bf16.mxu1 %v6114_v60  ;;  %v6156_v60 = vld [vmem:[%s7767_s1 + $0x9d0] sm:$0xff]  }
 0x107   :  { %5542 = vmatpush3.bf16.msra.mxu0 %v6113_v58 }
 0x108   :  { %5543 = vmatprep.subr.bf16.mxu0 %v6116_v2  ;;  %v6159_v2 = vld [vmem:[%s7767_s1 + $0x918] sm:$0xff]  }
 0x109   :  { %5564 = vmatpush3.bf16.msra.mxu1 %v6115_v0  ;;  %v6158_v0 = vld [vmem:[%s7767_s1 + $0x958] sm:$0xff]  }
 0x10a   :  { %5565 = vmatprep.subr.bf16.mxu1 %v6118_v8  ;;  %v6165_v8 = vld [vmem:[%s7767_s1 + $0x9a0] sm:$0xff]  }
 0x10b   :  { %5544 = vmatpush3.bf16.msra.mxu0 %v6117_v6  ;;  %v6163_v6 = vld [vmem:[%s7767_s1 + $0x920] sm:$0xff]  }
 0x10c   :  { %5545 = vmatprep.subr.bf16.mxu0 %v6120_v12  ;;  %v6169_v12 = vld [vmem:[%s7767_s1 + $0x9a8] sm:$0xff]  }
 0x10d   :  { %5566 = vmatpush3.bf16.msra.mxu1 %v6119_v11  ;;  %v6168_v11 = vld [vmem:[%s7767_s1 + $0x9e8] sm:$0xff]  }
 0x10e   :  { %5567 = vmatprep.subr.bf16.mxu1 %v6122_v15  ;;  %v6172_v15 = vld [vmem:[%s7767_s1 + $0x9f0] sm:$0xff]  }
 0x10f   :  { %5546 = vmatpush3.bf16.msra.mxu0 %v6121_v14  ;;  %v6171_v14 = vld [vmem:[%s7767_s1 + $0x930] sm:$0xff]  }
 0x110   :  { %5547 = vmatprep.subr.bf16.mxu0 %v6124_v17  ;;  %v6174_v17 = vld [vmem:[%s7767_s1 + $0x978] sm:$0xff]  }
 0x111   :  { %5568 = vmatpush3.bf16.msra.mxu1 %v6123_v16  ;;  %v6173_v16 = vld [vmem:[%s7767_s1 + $0x9b0] sm:$0xff]  }
 0x112   :  { %5569 = vmatprep.subr.bf16.mxu1 %v6126_v19  ;;  %v6176_v19 = vld [vmem:[%s7767_s1 + $0x9f8] sm:$0xff]  }
 0x113   :  { %5548 = vmatpush3.bf16.msra.mxu0 %v6125_v18  ;;  %v6175_v18 = vld [vmem:[%s7767_s1 + $0x938] sm:$0xff]  }
 0x114   :  { %5549 = vmatprep.subr.bf16.mxu0 %v6128_v21  ;;  %v6179_v21 = vld [vmem:[%s7768_s0 + $0x94] ss:$196 sps:$4 sm:$0xff]  }
 0x115   :  { %v5247_v52 = vpop.f32.mrb[4].mxu0  ;;  %5570 = vmatpush3.bf16.msra.mxu1 %v6127_v20  ;;  %v6177_v20 = vld [vmem:[%s7768_s0 + $0x90] ss:$196 sps:$4 sm:$0xff]  }
 0x116   :  { %v5248_v54 = vpop.f32.mrb[5].mxu0  ;;  %5571 = vmatprep.subr.bf16.mxu1 %v6130_v23  ;;  %v6181_v23 = vld [vmem:[%s7767_s1 + $0xa40] sm:$0xff]  }
 0x117   :  { %v5249_v56 = vadd.f32 %v5248_v54, %v5247_v52  ;;  %v5250_v57 = vpop.f32.mrb[6].mxu0  ;;  %v5269_v62 = vpop.f32.mrb[4].mxu1  ;;  %5550 = vmatpush3.bf16.msra.mxu0 %v6129_v22  ;;  %v6154_v54 = vld [vmem:[%s7767_s1 + $0x950] sm:$0xff]   ;;  %v6180_v22 = vld [vmem:[%s7767_s1 + $0x9b8] sm:$0xff]  }
 0x118   :  { %v5251_v59 = vpop.f32.mrb[7].mxu0  ;;  %v5270_v1 = vpop.f32.mrb[5].mxu1  ;;  %5551 = vmatprep.subr.bf16.mxu0 %v6132_v25  ;;  %v6184_v25 = vld [vmem:[%s7768_s0 + $0x9c] ss:$196 sps:$4 sm:$0xff]  }
 0x119   :  { %v3583_v61 = vadd.f32 %v5249_v56, %v3542_v33  ;;  %v5252_v63 = vadd.f32 %v5251_v59, %v5250_v57  ;;  %v5271_v4 = vadd.f32 %v5270_v1, %v5269_v62  ;;  %v5272_v5 = vpop.f32.mrb[6].mxu1  ;;  %5572 = vmatpush3.bf16.msra.mxu1 %v6131_v24  ;;  %v6141_v33 = vld [vmem:[%s7768_s0 + $0x84] ss:$196 sps:$4 sm:$0xff]   ;;  %v6155_v57 = vld [vmem:[%s7767_s1 + $0x910] sm:$0xff]   ;;  %v6182_v24 = vld [vmem:[%s7768_s0 + $0x98] ss:$196 sps:$4 sm:$0xff]  }
 0x11a   :  { %v5273_v7 = vpop.f32.mrb[7].mxu1  ;;  %5573 = vmatprep.subr.bf16.mxu1 %v6134_v27  ;;  %4154 = vmatprep.mubr.bf16.mxu0 %v6141_v33  ;;  %v6186_v27 = vld [vmem:[%s7767_s1 + $0xac0] sm:$0xff]  }
 0x11b   :  { %v3586_v3 = vadd.f32 %v5252_v63, %v3545_v35  ;;  %v7227_v9 = vadd.f32 %v5271_v4, %v3583_v61  ;;  %v5274_v10 = vadd.f32 %v5273_v7, %v5272_v5  ;;  %5552 = vmatpush3.bf16.msra.mxu0 %v6133_v26  ;;  %v6143_v35 = vld [vmem:[%s7767_s1 + $0x940] sm:$0xff]   ;;  %v6157_v63 = vld [vmem:[%s7767_s1 + $0x990] sm:$0xff]   ;;  %v6161_v4 = vld [vmem:[%s7767_s1 + $0x998] sm:$0xff]  }
 0x11c   :  { %5553 = vmatprep.subr.bf16.mxu0 %v6136_v29  ;;  %v6162_v5 = vld [vmem:[%s7767_s1 + $0x960] sm:$0xff]  }
 0x11d   :  { %v7235_v13 = vadd.f32 %v5274_v10, %v3586_v3  ;;  %5574 = vmatpush3.bf16.msra.mxu1 %v6135_v28  ;;  %v6160_v3 = vld [vmem:[%s7767_s1 + $0x9d8] sm:$0xff]   ;;  %v6164_v7 = vld [vmem:[%s7767_s1 + $0x9e0] sm:$0xff]   ;;  %v6167_v10 = vld [vmem:[%s7767_s1 + $0x928] sm:$0xff]  }
 0x11e   :  { %5575 = vmatprep.subr.bf16.mxu1 %v6138_v31  ;;  %v6185_v26 = vld [vmem:[%s7767_s1 + $0xa00] sm:$0xff]  }
 0x11f   :  { %5554 = vmatpush3.bf16.msra.mxu0 %v6137_v30  ;;  %v6187_v28 = vld [vmem:[%s7767_s1 + $0xa80] sm:$0xff]   ;;  %v6188_v30 = vld [vmem:[%s7767_s1 + $0xa48] sm:$0xff]  }
 0x120   :  { %5583 = vmatprep.subr.bf16.mxu0 %v6143_v35  ;;  %v6190_v35 = vld [vmem:[%s7767_s1 + $0xac8] sm:$0xff]  }
 0x121   :  { %5576 = vmatpush3.bf16.msra.mxu1 %v6142_v34 }
 0x122   :  { %4155 = vmatmul.mubr.bf16.vlgmr.msra.gmra.mrb[32].mxu0 %v6139_v32  ;;  %5605 = vmatprep.subr.bf16.mxu1 %v6148_v39  ;;  %v6189_v32 = vld [vmem:[%s7767_s1 + $0xa08] sm:$0xff]  }
 0x123   :  { %5584 = vmatpush3.bf16.msra.mxu0 %v6147_v38  ;;  %4236 = vmatprep.mubr.bf16.mxu0 %v6179_v21 }
 0x124   :  { %4196 = vmatmul.mubr.bf16.vlgmr.msra.gmra.mrb[32].mxu1 %v6144_v36  ;;  %5585 = vmatprep.subr.bf16.mxu0 %v6150_v43  ;;  %v6193_v43 = vld [vmem:[%s7767_s1 + $0xa10] sm:$0xff]  }
 0x125   :  { %5606 = vmatpush3.bf16.msra.mxu1 %v6149_v41  ;;  %4277 = vmatprep.mubr.bf16.mxu1 %v6184_v25 }
 0x126   :  { %5607 = vmatprep.subr.bf16.mxu1 %v6152_v48 }
 0x127   :  { %5586 = vmatpush3.bf16.msra.mxu0 %v6151_v46  ;;  %v6194_v46 = vld [vmem:[%s7767_s1 + $0xad0] sm:$0xff]  }
 0x128   :  { %5587 = vmatprep.subr.bf16.mxu0 %v6154_v54 }
 0x129   :  { %5608 = vmatpush3.bf16.msra.mxu1 %v6153_v51 }
 0x12a   :  { %5609 = vmatprep.subr.bf16.mxu1 %v6156_v60  ;;  %v6203_v60 = vld [vmem:[%s7767_s1 + $0xaa0] sm:$0xff]  }
 0x12b   :  { %5588 = vmatpush3.bf16.msra.mxu0 %v6155_v57  ;;  %v6200_v57 = vld [vmem:[%s7767_s1 + $0xa60] sm:$0xff]  }
 0x12c   :  { %5589 = vmatprep.subr.bf16.mxu0 %v6158_v0  ;;  %v6207_v0 = vld [vmem:[%s7767_s1 + $0xaa8] sm:$0xff]  }
 0x12d   :  { %5610 = vmatpush3.bf16.msra.mxu1 %v6157_v63  ;;  %v6206_v63 = vld [vmem:[%s7767_s1 + $0xae8] sm:$0xff]  }
 0x12e   :  { %5611 = vmatprep.subr.bf16.mxu1 %v6160_v3  ;;  %v6210_v3 = vld [vmem:[%s7767_s1 + $0xaf0] sm:$0xff]  }
 0x12f   :  { %5590 = vmatpush3.bf16.msra.mxu0 %v6159_v2  ;;  %v6209_v2 = vld [vmem:[%s7767_s1 + $0xa30] sm:$0xff]  }
 0x130   :  { %5591 = vmatprep.subr.bf16.mxu0 %v6162_v5  ;;  %v6212_v5 = vld [vmem:[%s7767_s1 + $0xa78] sm:$0xff]  }
 0x131   :  { %5612 = vmatpush3.bf16.msra.mxu1 %v6161_v4  ;;  %v6211_v4 = vld [vmem:[%s7767_s1 + $0xab0] sm:$0xff]  }
 0x132   :  { %5613 = vmatprep.subr.bf16.mxu1 %v6164_v7  ;;  %v6214_v7 = vld [vmem:[%s7767_s1 + $0xaf8] sm:$0xff]  }
 0x133   :  { %5592 = vmatpush3.bf16.msra.mxu0 %v6163_v6  ;;  %v6213_v6 = vld [vmem:[%s7767_s1 + $0xa38] sm:$0xff]  }
 0x135   :  { %v5291_v40 = vpop.f32.mrb[8].mxu0  ;;  %5614 = vmatpush3.bf16.msra.mxu1 %v6165_v8  ;;  %v6215_v8 = vld [vmem:[%s7768_s0 + $0xa0] ss:$196 sps:$4 sm:$0xff]  }
 0x136   :  { %v5292_v42 = vpop.f32.mrb[9].mxu0  ;;  %5615 = vmatprep.subr.bf16.mxu1 %v6168_v11  ;;  %v6219_v11 = vld [vmem:[%s7767_s1 + $0xb40] sm:$0xff]  }
 0x137   :  { %v5293_v44 = vadd.f32 %v5292_v42, %v5291_v40  ;;  %v5294_v45 = vpop.f32.mrb[10].mxu0  ;;  %v5313_v47 = vpop.f32.mrb[8].mxu1  ;;  %v6192_v40 = vld [vmem:[%s7767_s1 + $0xa50] sm:$0xff]  }
 0x138   :  { %v5295_v50 = vpop.f32.mrb[11].mxu0  ;;  %v5314_v53 = vpop.f32.mrb[9].mxu1 }
 0x139   :  { %v3665_v49 = vadd.f32 %v5293_v44, %v7227_v9  ;;  %v5296_v52 = vadd.f32 %v5295_v50, %v5294_v45  ;;  %v5315_v55 = vadd.f32 %v5314_v53, %v5313_v47  ;;  %v5316_v56 = vpop.f32.mrb[10].mxu1  ;;  %v6166_v9 = vld [vmem:[%s7767_s1 + $0x968] sm:$0xff]   ;;  %5616 = vmatpush3.bf16.msra.mxu1 %v6169_v12  ;;  %v6197_v53 = vld [vmem:[%s7767_s1 + $0xa18] sm:$0xff]  }
 0x13a   :  { %v5317_v59 = vpop.f32.mrb[11].mxu1  ;;  %5593 = vmatprep.subr.bf16.mxu0 %v6166_v9  ;;  %5617 = vmatprep.subr.bf16.mxu1 %v6172_v15  ;;  %v6217_v9 = vld [vmem:[%s7768_s0 + $0xa4] ss:$196 sps:$4 sm:$0xff]  }
 0x13b   :  { %v3668_v58 = vadd.f32 %v5296_v52, %v7235_v13  ;;  %v7341_v61 = vadd.f32 %v5315_v55, %v3665_v49  ;;  %v5318_v62 = vadd.f32 %v5317_v59, %v5316_v56  ;;  %5594 = vmatpush3.bf16.msra.mxu0 %v6167_v10  ;;  %v6170_v13 = vld [vmem:[%s7767_s1 + $0x970] sm:$0xff]   ;;  %v6196_v52 = vld [vmem:[%s7767_s1 + $0xa58] sm:$0xff]   ;;  %v6202_v59 = vld [vmem:[%s7767_s1 + $0xae0] sm:$0xff]  }
 0x13c   :  { %5595 = vmatprep.subr.bf16.mxu0 %v6170_v13  ;;  %v6195_v49 = vld [vmem:[%s7767_s1 + $0xa90] sm:$0xff]   ;;  %v6198_v55 = vld [vmem:[%s7767_s1 + $0xad8] sm:$0xff]   ;;  %v6220_v12 = vld [vmem:[%s7768_s0 + $0xa8] ss:$196 sps:$4 sm:$0xff]  }
 0x13d   :  { %v7349_v1 = vadd.f32 %v5318_v62, %v3668_v58  ;;  %5618 = vmatpush3.bf16.msra.mxu1 %v6173_v16  ;;  %v6199_v56 = vld [vmem:[%s7767_s1 + $0xa98] sm:$0xff]   ;;  %v6201_v58 = vld [vmem:[%s7767_s1 + $0xa20] sm:$0xff]   ;;  %v6205_v62 = vld [vmem:[%s7767_s1 + $0xa28] sm:$0xff]  }
 0x13e   :  { %5619 = vmatprep.subr.bf16.mxu1 %v6176_v19  ;;  %v6218_v10 = vld [vmem:[%s7767_s1 + $0xab8] sm:$0xff]   ;;  %v6222_v13 = vld [vmem:[%s7768_s0 + $0xac] ss:$196 sps:$4 sm:$0xff]   ;;  %v6224_v15 = vld [vmem:[%s7767_s1 + $0xbc0] sm:$0xff]  }
 0x13f   :  { %5596 = vmatpush3.bf16.msra.mxu0 %v6171_v14  ;;  %v6223_v14 = vld [vmem:[%s7767_s1 + $0xb00] sm:$0xff]   ;;  %v6226_v19 = vld [vmem:[%s7767_s1 + $0xb48] sm:$0xff]  }
 0x140   :  { %5597 = vmatprep.subr.bf16.mxu0 %v6174_v17  ;;  %v6225_v17 = vld [vmem:[%s7767_s1 + $0xb80] sm:$0xff]  }
 0x141   :  { %5620 = vmatpush3.bf16.msra.mxu1 %v6180_v22  ;;  %v6227_v22 = vld [vmem:[%s7767_s1 + $0xb08] sm:$0xff]  }
 0x142   :  { %5649 = vmatprep.subr.bf16.mxu1 %v6186_v27 }
 0x143   :  { %5598 = vmatpush3.bf16.msra.mxu0 %v6175_v18 }
 0x144   :  { %5627 = vmatprep.subr.bf16.mxu0 %v6181_v23  ;;  %4278 = vmatmul.mubr.bf16.vlgmr.msra.gmra.mrb[36].mxu1 %v6182_v24  ;;  %v6228_v24 = vld [vmem:[%s7767_s1 + $0xbc8] sm:$0xff]  }
 0x145   :  { %5650 = vmatpush3.bf16.msra.mxu1 %v6187_v28  ;;  %4359 = vmatprep.mubr.bf16.mxu1 %v6222_v13  ;;  %v6229_v28 = vld [vmem:[%s7767_s1 + $0xb88] sm:$0xff]  }
 0x146   :  { %4237 = vmatmul.mubr.bf16.vlgmr.msra.gmra.mrb[36].mxu0 %v6177_v20  ;;  %5651 = vmatprep.subr.bf16.mxu1 %v6190_v35 }
 0x147   :  { %5628 = vmatpush3.bf16.msra.mxu0 %v6185_v26  ;;  %4318 = vmatprep.mubr.bf16.mxu0 %v6217_v9 }
 0x148   :  { %5629 = vmatprep.subr.bf16.mxu0 %v6188_v30  ;;  %v6230_v30 = vld [vmem:[%s7767_s1 + $0xb50] sm:$0xff]  }
 0x149   :  { %5652 = vmatpush3.bf16.msra.mxu1 %v6191_v37 }
 0x14a   :  { %5653 = vmatprep.subr.bf16.mxu1 %v6194_v46  ;;  %v6239_v46 = vld [vmem:[%s7767_s1 + $0xb20] sm:$0xff]  }
 0x14b   :  { %5630 = vmatpush3.bf16.msra.mxu0 %v6189_v32 }
 0x14c   :  { %5631 = vmatprep.subr.bf16.mxu0 %v6192_v40  ;;  %v6234_v40 = vld [vmem:[%s7767_s1 + $0xb58] sm:$0xff]  }
 0x14d   :  { %5654 = vmatpush3.bf16.msra.mxu1 %v6195_v49  ;;  %v6242_v49 = vld [vmem:[%s7767_s1 + $0xb68] sm:$0xff]  }
 0x14e   :  { %5655 = vmatprep.subr.bf16.mxu1 %v6198_v55  ;;  %v6248_v55 = vld [vmem:[%s7767_s1 + $0xbf0] sm:$0xff]  }
 0x14f   :  { %5632 = vmatpush3.bf16.msra.mxu0 %v6193_v43  ;;  %v6236_v43 = vld [vmem:[%s7767_s1 + $0xbd8] sm:$0xff]  }
 0x150   :  { %5633 = vmatprep.subr.bf16.mxu0 %v6196_v52  ;;  %v6245_v52 = vld [vmem:[%s7767_s1 + $0xba8] sm:$0xff]  }
 0x151   :  { %5656 = vmatpush3.bf16.msra.mxu1 %v6199_v56  ;;  %v6249_v56 = vld [vmem:[%s7767_s1 + $0xbb0] sm:$0xff]  }
 0x152   :  { %5657 = vmatprep.subr.bf16.mxu1 %v6202_v59  ;;  %v6252_v59 = vld [vmem:[%s7767_s1 + $0xbf8] sm:$0xff]  }
 0x153   :  { %5634 = vmatpush3.bf16.msra.mxu0 %v6197_v53  ;;  %v6246_v53 = vld [vmem:[%s7767_s1 + $0xb70] sm:$0xff]  }
 0x154   :  { %5635 = vmatprep.subr.bf16.mxu0 %v6200_v57  ;;  %v6250_v57 = vld [vmem:[%s7767_s1 + $0xb78] sm:$0xff]  }
 0x155   :  { %v5335_v29 = vpop.f32.mrb[12].mxu0  ;;  %5658 = vmatpush3.bf16.msra.mxu1 %v6203_v60  ;;  %v6253_v60 = vld [vmem:[%s7768_s0 + $0xb0] ss:$196 sps:$4 sm:$0xff]  }
 0x156   :  { %v5336_v31 = vpop.f32.mrb[13].mxu0  ;;  %5659 = vmatprep.subr.bf16.mxu1 %v6206_v63  ;;  %v6285_v63 = vmov 0.0  }
 0x157   :  { %v5337_v33 = vadd.f32 %v5336_v31, %v5335_v29  ;;  %v5338_v34 = vpop.f32.mrb[14].mxu0  ;;  %v5357_v36 = vpop.f32.mrb[12].mxu1  ;;  %5636 = vmatpush3.bf16.msra.mxu0 %v6201_v58  ;;  %v6251_v58 = vld [vmem:[%s7767_s1 + $0xb38] sm:$0xff]  }
 0x158   :  { %v5339_v39 = vpop.f32.mrb[15].mxu0  ;;  %v5358_v42 = vpop.f32.mrb[13].mxu1 }
 0x159   :  { %v3747_v38 = vadd.f32 %v5337_v33, %v7341_v61  ;;  %v5340_v41 = vadd.f32 %v5339_v39, %v5338_v34  ;;  %v5359_v44 = vadd.f32 %v5358_v42, %v5357_v36  ;;  %v5360_v45 = vpop.f32.mrb[14].mxu1  ;;  %v6204_v61 = vld [vmem:[%s7767_s1 + $0xa68] sm:$0xff]   ;;  %5660 = vmatpush3.bf16.msra.mxu1 %v6207_v0  ;;  %v6231_v34 = vld [vmem:[%s7767_s1 + $0xb10] sm:$0xff]   ;;  %v6235_v42 = vld [vmem:[%s7767_s1 + $0xb18] sm:$0xff]  }
 0x15a   :  { %v5361_v48 = vpop.f32.mrb[15].mxu1  ;;  %5637 = vmatprep.subr.bf16.mxu0 %v6204_v61  ;;  %5661 = vmatprep.subr.bf16.mxu1 %v6210_v3  ;;  %v6232_v36 = vld [vmem:[%s7767_s1 + $0xbd0] sm:$0xff]   ;;  %v6257_v0 = vld [vmem:[%s7768_s0 + $0xb8] ss:$196 sps:$4 sm:$0xff]   ;;  %v6261_v3 = vld [vmem:[%s7767_s1 + $0xc08] sm:$0xff]  }
 0x15b   :  { %v3750_v47 = vadd.f32 %v5340_v41, %v7349_v1  ;;  %v7458_v50 = vadd.f32 %v5359_v44, %v3747_v38  ;;  %v5362_v51 = vadd.f32 %v5361_v48, %v5360_v45  ;;  %5638 = vmatpush3.bf16.msra.mxu0 %v6205_v62  ;;  %v6208_v1 = vld [vmem:[%s7767_s1 + $0xa70] sm:$0xff]   ;;  %v6237_v44 = vld [vmem:[%s7767_s1 + $0xb98] sm:$0xff]   ;;  %v6238_v45 = vld [vmem:[%s7767_s1 + $0xb60] sm:$0xff]  }
 0x15c   :  { %5639 = vmatprep.subr.bf16.mxu0 %v6208_v1  ;;  %v6233_v39 = vld [vmem:[%s7767_s1 + $0xb90] sm:$0xff]   ;;  %v6241_v48 = vld [vmem:[%s7767_s1 + $0xba0] sm:$0xff]   ;;  %v6256_v62 = vld [vmem:[%s7767_s1 + $0xbb8] sm:$0xff]  }
 0x15d   :  { %v7466_v54 = vadd.f32 %v5362_v51, %v3750_v47  ;;  %5662 = vmatpush3.bf16.msra.mxu1 %v6211_v4  ;;  %v6240_v47 = vld [vmem:[%s7767_s1 + $0xbe0] sm:$0xff]   ;;  %v6244_v51 = vld [vmem:[%s7767_s1 + $0xbe8] sm:$0xff]   ;;  %v6255_v61 = vld [vmem:[%s7768_s0 + $0xb4] ss:$196 sps:$4 sm:$0xff]  }
 0x15e   :  { %5663 = vmatprep.subr.bf16.mxu1 %v6214_v7  ;;  %v6259_v1 = vld [vmem:[%s7768_s0 + $0xbc] ss:$196 sps:$4 sm:$0xff]  }
 0x15f   :  { %5640 = vmatpush3.bf16.msra.mxu0 %v6209_v2  ;;  %v6260_v2 = vld [vmem:[%s7767_s1 + $0xc00] sm:$0xff]  }
 0x160   :  { %5641 = vmatprep.subr.bf16.mxu0 %v6212_v5 }
 0x161   :  { %5664 = vmatpush3.bf16.msra.mxu1 %v6218_v10  ;;  %v6262_v10 = vld [vmem:[%s7767_s1 + $0xc10] sm:$0xff]  }
 0x162   :  { %5693 = vmatprep.subr.bf16.mxu1 %v6224_v15 }
 0x163   :  { %5642 = vmatpush3.bf16.msra.mxu0 %v6213_v6 }
 0x164   :  { %5671 = vmatprep.subr.bf16.mxu0 %v6219_v11  ;;  %4360 = vmatmul.mubr.bf16.vlgmr.msra.gmra.mrb[40].mxu1 %v6220_v12 }
 0x165   :  { %5694 = vmatpush3.bf16.msra.mxu1 %v6225_v17  ;;  %4441 = vmatprep.mubr.bf16.mxu1 %v6259_v1 }
 0x166   :  { %4319 = vmatmul.mubr.bf16.vlgmr.msra.gmra.mrb[40].mxu0 %v6215_v8  ;;  %5695 = vmatprep.subr.bf16.mxu1 %v6228_v24  ;;  %v6266_v24 = vld [vmem:[%s7767_s1 + $0xc30] sm:$0xff]  }
 0x167   :  { %5672 = vmatpush3.bf16.msra.mxu0 %v6223_v14  ;;  %4400 = vmatprep.mubr.bf16.mxu0 %v6255_v61  ;;  %v6271_v61 = vld [vmem:[%s7770_s3 + $0x10] sm:$0xff]  }
 0x168   :  { %5673 = vmatprep.subr.bf16.mxu0 %v6226_v19 }
 0x169   :  { %5696 = vmatpush3.bf16.msra.mxu1 %v6229_v28 }
 0x16a   :  { %5697 = vmatprep.subr.bf16.mxu1 %v6232_v36 }
 0x16b   :  { %5674 = vmatpush3.bf16.msra.mxu0 %v6227_v22  ;;  %v6264_v22 = vld [vmem:[%s7767_s1 + $0xc20] sm:$0xff]  }
 0x16c   :  { %5675 = vmatprep.subr.bf16.mxu0 %v6230_v30 }
 0x16d   :  { %5698 = vmatpush3.bf16.msra.mxu1 %v6233_v39 }
 0x16e   :  { %5699 = vmatprep.subr.bf16.mxu1 %v6236_v43 }
 0x16f   :  { %5676 = vmatpush3.bf16.msra.mxu0 %v6231_v34 }
 0x170   :  { %5677 = vmatprep.subr.bf16.mxu0 %v6234_v40 }
 0x171   :  { %5700 = vmatpush3.bf16.msra.mxu1 %v6237_v44 }
 0x172   :  { %5701 = vmatprep.subr.bf16.mxu1 %v6240_v47 }
 0x173   :  { %5678 = vmatpush3.bf16.msra.mxu0 %v6235_v42 }
 0x174   :  { %5679 = vmatprep.subr.bf16.mxu0 %v6238_v45 }
 0x175   :  { %v5379_v16 = vpop.f32.mrb[16].mxu0  ;;  %5702 = vmatpush3.bf16.msra.mxu1 %v6241_v48 }
 0x176   :  { %v5380_v18 = vpop.f32.mrb[17].mxu0  ;;  %5703 = vmatprep.subr.bf16.mxu1 %v6244_v51 }
 0x177   :  { %v5381_v20 = vadd.f32 %v5380_v18, %v5379_v16  ;;  %v5382_v21 = vpop.f32.mrb[18].mxu0  ;;  %v5401_v26 = vpop.f32.mrb[16].mxu1  ;;  %5680 = vmatpush3.bf16.msra.mxu0 %v6239_v46 }
 0x178   :  { %v5383_v23 = vpop.f32.mrb[19].mxu0  ;;  %v5402_v29 = vpop.f32.mrb[17].mxu1  ;;  %5681 = vmatprep.subr.bf16.mxu0 %v6242_v49 }
 0x179   :  { %v3829_v25 = vadd.f32 %v5381_v20, %v7458_v50  ;;  %v5384_v27 = vadd.f32 %v5383_v23, %v5382_v21  ;;  %v5403_v32 = vadd.f32 %v5402_v29, %v5401_v26  ;;  %v5404_v33 = vpop.f32.mrb[18].mxu1  ;;  %v6243_v50 = vld [vmem:[%s7767_s1 + $0xb28] sm:$0xff]   ;;  %5704 = vmatpush3.bf16.msra.mxu1 %v6245_v52  ;;  %v6263_v20 = vld [vmem:[%s7767_s1 + $0xc18] sm:$0xff]   ;;  %v6268_v26 = vld [vmem:[%s7768_s0 + $0xc0] ss:$196 sps:$4 sm:$0xff]  }
 0x17a   :  { %v5405_v35 = vpop.f32.mrb[19].mxu1  ;;  %5705 = vmatprep.subr.bf16.mxu1 %v6248_v55  ;;  %v6265_v23 = vld [vmem:[%s7767_s1 + $0xc28] sm:$0xff]  }
 0x17b   :  { %v3832_v31 = vadd.f32 %v5384_v27, %v7466_v54  ;;  %v7569_v37 = vadd.f32 %v5403_v32, %v3829_v25  ;;  %v5406_v38 = vadd.f32 %v5405_v35, %v5404_v33  ;;  %5682 = vmatpush3.bf16.msra.mxu0 %v6243_v50  ;;  %v6247_v54 = vld [vmem:[%s7767_s1 + $0xb30] sm:$0xff]   ;;  %v6267_v25 = vld [vmem:[%s7767_s1 + $0xc38] sm:$0xff]  }
 0x17c   :  { %5683 = vmatprep.subr.bf16.mxu0 %v6246_v53 }
 0x17d   :  { %v7577_v41 = vadd.f32 %v5406_v38, %v3832_v31  ;;  %5706 = vmatpush3.bf16.msra.mxu1 %v6249_v56 }
 0x17e   :  { %5707 = vmatprep.subr.bf16.mxu1 %v6252_v59  ;;  %v6269_v59 = vld [vmem:[%s7770_s3] sm:$0xff]  }
 0x17f   :  { %5684 = vmatpush3.bf16.msra.mxu0 %v6247_v54 }
 0x180   :  { %5685 = vmatprep.subr.bf16.mxu0 %v6250_v57 }
 0x181   :  { %5708 = vmatpush3.bf16.msra.mxu1 %v6256_v62  ;;  %v6272_v62 = vld [vmem:[%s7770_s3 + $0x18] sm:$0xff]  }
 0x182   :  { %5762 = vmatprep.subr.bf16.mxu1 %v6285_v63 }
 0x183   :  { %5686 = vmatpush3.bf16.msra.mxu0 %v6251_v58 }
 0x184   :  { %5742 = vmatprep.subr.bf16.mxu0 %v6285_v63  ;;  %4442 = vmatmul.mubr.bf16.vlgmr.msra.gmra.mrb[44].mxu1 %v6257_v0  ;;  %v6273_v0 = vld [vmem:[%s7770_s3 + $0x20] sm:$0xff]  }
 0x185   :  { %5778 = vmatprep.mubr.msk.bf16.mxu1 %vm6286_vm0, %v6285_v63  ;;  %5763 = vmatpush3.bf16.msra.mxu1 %v6269_v59 }
 0x186   :  { %4401 = vmatmul.mubr.bf16.vlgmr.msra.gmra.mrb[44].mxu0 %v6253_v60  ;;  %v6270_v60 = vld [vmem:[%s7770_s3 + $0x8] sm:$0xff]   ;;  %5764 = vmatprep.subr.bf16.mxu1 %v6285_v63 }
 0x187   :  { %5758 = vmatprep.mubr.msk.bf16.mxu0 %vm6286_vm0, %v6285_v63  ;;  %5743 = vmatpush3.bf16.msra.mxu0 %v6260_v2 }
 0x188   :  { %5744 = vmatprep.subr.bf16.mxu0 %v6285_v63 }
 0x189   :  { %5765 = vmatpush3.bf16.msra.mxu1 %v6270_v60 }
 0x18a   :  { %5766 = vmatprep.subr.bf16.mxu1 %v6285_v63 }
 0x18b   :  { %5745 = vmatpush3.bf16.msra.mxu0 %v6261_v3 }
 0x18c   :  { %5746 = vmatprep.subr.bf16.mxu0 %v6285_v63 }
 0x18d   :  { %5767 = vmatpush3.bf16.msra.mxu1 %v6271_v61 }
 0x18e   :  { %5768 = vmatprep.subr.bf16.mxu1 %v6285_v63 }
 0x18f   :  { %5747 = vmatpush3.bf16.msra.mxu0 %v6262_v10 }
 0x190   :  { %5748 = vmatprep.subr.bf16.mxu0 %v6285_v63 }
 0x191   :  { %5769 = vmatpush3.bf16.msra.mxu1 %v6272_v62 }
 0x192   :  { %5770 = vmatprep.subr.bf16.mxu1 %v6285_v63 }
 0x193   :  { %5749 = vmatpush3.bf16.msra.mxu0 %v6263_v20  ;;  %v6277_v20 = vld [vmem:[%s7771_s5] sm:$0xff]  }
 0x194   :  { %5750 = vmatprep.subr.bf16.mxu0 %v6285_v63 }
 0x195   :  { %v5423_v4 = vpop.f32.mrb[20].mxu0  ;;  %5771 = vmatpush3.bf16.msra.mxu1 %v6273_v0 }
 0x196   :  { %v5424_v5 = vpop.f32.mrb[21].mxu0  ;;  %5772 = vmatprep.subr.bf16.mxu1 %v6285_v63 }
 0x197   :  { %v5425_v6 = vadd.f32 %v5424_v5, %v5423_v4  ;;  %v5426_v7 = vpop.f32.mrb[22].mxu0  ;;  %v5445_v8 = vpop.f32.mrb[20].mxu1  ;;  %5751 = vmatpush3.bf16.msra.mxu0 %v6264_v22  ;;  %v6274_v5 = vld [vmem:[%s7770_s3 + $0x28] sm:$0xff]   ;;  %v6279_v22 = vld [vmem:[%s7771_s5 + $0x10] sm:$0xff]  }
 0x198   :  { %v5427_v9 = vpop.f32.mrb[23].mxu0  ;;  %v5446_v13 = vpop.f32.mrb[21].mxu1  ;;  %5752 = vmatprep.subr.bf16.mxu0 %v6285_v63 }
 0x199   :  { %v3911_v11 = vadd.f32 %v5425_v6, %v7569_v37  ;;  %v5428_v12 = vadd.f32 %v5427_v9, %v5426_v7  ;;  %v5447_v14 = vadd.f32 %v5446_v13, %v5445_v8  ;;  %v5448_v15 = vpop.f32.mrb[22].mxu1  ;;  %5773 = vmatpush3.bf16.msra.mxu1 %v6274_v5 }
 0x19a   :  { %v5449_v17 = vpop.f32.mrb[23].mxu1  ;;  %5774 = vmatprep.subr.bf16.mxu1 %v6285_v63 }
 0x19b   :  { %v3914_v16 = vadd.f32 %v5428_v12, %v7577_v41  ;;  %v3952_v18 = vadd.f32 %v5447_v14, %v3911_v11  ;;  %v5450_v19 = vadd.f32 %v5449_v17, %v5448_v15  ;;  %5753 = vmatpush3.bf16.msra.mxu0 %v6265_v23  ;;  %v6280_v23 = vld [vmem:[%s7771_s5 + $0x18] sm:$0xff]  }
 0x19c   :  { %5754 = vmatprep.subr.bf16.mxu0 %v6285_v63 }
 0x19d   :  { %v3955_v21 = vadd.f32 %v5450_v19, %v3914_v16  ;;  %v6276_v19 = vld [vmem:[%s7770_s3 + $0x38] sm:$0xff]  }
 0x19f   :  { %5755 = vmatpush3.bf16.msra.mxu0 %v6266_v24  ;;  %v6281_v24 = vld [vmem:[%s7771_s5 + $0x20] sm:$0xff]  }
 0x1a0   :  { %5756 = vmatprep.subr.bf16.mxu0 %v6285_v63 }
 0x1a3   :  { %5757 = vmatpush3.bf16.msra.mxu0 %v6267_v25 }
 0x1a4   :  { %5782 = vmatprep.subr.bf16.mxu0 %v6285_v63 }
 0x1a6   :  { %5759 = vmatmul.mubr.bf16.vlgmr.msra.gmra.mrb[48].mxu0 %v6268_v26 }
 0x1a7   :  { %5798 = vmatprep.mubr.msk.bf16.mxu0 %vm6286_vm0, %v6285_v63  ;;  %5783 = vmatpush3.bf16.msra.mxu0 %v6277_v20  ;;  %v6283_v20 = vld [vmem:[%s7771_s5 + $0x30] sm:$0xff]  }
 0x1a8   :  { %5784 = vmatprep.subr.bf16.mxu0 %v6285_v63 }
 0x1b5   :  { %v5467_v27 = vpop.f32.mrb[24].mxu0 }
 0x1b6   :  { %v5468_v28 = vpop.f32.mrb[25].mxu0 }
 0x1b7   :  { %v5469_v29 = vadd.f32 %v5468_v28, %v5467_v27  ;;  %v5470_v30 = vpop.f32.mrb[26].mxu0  ;;  %v5489_v31 = vpop.f32.mrb[24].mxu1 }
 0x1b8   :  { %v5471_v32 = vpop.f32.mrb[27].mxu0  ;;  %v5490_v35 = vpop.f32.mrb[25].mxu1 }
 0x1b9   :  { %v3993_v33 = vadd.f32 %v5469_v29, %v3952_v18  ;;  %v5472_v34 = vadd.f32 %v5471_v32, %v5470_v30  ;;  %v5491_v36 = vadd.f32 %v5490_v35, %v5489_v31  ;;  %v5492_v37 = vpop.f32.mrb[26].mxu1  ;;  %v6275_v18 = vld [vmem:[%s7770_s3 + $0x30] sm:$0xff]   ;;  %v6282_v31 = vld [vmem:[%s7771_s5 + $0x28] sm:$0xff]  }
 0x1ba   :  { %v5493_v39 = vpop.f32.mrb[27].mxu1  ;;  %5775 = vmatpush3.bf16.msra.mxu1 %v6275_v18 }
 0x1bb   :  { %v3996_v38 = vadd.f32 %v5472_v34, %v3955_v21  ;;  %v4034_v40 = vadd.f32 %v5491_v36, %v3993_v33  ;;  %v5494_v41 = vadd.f32 %v5493_v39, %v5492_v37  ;;  %5776 = vmatprep.subr.bf16.mxu1 %v6285_v63  ;;  %v6278_v21 = vld [vmem:[%s7771_s5 + $0x8] sm:$0xff]  }
 0x1bc   :  { %5785 = vmatpush3.bf16.msra.mxu0 %v6278_v21  ;;  %v6284_v21 = vld [vmem:[%s7771_s5 + $0x38] sm:$0xff]  }
 0x1bd   :  { %v4037_v42 = vadd.f32 %v5494_v41, %v3996_v38  ;;  %5786 = vmatprep.subr.bf16.mxu0 %v6285_v63 }
 0x1be   :  { %5777 = vmatpush3.bf16.msra.mxu1 %v6276_v19 }
 0x1c0   :  { %5787 = vmatpush3.bf16.msra.mxu0 %v6279_v22  ;;  %v5169_v22 = vld [vmem:[%s7772_s4] ss:$0 sm:$0xff] }
 0x1c1   :  { %5788 = vmatprep.subr.bf16.mxu0 %v6285_v63 }
 0x1c4   :  { %5789 = vmatpush3.bf16.msra.mxu0 %v6280_v23 }
 0x1c5   :  { %5790 = vmatprep.subr.bf16.mxu0 %v6285_v63 }
 0x1c8   :  { %5791 = vmatpush3.bf16.msra.mxu0 %v6281_v24 }
 0x1c9   :  { %5792 = vmatprep.subr.bf16.mxu0 %v6285_v63 }
 0x1cc   :  { %5793 = vmatpush3.bf16.msra.mxu0 %v6282_v31 }
 0x1cd   :  { %5794 = vmatprep.subr.bf16.mxu0 %v6285_v63 }
 0x1d0   :  { %5795 = vmatpush3.bf16.msra.mxu0 %v6283_v20 }
 0x1d1   :  { %5796 = vmatprep.subr.bf16.mxu0 %v6285_v63  ;;  %v5178_v63 = vld [vmem:[%s7773_s6] ss:$0 sm:$0xff] }
 0x1d4   :  { %5797 = vmatpush3.bf16.msra.mxu0 %v6284_v21 }
 0x1d5   :  { %v5511_v43 = vpop.f32.mrb[28].mxu0 }
 0x1d6   :  { %v5512_v44 = vpop.f32.mrb[29].mxu0 }
 0x1d7   :  { %v5513_v45 = vadd.f32 %v5512_v44, %v5511_v43  ;;  %v5514_v46 = vpop.f32.mrb[30].mxu0  ;;  %v5533_v47 = vpop.f32.mrb[28].mxu1 }
 0x1d8   :  { %v5515_v48 = vpop.f32.mrb[31].mxu0  ;;  %v5534_v51 = vpop.f32.mrb[29].mxu1 }
 0x1d9   :  { %v4075_v49 = vadd.f32 %v5513_v45, %v4034_v40  ;;  %v5516_v50 = vadd.f32 %v5515_v48, %v5514_v46  ;;  %v5535_v52 = vadd.f32 %v5534_v51, %v5533_v47  ;;  %v5536_v53 = vpop.f32.mrb[30].mxu1 }
 0x1da   :  { %v5537_v55 = vpop.f32.mrb[31].mxu1 }
 0x1db   :  { %v4078_v54 = vadd.f32 %v5516_v50, %v4037_v42  ;;  %v4116_v56 = vadd.f32 %v5535_v52, %v4075_v49  ;;  %v5538_v57 = vadd.f32 %v5537_v55, %v5536_v53 }
 0x1dd   :  { %v4119_v58 = vadd.f32 %v5538_v57, %v4078_v54 }
 0x1f5   :  { %v5555_v1 = vpop.f32.mrb[32].mxu0 }
 0x1f6   :  { %v5556_v2 = vpop.f32.mrb[33].mxu0 }
 0x1f7   :  { %v5557_v3 = vadd.f32 %v5556_v2, %v5555_v1  ;;  %v5558_v4 = vpop.f32.mrb[34].mxu0  ;;  %v5577_v8 = vpop.f32.mrb[32].mxu1 }
 0x1f8   :  { %v5559_v6 = vpop.f32.mrb[35].mxu0  ;;  %v5578_v10 = vpop.f32.mrb[33].mxu1 }
 0x1f9   :  { %v4157_v7 = vadd.f32 %v5557_v3, %v4116_v56  ;;  %v5560_v9 = vadd.f32 %v5559_v6, %v5558_v4  ;;  %v5579_v12 = vadd.f32 %v5578_v10, %v5577_v8  ;;  %v5580_v13 = vpop.f32.mrb[34].mxu1 }
 0x1fa   :  { %v5581_v14 = vpop.f32.mrb[35].mxu1 }
 0x1fb   :  { %v4160_v11 = vadd.f32 %v5560_v9, %v4119_v58  ;;  %v4198_v15 = vadd.f32 %v5579_v12, %v4157_v7  ;;  %v5582_v16 = vadd.f32 %v5581_v14, %v5580_v13 }
 0x1fd   :  { %v4201_v17 = vadd.f32 %v5582_v16, %v4160_v11 }
 0x217   :  { %v5621_v29 = vpop.f32.mrb[36].mxu1 }
 0x218   :  { %v5622_v34 = vpop.f32.mrb[37].mxu1 }
 0x219   :  { %v5599_v25 = vpop.f32.mrb[36].mxu0  ;;  %v5623_v35 = vadd.f32 %v5622_v34, %v5621_v29  ;;  %v5624_v36 = vpop.f32.mrb[38].mxu1 }
 0x21a   :  { %v5600_v26 = vpop.f32.mrb[37].mxu0  ;;  %v5625_v38 = vpop.f32.mrb[39].mxu1 }
 0x21b   :  { %v5601_v27 = vadd.f32 %v5600_v26, %v5599_v25  ;;  %v5602_v28 = vpop.f32.mrb[38].mxu0  ;;  %v5626_v40 = vadd.f32 %v5625_v38, %v5624_v36 }
 0x21c   :  { %v5603_v30 = vpop.f32.mrb[39].mxu0 }
 0x21d   :  { %v4239_v32 = vadd.f32 %v5601_v27, %v4198_v15  ;;  %v5604_v33 = vadd.f32 %v5603_v30, %v5602_v28 }
 0x21f   :  { %v4242_v37 = vadd.f32 %v5604_v33, %v4201_v17  ;;  %v4280_v39 = vadd.f32 %v5623_v35, %v4239_v32 }
 0x221   :  { %v4283_v41 = vadd.f32 %v5626_v40, %v4242_v37 }
 0x237   :  { %v5665_v46 = vpop.f32.mrb[40].mxu1 }
 0x238   :  { %v5666_v50 = vpop.f32.mrb[41].mxu1 }
 0x239   :  { %v5643_v42 = vpop.f32.mrb[40].mxu0  ;;  %v5667_v51 = vadd.f32 %v5666_v50, %v5665_v46  ;;  %v5668_v52 = vpop.f32.mrb[42].mxu1 }
 0x23a   :  { %v5644_v43 = vpop.f32.mrb[41].mxu0  ;;  %v5669_v54 = vpop.f32.mrb[43].mxu1 }
 0x23b   :  { %v5645_v44 = vadd.f32 %v5644_v43, %v5643_v42  ;;  %v5646_v45 = vpop.f32.mrb[42].mxu0  ;;  %v5670_v56 = vadd.f32 %v5669_v54, %v5668_v52 }
 0x23c   :  { %v5647_v47 = vpop.f32.mrb[43].mxu0 }
 0x23d   :  { %v4321_v48 = vadd.f32 %v5645_v44, %v4280_v39  ;;  %v5648_v49 = vadd.f32 %v5647_v47, %v5646_v45 }
 0x23f   :  { %v4324_v53 = vadd.f32 %v5648_v49, %v4283_v41  ;;  %v4362_v55 = vadd.f32 %v5667_v51, %v4321_v48 }
 0x241   :  { %v4365_v57 = vadd.f32 %v5670_v56, %v4324_v53 }
 0x257   :  { %v5709_v62 = vpop.f32.mrb[44].mxu1 }
 0x258   :  { %v5710_v3 = vpop.f32.mrb[45].mxu1 }
 0x259   :  { %v5687_v58 = vpop.f32.mrb[44].mxu0  ;;  %v5711_v4 = vadd.f32 %v5710_v3, %v5709_v62  ;;  %v5712_v5 = vpop.f32.mrb[46].mxu1 }
 0x25a   :  { %v5688_v59 = vpop.f32.mrb[45].mxu0  ;;  %v5713_v7 = vpop.f32.mrb[47].mxu1 }
 0x25b   :  { %v5689_v60 = vadd.f32 %v5688_v59, %v5687_v58  ;;  %v5690_v61 = vpop.f32.mrb[46].mxu0  ;;  %v5714_v8 = vadd.f32 %v5713_v7, %v5712_v5 }
 0x25c   :  { %v5691_v0 = vpop.f32.mrb[47].mxu0 }
 0x25d   :  { %v4403_v1 = vadd.f32 %v5689_v60, %v4362_v55  ;;  %v5692_v2 = vadd.f32 %v5691_v0, %v5690_v61 }
 0x25f   :  { %v4406_v6 = vadd.f32 %v5692_v2, %v4365_v57  ;;  %v4444_v9 = vadd.f32 %v5711_v4, %v4403_v1 }
 0x261   :  { %v4447_v10 = vadd.f32 %v5714_v8, %v4406_v6 }
 0x279   :  { %v4484_v11 = vpop.f32.mrb[48].mxu0 }
 0x27a   :  { %v4485_v12 = vadd.f32 %v4484_v11, %v4444_v9  ;;  %v5760_v13 = vpop.f32.mrb[49].mxu0 }
 0x27b   :  { %v4487_v14 = vpop.f32.mrb[50].mxu0 }
 0x27c   :  { %v4488_v15 = vadd.f32 %v4487_v14, %v4447_v10  ;;  %v5761_v16 = vpop.f32.mrb[51].mxu0  ;;  %v4491_v17 = vmax.f32 %v4485_v12, 0.0 }
 0x27e   :  { %v4492_v18 = vmax.f32 %v4488_v15, 0.0 }
 0x280   :  { %v4493_v19 = vpack.c.bf16 %v4492_v18, %v4491_v17 }
 0x282   :  { %5779 = vmatmul.mubr.bf16.vlgmr.msra.gmra.mrb[48].mxu1 %v4493_v19 }
 0x355   :  { %v4599_v23 = vpop.f32.mrb[48].mxu1 }
 0x356   :  { %v4600_v24 = vadd.f32 %v5169_v22, %v4599_v23  ;;  %v5780_v25 = vpop.f32.mrb[49].mxu1 }
 0x357   :  { %v4602_v26 = vpop.f32.mrb[50].mxu1 }
 0x358   :  { %v4603_v27 = vadd.f32 %v5169_v22, %v4602_v26  ;;  %v5781_v28 = vpop.f32.mrb[51].mxu1  ;;  %v4606_v29 = vmax.f32 %v4600_v24, 0.0 }
 0x35a   :  { %v4607_v30 = vmax.f32 %v4603_v27, 0.0 }
 0x35c   :  { %v4608_v31 = vpack.c.bf16 %v4607_v30, %v4606_v29 }
 0x35e   :  { %5799 = vmatmul.mubr.bf16.vlgmr.msra.gmra.mrb[52].mxu0 %v4608_v31 }
 0x431   :  { %v4714_v32 = vpop.f32.mrb[52].mxu0 }
 0x432   :  { %v4715_v33 = vadd.f32 %v5178_v63, %v4714_v32  ;;  %v5800_v34 = vpop.f32.mrb[53].mxu0 }
 0x433   :  { %v4717_v35 = vpop.f32.mrb[54].mxu0 }
 0x434   :  { %4721 = vst [vmem:[%s7774_s7] sm:$0xff] %v4715_v33  ;;  %v4718_v36 = vadd.f32 %v5178_v63, %v4717_v35  ;;  %v5801_v37 = vpop.f32.mrb[55].mxu0 }
 0x436   :  { %4722 = vst [vmem:[%s7774_s7 + $0x8] sm:$0xff] %v4718_v36 }

</bundles_post_ra>
